<compile_context>
chip_gen: v6e
topology: v6e:2x2x1
jax: 0.10.0
libtpu: 0.0.40
codegen_flags: <defaults>
</compile_context>

<pallas_src>
import math
from functools import partial

import numpy as np
import jax
import jax.numpy as jnp
from jax.experimental import pallas as pl
from jax.experimental.pallas import tpu as pltpu

# ----------------------------- configuration -------------------------------
B = 2              # batch
C_IN = 4           # in_channels
IMG = 16           # input spatial size
PATCH = 2          # patch size
GRID = IMG // PATCH
TOKENS = GRID * GRID          # 64 patches
HIDDEN = 64                   # hidden_size
NUM_HEADS = 4
HEAD_DIM = HIDDEN // NUM_HEADS
DEPTH = 2                     # small depth for the demo
MLP_HIDDEN = int(HIDDEN * 4.0)
C_OUT = C_IN * 2              # learn_sigma=True
C_COND = 8                    # conditional image channels (analog of 62)
COND_IMG = 16                 # conditional spatial size
LC = COND_IMG * COND_IMG
FREQ = 256                    # frequency_embedding_size
P_OUT = PATCH * C_OUT         # final-layer output width per token (=16)
OUT_PAD = 128                 # lane-dense padded output width


# ------------------------- sincos pos-embed (glue) --------------------------
def get_1d_sincos_pos_embed_from_grid(embed_dim, pos):
    assert embed_dim % 2 == 0
    omega = np.arange(embed_dim // 2, dtype=np.float64)
    omega /= embed_dim / 2.0
    omega = 1.0 / 10000 ** omega
    pos = pos.reshape(-1)
    out = np.einsum('m,d->md', pos, omega)
    return np.concatenate([np.sin(out), np.cos(out)], axis=1)


def get_2d_sincos_pos_embed_from_grid(embed_dim, grid):
    assert embed_dim % 2 == 0
    emb_h = get_1d_sincos_pos_embed_from_grid(embed_dim // 2, grid[0])
    emb_w = get_1d_sincos_pos_embed_from_grid(embed_dim // 2, grid[1])
    return np.concatenate([emb_h, emb_w], axis=1)


def get_2d_sincos_pos_embed(embed_dim, grid_size):
    grid_h = np.arange(grid_size, dtype=np.float32)
    grid_w = np.arange(grid_size, dtype=np.float32)
    grid = np.meshgrid(grid_w, grid_h)
    grid = np.stack(grid, axis=0).reshape([2, 1, grid_size, grid_size])
    return get_2d_sincos_pos_embed_from_grid(embed_dim, grid)


# ------------------------ in-kernel math helpers -----------------------------
def _mm(a, b):
    """A @ B, bf16 operands on the MXU, f32 accumulation."""
    return jnp.dot(a.astype(jnp.bfloat16), b.astype(jnp.bfloat16),
                   preferred_element_type=jnp.float32)


def _mm_t(a, b):
    """A @ B^T, bf16 operands, f32 accumulation (rhs-transposed matmul)."""
    return jax.lax.dot_general(a.astype(jnp.bfloat16), b.astype(jnp.bfloat16),
                               (((1,), (1,)), ((), ())),
                               preferred_element_type=jnp.float32)


def _layernorm(v, g, b, eps=1e-6):
    mu = jnp.mean(v, axis=-1, keepdims=True)
    var = jnp.mean(jnp.square(v - mu), axis=-1, keepdims=True)
    return (v - mu) * jax.lax.rsqrt(var + eps) * g + b


def _softmax(a):
    m = jnp.max(a, axis=-1, keepdims=True)
    e = jnp.exp(a - m)
    return e * pl.reciprocal(jnp.sum(e, axis=-1, keepdims=True), approx=True)


# b64 slab row indices (packed per-depth 64-wide params)
_LN1G, _LN1B, _LN2G, _LN2B, _LN3G, _LN3B = 0, 1, 2, 3, 4, 5
_PROJB, _CAQB, _CAKB, _CAOB, _FC2B = 6, 7, 8, 9, 10


# --------------------- the single fused DiT forward kernel -------------------
def _dit_kernel(xp_ref, tf_ref, cf_ref,
                pw_ref, pb_ref, pos_ref,
                t1w_ref, t1b_ref, t2w_ref, t2b_ref,
                c1w_ref, c1b_ref, c2w_ref, c2b_ref, cfw_ref, cfb_ref,
                perm_ref, adaw_ref, adab_ref, linw_ref, linb_ref,
                qkvw_ref, qkvb_ref, projw_ref, cqw_ref, ckw_ref, cow_ref,
                f1w_ref, f1b_ref, f2w_ref, b64_ref,
                o_ref, x_acc, cemb_s, cond_s, *, num_heads, depth):
    d_id = pl.program_id(1)
    D = HIDDEN
    hd = D // num_heads
    n_kv = TOKENS // 2
    scale = 1.0 / math.sqrt(hd)

    # ---------------- fused embedding preamble (once per batch element) ------
    @pl.when(d_id == 0)
    def _():
        pos = pos_ref[...]                                       # (T, D)
        # PatchEmbed + pos_embed
        x_acc[...] = _mm(xp_ref[0], pw_ref[...]) + pb_ref[...] + pos
        # TimestepEmbedder: Linear -> SiLU -> Linear
        t1 = _mm(tf_ref[0], t1w_ref[...]) + t1b_ref[...]         # (1, D)
        t1 = t1 * jax.nn.sigmoid(t1)
        temb = _mm(t1, t2w_ref[...]) + t2b_ref[...]              # (1, D)
        # c_embedder: 1x1 conv -> relu -> 1x1 conv -> relu -> fc, + pos
        y = jnp.maximum(_mm(c1w_ref[...], cf_ref[0]) + c1b_ref[...], 0.0)
        y = jnp.maximum(_mm(c2w_ref[...], y) + c2b_ref[...], 0.0)
        cemb = _mm(y, cfw_ref[...]) + cfb_ref[...] + pos         # (T, D)
        cemb_s[...] = cemb                                       # FinalLayer cond
        # cross-attn conditioning, rows permuted to [even tokens; odd tokens]
        cond_s[...] = _mm(perm_ref[...], cemb + temb)

    x = x_acc[...]                           # (T, D) f32, carried across depth
    b64 = b64_ref[0]                         # (11, 64) packed params

    # ---------------- self-attention (qkv_bias=True, k-bias == 0) ------------
    h1 = _layernorm(x, b64[_LN1G:_LN1G + 1], b64[_LN1B:_LN1B + 1])
    qkv = _mm(h1, qkvw_ref[0]) + qkvb_ref[0]                     # (T, 3D) fused
    pjw = projw_ref[0]
    sa = None
    for h in range(num_heads):
        lo, hi = h * hd, (h + 1) * hd
        q = qkv[:, lo:hi]
        k = qkv[:, D + lo:D + hi]
        v = qkv[:, 2 * D + lo:2 * D + hi]
        att = _softmax(_mm_t(q, k) * scale)                      # (T, T)
        sa_h = _mm(_mm(att, v), pjw[lo:hi, :])                   # folded proj
        sa = sa_h if sa is None else sa + sa_h
    x = x + sa + b64[_PROJB:_PROJB + 1]

    # ---------------- cross-attention (adds its internal residual too) -------
    h2 = _layernorm(x, b64[_LN2G:_LN2G + 1], b64[_LN2B:_LN2B + 1])
    qx = _mm(h2, cqw_ref[0]) + b64[_CAQB:_CAQB + 1]              # (T, D)
    kv = _mm(cond_s[...], ckw_ref[0]) + b64[_CAKB:_CAKB + 1]     # (T, D), M=64
    cw = cow_ref[0]
    ca = None
    for h in range(num_heads):
        lo, hi = h * hd, (h + 1) * hd
        q = qx[:, lo:hi]
        kk = kv[:n_kv, lo:hi]                                    # even tokens
        vv = kv[n_kv:, lo:hi]                                    # odd tokens
        att = _softmax(_mm_t(q, kk) * scale)                     # (T, T/2)
        ca_h = _mm(_mm(att, vv), cw[lo:hi, :])
        ca = ca_h if ca is None else ca + ca_h
    x = x + (h2 + ca + b64[_CAOB:_CAOB + 1])                     # double residual

    # ---------------- MLP (GELU tanh approx) ---------------------------------
    h3 = _layernorm(x, b64[_LN3G:_LN3G + 1], b64[_LN3B:_LN3B + 1])
    m = jax.nn.gelu(_mm(h3, f1w_ref[0]) + f1b_ref[0], approximate=True)
    x = x + _mm(m, f2w_ref[0]) + b64[_FC2B:_FC2B + 1]

    x_acc[...] = x

    # ---------------- FinalLayer fused at the last depth step ----------------
    @pl.when(d_id == depth - 1)
    def _():
        cemb = cemb_s[...]
        mod = _mm(jax.nn.silu(cemb), adaw_ref[...]) + adab_ref[...]   # (T, 2D)
        shift = mod[:, :D]
        scl = mod[:, D:]
        mu = jnp.mean(x, axis=-1, keepdims=True)
        var = jnp.mean(jnp.square(x - mu), axis=-1, keepdims=True)
        xn = (x - mu) * jax.lax.rsqrt(var + 1e-6)                # LN, no affine
        xm = xn * (1.0 + scl) + shift                            # modulate
        # lin_w is zero-padded to 128 output lanes -> unmasked, lane-dense store
        o_ref[0] = (_mm(xm, linw_ref[...]) + linb_ref[...]).astype(o_ref.dtype)


_CONST_KEYS = ('patch_w', 'patch_b', 'pos', 't1_w', 't1_b', 't2_w', 't2_b',
               'cconv1_w', 'cconv1_b', 'cconv2_w', 'cconv2_b', 'cfc_w', 'cfc_b',
               'perm', 'adaln_w', 'adaln_b', 'lin_w', 'lin_b')
_DEPTH_KEYS = ('qkv_w', 'qkv_b', 'proj_w', 'cq_w', 'ck_w', 'co_w',
               'f1_w', 'f1_b', 'f2_w', 'b64')


def dit_call(pp, xp, tf, cf):
    Bn = xp.shape[0]
    consts = [pp[k] for k in _CONST_KEYS]
    dparams = [pp[k] for k in _DEPTH_KEYS]

    def batch_spec(a):
        nd = a.ndim
        return pl.BlockSpec((1,) + a.shape[1:], lambda b, d: (b,) + (0,) * (nd - 1))

    def const_spec(a):
        nd = a.ndim
        return pl.BlockSpec(a.shape, lambda b, d: (0,) * nd)

    def depth_spec(a):
        nd = a.ndim
        return pl.BlockSpec((1,) + a.shape[1:], lambda b, d: (d,) + (0,) * (nd - 1))

    in_specs = ([batch_spec(xp), batch_spec(tf), batch_spec(cf)]
                + [const_spec(a) for a in consts]
                + [depth_spec(a) for a in dparams])

    return pl.pallas_call(
        partial(_dit_kernel, num_heads=NUM_HEADS, depth=DEPTH),
        grid=(Bn, DEPTH),
        in_specs=in_specs,
        out_specs=pl.BlockSpec((1, TOKENS, OUT_PAD), lambda b, d: (b, 0, 0)),
        out_shape=jax.ShapeDtypeStruct((Bn, TOKENS, OUT_PAD), jnp.float32),
        scratch_shapes=[pltpu.VMEM((TOKENS, HIDDEN), jnp.float32),   # x carry
                        pltpu.VMEM((TOKENS, HIDDEN), jnp.float32),   # cemb
                        pltpu.VMEM((TOKENS, HIDDEN), jnp.float32)],  # cond (perm)
        compiler_params=pltpu.CompilerParams(
            dimension_semantics=("parallel", "arbitrary")),
    )(xp, tf, cf, *consts, *dparams)


# ------------------------------ glue / forward -------------------------------
def timestep_embedding(t, dim, max_period=10000):
    half = dim // 2
    freqs = jnp.exp(-math.log(max_period) *
                    jnp.arange(half, dtype=jnp.float32) / half)
    args = t.astype(jnp.float32)[:, None] * freqs[None]
    return jnp.concatenate([jnp.cos(args), jnp.sin(args)], axis=-1)


@jax.jit
def dit_forward(pp, x, t, c):
    Bn = x.shape[0]
    p = PATCH

    # patchify (glue): NCHW -> (B, T, C*p*p) with (c, ph, pw) ordering like conv
    xp = x.reshape(Bn, C_IN, GRID, p, GRID, p)
    xp = xp.transpose(0, 2, 4, 1, 3, 5).reshape(Bn, TOKENS, C_IN * p * p)
    tf = timestep_embedding(t, FREQ).reshape(Bn, 1, FREQ)
    cf = c.reshape(Bn, C_COND, LC)

    out_pad = dit_call(pp, xp, tf, cf)          # (B, T, 128), lane-dense store
    y = out_pad[:, :, :P_OUT]                   # (B, T, p*c)

    # TODO(synk): reference unpatchify is inconsistent (would raise); 1-D-patch
    # interpretation used: (B, T, p*c) -> (B, c, h, w*p).
    o = y.reshape(Bn, GRID, GRID, PATCH, C_OUT)
    o = jnp.einsum('nhwpc->nchwp', o)
    return o.reshape(Bn, C_OUT, GRID, GRID * PATCH)


# ------------------------------ parameter init -------------------------------
def init_params(key):
    keys = iter(jax.random.split(key, 256))

    def xavier(shape):
        fin, fout = shape[-2], shape[-1]
        lim = math.sqrt(6.0 / (fin + fout))
        return jax.random.uniform(next(keys), shape, jnp.float32, -lim, lim)

    def small(shape, std=0.02):
        return std * jax.random.normal(next(keys), shape, jnp.float32)

    def bias(n):
        return small((1, n))

    def make_block():
        q_bias = small((1, HIDDEN))
        v_bias = small((1, HIDDEN))
        qkv_b = jnp.concatenate(
            [q_bias, jnp.zeros((1, HIDDEN), jnp.float32), v_bias], axis=-1)
        return {
            'ln1_g': jnp.ones((1, HIDDEN), jnp.float32),
            'ln1_b': jnp.zeros((1, HIDDEN), jnp.float32),
            'qkv_w': xavier((HIDDEN, 3 * HIDDEN)),
            'qkv_b': qkv_b,
            'proj_w': xavier((HIDDEN, HIDDEN)), 'proj_b': bias(HIDDEN),
            'ln2_g': jnp.ones((1, HIDDEN), jnp.float32),
            'ln2_b': jnp.zeros((1, HIDDEN), jnp.float32),
            'caq_w': xavier((HIDDEN, HIDDEN)), 'caq_b': bias(HIDDEN),
            'cak_w': xavier((HIDDEN, HIDDEN)), 'cak_b': bias(HIDDEN),
            # TODO(synk): CrossAttention.v_proj exists in the reference but is
            # never used in its forward; it is omitted here.
            'cao_w': xavier((HIDDEN, HIDDEN)), 'cao_b': bias(HIDDEN),
            'ln3_g': jnp.ones((1, HIDDEN), jnp.float32),
            'ln3_b': jnp.zeros((1, HIDDEN), jnp.float32),
            'fc1_w': xavier((HIDDEN, MLP_HIDDEN)), 'fc1_b': bias(MLP_HIDDEN),
            'fc2_w': xavier((MLP_HIDDEN, HIDDEN)), 'fc2_b': bias(HIDDEN),
        }

    pos = get_2d_sincos_pos_embed(HIDDEN, GRID)
    return {
        'patch_w': xavier((C_IN * PATCH * PATCH, HIDDEN)),
        'patch_b': bias(HIDDEN),
        'pos_embed': jnp.asarray(pos, jnp.float32)[None],
        't1_w': small((FREQ, HIDDEN)), 't1_b': bias(HIDDEN),
        't2_w': small((HIDDEN, HIDDEN)), 't2_b': bias(HIDDEN),
        # 1x1 conv weights stored (out_ch, in_ch); biases (out_ch, 1)
        'cconv1_w': xavier((TOKENS, C_COND)), 'cconv1_b': small((TOKENS, 1)),
        'cconv2_w': xavier((TOKENS, TOKENS)), 'cconv2_b': small((TOKENS, 1)),
        'cfc_w': xavier((LC, HIDDEN)), 'cfc_b': bias(HIDDEN),
        'blocks': [make_block() for _ in range(DEPTH)],
        'final': {
            'adaln_w': xavier((HIDDEN, 2 * HIDDEN)), 'adaln_b': bias(2 * HIDDEN),
            'lin_w': xavier((HIDDEN, P_OUT)), 'lin_b': bias(P_OUT),
        },
    }


def prepare_params(p):
    """Depth-stack / pack block params, pad the final linear to 128 lanes,
    build the even/odd token permutation matrix, cast matmul weights to bf16."""
    bf = lambda a: a.astype(jnp.bfloat16)
    blocks = p['blocks']

    def stk(fn):
        return jnp.stack([fn(b) for b in blocks], axis=0)

    # packed (DEPTH, 11, 64) slab of LN params + 64-wide biases
    b64 = stk(lambda b: jnp.concatenate(
        [b['ln1_g'], b['ln1_b'], b['ln2_g'], b['ln2_b'], b['ln3_g'], b['ln3_b'],
         b['proj_b'], b['caq_b'], b['cak_b'], b['cao_b'], b['fc2_b']], axis=0))

    fin = p['final']
    lin_w_pad = jnp.zeros((HIDDEN, OUT_PAD), jnp.float32).at[:, :P_OUT].set(fin['lin_w'])
    lin_b_pad = jnp.zeros((1, OUT_PAD), jnp.float32).at[:, :P_OUT].set(fin['lin_b'])

    # permutation matrix: rows 0..31 pick even tokens, rows 32..63 pick odd
    src = np.concatenate([np.arange(0, TOKENS, 2), np.arange(1, TOKENS, 2)])
    perm = np.zeros((TOKENS, TOKENS), np.float32)
    perm[np.arange(TOKENS), src] = 1.0

    return {
        'patch_w': bf(p['patch_w']), 'patch_b': p['patch_b'],
        'pos': p['pos_embed'][0],
        't1_w': bf(p['t1_w']), 't1_b': p['t1_b'],
        't2_w': bf(p['t2_w']), 't2_b': p['t2_b'],
        'cconv1_w': bf(p['cconv1_w']), 'cconv1_b': p['cconv1_b'],
        'cconv2_w': bf(p['cconv2_w']), 'cconv2_b': p['cconv2_b'],
        'cfc_w': bf(p['cfc_w']), 'cfc_b': p['cfc_b'],
        'perm': jnp.asarray(perm, jnp.bfloat16),
        'adaln_w': bf(fin['adaln_w']), 'adaln_b': fin['adaln_b'],
        'lin_w': bf(lin_w_pad), 'lin_b': lin_b_pad,
        'qkv_w': stk(lambda b: bf(b['qkv_w'])),        # (DEPTH, 64, 192)
        'qkv_b': stk(lambda b: b['qkv_b']),            # (DEPTH, 1, 192)
        'proj_w': stk(lambda b: bf(b['proj_w'])),
        'cq_w': stk(lambda b: bf(b['caq_w'])),
        'ck_w': stk(lambda b: bf(b['cak_w'])),
        'co_w': stk(lambda b: bf(b['cao_w'])),
        'f1_w': stk(lambda b: bf(b['fc1_w'])),
        'f1_b': stk(lambda b: b['fc1_b']),
        'f2_w': stk(lambda b: bf(b['fc2_w'])),
        'b64': b64,
    }


# ----------------------------------- main ------------------------------------
if __name__ == "__main__":
    root = jax.random.PRNGKey(0)
    kp, kx, kt, kc = jax.random.split(root, 4)

    params = init_params(kp)
    pp = prepare_params(params)

    x = jax.random.normal(kx, (B, C_IN, IMG, IMG), jnp.float32)        # NCHW
    t = jax.random.uniform(kt, (B,), jnp.float32, 0.0, 1000.0)
    c = jax.random.normal(kc, (B, C_COND, COND_IMG, COND_IMG), jnp.float32)

    out = dit_forward(pp, x, t, c)
    out = jax.block_until_ready(out)
    assert out.shape == (B, C_OUT, GRID, GRID * PATCH)
    assert bool(jnp.all(jnp.isfinite(out)))
    print("KERNEL_OK")
</pallas_src>

<mosaic_0001>
module attributes {stable_mosaic.version = 11 : i64} {
  func.func @_dit_kernel(%arg0: i32, %arg1: i32, %arg2: memref<1x64x16xf32, #tpu.memory_space<vmem>>, %arg3: memref<1x1x256xf32, #tpu.memory_space<vmem>>, %arg4: memref<1x8x256xf32, #tpu.memory_space<vmem>>, %arg5: memref<16x64xbf16, #tpu.memory_space<vmem>>, %arg6: memref<1x64xf32, #tpu.memory_space<vmem>>, %arg7: memref<64x64xf32, #tpu.memory_space<vmem>>, %arg8: memref<256x64xbf16, #tpu.memory_space<vmem>>, %arg9: memref<1x64xf32, #tpu.memory_space<vmem>>, %arg10: memref<64x64xbf16, #tpu.memory_space<vmem>>, %arg11: memref<1x64xf32, #tpu.memory_space<vmem>>, %arg12: memref<64x8xbf16, #tpu.memory_space<vmem>>, %arg13: memref<64x1xf32, #tpu.memory_space<vmem>>, %arg14: memref<64x64xbf16, #tpu.memory_space<vmem>>, %arg15: memref<64x1xf32, #tpu.memory_space<vmem>>, %arg16: memref<256x64xbf16, #tpu.memory_space<vmem>>, %arg17: memref<1x64xf32, #tpu.memory_space<vmem>>, %arg18: memref<64x64xbf16, #tpu.memory_space<vmem>>, %arg19: memref<64x128xbf16, #tpu.memory_space<vmem>>, %arg20: memref<1x128xf32, #tpu.memory_space<vmem>>, %arg21: memref<64x128xbf16, #tpu.memory_space<vmem>>, %arg22: memref<1x128xf32, #tpu.memory_space<vmem>>, %arg23: memref<1x64x192xbf16, #tpu.memory_space<vmem>>, %arg24: memref<1x1x192xf32, #tpu.memory_space<vmem>>, %arg25: memref<1x64x64xbf16, #tpu.memory_space<vmem>>, %arg26: memref<1x64x64xbf16, #tpu.memory_space<vmem>>, %arg27: memref<1x64x64xbf16, #tpu.memory_space<vmem>>, %arg28: memref<1x64x64xbf16, #tpu.memory_space<vmem>>, %arg29: memref<1x64x256xbf16, #tpu.memory_space<vmem>>, %arg30: memref<1x1x256xf32, #tpu.memory_space<vmem>>, %arg31: memref<1x256x64xbf16, #tpu.memory_space<vmem>>, %arg32: memref<1x11x64xf32, #tpu.memory_space<vmem>>, %arg33: memref<1x64x128xf32, #tpu.memory_space<vmem>>, %arg34: memref<64x64xf32, #tpu.memory_space<vmem>>, %arg35: memref<64x64xf32, #tpu.memory_space<vmem>>, %arg36: memref<64x64xf32, #tpu.memory_space<vmem>>) attributes {dimension_semantics = [#tpu.dimension_semantics<parallel>, #tpu.dimension_semantics<arbitrary>], iteration_bounds = array<i64: 2, 2>, scalar_prefetch = 0 : i64, scratch_operands = 3 : i64, tpu.core_type = #tpu.core_type<tc>, window_params = [{transform_indices = @transform_0, window_bounds = array<i64: 1, 64, 16>}, {transform_indices = @transform_1, window_bounds = array<i64: 1, 1, 256>}, {transform_indices = @transform_2, window_bounds = array<i64: 1, 8, 256>}, {pipeline_mode = #tpu.pipeline_mode<synchronous>, transform_indices = @transform_3, window_bounds = array<i64: 16, 64>}, {pipeline_mode = #tpu.pipeline_mode<synchronous>, transform_indices = @transform_4, window_bounds = array<i64: 1, 64>}, {pipeline_mode = #tpu.pipeline_mode<synchronous>, transform_indices = @transform_5, window_bounds = array<i64: 64, 64>}, {pipeline_mode = #tpu.pipeline_mode<synchronous>, transform_indices = @transform_6, window_bounds = array<i64: 256, 64>}, {pipeline_mode = #tpu.pipeline_mode<synchronous>, transform_indices = @transform_7, window_bounds = array<i64: 1, 64>}, {pipeline_mode = #tpu.pipeline_mode<synchronous>, transform_indices = @transform_8, window_bounds = array<i64: 64, 64>}, {pipeline_mode = #tpu.pipeline_mode<synchronous>, transform_indices = @transform_9, window_bounds = array<i64: 1, 64>}, {pipeline_mode = #tpu.pipeline_mode<synchronous>, transform_indices = @transform_10, window_bounds = array<i64: 64, 8>}, {pipeline_mode = #tpu.pipeline_mode<synchronous>, transform_indices = @transform_11, window_bounds = array<i64: 64, 1>}, {pipeline_mode = #tpu.pipeline_mode<synchronous>, transform_indices = @transform_12, window_bounds = array<i64: 64, 64>}, {pipeline_mode = #tpu.pipeline_mode<synchronous>, transform_indices = @transform_13, window_bounds = array<i64: 64, 1>}, {pipeline_mode = #tpu.pipeline_mode<synchronous>, transform_indices = @transform_14, window_bounds = array<i64: 256, 64>}, {pipeline_mode = #tpu.pipeline_mode<synchronous>, transform_indices = @transform_15, window_bounds = array<i64: 1, 64>}, {pipeline_mode = #tpu.pipeline_mode<synchronous>, transform_indices = @transform_16, window_bounds = array<i64: 64, 64>}, {pipeline_mode = #tpu.pipeline_mode<synchronous>, transform_indices = @transform_17, window_bounds = array<i64: 64, 128>}, {pipeline_mode = #tpu.pipeline_mode<synchronous>, transform_indices = @transform_18, window_bounds = array<i64: 1, 128>}, {pipeline_mode = #tpu.pipeline_mode<synchronous>, transform_indices = @transform_19, window_bounds = array<i64: 64, 128>}, {pipeline_mode = #tpu.pipeline_mode<synchronous>, transform_indices = @transform_20, window_bounds = array<i64: 1, 128>}, {transform_indices = @transform_21, window_bounds = array<i64: 1, 64, 192>}, {transform_indices = @transform_22, window_bounds = array<i64: 1, 1, 192>}, {transform_indices = @transform_23, window_bounds = array<i64: 1, 64, 64>}, {transform_indices = @transform_24, window_bounds = array<i64: 1, 64, 64>}, {transform_indices = @transform_25, window_bounds = array<i64: 1, 64, 64>}, {transform_indices = @transform_26, window_bounds = array<i64: 1, 64, 64>}, {transform_indices = @transform_27, window_bounds = array<i64: 1, 64, 256>}, {transform_indices = @transform_28, window_bounds = array<i64: 1, 1, 256>}, {transform_indices = @transform_29, window_bounds = array<i64: 1, 256, 64>}, {transform_indices = @transform_30, window_bounds = array<i64: 1, 11, 64>}, {transform_indices = @transform_31, window_bounds = array<i64: 1, 64, 128>}]} {
    %c0_i32 = arith.constant 0 : i32
    %0 = arith.cmpi eq, %arg1, %c0_i32 : i32
    %1 = arith.extui %0 : i1 to i32
    %c0_i32_0 = arith.constant 0 : i32
    %2 = arith.cmpi ne, %1, %c0_i32_0 : i32
    scf.if %2 {
      %c0_108 = arith.constant 0 : index
      %c0_109 = arith.constant 0 : index
      %345 = vector.load %arg7[%c0_108, %c0_109] : memref<64x64xf32, #tpu.memory_space<vmem>>, vector<64x64xf32>
      %c0_110 = arith.constant 0 : index
      %c0_111 = arith.constant 0 : index
      %c0_112 = arith.constant 0 : index
      %346 = vector.load %arg2[%c0_110, %c0_111, %c0_112] : memref<1x64x16xf32, #tpu.memory_space<vmem>>, vector<1x64x16xf32>
      %347 = vector.shape_cast %346 : vector<1x64x16xf32> to vector<64x16xf32>
      %c0_113 = arith.constant 0 : index
      %c0_114 = arith.constant 0 : index
      %348 = vector.load %arg5[%c0_113, %c0_114] : memref<16x64xbf16, #tpu.memory_space<vmem>>, vector<16x64xbf16>
      %349 = arith.truncf %347 : vector<64x16xf32> to vector<64x16xbf16>
      %cst_115 = arith.constant dense<0.000000e+00> : vector<64x64xf32>
      %350 = tpu.matmul %349, %348, %cst_115 {dimension_numbers = #tpu.dot_dimension_numbers<[1], [0], [0], [1], [0, 0, 1, 1], [], []>} : vector<64x16xbf16>, vector<16x64xbf16>, vector<64x64xf32> -> vector<64x64xf32>
      %c0_116 = arith.constant 0 : index
      %c0_117 = arith.constant 0 : index
      %351 = vector.load %arg6[%c0_116, %c0_117] : memref<1x64xf32, #tpu.memory_space<vmem>>, vector<1x64xf32>
      %352 = vector.broadcast %351 : vector<1x64xf32> to vector<64x64xf32>
      %353 = arith.addf %350, %352 : vector<64x64xf32>
      %354 = arith.addf %353, %345 : vector<64x64xf32>
      %c0_118 = arith.constant 0 : index
      %c0_119 = arith.constant 0 : index
      %355 = vector.load %arg34[%c0_118, %c0_119] : memref<64x64xf32, #tpu.memory_space<vmem>>, vector<64x64xf32>
      tpu.vector_store %arg34[%c0_118, %c0_119], %354 {strides = array<i32>} : memref<64x64xf32, #tpu.memory_space<vmem>>, vector<64x64xf32>,
      %c0_120 = arith.constant 0 : index
      %c0_121 = arith.constant 0 : index
      %c0_122 = arith.constant 0 : index
      %356 = vector.load %arg3[%c0_120, %c0_121, %c0_122] : memref<1x1x256xf32, #tpu.memory_space<vmem>>, vector<1x1x256xf32>
      %357 = vector.shape_cast %356 : vector<1x1x256xf32> to vector<1x256xf32>
      %c0_123 = arith.constant 0 : index
      %c0_124 = arith.constant 0 : index
      %358 = vector.load %arg8[%c0_123, %c0_124] : memref<256x64xbf16, #tpu.memory_space<vmem>>, vector<256x64xbf16>
      %359 = arith.truncf %357 : vector<1x256xf32> to vector<1x256xbf16>
      %cst_125 = arith.constant dense<0.000000e+00> : vector<1x64xf32>
      %360 = tpu.matmul %359, %358, %cst_125 {dimension_numbers = #tpu.dot_dimension_numbers<[1], [0], [0], [1], [0, 0, 1, 1], [], []>} : vector<1x256xbf16>, vector<256x64xbf16>, vector<1x64xf32> -> vector<1x64xf32>
      %c0_126 = arith.constant 0 : index
      %c0_127 = arith.constant 0 : index
      %361 = vector.load %arg9[%c0_126, %c0_127] : memref<1x64xf32, #tpu.memory_space<vmem>>, vector<1x64xf32>
      %362 = arith.addf %360, %361 : vector<1x64xf32>
      %363 = arith.negf %362 : vector<1x64xf32>
      %364 = math.exp %363 : vector<1x64xf32>
      %cst_128 = arith.constant 1.000000e+00 : f32
      %365 = vector.broadcast %cst_128 : f32 to vector<1x64xf32>
      %366 = arith.addf %365, %364 : vector<1x64xf32>
      %367 = arith.divf %365, %366 : vector<1x64xf32>
      %368 = arith.mulf %362, %367 : vector<1x64xf32>
      %c0_129 = arith.constant 0 : index
      %c0_130 = arith.constant 0 : index
      %369 = vector.load %arg10[%c0_129, %c0_130] : memref<64x64xbf16, #tpu.memory_space<vmem>>, vector<64x64xbf16>
      %370 = arith.truncf %368 : vector<1x64xf32> to vector<1x64xbf16>
      %cst_131 = arith.constant dense<0.000000e+00> : vector<1x64xf32>
      %371 = tpu.matmul %370, %369, %cst_131 {dimension_numbers = #tpu.dot_dimension_numbers<[1], [0], [0], [1], [0, 0, 1, 1], [], []>} : vector<1x64xbf16>, vector<64x64xbf16>, vector<1x64xf32> -> vector<1x64xf32>
      %c0_132 = arith.constant 0 : index
      %c0_133 = arith.constant 0 : index
      %372 = vector.load %arg11[%c0_132, %c0_133] : memref<1x64xf32, #tpu.memory_space<vmem>>, vector<1x64xf32>
      %373 = arith.addf %371, %372 : vector<1x64xf32>
      %c0_134 = arith.constant 0 : index
      %c0_135 = arith.constant 0 : index
      %374 = vector.load %arg12[%c0_134, %c0_135] : memref<64x8xbf16, #tpu.memory_space<vmem>>, vector<64x8xbf16>
      %c0_136 = arith.constant 0 : index
      %c0_137 = arith.constant 0 : index
      %c0_138 = arith.constant 0 : index
      %375 = vector.load %arg4[%c0_136, %c0_137, %c0_138] : memref<1x8x256xf32, #tpu.memory_space<vmem>>, vector<1x8x256xf32>
      %376 = vector.shape_cast %375 : vector<1x8x256xf32> to vector<8x256xf32>
      %377 = arith.truncf %376 : vector<8x256xf32> to vector<8x256xbf16>
      %cst_139 = arith.constant dense<0.000000e+00> : vector<64x256xf32>
      %378 = tpu.matmul %374, %377, %cst_139 {dimension_numbers = #tpu.dot_dimension_numbers<[1], [0], [0], [1], [0, 0, 1, 1], [], []>} : vector<64x8xbf16>, vector<8x256xbf16>, vector<64x256xf32> -> vector<64x256xf32>
      %c0_140 = arith.constant 0 : index
      %c0_141 = arith.constant 0 : index
      %379 = vector.load %arg13[%c0_140, %c0_141] : memref<64x1xf32, #tpu.memory_space<vmem>>, vector<64x1xf32>
      %380 = vector.broadcast %379 : vector<64x1xf32> to vector<64x256xf32>
      %381 = arith.addf %378, %380 : vector<64x256xf32>
      %cst_142 = arith.constant 0.000000e+00 : f32
      %382 = vector.broadcast %cst_142 : f32 to vector<64x256xf32>
      %383 = arith.maximumf %381, %382 : vector<64x256xf32>
      %c0_143 = arith.constant 0 : index
      %c0_144 = arith.constant 0 : index
      %384 = vector.load %arg14[%c0_143, %c0_144] : memref<64x64xbf16, #tpu.memory_space<vmem>>, vector<64x64xbf16>
      %385 = arith.truncf %383 : vector<64x256xf32> to vector<64x256xbf16>
      %cst_145 = arith.constant dense<0.000000e+00> : vector<64x256xf32>
      %386 = tpu.matmul %384, %385, %cst_145 {dimension_numbers = #tpu.dot_dimension_numbers<[1], [0], [0], [1], [0, 0, 1, 1], [], []>} : vector<64x64xbf16>, vector<64x256xbf16>, vector<64x256xf32> -> vector<64x256xf32>
      %c0_146 = arith.constant 0 : index
      %c0_147 = arith.constant 0 : index
      %387 = vector.load %arg15[%c0_146, %c0_147] : memref<64x1xf32, #tpu.memory_space<vmem>>, vector<64x1xf32>
      %388 = vector.broadcast %387 : vector<64x1xf32> to vector<64x256xf32>
      %389 = arith.addf %386, %388 : vector<64x256xf32>
      %cst_148 = arith.constant 0.000000e+00 : f32
      %390 = vector.broadcast %cst_148 : f32 to vector<64x256xf32>
      %391 = arith.maximumf %389, %390 : vector<64x256xf32>
      %c0_149 = arith.constant 0 : index
      %c0_150 = arith.constant 0 : index
      %392 = vector.load %arg16[%c0_149, %c0_150] : memref<256x64xbf16, #tpu.memory_space<vmem>>, vector<256x64xbf16>
      %393 = arith.truncf %391 : vector<64x256xf32> to vector<64x256xbf16>
      %cst_151 = arith.constant dense<0.000000e+00> : vector<64x64xf32>
      %394 = tpu.matmul %393, %392, %cst_151 {dimension_numbers = #tpu.dot_dimension_numbers<[1], [0], [0], [1], [0, 0, 1, 1], [], []>} : vector<64x256xbf16>, vector<256x64xbf16>, vector<64x64xf32> -> vector<64x64xf32>
      %c0_152 = arith.constant 0 : index
      %c0_153 = arith.constant 0 : index
      %395 = vector.load %arg17[%c0_152, %c0_153] : memref<1x64xf32, #tpu.memory_space<vmem>>, vector<1x64xf32>
      %396 = vector.broadcast %395 : vector<1x64xf32> to vector<64x64xf32>
      %397 = arith.addf %394, %396 : vector<64x64xf32>
      %398 = arith.addf %397, %345 : vector<64x64xf32>
      %c0_154 = arith.constant 0 : index
      %c0_155 = arith.constant 0 : index
      %399 = vector.load %arg35[%c0_154, %c0_155] : memref<64x64xf32, #tpu.memory_space<vmem>>, vector<64x64xf32>
      tpu.vector_store %arg35[%c0_154, %c0_155], %398 {strides = array<i32>} : memref<64x64xf32, #tpu.memory_space<vmem>>, vector<64x64xf32>,
      %c0_156 = arith.constant 0 : index
      %c0_157 = arith.constant 0 : index
      %400 = vector.load %arg18[%c0_156, %c0_157] : memref<64x64xbf16, #tpu.memory_space<vmem>>, vector<64x64xbf16>
      %401 = vector.broadcast %373 : vector<1x64xf32> to vector<64x64xf32>
      %402 = arith.addf %398, %401 : vector<64x64xf32>
      %403 = arith.truncf %402 : vector<64x64xf32> to vector<64x64xbf16>
      %cst_158 = arith.constant dense<0.000000e+00> : vector<64x64xf32>
      %404 = tpu.matmul %400, %403, %cst_158 {dimension_numbers = #tpu.dot_dimension_numbers<[1], [0], [0], [1], [0, 0, 1, 1], [], []>} : vector<64x64xbf16>, vector<64x64xbf16>, vector<64x64xf32> -> vector<64x64xf32>
      %c0_159 = arith.constant 0 : index
      %c0_160 = arith.constant 0 : index
      %405 = vector.load %arg36[%c0_159, %c0_160] : memref<64x64xf32, #tpu.memory_space<vmem>>, vector<64x64xf32>
      tpu.vector_store %arg36[%c0_159, %c0_160], %404 {strides = array<i32>} : memref<64x64xf32, #tpu.memory_space<vmem>>, vector<64x64xf32>,
    } else {
    }
    %c0 = arith.constant 0 : index
    %c0_1 = arith.constant 0 : index
    %3 = vector.load %arg34[%c0, %c0_1] : memref<64x64xf32, #tpu.memory_space<vmem>>, vector<64x64xf32>
    %c0_2 = arith.constant 0 : index
    %c0_3 = arith.constant 0 : index
    %c0_4 = arith.constant 0 : index
    %4 = vector.load %arg32[%c0_2, %c0_3, %c0_4] : memref<1x11x64xf32, #tpu.memory_space<vmem>>, vector<1x11x64xf32>
    %5 = vector.shape_cast %4 : vector<1x11x64xf32> to vector<11x64xf32>
    %6 = vector.extract_strided_slice %5 {offsets = [0, 0], sizes = [1, 64], strides = [1, 1]} : vector<11x64xf32> to vector<1x64xf32>
    %7 = vector.extract_strided_slice %5 {offsets = [1, 0], sizes = [1, 64], strides = [1, 1]} : vector<11x64xf32> to vector<1x64xf32>
    %cst = arith.constant dense<0.000000e+00> : vector<64xf32>
    %8 = vector.multi_reduction <add>, %3, %cst [1] : vector<64x64xf32> to vector<64xf32>
    %9 = vector.shape_cast %8 : vector<64xf32> to vector<64x1xf32>
    %cst_5 = arith.constant 6.400000e+01 : f32
    %10 = vector.broadcast %cst_5 : f32 to vector<64x1xf32>
    %11 = arith.divf %9, %10 : vector<64x1xf32>
    %12 = vector.broadcast %11 : vector<64x1xf32> to vector<64x64xf32>
    %13 = arith.subf %3, %12 : vector<64x64xf32>
    %14 = arith.mulf %13, %13 : vector<64x64xf32>
    %cst_6 = arith.constant dense<0.000000e+00> : vector<64xf32>
    %15 = vector.multi_reduction <add>, %14, %cst_6 [1] : vector<64x64xf32> to vector<64xf32>
    %16 = vector.shape_cast %15 : vector<64xf32> to vector<64x1xf32>
    %cst_7 = arith.constant 6.400000e+01 : f32
    %17 = vector.broadcast %cst_7 : f32 to vector<64x1xf32>
    %18 = arith.divf %16, %17 : vector<64x1xf32>
    %19 = vector.broadcast %11 : vector<64x1xf32> to vector<64x64xf32>
    %20 = arith.subf %3, %19 : vector<64x64xf32>
    %cst_8 = arith.constant 9.99999997E-7 : f32
    %21 = vector.broadcast %cst_8 : f32 to vector<64x1xf32>
    %22 = arith.addf %18, %21 : vector<64x1xf32>
    %23 = math.rsqrt %22 : vector<64x1xf32>
    %24 = vector.broadcast %23 : vector<64x1xf32> to vector<64x64xf32>
    %25 = arith.mulf %20, %24 : vector<64x64xf32>
    %26 = vector.broadcast %6 : vector<1x64xf32> to vector<64x64xf32>
    %27 = arith.mulf %25, %26 : vector<64x64xf32>
    %28 = vector.broadcast %7 : vector<1x64xf32> to vector<64x64xf32>
    %29 = arith.addf %27, %28 : vector<64x64xf32>
    %c0_9 = arith.constant 0 : index
    %c0_10 = arith.constant 0 : index
    %c0_11 = arith.constant 0 : index
    %30 = vector.load %arg23[%c0_9, %c0_10, %c0_11] : memref<1x64x192xbf16, #tpu.memory_space<vmem>>, vector<1x64x192xbf16>
    %31 = vector.shape_cast %30 : vector<1x64x192xbf16> to vector<64x192xbf16>
    %32 = arith.truncf %29 : vector<64x64xf32> to vector<64x64xbf16>
    %cst_12 = arith.constant dense<0.000000e+00> : vector<64x192xf32>
    %33 = tpu.matmul %32, %31, %cst_12 {dimension_numbers = #tpu.dot_dimension_numbers<[1], [0], [0], [1], [0, 0, 1, 1], [], []>} : vector<64x64xbf16>, vector<64x192xbf16>, vector<64x192xf32> -> vector<64x192xf32>
    %c0_13 = arith.constant 0 : index
    %c0_14 = arith.constant 0 : index
    %c0_15 = arith.constant 0 : index
    %34 = vector.load %arg24[%c0_13, %c0_14, %c0_15] : memref<1x1x192xf32, #tpu.memory_space<vmem>>, vector<1x1x192xf32>
    %35 = vector.shape_cast %34 : vector<1x1x192xf32> to vector<1x192xf32>
    %36 = vector.broadcast %35 : vector<1x192xf32> to vector<64x192xf32>
    %37 = arith.addf %33, %36 : vector<64x192xf32>
    %c0_16 = arith.constant 0 : index
    %c0_17 = arith.constant 0 : index
    %c0_18 = arith.constant 0 : index
    %38 = vector.load %arg25[%c0_16, %c0_17, %c0_18] : memref<1x64x64xbf16, #tpu.memory_space<vmem>>, vector<1x64x64xbf16>
    %39 = vector.shape_cast %38 : vector<1x64x64xbf16> to vector<64x64xbf16>
    %40 = vector.extract_strided_slice %37 {offsets = [0, 0], sizes = [64, 16], strides = [1, 1]} : vector<64x192xf32> to vector<64x16xf32>
    %41 = vector.extract_strided_slice %37 {offsets = [0, 64], sizes = [64, 16], strides = [1, 1]} : vector<64x192xf32> to vector<64x16xf32>
    %42 = vector.extract_strided_slice %37 {offsets = [0, 128], sizes = [64, 16], strides = [1, 1]} : vector<64x192xf32> to vector<64x16xf32>
    %43 = arith.truncf %40 : vector<64x16xf32> to vector<64x16xbf16>
    %44 = arith.truncf %41 : vector<64x16xf32> to vector<64x16xbf16>
    %cst_19 = arith.constant dense<0.000000e+00> : vector<64x64xf32>
    %45 = tpu.matmul %43, %44, %cst_19 {dimension_numbers = #tpu.dot_dimension_numbers<[1], [1], [0], [0], [0, 0, 1, 0], [], []>} : vector<64x16xbf16>, vector<64x16xbf16>, vector<64x64xf32> -> vector<64x64xf32>
    %cst_20 = arith.constant 2.500000e-01 : f32
    %46 = vector.broadcast %cst_20 : f32 to vector<64x64xf32>
    %47 = arith.mulf %45, %46 : vector<64x64xf32>
    %cst_21 = arith.constant dense<0xFF800000> : vector<64xf32>
    %48 = vector.multi_reduction <maximumf>, %47, %cst_21 [1] : vector<64x64xf32> to vector<64xf32>
    %49 = vector.shape_cast %48 : vector<64xf32> to vector<64x1xf32>
    %50 = vector.broadcast %49 : vector<64x1xf32> to vector<64x64xf32>
    %51 = arith.subf %47, %50 : vector<64x64xf32>
    %52 = math.exp %51 : vector<64x64xf32>
    %cst_22 = arith.constant dense<0.000000e+00> : vector<64xf32>
    %53 = vector.multi_reduction <add>, %52, %cst_22 [1] : vector<64x64xf32> to vector<64xf32>
    %54 = vector.shape_cast %53 : vector<64xf32> to vector<64x1xf32>
    %55 = tpu.reciprocal %54 {approx = true} : vector<64x1xf32> -> vector<64x1xf32>
    %56 = vector.broadcast %55 : vector<64x1xf32> to vector<64x64xf32>
    %57 = arith.mulf %52, %56 : vector<64x64xf32>
    %58 = arith.truncf %57 : vector<64x64xf32> to vector<64x64xbf16>
    %59 = arith.truncf %42 : vector<64x16xf32> to vector<64x16xbf16>
    %cst_23 = arith.constant dense<0.000000e+00> : vector<64x16xf32>
    %60 = tpu.matmul %58, %59, %cst_23 {dimension_numbers = #tpu.dot_dimension_numbers<[1], [0], [0], [1], [0, 0, 1, 1], [], []>} : vector<64x64xbf16>, vector<64x16xbf16>, vector<64x16xf32> -> vector<64x16xf32>
    %61 = vector.extract_strided_slice %39 {offsets = [0, 0], sizes = [16, 64], strides = [1, 1]} : vector<64x64xbf16> to vector<16x64xbf16>
    %62 = arith.truncf %60 : vector<64x16xf32> to vector<64x16xbf16>
    %cst_24 = arith.constant dense<0.000000e+00> : vector<64x64xf32>
    %63 = tpu.matmul %62, %61, %cst_24 {dimension_numbers = #tpu.dot_dimension_numbers<[1], [0], [0], [1], [0, 0, 1, 1], [], []>} : vector<64x16xbf16>, vector<16x64xbf16>, vector<64x64xf32> -> vector<64x64xf32>
    %64 = vector.extract_strided_slice %37 {offsets = [0, 16], sizes = [64, 16], strides = [1, 1]} : vector<64x192xf32> to vector<64x16xf32>
    %65 = vector.extract_strided_slice %37 {offsets = [0, 80], sizes = [64, 16], strides = [1, 1]} : vector<64x192xf32> to vector<64x16xf32>
    %66 = vector.extract_strided_slice %37 {offsets = [0, 144], sizes = [64, 16], strides = [1, 1]} : vector<64x192xf32> to vector<64x16xf32>
    %67 = arith.truncf %64 : vector<64x16xf32> to vector<64x16xbf16>
    %68 = arith.truncf %65 : vector<64x16xf32> to vector<64x16xbf16>
    %cst_25 = arith.constant dense<0.000000e+00> : vector<64x64xf32>
    %69 = tpu.matmul %67, %68, %cst_25 {dimension_numbers = #tpu.dot_dimension_numbers<[1], [1], [0], [0], [0, 0, 1, 0], [], []>} : vector<64x16xbf16>, vector<64x16xbf16>, vector<64x64xf32> -> vector<64x64xf32>
    %cst_26 = arith.constant 2.500000e-01 : f32
    %70 = vector.broadcast %cst_26 : f32 to vector<64x64xf32>
    %71 = arith.mulf %69, %70 : vector<64x64xf32>
    %cst_27 = arith.constant dense<0xFF800000> : vector<64xf32>
    %72 = vector.multi_reduction <maximumf>, %71, %cst_27 [1] : vector<64x64xf32> to vector<64xf32>
    %73 = vector.shape_cast %72 : vector<64xf32> to vector<64x1xf32>
    %74 = vector.broadcast %73 : vector<64x1xf32> to vector<64x64xf32>
    %75 = arith.subf %71, %74 : vector<64x64xf32>
    %76 = math.exp %75 : vector<64x64xf32>
    %cst_28 = arith.constant dense<0.000000e+00> : vector<64xf32>
    %77 = vector.multi_reduction <add>, %76, %cst_28 [1] : vector<64x64xf32> to vector<64xf32>
    %78 = vector.shape_cast %77 : vector<64xf32> to vector<64x1xf32>
    %79 = tpu.reciprocal %78 {approx = true} : vector<64x1xf32> -> vector<64x1xf32>
    %80 = vector.broadcast %79 : vector<64x1xf32> to vector<64x64xf32>
    %81 = arith.mulf %76, %80 : vector<64x64xf32>
    %82 = arith.truncf %81 : vector<64x64xf32> to vector<64x64xbf16>
    %83 = arith.truncf %66 : vector<64x16xf32> to vector<64x16xbf16>
    %cst_29 = arith.constant dense<0.000000e+00> : vector<64x16xf32>
    %84 = tpu.matmul %82, %83, %cst_29 {dimension_numbers = #tpu.dot_dimension_numbers<[1], [0], [0], [1], [0, 0, 1, 1], [], []>} : vector<64x64xbf16>, vector<64x16xbf16>, vector<64x16xf32> -> vector<64x16xf32>
    %85 = vector.extract_strided_slice %39 {offsets = [16, 0], sizes = [16, 64], strides = [1, 1]} : vector<64x64xbf16> to vector<16x64xbf16>
    %86 = arith.truncf %84 : vector<64x16xf32> to vector<64x16xbf16>
    %cst_30 = arith.constant dense<0.000000e+00> : vector<64x64xf32>
    %87 = tpu.matmul %86, %85, %cst_30 {dimension_numbers = #tpu.dot_dimension_numbers<[1], [0], [0], [1], [0, 0, 1, 1], [], []>} : vector<64x16xbf16>, vector<16x64xbf16>, vector<64x64xf32> -> vector<64x64xf32>
    %88 = arith.addf %63, %87 : vector<64x64xf32>
    %89 = vector.extract_strided_slice %37 {offsets = [0, 32], sizes = [64, 16], strides = [1, 1]} : vector<64x192xf32> to vector<64x16xf32>
    %90 = vector.extract_strided_slice %37 {offsets = [0, 96], sizes = [64, 16], strides = [1, 1]} : vector<64x192xf32> to vector<64x16xf32>
    %91 = vector.extract_strided_slice %37 {offsets = [0, 160], sizes = [64, 16], strides = [1, 1]} : vector<64x192xf32> to vector<64x16xf32>
    %92 = arith.truncf %89 : vector<64x16xf32> to vector<64x16xbf16>
    %93 = arith.truncf %90 : vector<64x16xf32> to vector<64x16xbf16>
    %cst_31 = arith.constant dense<0.000000e+00> : vector<64x64xf32>
    %94 = tpu.matmul %92, %93, %cst_31 {dimension_numbers = #tpu.dot_dimension_numbers<[1], [1], [0], [0], [0, 0, 1, 0], [], []>} : vector<64x16xbf16>, vector<64x16xbf16>, vector<64x64xf32> -> vector<64x64xf32>
    %cst_32 = arith.constant 2.500000e-01 : f32
    %95 = vector.broadcast %cst_32 : f32 to vector<64x64xf32>
    %96 = arith.mulf %94, %95 : vector<64x64xf32>
    %cst_33 = arith.constant dense<0xFF800000> : vector<64xf32>
    %97 = vector.multi_reduction <maximumf>, %96, %cst_33 [1] : vector<64x64xf32> to vector<64xf32>
    %98 = vector.shape_cast %97 : vector<64xf32> to vector<64x1xf32>
    %99 = vector.broadcast %98 : vector<64x1xf32> to vector<64x64xf32>
    %100 = arith.subf %96, %99 : vector<64x64xf32>
    %101 = math.exp %100 : vector<64x64xf32>
    %cst_34 = arith.constant dense<0.000000e+00> : vector<64xf32>
    %102 = vector.multi_reduction <add>, %101, %cst_34 [1] : vector<64x64xf32> to vector<64xf32>
    %103 = vector.shape_cast %102 : vector<64xf32> to vector<64x1xf32>
    %104 = tpu.reciprocal %103 {approx = true} : vector<64x1xf32> -> vector<64x1xf32>
    %105 = vector.broadcast %104 : vector<64x1xf32> to vector<64x64xf32>
    %106 = arith.mulf %101, %105 : vector<64x64xf32>
    %107 = arith.truncf %106 : vector<64x64xf32> to vector<64x64xbf16>
    %108 = arith.truncf %91 : vector<64x16xf32> to vector<64x16xbf16>
    %cst_35 = arith.constant dense<0.000000e+00> : vector<64x16xf32>
    %109 = tpu.matmul %107, %108, %cst_35 {dimension_numbers = #tpu.dot_dimension_numbers<[1], [0], [0], [1], [0, 0, 1, 1], [], []>} : vector<64x64xbf16>, vector<64x16xbf16>, vector<64x16xf32> -> vector<64x16xf32>
    %110 = vector.extract_strided_slice %39 {offsets = [32, 0], sizes = [16, 64], strides = [1, 1]} : vector<64x64xbf16> to vector<16x64xbf16>
    %111 = arith.truncf %109 : vector<64x16xf32> to vector<64x16xbf16>
    %cst_36 = arith.constant dense<0.000000e+00> : vector<64x64xf32>
    %112 = tpu.matmul %111, %110, %cst_36 {dimension_numbers = #tpu.dot_dimension_numbers<[1], [0], [0], [1], [0, 0, 1, 1], [], []>} : vector<64x16xbf16>, vector<16x64xbf16>, vector<64x64xf32> -> vector<64x64xf32>
    %113 = arith.addf %88, %112 : vector<64x64xf32>
    %114 = vector.extract_strided_slice %37 {offsets = [0, 48], sizes = [64, 16], strides = [1, 1]} : vector<64x192xf32> to vector<64x16xf32>
    %115 = vector.extract_strided_slice %37 {offsets = [0, 112], sizes = [64, 16], strides = [1, 1]} : vector<64x192xf32> to vector<64x16xf32>
    %116 = vector.extract_strided_slice %37 {offsets = [0, 176], sizes = [64, 16], strides = [1, 1]} : vector<64x192xf32> to vector<64x16xf32>
    %117 = arith.truncf %114 : vector<64x16xf32> to vector<64x16xbf16>
    %118 = arith.truncf %115 : vector<64x16xf32> to vector<64x16xbf16>
    %cst_37 = arith.constant dense<0.000000e+00> : vector<64x64xf32>
    %119 = tpu.matmul %117, %118, %cst_37 {dimension_numbers = #tpu.dot_dimension_numbers<[1], [1], [0], [0], [0, 0, 1, 0], [], []>} : vector<64x16xbf16>, vector<64x16xbf16>, vector<64x64xf32> -> vector<64x64xf32>
    %cst_38 = arith.constant 2.500000e-01 : f32
    %120 = vector.broadcast %cst_38 : f32 to vector<64x64xf32>
    %121 = arith.mulf %119, %120 : vector<64x64xf32>
    %cst_39 = arith.constant dense<0xFF800000> : vector<64xf32>
    %122 = vector.multi_reduction <maximumf>, %121, %cst_39 [1] : vector<64x64xf32> to vector<64xf32>
    %123 = vector.shape_cast %122 : vector<64xf32> to vector<64x1xf32>
    %124 = vector.broadcast %123 : vector<64x1xf32> to vector<64x64xf32>
    %125 = arith.subf %121, %124 : vector<64x64xf32>
    %126 = math.exp %125 : vector<64x64xf32>
    %cst_40 = arith.constant dense<0.000000e+00> : vector<64xf32>
    %127 = vector.multi_reduction <add>, %126, %cst_40 [1] : vector<64x64xf32> to vector<64xf32>
    %128 = vector.shape_cast %127 : vector<64xf32> to vector<64x1xf32>
    %129 = tpu.reciprocal %128 {approx = true} : vector<64x1xf32> -> vector<64x1xf32>
    %130 = vector.broadcast %129 : vector<64x1xf32> to vector<64x64xf32>
    %131 = arith.mulf %126, %130 : vector<64x64xf32>
    %132 = arith.truncf %131 : vector<64x64xf32> to vector<64x64xbf16>
    %133 = arith.truncf %116 : vector<64x16xf32> to vector<64x16xbf16>
    %cst_41 = arith.constant dense<0.000000e+00> : vector<64x16xf32>
    %134 = tpu.matmul %132, %133, %cst_41 {dimension_numbers = #tpu.dot_dimension_numbers<[1], [0], [0], [1], [0, 0, 1, 1], [], []>} : vector<64x64xbf16>, vector<64x16xbf16>, vector<64x16xf32> -> vector<64x16xf32>
    %135 = vector.extract_strided_slice %39 {offsets = [48, 0], sizes = [16, 64], strides = [1, 1]} : vector<64x64xbf16> to vector<16x64xbf16>
    %136 = arith.truncf %134 : vector<64x16xf32> to vector<64x16xbf16>
    %cst_42 = arith.constant dense<0.000000e+00> : vector<64x64xf32>
    %137 = tpu.matmul %136, %135, %cst_42 {dimension_numbers = #tpu.dot_dimension_numbers<[1], [0], [0], [1], [0, 0, 1, 1], [], []>} : vector<64x16xbf16>, vector<16x64xbf16>, vector<64x64xf32> -> vector<64x64xf32>
    %138 = arith.addf %113, %137 : vector<64x64xf32>
    %139 = arith.addf %3, %138 : vector<64x64xf32>
    %140 = vector.extract_strided_slice %5 {offsets = [6, 0], sizes = [1, 64], strides = [1, 1]} : vector<11x64xf32> to vector<1x64xf32>
    %141 = vector.broadcast %140 : vector<1x64xf32> to vector<64x64xf32>
    %142 = arith.addf %139, %141 : vector<64x64xf32>
    %143 = vector.extract_strided_slice %5 {offsets = [2, 0], sizes = [1, 64], strides = [1, 1]} : vector<11x64xf32> to vector<1x64xf32>
    %144 = vector.extract_strided_slice %5 {offsets = [3, 0], sizes = [1, 64], strides = [1, 1]} : vector<11x64xf32> to vector<1x64xf32>
    %cst_43 = arith.constant dense<0.000000e+00> : vector<64xf32>
    %145 = vector.multi_reduction <add>, %142, %cst_43 [1] : vector<64x64xf32> to vector<64xf32>
    %146 = vector.shape_cast %145 : vector<64xf32> to vector<64x1xf32>
    %cst_44 = arith.constant 6.400000e+01 : f32
    %147 = vector.broadcast %cst_44 : f32 to vector<64x1xf32>
    %148 = arith.divf %146, %147 : vector<64x1xf32>
    %149 = vector.broadcast %148 : vector<64x1xf32> to vector<64x64xf32>
    %150 = arith.subf %142, %149 : vector<64x64xf32>
    %151 = arith.mulf %150, %150 : vector<64x64xf32>
    %cst_45 = arith.constant dense<0.000000e+00> : vector<64xf32>
    %152 = vector.multi_reduction <add>, %151, %cst_45 [1] : vector<64x64xf32> to vector<64xf32>
    %153 = vector.shape_cast %152 : vector<64xf32> to vector<64x1xf32>
    %cst_46 = arith.constant 6.400000e+01 : f32
    %154 = vector.broadcast %cst_46 : f32 to vector<64x1xf32>
    %155 = arith.divf %153, %154 : vector<64x1xf32>
    %156 = vector.broadcast %148 : vector<64x1xf32> to vector<64x64xf32>
    %157 = arith.subf %142, %156 : vector<64x64xf32>
    %cst_47 = arith.constant 9.99999997E-7 : f32
    %158 = vector.broadcast %cst_47 : f32 to vector<64x1xf32>
    %159 = arith.addf %155, %158 : vector<64x1xf32>
    %160 = math.rsqrt %159 : vector<64x1xf32>
    %161 = vector.broadcast %160 : vector<64x1xf32> to vector<64x64xf32>
    %162 = arith.mulf %157, %161 : vector<64x64xf32>
    %163 = vector.broadcast %143 : vector<1x64xf32> to vector<64x64xf32>
    %164 = arith.mulf %162, %163 : vector<64x64xf32>
    %165 = vector.broadcast %144 : vector<1x64xf32> to vector<64x64xf32>
    %166 = arith.addf %164, %165 : vector<64x64xf32>
    %c0_48 = arith.constant 0 : index
    %c0_49 = arith.constant 0 : index
    %c0_50 = arith.constant 0 : index
    %167 = vector.load %arg26[%c0_48, %c0_49, %c0_50] : memref<1x64x64xbf16, #tpu.memory_space<vmem>>, vector<1x64x64xbf16>
    %168 = vector.shape_cast %167 : vector<1x64x64xbf16> to vector<64x64xbf16>
    %169 = arith.truncf %166 : vector<64x64xf32> to vector<64x64xbf16>
    %cst_51 = arith.constant dense<0.000000e+00> : vector<64x64xf32>
    %170 = tpu.matmul %169, %168, %cst_51 {dimension_numbers = #tpu.dot_dimension_numbers<[1], [0], [0], [1], [0, 0, 1, 1], [], []>} : vector<64x64xbf16>, vector<64x64xbf16>, vector<64x64xf32> -> vector<64x64xf32>
    %171 = vector.extract_strided_slice %5 {offsets = [7, 0], sizes = [1, 64], strides = [1, 1]} : vector<11x64xf32> to vector<1x64xf32>
    %172 = vector.broadcast %171 : vector<1x64xf32> to vector<64x64xf32>
    %173 = arith.addf %170, %172 : vector<64x64xf32>
    %c0_52 = arith.constant 0 : index
    %c0_53 = arith.constant 0 : index
    %174 = vector.load %arg36[%c0_52, %c0_53] : memref<64x64xf32, #tpu.memory_space<vmem>>, vector<64x64xf32>
    %c0_54 = arith.constant 0 : index
    %c0_55 = arith.constant 0 : index
    %c0_56 = arith.constant 0 : index
    %175 = vector.load %arg27[%c0_54, %c0_55, %c0_56] : memref<1x64x64xbf16, #tpu.memory_space<vmem>>, vector<1x64x64xbf16>
    %176 = vector.shape_cast %175 : vector<1x64x64xbf16> to vector<64x64xbf16>
    %177 = arith.truncf %174 : vector<64x64xf32> to vector<64x64xbf16>
    %cst_57 = arith.constant dense<0.000000e+00> : vector<64x64xf32>
    %178 = tpu.matmul %177, %176, %cst_57 {dimension_numbers = #tpu.dot_dimension_numbers<[1], [0], [0], [1], [0, 0, 1, 1], [], []>} : vector<64x64xbf16>, vector<64x64xbf16>, vector<64x64xf32> -> vector<64x64xf32>
    %179 = vector.extract_strided_slice %5 {offsets = [8, 0], sizes = [1, 64], strides = [1, 1]} : vector<11x64xf32> to vector<1x64xf32>
    %180 = vector.broadcast %179 : vector<1x64xf32> to vector<64x64xf32>
    %181 = arith.addf %178, %180 : vector<64x64xf32>
    %c0_58 = arith.constant 0 : index
    %c0_59 = arith.constant 0 : index
    %c0_60 = arith.constant 0 : index
    %182 = vector.load %arg28[%c0_58, %c0_59, %c0_60] : memref<1x64x64xbf16, #tpu.memory_space<vmem>>, vector<1x64x64xbf16>
    %183 = vector.shape_cast %182 : vector<1x64x64xbf16> to vector<64x64xbf16>
    %184 = vector.extract_strided_slice %173 {offsets = [0, 0], sizes = [64, 16], strides = [1, 1]} : vector<64x64xf32> to vector<64x16xf32>
    %185 = vector.extract_strided_slice %181 {offsets = [0, 0], sizes = [32, 16], strides = [1, 1]} : vector<64x64xf32> to vector<32x16xf32>
    %186 = vector.extract_strided_slice %181 {offsets = [32, 0], sizes = [32, 16], strides = [1, 1]} : vector<64x64xf32> to vector<32x16xf32>
    %187 = arith.truncf %184 : vector<64x16xf32> to vector<64x16xbf16>
    %188 = arith.truncf %185 : vector<32x16xf32> to vector<32x16xbf16>
    %cst_61 = arith.constant dense<0.000000e+00> : vector<64x32xf32>
    %189 = tpu.matmul %187, %188, %cst_61 {dimension_numbers = #tpu.dot_dimension_numbers<[1], [1], [0], [0], [0, 0, 1, 0], [], []>} : vector<64x16xbf16>, vector<32x16xbf16>, vector<64x32xf32> -> vector<64x32xf32>
    %cst_62 = arith.constant 2.500000e-01 : f32
    %190 = vector.broadcast %cst_62 : f32 to vector<64x32xf32>
    %191 = arith.mulf %189, %190 : vector<64x32xf32>
    %cst_63 = arith.constant dense<0xFF800000> : vector<64xf32>
    %192 = vector.multi_reduction <maximumf>, %191, %cst_63 [1] : vector<64x32xf32> to vector<64xf32>
    %193 = vector.shape_cast %192 : vector<64xf32> to vector<64x1xf32>
    %194 = vector.broadcast %193 : vector<64x1xf32> to vector<64x32xf32>
    %195 = arith.subf %191, %194 : vector<64x32xf32>
    %196 = math.exp %195 : vector<64x32xf32>
    %cst_64 = arith.constant dense<0.000000e+00> : vector<64xf32>
    %197 = vector.multi_reduction <add>, %196, %cst_64 [1] : vector<64x32xf32> to vector<64xf32>
    %198 = vector.shape_cast %197 : vector<64xf32> to vector<64x1xf32>
    %199 = tpu.reciprocal %198 {approx = true} : vector<64x1xf32> -> vector<64x1xf32>
    %200 = vector.broadcast %199 : vector<64x1xf32> to vector<64x32xf32>
    %201 = arith.mulf %196, %200 : vector<64x32xf32>
    %202 = arith.truncf %201 : vector<64x32xf32> to vector<64x32xbf16>
    %203 = arith.truncf %186 : vector<32x16xf32> to vector<32x16xbf16>
    %cst_65 = arith.constant dense<0.000000e+00> : vector<64x16xf32>
    %204 = tpu.matmul %202, %203, %cst_65 {dimension_numbers = #tpu.dot_dimension_numbers<[1], [0], [0], [1], [0, 0, 1, 1], [], []>} : vector<64x32xbf16>, vector<32x16xbf16>, vector<64x16xf32> -> vector<64x16xf32>
    %205 = vector.extract_strided_slice %183 {offsets = [0, 0], sizes = [16, 64], strides = [1, 1]} : vector<64x64xbf16> to vector<16x64xbf16>
    %206 = arith.truncf %204 : vector<64x16xf32> to vector<64x16xbf16>
    %cst_66 = arith.constant dense<0.000000e+00> : vector<64x64xf32>
    %207 = tpu.matmul %206, %205, %cst_66 {dimension_numbers = #tpu.dot_dimension_numbers<[1], [0], [0], [1], [0, 0, 1, 1], [], []>} : vector<64x16xbf16>, vector<16x64xbf16>, vector<64x64xf32> -> vector<64x64xf32>
    %208 = vector.extract_strided_slice %173 {offsets = [0, 16], sizes = [64, 16], strides = [1, 1]} : vector<64x64xf32> to vector<64x16xf32>
    %209 = vector.extract_strided_slice %181 {offsets = [0, 16], sizes = [32, 16], strides = [1, 1]} : vector<64x64xf32> to vector<32x16xf32>
    %210 = vector.extract_strided_slice %181 {offsets = [32, 16], sizes = [32, 16], strides = [1, 1]} : vector<64x64xf32> to vector<32x16xf32>
    %211 = arith.truncf %208 : vector<64x16xf32> to vector<64x16xbf16>
    %212 = arith.truncf %209 : vector<32x16xf32> to vector<32x16xbf16>
    %cst_67 = arith.constant dense<0.000000e+00> : vector<64x32xf32>
    %213 = tpu.matmul %211, %212, %cst_67 {dimension_numbers = #tpu.dot_dimension_numbers<[1], [1], [0], [0], [0, 0, 1, 0], [], []>} : vector<64x16xbf16>, vector<32x16xbf16>, vector<64x32xf32> -> vector<64x32xf32>
    %cst_68 = arith.constant 2.500000e-01 : f32
    %214 = vector.broadcast %cst_68 : f32 to vector<64x32xf32>
    %215 = arith.mulf %213, %214 : vector<64x32xf32>
    %cst_69 = arith.constant dense<0xFF800000> : vector<64xf32>
    %216 = vector.multi_reduction <maximumf>, %215, %cst_69 [1] : vector<64x32xf32> to vector<64xf32>
    %217 = vector.shape_cast %216 : vector<64xf32> to vector<64x1xf32>
    %218 = vector.broadcast %217 : vector<64x1xf32> to vector<64x32xf32>
    %219 = arith.subf %215, %218 : vector<64x32xf32>
    %220 = math.exp %219 : vector<64x32xf32>
    %cst_70 = arith.constant dense<0.000000e+00> : vector<64xf32>
    %221 = vector.multi_reduction <add>, %220, %cst_70 [1] : vector<64x32xf32> to vector<64xf32>
    %222 = vector.shape_cast %221 : vector<64xf32> to vector<64x1xf32>
    %223 = tpu.reciprocal %222 {approx = true} : vector<64x1xf32> -> vector<64x1xf32>
    %224 = vector.broadcast %223 : vector<64x1xf32> to vector<64x32xf32>
    %225 = arith.mulf %220, %224 : vector<64x32xf32>
    %226 = arith.truncf %225 : vector<64x32xf32> to vector<64x32xbf16>
    %227 = arith.truncf %210 : vector<32x16xf32> to vector<32x16xbf16>
    %cst_71 = arith.constant dense<0.000000e+00> : vector<64x16xf32>
    %228 = tpu.matmul %226, %227, %cst_71 {dimension_numbers = #tpu.dot_dimension_numbers<[1], [0], [0], [1], [0, 0, 1, 1], [], []>} : vector<64x32xbf16>, vector<32x16xbf16>, vector<64x16xf32> -> vector<64x16xf32>
    %229 = vector.extract_strided_slice %183 {offsets = [16, 0], sizes = [16, 64], strides = [1, 1]} : vector<64x64xbf16> to vector<16x64xbf16>
    %230 = arith.truncf %228 : vector<64x16xf32> to vector<64x16xbf16>
    %cst_72 = arith.constant dense<0.000000e+00> : vector<64x64xf32>
    %231 = tpu.matmul %230, %229, %cst_72 {dimension_numbers = #tpu.dot_dimension_numbers<[1], [0], [0], [1], [0, 0, 1, 1], [], []>} : vector<64x16xbf16>, vector<16x64xbf16>, vector<64x64xf32> -> vector<64x64xf32>
    %232 = arith.addf %207, %231 : vector<64x64xf32>
    %233 = vector.extract_strided_slice %173 {offsets = [0, 32], sizes = [64, 16], strides = [1, 1]} : vector<64x64xf32> to vector<64x16xf32>
    %234 = vector.extract_strided_slice %181 {offsets = [0, 32], sizes = [32, 16], strides = [1, 1]} : vector<64x64xf32> to vector<32x16xf32>
    %235 = vector.extract_strided_slice %181 {offsets = [32, 32], sizes = [32, 16], strides = [1, 1]} : vector<64x64xf32> to vector<32x16xf32>
    %236 = arith.truncf %233 : vector<64x16xf32> to vector<64x16xbf16>
    %237 = arith.truncf %234 : vector<32x16xf32> to vector<32x16xbf16>
    %cst_73 = arith.constant dense<0.000000e+00> : vector<64x32xf32>
    %238 = tpu.matmul %236, %237, %cst_73 {dimension_numbers = #tpu.dot_dimension_numbers<[1], [1], [0], [0], [0, 0, 1, 0], [], []>} : vector<64x16xbf16>, vector<32x16xbf16>, vector<64x32xf32> -> vector<64x32xf32>
    %cst_74 = arith.constant 2.500000e-01 : f32
    %239 = vector.broadcast %cst_74 : f32 to vector<64x32xf32>
    %240 = arith.mulf %238, %239 : vector<64x32xf32>
    %cst_75 = arith.constant dense<0xFF800000> : vector<64xf32>
    %241 = vector.multi_reduction <maximumf>, %240, %cst_75 [1] : vector<64x32xf32> to vector<64xf32>
    %242 = vector.shape_cast %241 : vector<64xf32> to vector<64x1xf32>
    %243 = vector.broadcast %242 : vector<64x1xf32> to vector<64x32xf32>
    %244 = arith.subf %240, %243 : vector<64x32xf32>
    %245 = math.exp %244 : vector<64x32xf32>
    %cst_76 = arith.constant dense<0.000000e+00> : vector<64xf32>
    %246 = vector.multi_reduction <add>, %245, %cst_76 [1] : vector<64x32xf32> to vector<64xf32>
    %247 = vector.shape_cast %246 : vector<64xf32> to vector<64x1xf32>
    %248 = tpu.reciprocal %247 {approx = true} : vector<64x1xf32> -> vector<64x1xf32>
    %249 = vector.broadcast %248 : vector<64x1xf32> to vector<64x32xf32>
    %250 = arith.mulf %245, %249 : vector<64x32xf32>
    %251 = arith.truncf %250 : vector<64x32xf32> to vector<64x32xbf16>
    %252 = arith.truncf %235 : vector<32x16xf32> to vector<32x16xbf16>
    %cst_77 = arith.constant dense<0.000000e+00> : vector<64x16xf32>
    %253 = tpu.matmul %251, %252, %cst_77 {dimension_numbers = #tpu.dot_dimension_numbers<[1], [0], [0], [1], [0, 0, 1, 1], [], []>} : vector<64x32xbf16>, vector<32x16xbf16>, vector<64x16xf32> -> vector<64x16xf32>
    %254 = vector.extract_strided_slice %183 {offsets = [32, 0], sizes = [16, 64], strides = [1, 1]} : vector<64x64xbf16> to vector<16x64xbf16>
    %255 = arith.truncf %253 : vector<64x16xf32> to vector<64x16xbf16>
    %cst_78 = arith.constant dense<0.000000e+00> : vector<64x64xf32>
    %256 = tpu.matmul %255, %254, %cst_78 {dimension_numbers = #tpu.dot_dimension_numbers<[1], [0], [0], [1], [0, 0, 1, 1], [], []>} : vector<64x16xbf16>, vector<16x64xbf16>, vector<64x64xf32> -> vector<64x64xf32>
    %257 = arith.addf %232, %256 : vector<64x64xf32>
    %258 = vector.extract_strided_slice %173 {offsets = [0, 48], sizes = [64, 16], strides = [1, 1]} : vector<64x64xf32> to vector<64x16xf32>
    %259 = vector.extract_strided_slice %181 {offsets = [0, 48], sizes = [32, 16], strides = [1, 1]} : vector<64x64xf32> to vector<32x16xf32>
    %260 = vector.extract_strided_slice %181 {offsets = [32, 48], sizes = [32, 16], strides = [1, 1]} : vector<64x64xf32> to vector<32x16xf32>
    %261 = arith.truncf %258 : vector<64x16xf32> to vector<64x16xbf16>
    %262 = arith.truncf %259 : vector<32x16xf32> to vector<32x16xbf16>
    %cst_79 = arith.constant dense<0.000000e+00> : vector<64x32xf32>
    %263 = tpu.matmul %261, %262, %cst_79 {dimension_numbers = #tpu.dot_dimension_numbers<[1], [1], [0], [0], [0, 0, 1, 0], [], []>} : vector<64x16xbf16>, vector<32x16xbf16>, vector<64x32xf32> -> vector<64x32xf32>
    %cst_80 = arith.constant 2.500000e-01 : f32
    %264 = vector.broadcast %cst_80 : f32 to vector<64x32xf32>
    %265 = arith.mulf %263, %264 : vector<64x32xf32>
    %cst_81 = arith.constant dense<0xFF800000> : vector<64xf32>
    %266 = vector.multi_reduction <maximumf>, %265, %cst_81 [1] : vector<64x32xf32> to vector<64xf32>
    %267 = vector.shape_cast %266 : vector<64xf32> to vector<64x1xf32>
    %268 = vector.broadcast %267 : vector<64x1xf32> to vector<64x32xf32>
    %269 = arith.subf %265, %268 : vector<64x32xf32>
    %270 = math.exp %269 : vector<64x32xf32>
    %cst_82 = arith.constant dense<0.000000e+00> : vector<64xf32>
    %271 = vector.multi_reduction <add>, %270, %cst_82 [1] : vector<64x32xf32> to vector<64xf32>
    %272 = vector.shape_cast %271 : vector<64xf32> to vector<64x1xf32>
    %273 = tpu.reciprocal %272 {approx = true} : vector<64x1xf32> -> vector<64x1xf32>
    %274 = vector.broadcast %273 : vector<64x1xf32> to vector<64x32xf32>
    %275 = arith.mulf %270, %274 : vector<64x32xf32>
    %276 = arith.truncf %275 : vector<64x32xf32> to vector<64x32xbf16>
    %277 = arith.truncf %260 : vector<32x16xf32> to vector<32x16xbf16>
    %cst_83 = arith.constant dense<0.000000e+00> : vector<64x16xf32>
    %278 = tpu.matmul %276, %277, %cst_83 {dimension_numbers = #tpu.dot_dimension_numbers<[1], [0], [0], [1], [0, 0, 1, 1], [], []>} : vector<64x32xbf16>, vector<32x16xbf16>, vector<64x16xf32> -> vector<64x16xf32>
    %279 = vector.extract_strided_slice %183 {offsets = [48, 0], sizes = [16, 64], strides = [1, 1]} : vector<64x64xbf16> to vector<16x64xbf16>
    %280 = arith.truncf %278 : vector<64x16xf32> to vector<64x16xbf16>
    %cst_84 = arith.constant dense<0.000000e+00> : vector<64x64xf32>
    %281 = tpu.matmul %280, %279, %cst_84 {dimension_numbers = #tpu.dot_dimension_numbers<[1], [0], [0], [1], [0, 0, 1, 1], [], []>} : vector<64x16xbf16>, vector<16x64xbf16>, vector<64x64xf32> -> vector<64x64xf32>
    %282 = arith.addf %257, %281 : vector<64x64xf32>
    %283 = arith.addf %166, %282 : vector<64x64xf32>
    %284 = vector.extract_strided_slice %5 {offsets = [9, 0], sizes = [1, 64], strides = [1, 1]} : vector<11x64xf32> to vector<1x64xf32>
    %285 = vector.broadcast %284 : vector<1x64xf32> to vector<64x64xf32>
    %286 = arith.addf %283, %285 : vector<64x64xf32>
    %287 = arith.addf %142, %286 : vector<64x64xf32>
    %288 = vector.extract_strided_slice %5 {offsets = [4, 0], sizes = [1, 64], strides = [1, 1]} : vector<11x64xf32> to vector<1x64xf32>
    %289 = vector.extract_strided_slice %5 {offsets = [5, 0], sizes = [1, 64], strides = [1, 1]} : vector<11x64xf32> to vector<1x64xf32>
    %cst_85 = arith.constant dense<0.000000e+00> : vector<64xf32>
    %290 = vector.multi_reduction <add>, %287, %cst_85 [1] : vector<64x64xf32> to vector<64xf32>
    %291 = vector.shape_cast %290 : vector<64xf32> to vector<64x1xf32>
    %cst_86 = arith.constant 6.400000e+01 : f32
    %292 = vector.broadcast %cst_86 : f32 to vector<64x1xf32>
    %293 = arith.divf %291, %292 : vector<64x1xf32>
    %294 = vector.broadcast %293 : vector<64x1xf32> to vector<64x64xf32>
    %295 = arith.subf %287, %294 : vector<64x64xf32>
    %296 = arith.mulf %295, %295 : vector<64x64xf32>
    %cst_87 = arith.constant dense<0.000000e+00> : vector<64xf32>
    %297 = vector.multi_reduction <add>, %296, %cst_87 [1] : vector<64x64xf32> to vector<64xf32>
    %298 = vector.shape_cast %297 : vector<64xf32> to vector<64x1xf32>
    %cst_88 = arith.constant 6.400000e+01 : f32
    %299 = vector.broadcast %cst_88 : f32 to vector<64x1xf32>
    %300 = arith.divf %298, %299 : vector<64x1xf32>
    %301 = vector.broadcast %293 : vector<64x1xf32> to vector<64x64xf32>
    %302 = arith.subf %287, %301 : vector<64x64xf32>
    %cst_89 = arith.constant 9.99999997E-7 : f32
    %303 = vector.broadcast %cst_89 : f32 to vector<64x1xf32>
    %304 = arith.addf %300, %303 : vector<64x1xf32>
    %305 = math.rsqrt %304 : vector<64x1xf32>
    %306 = vector.broadcast %305 : vector<64x1xf32> to vector<64x64xf32>
    %307 = arith.mulf %302, %306 : vector<64x64xf32>
    %308 = vector.broadcast %288 : vector<1x64xf32> to vector<64x64xf32>
    %309 = arith.mulf %307, %308 : vector<64x64xf32>
    %310 = vector.broadcast %289 : vector<1x64xf32> to vector<64x64xf32>
    %311 = arith.addf %309, %310 : vector<64x64xf32>
    %c0_90 = arith.constant 0 : index
    %c0_91 = arith.constant 0 : index
    %c0_92 = arith.constant 0 : index
    %312 = vector.load %arg29[%c0_90, %c0_91, %c0_92] : memref<1x64x256xbf16, #tpu.memory_space<vmem>>, vector<1x64x256xbf16>
    %313 = vector.shape_cast %312 : vector<1x64x256xbf16> to vector<64x256xbf16>
    %314 = arith.truncf %311 : vector<64x64xf32> to vector<64x64xbf16>
    %cst_93 = arith.constant dense<0.000000e+00> : vector<64x256xf32>
    %315 = tpu.matmul %314, %313, %cst_93 {dimension_numbers = #tpu.dot_dimension_numbers<[1], [0], [0], [1], [0, 0, 1, 1], [], []>} : vector<64x64xbf16>, vector<64x256xbf16>, vector<64x256xf32> -> vector<64x256xf32>
    %c0_94 = arith.constant 0 : index
    %c0_95 = arith.constant 0 : index
    %c0_96 = arith.constant 0 : index
    %316 = vector.load %arg30[%c0_94, %c0_95, %c0_96] : memref<1x1x256xf32, #tpu.memory_space<vmem>>, vector<1x1x256xf32>
    %317 = vector.shape_cast %316 : vector<1x1x256xf32> to vector<1x256xf32>
    %318 = vector.broadcast %317 : vector<1x256xf32> to vector<64x256xf32>
    %319 = arith.addf %315, %318 : vector<64x256xf32>
    %320 = arith.mulf %319, %319 : vector<64x256xf32>
    %321 = arith.mulf %319, %320 : vector<64x256xf32>
    %cst_97 = arith.constant 4.471500e-02 : f32
    %322 = vector.broadcast %cst_97 : f32 to vector<64x256xf32>
    %323 = arith.mulf %322, %321 : vector<64x256xf32>
    %324 = arith.addf %319, %323 : vector<64x256xf32>
    %cst_98 = arith.constant 0.797884583 : f32
    %325 = vector.broadcast %cst_98 : f32 to vector<64x256xf32>
    %326 = arith.mulf %325, %324 : vector<64x256xf32>
    %327 = math.tanh %326 : vector<64x256xf32>
    %cst_99 = arith.constant 1.000000e+00 : f32
    %328 = vector.broadcast %cst_99 : f32 to vector<64x256xf32>
    %329 = arith.addf %328, %327 : vector<64x256xf32>
    %cst_100 = arith.constant 5.000000e-01 : f32
    %330 = vector.broadcast %cst_100 : f32 to vector<64x256xf32>
    %331 = arith.mulf %330, %329 : vector<64x256xf32>
    %332 = arith.mulf %319, %331 : vector<64x256xf32>
    %c0_101 = arith.constant 0 : index
    %c0_102 = arith.constant 0 : index
    %c0_103 = arith.constant 0 : index
    %333 = vector.load %arg31[%c0_101, %c0_102, %c0_103] : memref<1x256x64xbf16, #tpu.memory_space<vmem>>, vector<1x256x64xbf16>
    %334 = vector.shape_cast %333 : vector<1x256x64xbf16> to vector<256x64xbf16>
    %335 = arith.truncf %332 : vector<64x256xf32> to vector<64x256xbf16>
    %cst_104 = arith.constant dense<0.000000e+00> : vector<64x64xf32>
    %336 = tpu.matmul %335, %334, %cst_104 {dimension_numbers = #tpu.dot_dimension_numbers<[1], [0], [0], [1], [0, 0, 1, 1], [], []>} : vector<64x256xbf16>, vector<256x64xbf16>, vector<64x64xf32> -> vector<64x64xf32>
    %337 = arith.addf %287, %336 : vector<64x64xf32>
    %338 = vector.extract_strided_slice %5 {offsets = [10, 0], sizes = [1, 64], strides = [1, 1]} : vector<11x64xf32> to vector<1x64xf32>
    %339 = vector.broadcast %338 : vector<1x64xf32> to vector<64x64xf32>
    %340 = arith.addf %337, %339 : vector<64x64xf32>
    %c0_105 = arith.constant 0 : index
    %c0_106 = arith.constant 0 : index
    %341 = vector.load %arg34[%c0_105, %c0_106] : memref<64x64xf32, #tpu.memory_space<vmem>>, vector<64x64xf32>
    tpu.vector_store %arg34[%c0_105, %c0_106], %340 {strides = array<i32>} : memref<64x64xf32, #tpu.memory_space<vmem>>, vector<64x64xf32>,
    %c1_i32 = arith.constant 1 : i32
    %342 = arith.cmpi eq, %arg1, %c1_i32 : i32
    %343 = arith.extui %342 : i1 to i32
    %c0_i32_107 = arith.constant 0 : i32
    %344 = arith.cmpi ne, %343, %c0_i32_107 : i32
    scf.if %344 {
      %c0_108 = arith.constant 0 : index
      %c0_109 = arith.constant 0 : index
      %345 = vector.load %arg35[%c0_108, %c0_109] : memref<64x64xf32, #tpu.memory_space<vmem>>, vector<64x64xf32>
      %346 = arith.negf %345 : vector<64x64xf32>
      %347 = math.exp %346 : vector<64x64xf32>
      %cst_110 = arith.constant 1.000000e+00 : f32
      %348 = vector.broadcast %cst_110 : f32 to vector<64x64xf32>
      %349 = arith.addf %348, %347 : vector<64x64xf32>
      %350 = arith.divf %348, %349 : vector<64x64xf32>
      %351 = arith.mulf %345, %350 : vector<64x64xf32>
      %c0_111 = arith.constant 0 : index
      %c0_112 = arith.constant 0 : index
      %352 = vector.load %arg19[%c0_111, %c0_112] : memref<64x128xbf16, #tpu.memory_space<vmem>>, vector<64x128xbf16>
      %353 = arith.truncf %351 : vector<64x64xf32> to vector<64x64xbf16>
      %cst_113 = arith.constant dense<0.000000e+00> : vector<64x128xf32>
      %354 = tpu.matmul %353, %352, %cst_113 {dimension_numbers = #tpu.dot_dimension_numbers<[1], [0], [0], [1], [0, 0, 1, 1], [], []>} : vector<64x64xbf16>, vector<64x128xbf16>, vector<64x128xf32> -> vector<64x128xf32>
      %c0_114 = arith.constant 0 : index
      %c0_115 = arith.constant 0 : index
      %355 = vector.load %arg20[%c0_114, %c0_115] : memref<1x128xf32, #tpu.memory_space<vmem>>, vector<1x128xf32>
      %356 = vector.broadcast %355 : vector<1x128xf32> to vector<64x128xf32>
      %357 = arith.addf %354, %356 : vector<64x128xf32>
      %358 = vector.extract_strided_slice %357 {offsets = [0, 0], sizes = [64, 64], strides = [1, 1]} : vector<64x128xf32> to vector<64x64xf32>
      %359 = vector.extract_strided_slice %357 {offsets = [0, 64], sizes = [64, 64], strides = [1, 1]} : vector<64x128xf32> to vector<64x64xf32>
      %cst_116 = arith.constant dense<0.000000e+00> : vector<64xf32>
      %360 = vector.multi_reduction <add>, %340, %cst_116 [1] : vector<64x64xf32> to vector<64xf32>
      %361 = vector.shape_cast %360 : vector<64xf32> to vector<64x1xf32>
      %cst_117 = arith.constant 6.400000e+01 : f32
      %362 = vector.broadcast %cst_117 : f32 to vector<64x1xf32>
      %363 = arith.divf %361, %362 : vector<64x1xf32>
      %364 = vector.broadcast %363 : vector<64x1xf32> to vector<64x64xf32>
      %365 = arith.subf %340, %364 : vector<64x64xf32>
      %366 = arith.mulf %365, %365 : vector<64x64xf32>
      %cst_118 = arith.constant dense<0.000000e+00> : vector<64xf32>
      %367 = vector.multi_reduction <add>, %366, %cst_118 [1] : vector<64x64xf32> to vector<64xf32>
      %368 = vector.shape_cast %367 : vector<64xf32> to vector<64x1xf32>
      %cst_119 = arith.constant 6.400000e+01 : f32
      %369 = vector.broadcast %cst_119 : f32 to vector<64x1xf32>
      %370 = arith.divf %368, %369 : vector<64x1xf32>
      %371 = vector.broadcast %363 : vector<64x1xf32> to vector<64x64xf32>
      %372 = arith.subf %340, %371 : vector<64x64xf32>
      %cst_120 = arith.constant 9.99999997E-7 : f32
      %373 = vector.broadcast %cst_120 : f32 to vector<64x1xf32>
      %374 = arith.addf %370, %373 : vector<64x1xf32>
      %375 = math.rsqrt %374 : vector<64x1xf32>
      %376 = vector.broadcast %375 : vector<64x1xf32> to vector<64x64xf32>
      %377 = arith.mulf %372, %376 : vector<64x64xf32>
      %cst_121 = arith.constant 1.000000e+00 : f32
      %378 = vector.broadcast %cst_121 : f32 to vector<64x64xf32>
      %379 = arith.addf %378, %359 : vector<64x64xf32>
      %380 = arith.mulf %377, %379 : vector<64x64xf32>
      %381 = arith.addf %380, %358 : vector<64x64xf32>
      %c0_122 = arith.constant 0 : index
      %c0_123 = arith.constant 0 : index
      %382 = vector.load %arg21[%c0_122, %c0_123] : memref<64x128xbf16, #tpu.memory_space<vmem>>, vector<64x128xbf16>
      %383 = arith.truncf %381 : vector<64x64xf32> to vector<64x64xbf16>
      %cst_124 = arith.constant dense<0.000000e+00> : vector<64x128xf32>
      %384 = tpu.matmul %383, %382, %cst_124 {dimension_numbers = #tpu.dot_dimension_numbers<[1], [0], [0], [1], [0, 0, 1, 1], [], []>} : vector<64x64xbf16>, vector<64x128xbf16>, vector<64x128xf32> -> vector<64x128xf32>
      %c0_125 = arith.constant 0 : index
      %c0_126 = arith.constant 0 : index
      %385 = vector.load %arg22[%c0_125, %c0_126] : memref<1x128xf32, #tpu.memory_space<vmem>>, vector<1x128xf32>
      %386 = vector.broadcast %385 : vector<1x128xf32> to vector<64x128xf32>
      %387 = arith.addf %384, %386 : vector<64x128xf32>
      %c0_127 = arith.constant 0 : index
      %c0_128 = arith.constant 0 : index
      %c0_129 = arith.constant 0 : index
      %388 = vector.load %arg33[%c0_127, %c0_128, %c0_129] : memref<1x64x128xf32, #tpu.memory_space<vmem>>, vector<1x64x128xf32>
      %389 = vector.shape_cast %388 : vector<1x64x128xf32> to vector<64x128xf32>
      %390 = vector.shape_cast %387 : vector<64x128xf32> to vector<1x64x128xf32>
      tpu.vector_store %arg33[%c0_127, %c0_128, %c0_129], %390 {strides = array<i32>} : memref<1x64x128xf32, #tpu.memory_space<vmem>>, vector<1x64x128xf32>,
    } else {
    }
    return
  }
  func.func @transform_0(%arg0: i32, %arg1: i32) -> (i32, i32, i32) {
    %c0_i32 = arith.constant 0 : i32
    %c0_i32_0 = arith.constant 0 : i32
    %c0_i32_1 = arith.constant 0 : i32
    return %arg0, %c0_i32, %c0_i32_0 : i32, i32, i32
  }
  func.func @transform_1(%arg0: i32, %arg1: i32) -> (i32, i32, i32) {
    %c0_i32 = arith.constant 0 : i32
    %c0_i32_0 = arith.constant 0 : i32
    %c0_i32_1 = arith.constant 0 : i32
    return %arg0, %c0_i32, %c0_i32_0 : i32, i32, i32
  }
  func.func @transform_2(%arg0: i32, %arg1: i32) -> (i32, i32, i32) {
    %c0_i32 = arith.constant 0 : i32
    %c0_i32_0 = arith.constant 0 : i32
    %c0_i32_1 = arith.constant 0 : i32
    return %arg0, %c0_i32, %c0_i32_0 : i32, i32, i32
  }
  func.func @transform_3(%arg0: i32, %arg1: i32) -> (i32, i32) {
    %c0_i32 = arith.constant 0 : i32
    %c0_i32_0 = arith.constant 0 : i32
    %c0_i32_1 = arith.constant 0 : i32
    return %c0_i32, %c0_i32_0 : i32, i32
  }
  func.func @transform_4(%arg0: i32, %arg1: i32) -> (i32, i32) {
    %c0_i32 = arith.constant 0 : i32
    %c0_i32_0 = arith.constant 0 : i32
    %c0_i32_1 = arith.constant 0 : i32
    return %c0_i32, %c0_i32_0 : i32, i32
  }
  func.func @transform_5(%arg0: i32, %arg1: i32) -> (i32, i32) {
    %c0_i32 = arith.constant 0 : i32
    %c0_i32_0 = arith.constant 0 : i32
    %c0_i32_1 = arith.constant 0 : i32
    return %c0_i32, %c0_i32_0 : i32, i32
  }
  func.func @transform_6(%arg0: i32, %arg1: i32) -> (i32, i32) {
    %c0_i32 = arith.constant 0 : i32
    %c0_i32_0 = arith.constant 0 : i32
    %c0_i32_1 = arith.constant 0 : i32
    return %c0_i32, %c0_i32_0 : i32, i32
  }
  func.func @transform_7(%arg0: i32, %arg1: i32) -> (i32, i32) {
    %c0_i32 = arith.constant 0 : i32
    %c0_i32_0 = arith.constant 0 : i32
    %c0_i32_1 = arith.constant 0 : i32
    return %c0_i32, %c0_i32_0 : i32, i32
  }
  func.func @transform_8(%arg0: i32, %arg1: i32) -> (i32, i32) {
    %c0_i32 = arith.constant 0 : i32
    %c0_i32_0 = arith.constant 0 : i32
    %c0_i32_1 = arith.constant 0 : i32
    return %c0_i32, %c0_i32_0 : i32, i32
  }
  func.func @transform_9(%arg0: i32, %arg1: i32) -> (i32, i32) {
    %c0_i32 = arith.constant 0 : i32
    %c0_i32_0 = arith.constant 0 : i32
    %c0_i32_1 = arith.constant 0 : i32
    return %c0_i32, %c0_i32_0 : i32, i32
  }
  func.func @transform_10(%arg0: i32, %arg1: i32) -> (i32, i32) {
    %c0_i32 = arith.constant 0 : i32
    %c0_i32_0 = arith.constant 0 : i32
    %c0_i32_1 = arith.constant 0 : i32
    return %c0_i32, %c0_i32_0 : i32, i32
  }
  func.func @transform_11(%arg0: i32, %arg1: i32) -> (i32, i32) {
    %c0_i32 = arith.constant 0 : i32
    %c0_i32_0 = arith.constant 0 : i32
    %c0_i32_1 = arith.constant 0 : i32
    return %c0_i32, %c0_i32_0 : i32, i32
  }
  func.func @transform_12(%arg0: i32, %arg1: i32) -> (i32, i32) {
    %c0_i32 = arith.constant 0 : i32
    %c0_i32_0 = arith.constant 0 : i32
    %c0_i32_1 = arith.constant 0 : i32
    return %c0_i32, %c0_i32_0 : i32, i32
  }
  func.func @transform_13(%arg0: i32, %arg1: i32) -> (i32, i32) {
    %c0_i32 = arith.constant 0 : i32
    %c0_i32_0 = arith.constant 0 : i32
    %c0_i32_1 = arith.constant 0 : i32
    return %c0_i32, %c0_i32_0 : i32, i32
  }
  func.func @transform_14(%arg0: i32, %arg1: i32) -> (i32, i32) {
    %c0_i32 = arith.constant 0 : i32
    %c0_i32_0 = arith.constant 0 : i32
    %c0_i32_1 = arith.constant 0 : i32
    return %c0_i32, %c0_i32_0 : i32, i32
  }
  func.func @transform_15(%arg0: i32, %arg1: i32) -> (i32, i32) {
    %c0_i32 = arith.constant 0 : i32
    %c0_i32_0 = arith.constant 0 : i32
    %c0_i32_1 = arith.constant 0 : i32
    return %c0_i32, %c0_i32_0 : i32, i32
  }
  func.func @transform_16(%arg0: i32, %arg1: i32) -> (i32, i32) {
    %c0_i32 = arith.constant 0 : i32
    %c0_i32_0 = arith.constant 0 : i32
    %c0_i32_1 = arith.constant 0 : i32
    return %c0_i32, %c0_i32_0 : i32, i32
  }
  func.func @transform_17(%arg0: i32, %arg1: i32) -> (i32, i32) {
    %c0_i32 = arith.constant 0 : i32
    %c0_i32_0 = arith.constant 0 : i32
    %c0_i32_1 = arith.constant 0 : i32
    return %c0_i32, %c0_i32_0 : i32, i32
  }
  func.func @transform_18(%arg0: i32, %arg1: i32) -> (i32, i32) {
    %c0_i32 = arith.constant 0 : i32
    %c0_i32_0 = arith.constant 0 : i32
    %c0_i32_1 = arith.constant 0 : i32
    return %c0_i32, %c0_i32_0 : i32, i32
  }
  func.func @transform_19(%arg0: i32, %arg1: i32) -> (i32, i32) {
    %c0_i32 = arith.constant 0 : i32
    %c0_i32_0 = arith.constant 0 : i32
    %c0_i32_1 = arith.constant 0 : i32
    return %c0_i32, %c0_i32_0 : i32, i32
  }
  func.func @transform_20(%arg0: i32, %arg1: i32) -> (i32, i32) {
    %c0_i32 = arith.constant 0 : i32
    %c0_i32_0 = arith.constant 0 : i32
    %c0_i32_1 = arith.constant 0 : i32
    return %c0_i32, %c0_i32_0 : i32, i32
  }
  func.func @transform_21(%arg0: i32, %arg1: i32) -> (i32, i32, i32) {
    %c0_i32 = arith.constant 0 : i32
    %c0_i32_0 = arith.constant 0 : i32
    %c0_i32_1 = arith.constant 0 : i32
    return %arg1, %c0_i32, %c0_i32_0 : i32, i32, i32
  }
  func.func @transform_22(%arg0: i32, %arg1: i32) -> (i32, i32, i32) {
    %c0_i32 = arith.constant 0 : i32
    %c0_i32_0 = arith.constant 0 : i32
    %c0_i32_1 = arith.constant 0 : i32
    return %arg1, %c0_i32, %c0_i32_0 : i32, i32, i32
  }
  func.func @transform_23(%arg0: i32, %arg1: i32) -> (i32, i32, i32) {
    %c0_i32 = arith.constant 0 : i32
    %c0_i32_0 = arith.constant 0 : i32
    %c0_i32_1 = arith.constant 0 : i32
    return %arg1, %c0_i32, %c0_i32_0 : i32, i32, i32
  }
  func.func @transform_24(%arg0: i32, %arg1: i32) -> (i32, i32, i32) {
    %c0_i32 = arith.constant 0 : i32
    %c0_i32_0 = arith.constant 0 : i32
    %c0_i32_1 = arith.constant 0 : i32
    return %arg1, %c0_i32, %c0_i32_0 : i32, i32, i32
  }
  func.func @transform_25(%arg0: i32, %arg1: i32) -> (i32, i32, i32) {
    %c0_i32 = arith.constant 0 : i32
    %c0_i32_0 = arith.constant 0 : i32
    %c0_i32_1 = arith.constant 0 : i32
    return %arg1, %c0_i32, %c0_i32_0 : i32, i32, i32
  }
  func.func @transform_26(%arg0: i32, %arg1: i32) -> (i32, i32, i32) {
    %c0_i32 = arith.constant 0 : i32
    %c0_i32_0 = arith.constant 0 : i32
    %c0_i32_1 = arith.constant 0 : i32
    return %arg1, %c0_i32, %c0_i32_0 : i32, i32, i32
  }
  func.func @transform_27(%arg0: i32, %arg1: i32) -> (i32, i32, i32) {
    %c0_i32 = arith.constant 0 : i32
    %c0_i32_0 = arith.constant 0 : i32
    %c0_i32_1 = arith.constant 0 : i32
    return %arg1, %c0_i32, %c0_i32_0 : i32, i32, i32
  }
  func.func @transform_28(%arg0: i32, %arg1: i32) -> (i32, i32, i32) {
    %c0_i32 = arith.constant 0 : i32
    %c0_i32_0 = arith.constant 0 : i32
    %c0_i32_1 = arith.constant 0 : i32
    return %arg1, %c0_i32, %c0_i32_0 : i32, i32, i32
  }
  func.func @transform_29(%arg0: i32, %arg1: i32) -> (i32, i32, i32) {
    %c0_i32 = arith.constant 0 : i32
    %c0_i32_0 = arith.constant 0 : i32
    %c0_i32_1 = arith.constant 0 : i32
    return %arg1, %c0_i32, %c0_i32_0 : i32, i32, i32
  }
  func.func @transform_30(%arg0: i32, %arg1: i32) -> (i32, i32, i32) {
    %c0_i32 = arith.constant 0 : i32
    %c0_i32_0 = arith.constant 0 : i32
    %c0_i32_1 = arith.constant 0 : i32
    return %arg1, %c0_i32, %c0_i32_0 : i32, i32, i32
  }
  func.func @transform_31(%arg0: i32, %arg1: i32) -> (i32, i32, i32) {
    %c0_i32 = arith.constant 0 : i32
    %c0_i32_0 = arith.constant 0 : i32
    %c0_i32_1 = arith.constant 0 : i32
    return %arg0, %c0_i32, %c0_i32_0 : i32, i32, i32
  }
}

</mosaic_0001>

<bundles_post_ra>
// kernel: dit_forward.1
= control target key start
LH: loop header
LB: loop body
LE: loop exit
PB: predicated region body
PF: predicated region fallthrough
CT: control target
= control target key end

     0   :  { %s9109_s6 = smov 1   ;;  %s9110_s10 = smov 2   ;;  %s11201_s0 = inlined_call_operand.smem [shape: u32[32], index: -1, kind: input, shape index: {}] }
   0x1   :  { %s9160_s5 = sld [smem:[%s11201_s0]]   ;;  %s9111_s14 = smov 3  }
   0x2   :  { %s9165_s9 = sld [smem:[%s11201_s0 + %s9109_s6]]   ;;  %s9112_s18 = smov 4  }
   0x3   :  { %s9170_s13 = sld [smem:[%s11201_s0 + %s9110_s10]]   ;;  %s9113_s22 = smov 5  }
   0x4   :  { %s9175_s17 = sld [smem:[%s11201_s0 + %s9111_s14]]   ;;  %s9114_s26 = smov 6  }
   0x5   :  { %s9180_s21 = sld [smem:[%s11201_s0 + %s9112_s18]]   ;;  %s9115_s30 = smov 7  }
   0x6   :  { %s9185_s25 = sld [smem:[%s11201_s0 + %s9113_s22]]   ;;  %s9116_s4 = smov 8  }
   0x7   :  { %11218 = sst [smem:[#allocation5_spill]] %s9160_s5  ;;  %s9117_s10 = smov 9  }
   0x8   :  { %11219 = sst [smem:[#allocation6_spill]] %s9165_s9  ;;  %s9118_s15 = smov 10  }
   0x9   :  { %11220 = sst [smem:[#allocation7_spill]] %s9170_s13  ;;  %s9119_s20 = smov 11  }
   0xa   :  { %11221 = sst [smem:[#allocation8_spill]] %s9175_s17  ;;  %s9121_s1 = smov 13  }
   0xb   :  { %11222 = sst [smem:[#allocation9_spill]] %s9180_s21  ;;  %s9122_s7 = smov 14  }
   0xc   :  { %11223 = sst [smem:[#allocation10_spill]] %s9185_s25  ;;  %s9124_s22 = smov 16  }
   0xd   :  { %s9190_s29 = sld [smem:[%s11201_s0 + %s9114_s26]]   ;;  %s9120_s26 = smov 12  }
   0xe   :  { %s9195_s3 = sld [smem:[%s11201_s0 + %s9115_s30]]   ;;  %s9125_s28 = smov 17  }
   0xf   :  { %s9200_s8 = sld [smem:[%s11201_s0 + %s9116_s4]]   ;;  %s9319_s23 = smov 0  }
  0x10   :  { %s9205_s14 = sld [smem:[%s11201_s0 + %s9117_s10]]  }
  0x11   :  { %s9210_s19 = sld [smem:[%s11201_s0 + %s9118_s15]]   ;;  %s9123_s15 = smov 15  }
  0x12   :  { %s9215_s24 = sld [smem:[%s11201_s0 + %s9119_s20]]  }
  0x13   :  { %s9220_s30 = sld [smem:[%s11201_s0 + %s9120_s26]]   ;;  %s9321_s26 = smov 0  }
  0x14   :  { %11224 = sst [smem:[#allocation11_spill]] %s9195_s3 }
  0x15   :  { %11225 = sst [smem:[#allocation12_spill]] %s9200_s8 }
  0x16   :  { %11226 = sst [smem:[#allocation13_spill]] %s9205_s14 }
  0x17   :  { %11227 = sst [smem:[#allocation14_spill]] %s9210_s19 }
  0x18   :  { %11228 = sst [smem:[#allocation15_spill]] %s9215_s24 }
  0x19   :  { %11229 = sst [smem:[#allocation16_spill]] %s9220_s30 }
  0x1a   :  { %s9225_s6 = sld [smem:[%s11201_s0 + %s9121_s1]]   ;;  %s9325_s1 = smov 0  }
  0x1b   :  { %s9230_s12 = sld [smem:[%s11201_s0 + %s9122_s7]]   ;;  %s9126_s7 = smov 18  }
  0x1c   :  { %s9235_s20 = sld [smem:[%s11201_s0 + %s9123_s15]]   ;;  %s9127_s15 = smov 19  }
  0x1d   :  { %s9240_s27 = sld [smem:[%s11201_s0 + %s9124_s22]]   ;;  %s9128_s22 = smov 20  }
  0x1e   :  { %s9245_s4 = sld [smem:[%s11201_s0 + %s9125_s28]]   ;;  %s9129_s28 = smov 21  }
  0x1f   :  { %s9250_s14 = sld [smem:[%s11201_s0 + %s9126_s7]]   ;;  %s9130_s7 = smov 22  }
  0x20   :  { %11230 = sst [smem:[#allocation17_spill]] %s9225_s6 }
  0x21   :  { %11231 = sst [smem:[#allocation18_spill]] %s9230_s12 }
  0x22   :  { %11232 = sst [smem:[#allocation19_spill]] %s9235_s20 }
  0x23   :  { %11233 = sst [smem:[#allocation20_spill]] %s9240_s27 }
  0x24   :  { %11234 = sst [smem:[#allocation21_spill]] %s9245_s4 }
  0x25   :  { %11235 = sst [smem:[#allocation22_spill]] %s9250_s14 }
  0x26   :  { %s9255_s20 = sld [smem:[%s11201_s0 + %s9127_s15]]   ;;  %s9131_s15 = smov 23  }
  0x27   :  { %s9260_s27 = sld [smem:[%s11201_s0 + %s9128_s22]]   ;;  %s9132_s22 = smov 24  }
  0x28   :  { %s9265_s4 = sld [smem:[%s11201_s0 + %s9129_s28]]   ;;  %s9133_s28 = smov 25  }
  0x29   :  { %s9270_s14 = sld [smem:[%s11201_s0 + %s9130_s7]]   ;;  %s9134_s7 = smov 26  }
  0x2a   :  { %s9285_s30 = sld [smem:[%s11201_s0 + %s9133_s28]]   ;;  %s9137_s28 = smov 29  }
  0x2b   :  { %s9290_s12 = sld [smem:[%s11201_s0 + %s9134_s7]]   ;;  %s9138_s7 = smov 30  }
  0x2c   :  { %11236 = sst [smem:[#allocation23_spill]] %s9255_s20 }
  0x2d   :  { %11237 = sst [smem:[#allocation24_spill]] %s9260_s27 }
  0x2e   :  { %11238 = sst [smem:[#allocation25_spill]] %s9265_s4 }
  0x2f   :  { %11239 = sst [smem:[#allocation26_spill]] %s9270_s14 }
  0x30   :  { %s9275_s20 = sld [smem:[%s11201_s0 + %s9131_s15]]   ;;  %s9135_s15 = smov 27  }
  0x31   :  { %s9280_s27 = sld [smem:[%s11201_s0 + %s9132_s22]]   ;;  %s9136_s22 = smov 28  }
  0x32   :  { %s9295_s25 = sld [smem:[%s11201_s0 + %s9135_s15]]   ;;  %s9139_s15 = smov 31  }
  0x33   :  { %s9300_s21 = sld [smem:[%s11201_s0 + %s9136_s22]]   ;;  %s9317_s22 = smov 0  }
  0x34   :  { %s9305_s19 = sld [smem:[%s11201_s0 + %s9137_s28]]   ;;  %s9323_s28 = smov 0  }
  0x35   :  { %s9310_s3 = sld [smem:[%s11201_s0 + %s9138_s7]]  }
  0x36   :  { %s9315_s6 = sld [smem:[%s11201_s0 + %s9139_s15]]  }
  0x37 LB: > { %11240 = sst [smem:[#allocation27_spill]] %s9099_s26  ;;  %s82_s0 = sadd.s32 1, %s9099_s26  ;;  %s9107_s1 = sphi %s9325_s1, %s73_s1   ;;  %s9103_s28 = sphi %s9323_s28, %s11278_s28   ;;  %s9099_s26 = sphi %s9321_s26, %s11277_s26   ;;  %s9095_s23 = sphi %s9319_s23, %s11276_s23   ;;  %s9091_s22 = sphi %s9317_s22, %s11275_s22  }
  0x38   : > { %11241 = sst [smem:[#allocation28_spill]] %s9103_s28  ;;  %s85_s2 = sadd.s32 1, %s9103_s28 }
  0x39   : > { %11242 = sst [smem:[#allocation29_spill]] %s9107_s1  ;;  %p83_p0 = scmp.ge.s32.totalorder %s82_s0, 2 }
  0x3a   : > { %p7437_p1 = scmp.ge.s32.totalorder %s9107_s1, 1  ;;  %p998_p2 = scmp.lt.s32.totalorder %s9107_s1, 5 }
  0x3b   : > { %s11280_s0 = smov (%p83_p0, %s82_s0), 0  ;;  %s11282_s2 = smov (!%p83_p0, %s85_s2), %s9103_s28 }
  0x3c   : > { %11243 = sst [smem:[#allocation30_spill]] %s11280_s0  ;;  %p999_p3 = pnand %p7437_p1, %p998_p2 }
  0x3d   : > { %p87_p4 = scmp.ge.s32.totalorder %s11282_s2, 2 }
  0x3e   : > { %1002 = sbr.rel (%p999_p3) target bundleno = 8259 (0x2043), region = 144 }
  0x3f   : > { %s11284_s2 = smov (%p87_p4, %s11282_s2), 0 }
  0x40   : > { %11244 = sst [smem:[#allocation31_spill]] %s11284_s2 }
  0x43   : > { %p1135_p5 = scmp.lt.s32.totalorder %s9095_s23, 1  ;;  %s11245_s5 = sld [smem:[#allocation5_spill]] }
  0x44   : > { %s11246_s9 = sld [smem:[#allocation6_spill]]  ;;  %p1149_p6 = scmp.lt.s32.totalorder %s9091_s22, 1 }
  0x45   : > { %s11247_s13 = sld [smem:[#allocation7_spill]]  ;;  %s11286_s23 = smov (!%p1135_p5, %s9095_s23), 1 }
  0x46   : > { %s11248_s4 = sld [smem:[#allocation25_spill]]  ;;  %s7723_s10 = sshll.u32 %s11286_s23, 6 }
  0x47   : > { %s11249_s14 = sld [smem:[#allocation26_spill]]  ;;  %s7440_s11 = sshll.u32 %s11286_s23, 1 }
  0x48   : > { %s1150_s7 = scalar_select %p1149_p6, %s9091_s22, 1 }
  0x49   : > { %s9352_s15 = scalar_lea.vmem %s11245_s5, %s7723_s10  ;;  %s7724_s18 = sshll.u32 %s11286_s23, 4 }
  0x4a   : > { %s9355_s16 = scalar_lea.vmem %s11246_s9, %s7440_s11  ;;  %s7725_s2 = sshll.u32 %s1150_s7, 6 }
  0x4b   : > { %s9358_s0 = scalar_lea.vmem %s11247_s13, %s7724_s18  ;;  %s7445_s26 = sshll.u32 %s1150_s7, 1 }
  0x4c   : > { %s9361_s28 = scalar_lea.vmem %s11248_s4, %s7725_s2  ;;  %s7726_s1 = sshll.u32 %s1150_s7, 5 }
  0x4d   : > { %11250 = sst [smem:[#allocation32_spill]] %s9361_s28  ;;  %s9364_s24 = scalar_lea.vmem %s11249_s14, %s7445_s26 }
  0x4e   : > { %s9367_s8 = scalar_lea.vmem %s9275_s20, %s7726_s1  ;;  %s9370_s17 = scalar_lea.vmem %s9280_s27, %s7726_s1 }
  0x4f   : > { %s9373_s5 = scalar_lea.vmem %s9285_s30, %s7726_s1  ;;  %s9376_s11 = scalar_lea.vmem %s9290_s12, %s7726_s1 }
  0x50   : > { %s9379_s23 = scalar_lea.vmem %s9295_s25, %s7725_s2  ;;  %s9382_s9 = scalar_lea.vmem %s9300_s21, %s7445_s26 }
  0x51   : > { %s7731_s18 = sshll.u32 %s1150_s7, 7  ;;  %s7732_s4 = sshll.u32 %s1150_s7, 4 }
  0x52   : > { %s9385_s13 = scalar_lea.vmem %s9305_s19, %s7731_s18  ;;  %s9388_s28 = scalar_lea.vmem %s9310_s3, %s7732_s4 }
  0x53   : > { %s9391_s14 = scalar_lea.vmem %s9315_s6, %s7723_s10  ;;  %p7463_p7 = scmp.ne.s32.totalorder %s9091_s22, 0 }
  0x54   : > { %s11251_s4 = sld [smem:[#allocation8_spill]] (!%p7463_p7) }
  0x55   : > { %1206 = sbr.rel (%p7463_p7) target bundleno = 1274 (0x4fa), region = 148  ;;  %s11252_s26 = sld [smem:[#allocation12_spill]] (!%p7463_p7) }
  0x56   : > { %s11254_s1 = sld [smem:[#allocation15_spill]] (!%p7463_p7) }
  0x57   : > { %s11256_s10 = sld [smem:[#allocation17_spill]] (!%p7463_p7) }
  0x58   : > { %s11259_s18 = sld [smem:[#allocation9_spill]] (!%p7463_p7) }
  0x5a   : > { %v8557_v0 = vld [vmem:[%s9190_s29 + $0x78] sm:$0xff]   ;;  %v8559_v2 = vld [vmem:[%s9190_s29 + $0x70] sm:$0xff]   ;;  %v8561_v4 = vld [vmem:[%s9190_s29 + $0x68] sm:$0xff]   ;;  %v1371_v5 = vlaneseq  ;;  %vm1242_vm0 = vcmask 130048   ;;  %v9140_v38 = vmov 0.0   ;;  %vm9141_vm1 = vmmov 0  }
  0x5b   : > { %v8558_v1 = vld [vmem:[%s9190_s29 + $0x38] sm:$0xff]   ;;  %7739 = vmatprep.subr.bf16.mxu1 %v8557_v0  ;;  %v8560_v3 = vld [vmem:[%s9190_s29 + $0x30] sm:$0xff]   ;;  %v8562_v6 = vld [vmem:[%s9190_s29 + $0x28] sm:$0xff]   ;;  %s11253_s2 = smov %s11252_s26  ;;  %vm1697_vm2 = vcmask 1043456   ;;  %v9142_v45 = vmov 0   ;;  %vm1328_vm3 = vcmask 523264  }
  0x5c   : > { %7740 = vmatpush3.bf16.msra.mxu1 %v8558_v1  ;;  %v8563_v7 = vld [vmem:[%s9190_s29 + $0x60] sm:$0xff]   ;;  %v9401_v8 = vshrl.u32 %v1371_v5, 7  ;;  %v8565_v10 = vld [vmem:[%s9190_s29 + $0x58] sm:$0xff]   ;;  %v8567_v13 = vld [vmem:[%s9190_s29 + $0x50] sm:$0xff]   ;;  %s11255_s7 = smov %s11254_s1  ;;  %8555 = vset.pattern.permute.xlu0 %v9142_v45  ;;  %vm1684_vm4 = vcmask 64512  }
  0x5d   : > { %7741 = vmatprep.subr.bf16.mxu1 %v8559_v2  ;;  %v8564_v9 = vld [vmem:[%s9190_s29 + $0x20] sm:$0xff]   ;;  %v8566_v12 = vld [vmem:[%s9190_s29 + $0x18] sm:$0xff]   ;;  %v8568_v16 = vld [vmem:[%s9190_s29 + $0x10] sm:$0xff]   ;;  %8556 = vset.pattern.permute.xlu1 %v9142_v45 }
  0x5e   : > { %v1377_v11 = vsub.s32 1, %v9401_v8  ;;  %v1373_v14 = vsub.s32 0, %v9401_v8  ;;  %v1337_v15 = vld [vmem:[%s9355_s16] sm:$0x3]  ;;  %v8569_v18 = vld [vmem:[%s9190_s29 + $0x48] sm:$0xff]   ;;  %v1217_v29 = vld [vmem:[%s9352_s15 + $0x10] sm:$0xff] }
  0x5f   : > { %v8570_v20 = vld [vmem:[%s9190_s29 + $0x8] sm:$0xff]   ;;  %v8571_v21 = vld [vmem:[%s9190_s29 + $0x40] sm:$0xff]   ;;  %v1218_v30 = vld [vmem:[%s9352_s15 + $0x18] sm:$0xff]  ;;  %s11258_s16 = sld [smem:[#allocation14_spill]] }
  0x60   : > { %7742 = vmatpush3.bf16.msra.mxu1 %v8560_v3  ;;  %v1378_v17 = vrot.slane %v1337_v15, %v1377_v11  ;;  %v8572_v22 = vld [vmem:[%s9190_s29] sm:$0xff]   ;;  %v1374_v23 = vrot.slane %v1337_v15, %v1373_v14  ;;  %v1216_v27 = vld [vmem:[%s9352_s15 + $0x8] sm:$0xff]  ;;  %v1226_v31 = vpack.c.bf16 %v1218_v30, %v1217_v29  ;;  %v8574_v35 = vld [vmem:[%s11252_s26 + $0x18] sm:$0xff]   ;;  %s11262_s26 = sld [smem:[#allocation16_spill]] }
  0x61   : > { %7743 = vmatprep.subr.bf16.mxu1 %v8561_v4  ;;  %v8573_v25 = vld [vmem:[%s11251_s4] sm:$0xff]   ;;  %v1220_v33 = vld [vmem:[%s9352_s15 + $0x28] sm:$0xff]  ;;  %v1221_v36 = vld [vmem:[%s9352_s15 + $0x30] sm:$0xff]  ;;  %s11260_s4 = sld [smem:[#allocation10_spill]] }
  0x62   : > { %v1382_v19 = vpack.c.bf16 %v1378_v17, %v1378_v17  ;;  %v1381_v24 = vpack.c.bf16 %v1374_v23, %v1374_v23  ;;  %8038 = vmatprep.subr.bf16.mxu0 %v8573_v25  ;;  %v1215_v26 = vld [vmem:[%s9352_s15] sm:$0xff]  ;;  %v1222_v37 = vld [vmem:[%s9352_s15 + $0x38] sm:$0xff]  ;;  %v8575_v40 = vld [vmem:[%s11253_s2 + $0x10] sm:$0xff]  }
  0x63   : > { %8039 = vmatpush3.bf16.msra.mxu0 %v8573_v25  ;;  %v1225_v28 = vpack.c.bf16 %v1216_v27, %v1215_v26  ;;  %v1219_v32 = vld [vmem:[%s9352_s15 + $0x20] sm:$0xff]  ;;  %v1228_v39 = vpack.c.bf16 %v1222_v37, %v1221_v36  ;;  %v8576_v41 = vld [vmem:[%s11253_s2 + $0x8] sm:$0xff]   ;;  %v1622_v46 = vld [vmem:[%s11254_s1 + $0x30] sm:$0xff]  ;;  %s11257_s15 = sld [smem:[#allocation11_spill]] }
  0x64   : > { %7744 = vmatpush3.bf16.msra.mxu1 %v8562_v6  ;;  %1512 = vmatprep.mubr.bf16.mxu1 %v1382_v19  ;;  %v1227_v34 = vpack.c.bf16 %v1220_v33, %v1219_v32  ;;  %v8577_v42 = vld [vmem:[%s11253_s2] sm:$0xff]   ;;  %v1613_v43 = vld [vmem:[%s9358_s0 + $0x8] sm:$0xff]  ;;  %v1623_v48 = vld [vmem:[%s11255_s7 + $0x38] sm:$0xff]  ;;  %s11264_s1 = sld [smem:[#allocation20_spill]] }
  0x65   : > { %7745 = vmatprep.subr.bf16.mxu1 %v8563_v7  ;;  %8040 = vmatprep.mubr.msk.bf16.mxu0 %vm1242_vm0, %v1225_v28  ;;  %v1615_v44 = vpack.c.bf16 %v1613_v43, %v1613_v43  ;;  %v1620_v47 = vld [vmem:[%s11255_s7 + $0x20] sm:$0xff]  ;;  %v1621_v49 = vld [vmem:[%s11255_s7 + $0x28] sm:$0xff]  ;;  %v1618_v50 = vld [vmem:[%s11255_s7 + $0x10] sm:$0xff] }
  0x66   : > { %8041 = vmatmul.mubr.msk.bf16.vlgmr.msra.gmra.mxu0 %vm1242_vm0, %v1226_v31  ;;  %8048 = vmatprep.subr.bf16.mxu0 %v9140_v38  ;;  %v1619_v51 = vld [vmem:[%s11255_s7 + $0x18] sm:$0xff]  ;;  %v1616_v52 = vld [vmem:[%s11255_s7] sm:$0xff]  ;;  %v1617_v53 = vld [vmem:[%s11255_s7 + $0x8] sm:$0xff] }
  0x67   : > { %8044 = vmatprep.mubr.msk.bf16.mxu0 %vm1242_vm0, %v1227_v34  ;;  %8049 = vmatpush3.bf16.msra.mxu0 %v8574_v35  ;;  %v1809_v54 = vld [vmem:[%s11256_s10] sm:$0xff]  ;;  %v1810_v55 = vld [vmem:[%s11256_s10 + $0x8] sm:$0xff]  ;;  %v1811_v56 = vld [vmem:[%s11256_s10 + $0x10] sm:$0xff] }
  0x68   : > { %7746 = vmatpush3.bf16.msra.mxu1 %v8564_v9  ;;  %8050 = vmatprep.subr.bf16.mxu0 %v9140_v38  ;;  %v1812_v57 = vld [vmem:[%s11256_s10 + $0x18] sm:$0xff]  ;;  %v1813_v58 = vld [vmem:[%s11256_s10 + $0x20] sm:$0xff]  ;;  %v1814_v59 = vld [vmem:[%s11256_s10 + $0x28] sm:$0xff] }
  0x69   : > { %7747 = vmatprep.subr.bf16.mxu1 %v8565_v10  ;;  %1656 = vperm.xlu0 %8555, %v1622_v46   ;;  %v1815_v60 = vld [vmem:[%s11256_s10 + $0x30] sm:$0xff]  ;;  %v1816_v61 = vld [vmem:[%s11256_s10 + $0x38] sm:$0xff]  ;;  %v1383_v63 = vld [vmem:[%s11257_s15] sm:$0x1]  ;;  %s11263_s15 = smov %s11262_s26 }
  0x6a   : > { %1646 = vperm.xlu1 %8556, %v1620_v47   ;;  %v1612_v9 = vld [vmem:[%s9358_s0] sm:$0xff]  ;;  %v8579_v17 = vld [vmem:[%s11258_s16 + $0x8] sm:$0xff]   ;;  %v8581_v19 = vld [vmem:[%s11258_s16 + $0x18] sm:$0xff]   ;;  %s11261_s0 = sld [smem:[#allocation18_spill]] }
  0x6b   : > { %8051 = vmatpush3.bf16.msra.mxu0 %v8575_v40  ;;  %v1614_v10 = vpack.c.bf16 %v1612_v9, %v1612_v9  ;;  %v9472_v28 = vld [vmem:[%s11260_s4 + $0x18] sm:$0xff]  ;;  %v9477_v32 = vld [vmem:[%s11260_s4 + $0x8] sm:$0xff]  ;;  %v9482_v36 = vld [vmem:[%s11260_s4 + $0x30] sm:$0xff] }
  0x6c   : > { %7748 = vmatpush3.bf16.msra.mxu1 %v8566_v12  ;;  %8052 = vmatprep.subr.bf16.mxu0 %v9140_v38  ;;  %v9487_v40 = vld [vmem:[%s11260_s4 + $0x20] sm:$0xff] }
  0x6d   : > { %7749 = vmatprep.subr.bf16.mxu1 %v8567_v13  ;;  %1661 = vperm.xlu0 %8555, %v1623_v48   ;;  %v1699_v15 = vsel %vm1697_vm2, %v1614_v10, 0 }
  0x6e   : > { %8045 = vmatmul.mubr.msk.bf16.gmra.mxu0 %vm1242_vm0, %v1228_v39  ;;  %1651 = vperm.xlu1 %8556, %v1621_v49   ;;  %v9497_v49 = vld [vmem:[%s11260_s4 + $0x28] sm:$0xff] }
  0x6f   : > { %8053 = vmatpush3.bf16.msra.mxu0 %v8576_v41  ;;  %8056 = vmatprep.mubr.msk.bf16.mxu0 %vm9141_vm1, %v9140_v38 }
  0x70   : > { %7750 = vmatpush3.bf16.msra.mxu1 %v8568_v16  ;;  %8054 = vmatprep.subr.bf16.mxu0 %v9140_v38  ;;  %v8578_v16 = vld [vmem:[%s11258_s16] sm:$0xff]  }
  0x71   : > { %7751 = vmatprep.subr.bf16.mxu1 %v8569_v18  ;;  %1636 = vperm.xlu0 %8555, %v1618_v50   ;;  %v8580_v18 = vld [vmem:[%s11258_s16 + $0x10] sm:$0xff]  }
  0x72   : > { %1641 = vperm.xlu1 %8556, %v1619_v51  }
  0x73   : > { %8055 = vmatpush3.bf16.msra.mxu0 %v8577_v42 }
  0x74   : > { %7752 = vmatpush3.bf16.msra.mxu1 %v8570_v20  ;;  %7496 = vmatprep.subr.msk.bf16.mxu0 %vm1697_vm2, %v1615_v44  ;;  %v7464_v20 = vld [vmem:[%s11259_s18] ss:$0 sm:$0xff]  ;;  %v9492_v44 = vld [vmem:[%s11260_s4 + $0x38] sm:$0xff]  ;;  %s11265_s18 = smov %s11264_s1 }
  0x75   : > { %7753 = vmatprep.subr.bf16.mxu1 %v8571_v21  ;;  %1626 = vperm.xlu0 %8555, %v1616_v52   ;;  %v9465_v21 = vld [vmem:[%s11260_s4 + $0x10] sm:$0xff] }
  0x76   : > { %1631 = vperm.xlu1 %8556, %v1617_v53  }
  0x78   : > { %7754 = vmatpush3.bf16.msra.mxu1 %v8572_v22 }
  0x79   : > { %1819 = vperm.xlu0 %8555, %v1809_v54   ;;  %v8586_v54 = vld [vmem:[%s11261_s0 + $0x78] sm:$0xff]  }
  0x7a   : > { %1824 = vperm.xlu1 %8556, %v1810_v55   ;;  %v8587_v55 = vld [vmem:[%s11261_s0 + $0x38] sm:$0xff]  }
  0x7b   : > { %1513 = vmatmul.mubr.bf16.vlgmr.msra.gmra.mxu1 %v1381_v24  ;;  %v9468_v24 = vld [vmem:[%s11260_s4] sm:$0xff] }
  0x7c   : > { %1921 = vmatprep.mubr.bf16.mxu1 %v9142_v45 }
  0x7d   : > { %1829 = vperm.xlu0 %8555, %v1811_v56   ;;  %v8588_v56 = vld [vmem:[%s11261_s0 + $0x70] sm:$0xff]  }
  0x7e   : > { %1834 = vperm.xlu1 %8556, %v1812_v57   ;;  %v8589_v57 = vld [vmem:[%s11261_s0 + $0x30] sm:$0xff]  }
  0x81   : > { %1839 = vperm.xlu0 %8555, %v1813_v58   ;;  %v8590_v58 = vld [vmem:[%s11261_s0 + $0x68] sm:$0xff]  }
  0x82   : > { %1844 = vperm.xlu1 %8556, %v1814_v59   ;;  %v8591_v59 = vld [vmem:[%s11261_s0 + $0x28] sm:$0xff]  }
  0x85   : > { %1849 = vperm.xlu0 %8555, %v1815_v60   ;;  %v8592_v60 = vld [vmem:[%s11261_s0 + $0x60] sm:$0xff]  }
  0x86   : > { %1854 = vperm.xlu1 %8556, %v1816_v61   ;;  %v8593_v61 = vld [vmem:[%s11261_s0 + $0x20] sm:$0xff]  }
 0x126   : > { %v8042_v22 = vpop.f32.mrf.mxu0 }
 0x127   : > { %v1298_v23 = vadd.f32 %v8042_v22, %v7464_v20 }
 0x128   : > { %v1289_v25 = vpop.f32.mrf.mxu0 }
 0x129   : > { %v1322_v26 = vadd.f32 %v1298_v23, %v9465_v21  ;;  %v1290_v27 = vadd.f32 %v7464_v20, %v1289_v25 }
 0x12a   : > { %v8043_v29 = vpop.f32.mrf.mxu0 }
 0x12b   : > { %1331 = vst.msk [vmem:[#allocation2 + $0x10] sm:$0xff] %vm1328_vm3, %v1322_v26  ;;  %v1320_v30 = vadd.f32 %v1290_v27, %v9468_v24  ;;  %v1301_v31 = vadd.f32 %v8043_v29, %v7464_v20 }
 0x12c   : > { %v1292_v33 = vpop.f32.mrf.mxu0 }
 0x12d   : > { %1329 = vst.msk [vmem:[#allocation2] sm:$0xff] %vm1328_vm3, %v1320_v30  ;;  %v1323_v34 = vadd.f32 %v1301_v31, %v9472_v28  ;;  %v1293_v35 = vadd.f32 %v7464_v20, %v1292_v33 }
 0x12e   : > { %v8046_v37 = vpop.f32.mrf.mxu0 }
 0x12f   : > { %1332 = vst.msk [vmem:[#allocation2 + $0x18] sm:$0xff] %vm1328_vm3, %v1323_v34  ;;  %v1321_v38 = vadd.f32 %v1293_v35, %v9477_v32  ;;  %v1314_v39 = vadd.f32 %v8046_v37, %v7464_v20 }
 0x130   : > { %v1305_v41 = vpop.f32.mrf.mxu0 }
 0x131   : > { %1330 = vst.msk [vmem:[#allocation2 + $0x8] sm:$0xff] %vm1328_vm3, %v1321_v38  ;;  %v1326_v42 = vadd.f32 %v1314_v39, %v9482_v36  ;;  %v1306_v43 = vadd.f32 %v7464_v20, %v1305_v41 }
 0x132   : > { %v8047_v46 = vpop.f32.mrf.mxu0 }
 0x133   : > { %1335 = vst.msk [vmem:[#allocation2 + $0x30] sm:$0xff] %vm1328_vm3, %v1326_v42  ;;  %v1324_v47 = vadd.f32 %v1306_v43, %v9487_v40  ;;  %v1317_v48 = vadd.f32 %v8047_v46, %v7464_v20 }
 0x134   : > { %v1308_v50 = vpop.f32.mrf.mxu0 }
 0x135   : > { %1333 = vst.msk [vmem:[#allocation2 + $0x20] sm:$0xff] %vm1328_vm3, %v1324_v47  ;;  %v1327_v51 = vadd.f32 %v1317_v48, %v9492_v44  ;;  %v1309_v52 = vadd.f32 %v7464_v20, %v1308_v50 }
 0x137   : > { %1336 = vst.msk [vmem:[#allocation2 + $0x38] sm:$0xff] %vm1328_vm3, %v1327_v51  ;;  %v1325_v53 = vadd.f32 %v1309_v52, %v9497_v49 }
 0x139   : > { %1334 = vst.msk [vmem:[#allocation2 + $0x28] sm:$0xff] %vm1328_vm3, %v1325_v53 }
 0x13b   : > { %v7755_v62 = vpop.f32.mrf.mxu1 }
 0x13d   : > { %v7756_v0 = vpop.f32.mrf.mxu1 }
 0x13e   : > { %v7757_v1 = vadd.f32 %v7756_v0, %v7755_v62  ;;  %v8594_v62 = vld [vmem:[%s11261_s0 + $0x58] sm:$0xff]  }
 0x13f   : > { %v7758_v2 = vpop.f32.mrf.mxu1 }
 0x140   : > { %v1515_v3 = vadd.f32 %v7757_v1, %v1383_v63  ;;  %v8595_v63 = vld [vmem:[%s11261_s0 + $0x18] sm:$0xff]  }
 0x141   : > { %v7759_v4 = vpop.f32.mrf.mxu1 }
 0x142   : > { %v7486_v5 = vmul.f32 -1.442695, %v1515_v3 }
 0x144   : > { %8606 = vpow2.f32 %v7486_v5 }
 0x151   : > { %v8607_v6 = vpop.eup %8606 }
 0x152   : > { %v1523_v7 = vadd.f32 1.0, %v8607_v6 }
 0x154   : > { %8608 = vrcp.f32 %v1523_v7 }
 0x161   : > { %v8609_v11 = vpop.eup %8608 }
 0x162   : > { %v1526_v12 = vmul.f32 %v8609_v11, %v1515_v3 }
 0x164   : > { %v1535_v13 = vpack.c.bf16 %v1526_v12, %v1526_v12 }
 0x166   : > { %8057 = vmatmul.mubr.msk.bf16.vlgmr.msra.gmra.mxu0 %vm1328_vm3, %v1535_v13 }
 0x167   : > { %1719 = vmatpush1.bf16.msra.mxu0 %v1699_v15  ;;  %1736 = vmatprep.mubr.bf16.mxu0 %v9142_v45  ;;  %v1647_v15 = vpop.permute.xlu1 %1646 }
 0x168   : > { %7766 = vmatprep.subr.bf16.mxu0 %v8586_v54 }
 0x16b   : > { %v1652_v20 = vpop.permute.xlu1 %1651 }
 0x16e   : > { %7497 = vmatmul.mubr.msk.bf16.vlgmr.msra.gmra.mxu0 %vm1684_vm4, %v8578_v16 }
 0x16f   : > { %1746 = vmatprep.mubr.bf16.mxu0 %v9142_v45  ;;  %7767 = vmatpush3.bf16.msra.mxu0 %v8587_v55  ;;  %v1642_v31 = vpop.permute.xlu1 %1641 }
 0x170   : > { %7768 = vmatprep.subr.bf16.mxu0 %v8588_v56 }
 0x173   : > { %7769 = vmatpush3.bf16.msra.mxu0 %v8589_v57  ;;  %v1632_v54 = vpop.permute.xlu1 %1631 }
 0x174   : > { %7770 = vmatprep.subr.bf16.mxu0 %v8590_v58 }
 0x176   : > { %7498 = vmatmul.mubr.msk.bf16.gmra.mxu0 %vm1684_vm4, %v8579_v17  ;;  %v1657_v17 = vpop.permute.xlu0 %1656 }
 0x177   : > { %1756 = vmatprep.mubr.bf16.mxu0 %v9142_v45  ;;  %7771 = vmatpush3.bf16.msra.mxu0 %v8591_v59 }
 0x178   : > { %7772 = vmatprep.subr.bf16.mxu0 %v8592_v60 }
 0x17a   : > { %v1662_v23 = vpop.permute.xlu0 %1661 }
 0x17b   : > { %7773 = vmatpush3.bf16.msra.mxu0 %v8593_v61 }
 0x17c   : > { %7774 = vmatprep.subr.bf16.mxu0 %v8594_v62 }
 0x17e   : > { %7499 = vmatmul.mubr.msk.bf16.gmra.mxu0 %vm1684_vm4, %v8580_v18  ;;  %v1637_v38 = vpop.permute.xlu0 %1636 }
 0x17f   : > { %1766 = vmatprep.mubr.bf16.mxu0 %v9142_v45  ;;  %7775 = vmatpush3.bf16.msra.mxu0 %v8595_v63 }
 0x182   : > { %v1627_v61 = vpop.permute.xlu0 %1626 }
 0x186   : > { %7500 = vmatmul.mubr.msk.bf16.gmra.mxu0 %vm1684_vm4, %v8581_v19 }
 0x226   : > { %v9514_v0 = vpop.f32.mrf.mxu0 }
 0x228   : > { %v8058_v1 = vpop.f32.mrf.mxu0 }
 0x22a   : > { %v1601_v2 = vpop.f32.mrf.mxu0 }
 0x22c   : > { %v8059_v3 = vpop.f32.mrf.mxu0 }
 0x22e   : > { %v1738_v4 = vpop.f32.mrf.mxu0 }
 0x230   : > { %v1740_v5 = vpop.f32.mrf.mxu0 }
 0x231   : > { %v1741_v1 = vadd.f32 %v1740_v5, %v1627_v61 }
 0x232   : > { %v1742_v6 = vpop.f32.mrf.mxu0 }
 0x233   : > { %v1743_v3 = vadd.f32 %v1742_v6, %v1632_v54 }
 0x234   : > { %v1744_v7 = vpop.f32.mrf.mxu0 }
 0x235   : > { %v1745_v58 = vadd.f32 %v1744_v7, %v1632_v54  ;;  %v1778_v7 = vmax.f32 %v1741_v1, 0.0 }
 0x236   : > { %v1748_v9 = vpop.f32.mrf.mxu0 }
 0x237   : > { %v1749_v62 = vadd.f32 %v1748_v9, %v1637_v38 }
 0x238   : > { %v1750_v10 = vpop.f32.mrf.mxu0 }
 0x239   : > { %v1751_v51 = vadd.f32 %v1750_v10, %v1637_v38 }
 0x23a   : > { %v1752_v11 = vpop.f32.mrf.mxu0 }
 0x23b   : > { %v1753_v55 = vadd.f32 %v1752_v11, %v1642_v31  ;;  %v1782_v2 = vmax.f32 %v1751_v51, 0.0  ;;  %v1739_v11 = vadd.f32 %v1738_v4, %v1627_v61  ;;  %v8583_v4 = vld [vmem:[%s11263_s15 + $0x8] sm:$0xff]  }
 0x23c   : > { %v1754_v12 = vpop.f32.mrf.mxu0 }
 0x23d   : > { %v1755_v42 = vadd.f32 %v1754_v12, %v1642_v31  ;;  %v1783_v12 = vmax.f32 %v1753_v55, 0.0  ;;  %v1777_v5 = vmax.f32 %v1739_v11, 0.0 }
 0x23e   : > { %v1758_v13 = vpop.f32.mrf.mxu0 }
 0x23f   : > { %v1759_v48 = vadd.f32 %v1758_v13, %v1647_v15  ;;  %v1784_v59 = vmax.f32 %v1755_v42, 0.0  ;;  %v1780_v13 = vmax.f32 %v1745_v58, 0.0 }
 0x240   : > { %v1760_v16 = vpop.f32.mrf.mxu0 }
 0x241   : > { %v1761_v35 = vadd.f32 %v1760_v16, %v1647_v15  ;;  %v1785_v63 = vmax.f32 %v1759_v48, 0.0  ;;  %v1804_v15 = vpack.c.bf16 %v1784_v59, %v1782_v2  ;;  %v1781_v16 = vmax.f32 %v1749_v62, 0.0 }
 0x242   : > { %v1762_v18 = vpop.f32.mrf.mxu0 }
 0x243   : > { %v1763_v39 = vadd.f32 %v1762_v18, %v1652_v20  ;;  %v1786_v52 = vmax.f32 %v1761_v35, 0.0  ;;  %v1803_v9 = vpack.c.bf16 %v1783_v12, %v1781_v16  ;;  %v1802_v18 = vpack.c.bf16 %v1780_v13, %v1778_v7  ;;  %v1825_v35 = vpop.permute.xlu1 %1824 }
 0x244   : > { %v1764_v19 = vpop.f32.mrf.mxu0 }
 0x245   : > { %v1765_v27 = vadd.f32 %v1764_v19, %v1652_v20  ;;  %v1787_v56 = vmax.f32 %v1763_v39, 0.0  ;;  %v8582_v19 = vld [vmem:[%s11262_s26] sm:$0xff]   ;;  %v8584_v20 = vld [vmem:[%s11263_s15 + $0x10] sm:$0xff]   ;;  %s11266_s26 = sld [smem:[#allocation19_spill]] }
 0x246   : > { %v1768_v22 = vpop.f32.mrf.mxu0 }
 0x247   : > { %v1769_v33 = vadd.f32 %v1768_v22, %v1657_v17  ;;  %v1788_v43 = vmax.f32 %v1765_v27, 0.0  ;;  %v1805_v10 = vpack.c.bf16 %v1787_v56, %v1785_v63  ;;  %v8585_v22 = vld [vmem:[%s11263_s15 + $0x18] sm:$0xff]   ;;  %v8599_v27 = vld [vmem:[%s11261_s0 + $0x8] sm:$0xff]   ;;  %v1835_v54 = vpop.permute.xlu1 %1834 }
 0x248   : > { %v1770_v25 = vpop.f32.mrf.mxu0 }
 0x249   : > { %v1771_v29 = vadd.f32 %v1770_v25, %v1657_v17  ;;  %v1789_v50 = vmax.f32 %v1769_v33, 0.0  ;;  %v1806_v60 = vpack.c.bf16 %v1788_v43, %v1786_v52  ;;  %v1779_v17 = vmax.f32 %v1743_v3, 0.0  ;;  %v8597_v25 = vld [vmem:[%s11261_s0 + $0x10] sm:$0xff]  }
 0x24a   : > { %v1772_v26 = vpop.f32.mrf.mxu0 }
 0x24b   : > { %v1773_v30 = vadd.f32 %v1772_v26, %v1662_v23  ;;  %v1790_v46 = vmax.f32 %v1771_v29, 0.0  ;;  %v1801_v6 = vpack.c.bf16 %v1779_v17, %v1777_v5  ;;  %v8598_v26 = vld [vmem:[%s11261_s0 + $0x48] sm:$0xff]   ;;  %v8600_v29 = vld [vmem:[%s11261_s0 + $0x40] sm:$0xff]  }
 0x24c   : > { %v1774_v34 = vpop.f32.mrf.mxu0 }
 0x24d   : > { %v1775_v37 = vadd.f32 %v1774_v34, %v1662_v23  ;;  %v1791_v41 = vmax.f32 %v1773_v30, 0.0  ;;  %v8596_v23 = vld [vmem:[%s11261_s0 + $0x50] sm:$0xff]   ;;  %v8601_v30 = vld [vmem:[%s11261_s0] sm:$0xff]   ;;  %v1820_v34 = vpop.permute.xlu0 %1819 }
 0x24e   : > { %7776 = vmatprep.subr.bf16.mxu0 %v8596_v23 }
 0x24f   : > { %v1792_v47 = vmax.f32 %v1775_v37, 0.0  ;;  %v1807_v57 = vpack.c.bf16 %v1791_v41, %v1789_v50  ;;  %7777 = vmatpush3.bf16.msra.mxu0 %v8597_v25 }
 0x250   : > { %7778 = vmatprep.subr.bf16.mxu0 %v8598_v26 }
 0x251   : > { %v1808_v53 = vpack.c.bf16 %v1792_v47, %v1790_v46  ;;  %v1830_v52 = vpop.permute.xlu0 %1829 }
 0x253   : > { %1897 = vmatprep.subr.bf16.mxu1 %v1808_v53  ;;  %7779 = vmatpush3.bf16.msra.mxu0 %v8599_v27 }
 0x254   : > { %1898 = vmatpush1.bf16.msra.mxu1 %v1807_v57  ;;  %7780 = vmatprep.subr.bf16.mxu0 %v8600_v29 }
 0x255   : > { %1899 = vmatprep.subr.bf16.mxu1 %v1806_v60 }
 0x257   : > { %7781 = vmatpush3.bf16.msra.mxu0 %v8601_v30 }
 0x258   : > { %1900 = vmatpush1.bf16.msra.mxu1 %v1805_v10  ;;  %v1840_v10 = vpop.permute.xlu0 %1839 }
 0x259   : > { %1901 = vmatprep.subr.bf16.mxu1 %v1804_v15  ;;  %v1845_v15 = vpop.permute.xlu1 %1844 }
 0x25c   : > { %1902 = vmatpush1.bf16.msra.mxu1 %v1803_v9  ;;  %v1850_v25 = vpop.permute.xlu0 %1849 }
 0x25d   : > { %1903 = vmatprep.subr.bf16.mxu1 %v1802_v18  ;;  %v1855_v27 = vpop.permute.xlu1 %1854 }
 0x260   : > { %1904 = vmatpush1.bf16.msra.mxu1 %v1801_v6 }
 0x263   : > { %7505 = vmatmul.mubr.msk.bf16.vlgmr.msra.gmra.mxu1 %vm1328_vm3, %v8582_v19 }
 0x264   : > { %1931 = vmatprep.mubr.bf16.mxu1 %v9142_v45 }
 0x26b   : > { %7506 = vmatmul.mubr.msk.bf16.gmra.mxu1 %vm1328_vm3, %v8583_v4 }
 0x26c   : > { %1941 = vmatprep.mubr.bf16.mxu1 %v9142_v45 }
 0x273   : > { %7507 = vmatmul.mubr.msk.bf16.gmra.mxu1 %vm1328_vm3, %v8584_v20 }
 0x274   : > { %1951 = vmatprep.mubr.bf16.mxu1 %v9142_v45 }
 0x27b   : > { %7508 = vmatmul.mubr.msk.bf16.gmra.mxu1 %vm1328_vm3, %v8585_v22 }
 0x323   : > { %v1923_v31 = vpop.f32.mrf.mxu1 }
 0x324   : > { %v1924_v39 = vadd.f32 %v1923_v31, %v1820_v34 }
 0x325   : > { %v1925_v33 = vpop.f32.mrf.mxu1 }
 0x326   : > { %v1926_v37 = vadd.f32 %v1925_v33, %v1820_v34  ;;  %v1962_v50 = vmax.f32 %v1924_v39, 0.0 }
 0x327   : > { %v1927_v45 = vpop.f32.mrf.mxu1 }
 0x328   : > { %v1928_v38 = vadd.f32 %v1927_v45, %v1825_v35  ;;  %v1963_v47 = vmax.f32 %v1926_v37, 0.0 }
 0x329   : > { %v1929_v41 = vpop.f32.mrf.mxu1 }
 0x32a   : > { %v1930_v42 = vadd.f32 %v1929_v41, %v1825_v35  ;;  %v1964_v43 = vmax.f32 %v1928_v38, 0.0 }
 0x32b   : > { %v1933_v46 = vpop.f32.mrf.mxu1 }
 0x32c   : > { %v1965_v48 = vmax.f32 %v1930_v42, 0.0  ;;  %v2010_v55 = vpack.c.bf16 %v1964_v43, %v1962_v50  ;;  %v1934_v59 = vadd.f32 %v1933_v46, %v1830_v52  ;;  %v8602_v46 = vld [vmem:[%s11264_s1] sm:$0xff]   ;;  %s11267_s1 = sld [smem:[#allocation13_spill]] }
 0x32d   : > { %v1935_v51 = vpop.f32.mrf.mxu1  ;;  %8068 = vmatprep.mubr.msk.bf16.mxu1 %vm1328_vm3, %v8602_v46 }
 0x32e   : > { %v2011_v53 = vpack.c.bf16 %v1965_v48, %v1963_v47  ;;  %v1936_v57 = vadd.f32 %v1935_v51, %v1830_v52  ;;  %v1966_v3 = vmax.f32 %v1934_v59, 0.0  ;;  %v7509_v48 = vld [vmem:[%s11266_s26] ss:$0 sm:$0xff] }
 0x32f   : > { %v1937_v56 = vpop.f32.mrf.mxu1 }
 0x330   : > { %v1938_v58 = vadd.f32 %v1937_v56, %v1835_v54  ;;  %2153 = vmatprep.mubr.bf16.mxu0 %v2011_v53  ;;  %v1967_v1 = vmax.f32 %v1936_v57, 0.0 }
 0x331   : > { %v1939_v60 = vpop.f32.mrf.mxu1  ;;  %2154 = vmatmul.mubr.bf16.vlgmr.msra.gmra.mxu0 %v2010_v55 }
 0x332   : > { %v1940_v61 = vadd.f32 %v1939_v60, %v1835_v54  ;;  %v1968_v62 = vmax.f32 %v1938_v58, 0.0 }
 0x333   : > { %v1943_v63 = vpop.f32.mrf.mxu1 }
 0x334   : > { %v1969_v2 = vmax.f32 %v1940_v61, 0.0  ;;  %v2012_v11 = vpack.c.bf16 %v1968_v62, %v1966_v3  ;;  %v1944_v9 = vadd.f32 %v1943_v63, %v1840_v10 }
 0x335   : > { %v1945_v12 = vpop.f32.mrf.mxu1 }
 0x336   : > { %v2013_v13 = vpack.c.bf16 %v1969_v2, %v1967_v1  ;;  %v1946_v7 = vadd.f32 %v1945_v12, %v1840_v10  ;;  %v1970_v22 = vmax.f32 %v1944_v9, 0.0 }
 0x337   : > { %v1947_v16 = vpop.f32.mrf.mxu1 }
 0x338   : > { %v1948_v17 = vadd.f32 %v1947_v16, %v1845_v15  ;;  %2161 = vmatprep.mubr.bf16.mxu0 %v2013_v13  ;;  %v1971_v4 = vmax.f32 %v1946_v7, 0.0 }
 0x339   : > { %v1949_v18 = vpop.f32.mrf.mxu1  ;;  %2162 = vmatmul.mubr.bf16.gmra.mxu0 %v2012_v11 }
 0x33a   : > { %v1950_v5 = vadd.f32 %v1949_v18, %v1845_v15  ;;  %v1972_v6 = vmax.f32 %v1948_v17, 0.0 }
 0x33b   : > { %v1953_v19 = vpop.f32.mrf.mxu1 }
 0x33c   : > { %v1973_v20 = vmax.f32 %v1950_v5, 0.0  ;;  %v2014_v29 = vpack.c.bf16 %v1972_v6, %v1970_v22  ;;  %v1954_v34 = vadd.f32 %v1953_v19, %v1850_v25  ;;  %v1536_v19 = vld [vmem:[%s11267_s1] sm:$0x1] }
 0x33d   : > { %v1955_v23 = vpop.f32.mrf.mxu1  ;;  %v1599_v22 = vadd.f32 %v9514_v0, %v1536_v19 }
 0x33e   : > { %v2015_v26 = vpack.c.bf16 %v1973_v20, %v1971_v4  ;;  %v1956_v31 = vadd.f32 %v1955_v23, %v1850_v25  ;;  %v1974_v41 = vmax.f32 %v1954_v34, 0.0 }
 0x33f   : > { %v1957_v30 = vpop.f32.mrf.mxu1 }
 0x340   : > { %v1958_v33 = vadd.f32 %v1957_v30, %v1855_v27  ;;  %2169 = vmatprep.mubr.bf16.mxu0 %v2015_v26  ;;  %v1975_v38 = vmax.f32 %v1956_v31, 0.0  ;;  %v2213_v26 = vrot.slane %v1599_v22, %v1373_v14 }
 0x341   : > { %v1959_v35 = vpop.f32.mrf.mxu1  ;;  %2170 = vmatmul.mubr.bf16.gmra.mxu0 %v2014_v29 }
 0x342   : > { %v1960_v45 = vadd.f32 %v1959_v35, %v1855_v27  ;;  %v1976_v37 = vmax.f32 %v1958_v33, 0.0 }
 0x344   : > { %v1977_v39 = vmax.f32 %v1960_v45, 0.0  ;;  %v2016_v43 = vpack.c.bf16 %v1976_v37, %v1974_v41  ;;  %v8603_v45 = vld [vmem:[%s11265_s18 + $0x8] sm:$0xff]   ;;  %v8604_v37 = vld [vmem:[%s11265_s18 + $0x10] sm:$0xff]  }
 0x346   : > { %v2017_v42 = vpack.c.bf16 %v1977_v39, %v1975_v38  ;;  %v8605_v38 = vld [vmem:[%s11265_s18 + $0x18] sm:$0xff]  }
 0x348   : > { %2177 = vmatprep.mubr.bf16.mxu0 %v2017_v42 }
 0x349   : > { %2178 = vmatmul.mubr.bf16.gmra.mxu0 %v2016_v43 }
 0x3f1   : > { %v7782_v47 = vpop.f32.mrf.mxu0 }
 0x3f3   : > { %v7783_v50 = vpop.f32.mrf.mxu0 }
 0x3f4   : > { %v7784_v51 = vadd.f32 %v7783_v50, %v7782_v47 }
 0x3f5   : > { %v7785_v52 = vpop.f32.mrf.mxu0 }
 0x3f6   : > { %v2156_v53 = vadd.f32 %v7784_v51, %v7509_v48 }
 0x3f7   : > { %v7786_v54 = vpop.f32.mrf.mxu0 }
 0x3f8   : > { %v2186_v55 = vadd.f32 %v2156_v53, %v9468_v24  ;;  %v7787_v56 = vadd.f32 %v7786_v54, %v7785_v52 }
 0x3f9   : > { %v7788_v57 = vpop.f32.mrf.mxu0 }
 0x3fa   : > { %2194 = vst.msk [vmem:[#allocation3] sm:$0xff] %vm1328_vm3, %v2186_v55  ;;  %v2159_v58 = vadd.f32 %v7787_v56, %v7509_v48 }
 0x3fb   : > { %v7789_v59 = vpop.f32.mrf.mxu0 }
 0x3fc   : > { %v2187_v60 = vadd.f32 %v2159_v58, %v9477_v32  ;;  %v7790_v61 = vadd.f32 %v7789_v59, %v7788_v57 }
 0x3fd   : > { %v7791_v62 = vpop.f32.mrf.mxu0 }
 0x3fe   : > { %2195 = vst.msk [vmem:[#allocation3 + $0x8] sm:$0xff] %vm1328_vm3, %v2187_v60  ;;  %v2164_v63 = vadd.f32 %v7790_v61, %v7509_v48  ;;  %v2215_v14 = vadd.f32 %v2213_v26, %v2187_v60 }
 0x3ff   : > { %v7792_v1 = vpop.f32.mrf.mxu0 }
 0x400   : > { %v2188_v2 = vadd.f32 %v2164_v63, %v9465_v21  ;;  %v7793_v3 = vadd.f32 %v7792_v1, %v7791_v62 }
 0x401   : > { %v7794_v12 = vpop.f32.mrf.mxu0 }
 0x402   : > { %2196 = vst.msk [vmem:[#allocation3 + $0x10] sm:$0xff] %vm1328_vm3, %v2188_v2  ;;  %v2167_v24 = vadd.f32 %v7793_v3, %v7509_v48  ;;  %v2216_v34 = vadd.f32 %v2213_v26, %v2188_v2 }
 0x403   : > { %v7795_v10 = vpop.f32.mrf.mxu0 }
 0x404   : > { %v2189_v13 = vadd.f32 %v2167_v24, %v9472_v28  ;;  %v7796_v15 = vadd.f32 %v7795_v10, %v7794_v12 }
 0x405   : > { %v7797_v11 = vpop.f32.mrf.mxu0 }
 0x406   : > { %2197 = vst.msk [vmem:[#allocation3 + $0x18] sm:$0xff] %vm1328_vm3, %v2189_v13  ;;  %v2172_v32 = vadd.f32 %v7796_v15, %v7509_v48  ;;  %v2217_v0 = vadd.f32 %v2213_v26, %v2189_v13 }
 0x407   : > { %v7798_v16 = vpop.f32.mrf.mxu0 }
 0x408   : > { %v2190_v7 = vadd.f32 %v2172_v32, %v9487_v40  ;;  %v7799_v17 = vadd.f32 %v7798_v16, %v7797_v11  ;;  %v2223_v8 = vpack.c.bf16 %v2217_v0, %v2216_v34 }
 0x409   : > { %v7800_v9 = vpop.f32.mrf.mxu0 }
 0x40a   : > { %2198 = vst.msk [vmem:[#allocation3 + $0x20] sm:$0xff] %vm1328_vm3, %v2190_v7  ;;  %v2175_v21 = vadd.f32 %v7799_v17, %v7509_v48  ;;  %v2218_v33 = vadd.f32 %v2213_v26, %v2190_v7 }
 0x40b   : > { %v7801_v18 = vpop.f32.mrf.mxu0 }
 0x40c   : > { %v2191_v5 = vadd.f32 %v2175_v21, %v9497_v49  ;;  %v7802_v6 = vadd.f32 %v7801_v18, %v7800_v9 }
 0x40d   : > { %v7803_v4 = vpop.f32.mrf.mxu0 }
 0x40e   : > { %2199 = vst.msk [vmem:[#allocation3 + $0x28] sm:$0xff] %vm1328_vm3, %v2191_v5  ;;  %v2180_v28 = vadd.f32 %v7802_v6, %v7509_v48  ;;  %v2219_v30 = vadd.f32 %v2213_v26, %v2191_v5 }
 0x40f   : > { %v7804_v20 = vpop.f32.mrf.mxu0 }
 0x410   : > { %v2192_v23 = vadd.f32 %v2180_v28, %v9482_v36  ;;  %v7805_v40 = vadd.f32 %v7804_v20, %v7803_v4  ;;  %v2224_v36 = vpack.c.bf16 %v2219_v30, %v2218_v33 }
 0x412   : > { %2200 = vst.msk [vmem:[#allocation3 + $0x30] sm:$0xff] %vm1328_vm3, %v2192_v23  ;;  %v2183_v25 = vadd.f32 %v7805_v40, %v7509_v48  ;;  %v2220_v27 = vadd.f32 %v2213_v26, %v2192_v23 }
 0x414   : > { %v2193_v49 = vadd.f32 %v2183_v25, %v9492_v44  ;;  %v2214_v44 = vadd.f32 %v2213_v26, %v2186_v55 }
 0x416   : > { %2201 = vst.msk [vmem:[#allocation3 + $0x38] sm:$0xff] %vm1328_vm3, %v2193_v49  ;;  %v2221_v29 = vadd.f32 %v2213_v26, %v2193_v49  ;;  %v2222_v35 = vpack.c.bf16 %v2215_v14, %v2214_v44 }
 0x418   : > { %v2225_v31 = vpack.c.bf16 %v2221_v29, %v2220_v27 }
 0x41a   : > { %8060 = vmatprep.subr.bf16.mxu1 %v2225_v31 }
 0x41b   : > { %8061 = vmatpush3.bf16.msra.mxu1 %v2225_v31 }
 0x41c   : > { %8062 = vmatprep.subr.bf16.mxu1 %v2224_v36 }
 0x41f   : > { %8063 = vmatpush3.bf16.msra.mxu1 %v2224_v36 }
 0x420   : > { %8064 = vmatprep.subr.bf16.mxu1 %v2223_v8 }
 0x423   : > { %8065 = vmatpush3.bf16.msra.mxu1 %v2223_v8 }
 0x424   : > { %8066 = vmatprep.subr.bf16.mxu1 %v2222_v35 }
 0x427   : > { %8067 = vmatpush3.bf16.msra.mxu1 %v2222_v35 }
 0x42a   : > { %8069 = vmatmul.mubr.msk.bf16.vlgmr.msra.gmra.mxu1 %vm1328_vm3, %v8603_v45 }
 0x42b   : > { %8072 = vmatprep.mubr.msk.bf16.mxu1 %vm1328_vm3, %v8604_v37 }
 0x432   : > { %8073 = vmatmul.mubr.msk.bf16.gmra.mxu1 %vm1328_vm3, %v8605_v38 }
 0x4ea   : > { %v8070_v39 = vpop.f32.mrf.mxu1 }
 0x4eb   : > { %2325 = vst.msk [vmem:[#allocation4 + $0x10] sm:$0xff] %vm1328_vm3, %v8070_v39 }
 0x4ec   : > { %v2292_v41 = vpop.f32.mrf.mxu1 }
 0x4ed   : > { %2323 = vst.msk [vmem:[#allocation4] sm:$0xff] %vm1328_vm3, %v2292_v41 }
 0x4ee   : > { %v8071_v42 = vpop.f32.mrf.mxu1 }
 0x4ef   : > { %2326 = vst.msk [vmem:[#allocation4 + $0x18] sm:$0xff] %vm1328_vm3, %v8071_v42 }
 0x4f0   : > { %v2295_v43 = vpop.f32.mrf.mxu1 }
 0x4f1   : > { %2324 = vst.msk [vmem:[#allocation4 + $0x8] sm:$0xff] %vm1328_vm3, %v2295_v43 }
 0x4f2   : > { %v8074_v46 = vpop.f32.mrf.mxu1 }
 0x4f3   : > { %2329 = vst.msk [vmem:[#allocation4 + $0x30] sm:$0xff] %vm1328_vm3, %v8074_v46 }
 0x4f4   : > { %v2308_v47 = vpop.f32.mrf.mxu1 }
 0x4f5   : > { %2327 = vst.msk [vmem:[#allocation4 + $0x20] sm:$0xff] %vm1328_vm3, %v2308_v47 }
 0x4f6   : > { %v8075_v48 = vpop.f32.mrf.mxu1 }
 0x4f7   : > { %2330 = vst.msk [vmem:[#allocation4 + $0x38] sm:$0xff] %vm1328_vm3, %v8075_v48 }
 0x4f8   : > { %v2311_v50 = vpop.f32.mrf.mxu1 }
 0x4f9   : > { %2328 = vst.msk [vmem:[#allocation4 + $0x28] sm:$0xff] %vm1328_vm3, %v2311_v50 }
 0x4fa PF: > { %v2331_v51 = vld [vmem:[#allocation2] sm:$0xff]  ;;  %vm2341_vm5 = vcmask 523264   ;;  %v2333_v52 = vld [vmem:[#allocation2 + $0x10] sm:$0xff]  ;;  %v2332_v53 = vld [vmem:[#allocation2 + $0x8] sm:$0xff]  ;;  %s11268_s26 = sld [smem:[#allocation32_spill]]  ;;  %v9143_v50 = vmov 0  }
 0x4fb   : > { %v2342_v54 = vsel %vm2341_vm5, %v2331_v51, 0.0  ;;  %v2348_v55 = vsel %vm2341_vm5, %v2333_v52, 0.0  ;;  %v2334_v56 = vld [vmem:[#allocation2 + $0x18] sm:$0xff]  ;;  %v2335_v57 = vld [vmem:[#allocation2 + $0x20] sm:$0xff]  ;;  %v2336_v58 = vld [vmem:[#allocation2 + $0x28] sm:$0xff]  ;;  %v2345_v61 = vsel %vm2341_vm5, %v2332_v53, 0.0  ;;  %2579 = vmatprep.mubr.bf16.mxu0 %v9143_v50 }
 0x4fc   : > { %2343 = vadd.xlane.f32.xlu0 %v2342_v54  ;;  %2349 = vadd.xlane.f32.xlu1 %v2348_v55  ;;  %v2337_v59 = vld [vmem:[#allocation2 + $0x30] sm:$0xff]  ;;  %v2338_v60 = vld [vmem:[#allocation2 + $0x38] sm:$0xff]  ;;  %v2351_v62 = vsel %vm2341_vm5, %v2334_v56, 0.0  ;;  %v2354_v63 = vsel %vm2341_vm5, %v2335_v57, 0.0  ;;  %v2357_v1 = vsel %vm2341_vm5, %v2336_v58, 0.0  ;;  %vm2644_vm6 = vcmask 130048  }
 0x4fd   : > { %v2360_v2 = vsel %vm2341_vm5, %v2337_v59, 0.0  ;;  %v2363_v3 = vsel %vm2341_vm5, %v2338_v60, 0.0  ;;  %s9145_s1 = smov 48   ;;  %vm4660_vm7 = vcmask 261120   ;;  %p7694_p8 = scmp.ne.s32.totalorder %s9091_s22, 1 }
 0x4fe   : > { %s11273_s22 = sld [smem:[#allocation24_spill]] (!%p7694_p8) }
 0x500   : > { %2346 = vadd.xlane.f32.xlu0 %v2345_v61  ;;  %2352 = vadd.xlane.f32.xlu1 %v2351_v62  ;;  %v8610_v39 = vld [vmem:[%s11268_s26 + $0x34] ss:$8 sps:$4 sm:$0xff]   ;;  %v8612_v41 = vld [vmem:[%s11268_s26 + $0x30] ss:$8 sps:$4 sm:$0xff]   ;;  %v8613_v42 = vld [vmem:[%s11268_s26 + $0x24] ss:$8 sps:$4 sm:$0xff]   ;;  %v2447_v61 = vlaneseq }
 0x501   : > { %2555 = vmatprep.subr.bf16.mxu0 %v8610_v39  ;;  %v8615_v43 = vld [vmem:[%s11268_s26 + $0x20] ss:$8 sps:$4 sm:$0xff]   ;;  %v8616_v46 = vld [vmem:[%s11268_s26 + $0x14] ss:$8 sps:$4 sm:$0xff]   ;;  %v8618_v47 = vld [vmem:[%s11268_s26 + $0x10] ss:$8 sps:$4 sm:$0xff]  }
 0x502   : > { %2556 = vmatpush1.bf16.msra.mxu0 %v8612_v41  ;;  %v8619_v48 = vld [vmem:[%s11268_s26 + $0x4] ss:$8 sps:$4 sm:$0xff]  }
 0x503   : > { %2557 = vmatprep.subr.bf16.mxu0 %v8613_v42 }
 0x504   : > { %2355 = vadd.xlane.f32.xlu0 %v2354_v63  ;;  %2358 = vadd.xlane.f32.xlu1 %v2357_v1 }
 0x506   : > { %2558 = vmatpush1.bf16.msra.mxu0 %v8615_v43 }
 0x507   : > { %2559 = vmatprep.subr.bf16.mxu0 %v8616_v46 }
 0x508   : > { %2361 = vadd.xlane.f32.xlu0 %v2360_v2  ;;  %2364 = vadd.xlane.f32.xlu1 %v2363_v3 }
 0x50a   : > { %2560 = vmatpush1.bf16.msra.mxu0 %v8618_v47 }
 0x50b   : > { %2561 = vmatprep.subr.bf16.mxu0 %v8619_v48 }
 0x585   : > { %v2344_v12 = vpop.xlane.xlu0 %2343  ;;  %v2350_v24 = vpop.xlane.xlu1 %2349 }
 0x586   : > { %v2367_v10 = vmul.f32 0.015625, %v2344_v12  ;;  %v2369_v13 = vmul.f32 0.015625, %v2350_v24  ;;  %v9627_v12 = vshrl.u32 %v2447_v61, 7 }
 0x588   : > { %v9578_v15 = vsub.f32 %v2331_v51, %v2367_v10  ;;  %v9580_v11 = vsub.f32 %v2333_v52, %v2369_v13  ;;  %v8621_v51 = vld [vmem:[%s11268_s26] ss:$8 sps:$4 sm:$0xff]   ;;  %s11216_s26 = smov 112  }
 0x589   : > { %v2347_v32 = vpop.xlane.xlu0 %2346  ;;  %v2353_v16 = vpop.xlane.xlu1 %2352  ;;  %2562 = vmatpush1.bf16.msra.mxu0 %v8621_v51 }
 0x58a   : > { %v2368_v7 = vmul.f32 0.015625, %v2347_v32  ;;  %v2370_v17 = vmul.f32 0.015625, %v2353_v16  ;;  %v2383_v9 = vmul.f32 %v9578_v15, %v9578_v15  ;;  %v2385_v21 = vmul.f32 %v9580_v11, %v9580_v11 }
 0x58c   : > { %v9586_v18 = vsub.f32 %v2332_v53, %v2368_v7  ;;  %v9588_v5 = vsub.f32 %v2334_v56, %v2370_v17  ;;  %v2391_v6 = vsel %vm2341_vm5, %v2383_v9, 0.0  ;;  %v2397_v28 = vsel %vm2341_vm5, %v2385_v21, 0.0  ;;  %v2339_v9 = vld [vmem:[%s9388_s28] sm:$0xff] }
 0x58d   : > { %2392 = vadd.xlane.f32.xlu0 %v2391_v6  ;;  %v2356_v19 = vpop.xlane.xlu0 %2355  ;;  %v2359_v4 = vpop.xlane.xlu1 %2358  ;;  %v9630_v7 = vsub.s32 0, %v9627_v12 }
 0x58e   : > { %v2371_v20 = vmul.f32 0.015625, %v2356_v19  ;;  %v2372_v22 = vmul.f32 0.015625, %v2359_v4  ;;  %v2384_v23 = vmul.f32 %v9586_v18, %v9586_v18  ;;  %v2386_v40 = vmul.f32 %v9588_v5, %v9588_v5 }
 0x590   : > { %v9596_v25 = vsub.f32 %v2335_v57, %v2371_v20  ;;  %v9598_v26 = vsub.f32 %v2336_v58, %v2372_v22  ;;  %v2394_v49 = vsel %vm2341_vm5, %v2384_v23, 0.0  ;;  %v2400_v30 = vsel %vm2341_vm5, %v2386_v40, 0.0 }
 0x591   : > { %2398 = vadd.xlane.f32.xlu0 %v2397_v28  ;;  %2395 = vadd.xlane.f32.xlu1 %v2394_v49  ;;  %v2362_v27 = vpop.xlane.xlu0 %2361  ;;  %v2365_v29 = vpop.xlane.xlu1 %2364  ;;  %v2450_v28 = vrot.slane %v2339_v9, %v9630_v7  ;;  %v9636_v20 = vsub.s32 1, %v9627_v12 }
 0x592   : > { %v2373_v31 = vmul.f32 0.015625, %v2362_v27  ;;  %v2374_v33 = vmul.f32 0.015625, %v2365_v29  ;;  %v2387_v36 = vmul.f32 %v9596_v25, %v9596_v25  ;;  %v2388_v0 = vmul.f32 %v9598_v26, %v9598_v26 }
 0x593   : > { %v2462_v29 = vrot.slane %v2339_v9, %v9636_v20 }
 0x594   : > { %v9606_v34 = vsub.f32 %v2337_v59, %v2373_v31  ;;  %v9608_v8 = vsub.f32 %v2338_v60, %v2374_v33  ;;  %v2403_v14 = vsel %vm2341_vm5, %v2387_v36, 0.0  ;;  %v2406_v44 = vsel %vm2341_vm5, %v2388_v0, 0.0 }
 0x595   : > { %2401 = vadd.xlane.f32.xlu1 %v2400_v30  ;;  %2404 = vadd.xlane.f32.xlu0 %v2403_v14 }
 0x596   : > { %v2389_v35 = vmul.f32 %v9606_v34, %v9606_v34  ;;  %v2390_v45 = vmul.f32 %v9608_v8, %v9608_v8 }
 0x598   : > { %v2409_v37 = vsel %vm2341_vm5, %v2389_v35, 0.0  ;;  %v2412_v38 = vsel %vm2341_vm5, %v2390_v45, 0.0 }
 0x599   : > { %2407 = vadd.xlane.f32.xlu1 %v2406_v44  ;;  %2410 = vadd.xlane.f32.xlu0 %v2409_v37 }
 0x59d   : > { %2413 = vadd.xlane.f32.xlu1 %v2412_v38 }
 0x616   : > { %v2393_v52 = vpop.xlane.xlu0 %2392 }
 0x617   : > { %v2415_v53 = vmul.f32 0.015625, %v2393_v52 }
 0x619   : > { %v2423_v54 = vadd.f32 1e-06, %v2415_v53 }
 0x61a   : > { %v2396_v55 = vpop.xlane.xlu1 %2395  ;;  %v2399_v56 = vpop.xlane.xlu0 %2398 }
 0x61b   : > { %8666 = vrsqrt.f32 %v2423_v54  ;;  %v2416_v57 = vmul.f32 0.015625, %v2396_v55  ;;  %v2417_v58 = vmul.f32 0.015625, %v2399_v56 }
 0x61d   : > { %v2424_v59 = vadd.f32 1e-06, %v2416_v57  ;;  %v2425_v60 = vadd.f32 1e-06, %v2417_v58  ;;  %v2483_v58 = vld [vmem:[%s9364_s24] sm:$0x3] }
 0x61e   : > { %v2402_v62 = vpop.xlane.xlu1 %2401  ;;  %v2405_v63 = vpop.xlane.xlu0 %2404  ;;  %s9144_s24 = smov 64  }
 0x61f   : > { %8668 = vrsqrt.f32 %v2424_v59  ;;  %v2418_v1 = vmul.f32 0.015625, %v2402_v62  ;;  %v2419_v3 = vmul.f32 0.015625, %v2405_v63 }
 0x620   : > { %8670 = vrsqrt.f32 %v2425_v60  ;;  %v2488_v60 = vrot.slane %v2483_v58, %v9630_v7 }
 0x621   : > { %v2426_v2 = vadd.f32 1e-06, %v2418_v1  ;;  %v2427_v13 = vadd.f32 1e-06, %v2419_v3 }
 0x622   : > { %v2408_v24 = vpop.xlane.xlu1 %2407  ;;  %v2411_v16 = vpop.xlane.xlu0 %2410 }
 0x623   : > { %8672 = vrsqrt.f32 %v2426_v2  ;;  %v2420_v10 = vmul.f32 0.015625, %v2408_v24  ;;  %v2421_v19 = vmul.f32 0.015625, %v2411_v16 }
 0x625   : > { %v2428_v32 = vadd.f32 1e-06, %v2420_v10  ;;  %v2429_v40 = vadd.f32 1e-06, %v2421_v19 }
 0x626   : > { %v2414_v17 = vpop.xlane.xlu1 %2413 }
 0x627   : > { %8674 = vrsqrt.f32 %v2428_v32  ;;  %v2422_v21 = vmul.f32 0.015625, %v2414_v17 }
 0x628   : > { %v8667_v6 = vpop.eup %8666  ;;  %8676 = vrsqrt.f32 %v2427_v13 }
 0x629   : > { %v2439_v4 = vmul.f32 %v8667_v6, %v9578_v15  ;;  %v2430_v22 = vadd.f32 1e-06, %v2422_v21 }
 0x62b   : > { %v2451_v27 = vmul.f32 %v2450_v28, %v2439_v4  ;;  %8678 = vrsqrt.f32 %v2430_v22 }
 0x62c   : > { %v8669_v23 = vpop.eup %8668  ;;  %8680 = vrsqrt.f32 %v2429_v40 }
 0x62d   : > { %v2440_v49 = vmul.f32 %v8669_v23, %v9586_v18  ;;  %v8671_v30 = vpop.eup %8670  ;;  %v2463_v36 = vadd.f32 %v2462_v29, %v2451_v27 }
 0x62e   : > { %v2441_v0 = vmul.f32 %v8671_v30, %v9580_v11 }
 0x62f   : > { %v2452_v31 = vmul.f32 %v2450_v28, %v2440_v49  ;;  %v2492_v49 = vrot.slane %v2483_v58, %v9636_v20 }
 0x630   : > { %v8673_v33 = vpop.eup %8672  ;;  %v2453_v18 = vmul.f32 %v2450_v28, %v2441_v0 }
 0x631   : > { %v2464_v15 = vadd.f32 %v2462_v29, %v2452_v31  ;;  %v2442_v14 = vmul.f32 %v8673_v33, %v9588_v5 }
 0x632   : > { %v2465_v41 = vadd.f32 %v2462_v29, %v2453_v18 }
 0x633   : > { %v2479_v44 = vpack.c.bf16 %v2464_v15, %v2463_v36  ;;  %v2454_v35 = vmul.f32 %v2450_v28, %v2442_v14 }
 0x634   : > { %v8675_v45 = vpop.eup %8674 }
 0x635   : > { %7542 = vmatmul.mubr.msk.bf16.vlgmr.msra.gmra.mxu0 %vm2341_vm5, %v2479_v44  ;;  %v8677_v37 = vpop.eup %8676  ;;  %v2466_v38 = vadd.f32 %v2462_v29, %v2454_v35  ;;  %v2444_v39 = vmul.f32 %v8675_v45, %v9598_v26 }
 0x636   : > { %2589 = vmatprep.mubr.bf16.mxu0 %v9143_v50  ;;  %v2443_v42 = vmul.f32 %v8677_v37, %v9596_v25 }
 0x637   : > { %v2480_v43 = vpack.c.bf16 %v2466_v38, %v2465_v41  ;;  %v2456_v46 = vmul.f32 %v2450_v28, %v2444_v39 }
 0x638   : > { %v8679_v11 = vpop.eup %8678  ;;  %v2455_v5 = vmul.f32 %v2450_v28, %v2443_v42 }
 0x639   : > { %v8681_v47 = vpop.eup %8680  ;;  %v2468_v48 = vadd.f32 %v2462_v29, %v2456_v46  ;;  %v2446_v51 = vmul.f32 %v8679_v11, %v9608_v8 }
 0x63a   : > { %v2467_v52 = vadd.f32 %v2462_v29, %v2455_v5  ;;  %v2445_v53 = vmul.f32 %v8681_v47, %v9606_v34 }
 0x63b   : > { %v2458_v54 = vmul.f32 %v2450_v28, %v2446_v51 }
 0x63c   : > { %v2481_v26 = vpack.c.bf16 %v2468_v48, %v2467_v52  ;;  %v2457_v25 = vmul.f32 %v2450_v28, %v2445_v53 }
 0x63d   : > { %7543 = vmatmul.mubr.msk.bf16.gmra.mxu0 %vm2341_vm5, %v2480_v43  ;;  %v2470_v55 = vadd.f32 %v2462_v29, %v2458_v54 }
 0x63e   : > { %2599 = vmatprep.mubr.bf16.mxu0 %v9143_v50  ;;  %v2469_v56 = vadd.f32 %v2462_v29, %v2457_v25 }
 0x640   : > { %v2482_v57 = vpack.c.bf16 %v2470_v55, %v2469_v56 }
 0x645   : > { %7544 = vmatmul.mubr.msk.bf16.gmra.mxu0 %vm2341_vm5, %v2481_v26 }
 0x646   : > { %2609 = vmatprep.mubr.bf16.mxu0 %v9143_v50 }
 0x64d   : > { %7545 = vmatmul.mubr.msk.bf16.gmra.mxu0 %vm2341_vm5, %v2482_v57 }
 0x6f5   : > { %v2581_v59 = vpop.f32.mrf.mxu0 }
 0x6f6   : > { %v2582_v62 = vadd.f32 %v2581_v59, %v2488_v60 }
 0x6f7   : > { %v2583_v8 = vpop.f32.mrf.mxu0 }
 0x6f8   : > { %v2584_v38 = vadd.f32 %v2583_v8, %v2492_v49 }
 0x6f9   : > { %v2585_v61 = vpop.f32.mrf.mxu0 }
 0x6fa   : > { %v2586_v34 = vadd.f32 %v2585_v61, %v2488_v60 }
 0x6fb   : > { %v2587_v63 = vpop.f32.mrf.mxu0 }
 0x6fc   : > { %v9655_v1 = vpack.c.bf16 %v2586_v34, %v2582_v62  ;;  %v2588_v18 = vadd.f32 %v2587_v63, %v2492_v49 }
 0x6fd   : > { %v2591_v2 = vpop.f32.mrf.mxu0 }
 0x6fe   : > { %8084 = vmatprep.mubr.msk.bf16.mxu1 %vm2644_vm6, %v9655_v1  ;;  %v2592_v28 = vadd.f32 %v2591_v2, %v2488_v60  ;;  %v9685_v39 = vpack.c.bf16 %v2588_v18, %v2584_v38 }
 0x6ff   : > { %v2593_v3 = vpop.f32.mrf.mxu0 }
 0x700   : > { %v2594_v45 = vadd.f32 %v2593_v3, %v2492_v49 }
 0x701   : > { %v2595_v24 = vpop.f32.mrf.mxu0 }
 0x702   : > { %v2596_v6 = vadd.f32 %v2595_v24, %v2488_v60 }
 0x703   : > { %v2597_v10 = vpop.f32.mrf.mxu0 }
 0x704   : > { %v9662_v23 = vpack.c.bf16 %v2596_v6, %v2592_v28  ;;  %v2598_v44 = vadd.f32 %v2597_v10, %v2492_v49 }
 0x705   : > { %v2601_v13 = vpop.f32.mrf.mxu0 }
 0x706   : > { %v2602_v17 = vadd.f32 %v2601_v13, %v2488_v60  ;;  %v9679_v37 = vpack.c.bf16 %v2598_v44, %v2594_v45 }
 0x707   : > { %v2603_v32 = vpop.f32.mrf.mxu0 }
 0x708   : > { %v2604_v0 = vadd.f32 %v2603_v32, %v2492_v49 }
 0x709   : > { %v2605_v16 = vpop.f32.mrf.mxu0 }
 0x70a   : > { %v2606_v9 = vadd.f32 %v2605_v16, %v2488_v60 }
 0x70b   : > { %v2607_v21 = vpop.f32.mrf.mxu0 }
 0x70c   : > { %v9659_v19 = vpack.c.bf16 %v2606_v9, %v2602_v17  ;;  %v2608_v31 = vadd.f32 %v2607_v21, %v2492_v49 }
 0x70d   : > { %v2611_v4 = vpop.f32.mrf.mxu0 }
 0x70e   : > { %2640 = vrot.lane.b32.xlu1 %v9659_v19, %s9144_s24  ;;  %v2612_v27 = vadd.f32 %v2611_v4, %v2488_v60  ;;  %v9672_v35 = vpack.c.bf16 %v2608_v31, %v2604_v0 }
 0x70f   : > { %v2613_v22 = vpop.f32.mrf.mxu0 }
 0x710   : > { %v2614_v33 = vadd.f32 %v2613_v22, %v2492_v49 }
 0x711   : > { %v2615_v40 = vpop.f32.mrf.mxu0 }
 0x712   : > { %v2616_v29 = vadd.f32 %v2615_v40, %v2488_v60  ;;  %2638 = vrot.lane.b32.xlu1 %v9662_v23, %s9144_s24 }
 0x713   : > { %v2617_v30 = vpop.f32.mrf.mxu0 }
 0x714   : > { %v9666_v36 = vpack.c.bf16 %v2616_v29, %v2612_v27  ;;  %v2618_v15 = vadd.f32 %v2617_v30, %v2492_v49 }
 0x716   : > { %v9668_v14 = vpack.c.bf16 %v2618_v15, %v2614_v33  ;;  %2636 = vrot.lane.b32.xlu1 %v9655_v1, %s9144_s24  ;;  %2642 = vrot.lane.b32.xlu0 %v9666_v36, %s9144_s24  ;;  %s9147_s24 = smov 32  }
 0x718   : > { %8092 = vmatprep.subr.bf16.mxu0 %v9668_v14 }
 0x719   : > { %8093 = vmatpush3.bf16.msra.mxu0 %v9668_v14 }
 0x71a   : > { %2931 = vrot.lane.b32.xlu1 %v9659_v19, %s9145_s1  ;;  %8094 = vmatprep.subr.bf16.mxu0 %v9672_v35 }
 0x71b   : > { %2933 = vrot.lane.b32.xlu0 %v9666_v36, %s9145_s1 }
 0x71d   : > { %8095 = vmatpush3.bf16.msra.mxu0 %v9672_v35 }
 0x71e   : > { %2927 = vrot.lane.b32.xlu1 %v9655_v1, %s9145_s1  ;;  %8096 = vmatprep.subr.bf16.mxu0 %v9679_v37 }
 0x71f   : > { %2929 = vrot.lane.b32.xlu0 %v9662_v23, %s9145_s1  ;;  %s9148_s1 = smov 96  }
 0x721   : > { %8097 = vmatpush3.bf16.msra.mxu0 %v9679_v37 }
 0x722   : > { %2921 = vrot.lane.b32.xlu1 %v9662_v23, %s11216_s26  ;;  %8098 = vmatprep.subr.bf16.mxu0 %v9685_v39 }
 0x723   : > { %2919 = vrot.lane.b32.xlu0 %v9655_v1, %s11216_s26 }
 0x725   : > { %8099 = vmatpush3.bf16.msra.mxu0 %v9685_v39 }
 0x726   : > { %2925 = vrot.lane.b32.xlu1 %v9666_v36, %s11216_s26 }
 0x727   : > { %2923 = vrot.lane.b32.xlu0 %v9659_v19, %s11216_s26 }
 0x780   : > { %v2641_v43 = vpop.permute.xlu1 %2640 }
 0x781   : > { %v2664_v46 = vsel %vm2644_vm6, %v2641_v43, 0 }
 0x784   : > { %v2639_v11 = vpop.permute.xlu1 %2638 }
 0x785   : > { %v2661_v47 = vsel %vm2644_vm6, %v2639_v11, 0 }
 0x788   : > { %v2643_v41 = vpop.permute.xlu0 %2642  ;;  %v2637_v5 = vpop.permute.xlu1 %2636 }
 0x789   : > { %8448 = vmatprep.subr.msk.bf16.mxu1 %vm2644_vm6, %v2643_v41  ;;  %v2667_v42 = vsel %vm2644_vm6, %v2643_v41, 0  ;;  %v2658_v48 = vsel %vm2644_vm6, %v2637_v5, 0 }
 0x78a   : > { %8077 = vmatpush3.bf16.xpose.msra.mxu1 %v2667_v42 }
 0x78b   : > { %8449 = vmatprep.subr.msk.bf16.mxu1 %vm2644_vm6, %v2641_v43 }
 0x78c   : > { %v2932_v53 = vpop.permute.xlu1 %2931 }
 0x78d   : > { %v2934_v51 = vpop.permute.xlu0 %2933  ;;  %v2954_v25 = vsel %vm2644_vm6, %v2932_v53, 0 }
 0x78e   : > { %v2957_v52 = vsel %vm2644_vm6, %v2934_v51, 0 }
 0x790   : > { %v2928_v56 = vpop.permute.xlu1 %2927 }
 0x791   : > { %v2930_v26 = vpop.permute.xlu0 %2929  ;;  %v2948_v57 = vsel %vm2644_vm6, %v2928_v56, 0 }
 0x792   : > { %8079 = vmatpush3.bf16.xpose.msra.mxu1 %v2664_v46  ;;  %v2951_v55 = vsel %vm2644_vm6, %v2930_v26, 0 }
 0x793   : > { %8450 = vmatprep.subr.msk.bf16.mxu1 %vm2644_vm6, %v2639_v11 }
 0x794   : > { %v2922_v58 = vpop.permute.xlu1 %2921 }
 0x795   : > { %v2920_v54 = vpop.permute.xlu0 %2919 }
 0x798   : > { %v2926_v60 = vpop.permute.xlu1 %2925 }
 0x799   : > { %v2924_v59 = vpop.permute.xlu0 %2923 }
 0x79a   : > { %8081 = vmatpush3.bf16.xpose.msra.mxu1 %v2661_v47 }
 0x79b   : > { %8451 = vmatprep.subr.msk.bf16.mxu1 %vm2644_vm6, %v2637_v5 }
 0x7a2   : > { %8083 = vmatpush3.bf16.xpose.msra.mxu1 %v2658_v48 }
 0x7a3   : > { %8452 = vmatprep.subr.msk.bf16.mxu1 %vm2644_vm6, %v2934_v51 }
 0x7a9   : > { %8085 = vmatmul.mubr.msk.bf16.vlgmr.msra.gmra.mxu1 %vm2644_vm6, %v9662_v23 }
 0x7aa   : > { %8088 = vmatprep.mubr.msk.bf16.mxu1 %vm2644_vm6, %v9659_v19  ;;  %8109 = vmatpush3.bf16.xpose.msra.mxu1 %v2957_v52 }
 0x7ab   : > { %8453 = vmatprep.subr.msk.bf16.mxu1 %vm2644_vm6, %v2932_v53 }
 0x7b1   : > { %8089 = vmatmul.mubr.msk.bf16.gmra.mxu1 %vm2644_vm6, %v9666_v36 }
 0x7b2   : > { %8111 = vmatpush3.bf16.xpose.msra.mxu1 %v2954_v25  ;;  %8116 = vmatprep.mubr.msk.bf16.mxu1 %vm2644_vm6, %v2920_v54 }
 0x7b3   : > { %8454 = vmatprep.subr.msk.bf16.mxu1 %vm2644_vm6, %v2930_v26 }
 0x7ba   : > { %8113 = vmatpush3.bf16.xpose.msra.mxu1 %v2951_v55 }
 0x7bb   : > { %8455 = vmatprep.subr.msk.bf16.mxu1 %vm2644_vm6, %v2928_v56 }
 0x7c2   : > { %8115 = vmatpush3.bf16.xpose.msra.mxu1 %v2948_v57 }
 0x7c9   : > { %8117 = vmatmul.mubr.msk.bf16.vlgmr.msra.gmra.mxu1 %vm2644_vm6, %v2922_v58 }
 0x7ca   : > { %8120 = vmatprep.mubr.msk.bf16.mxu1 %vm2644_vm6, %v2924_v59 }
 0x7d1   : > { %8121 = vmatmul.mubr.msk.bf16.gmra.mxu1 %vm2644_vm6, %v2926_v60 }
 0x869   : > { %v8086_v8 = vpop.f32.mrf.mxu1 }
 0x86a   : > { %v9724_v61 = vmul.f32 0.25, %v8086_v8 }
 0x86b   : > { %v2703_v62 = vpop.f32.mrf.mxu1 }
 0x86c   : > { %v9726_v34 = vmul.f32 0.25, %v2703_v62  ;;  %v2748_v63 = vsel %vm2341_vm5, %v9724_v61, -inf }
 0x86d   : > { %2749 = vmax.xlane.f32.xlu0 %v2748_v63  ;;  %v8087_v2 = vpop.f32.mrf.mxu1 }
 0x86e   : > { %v9730_v24 = vmul.f32 0.25, %v8087_v2  ;;  %v2742_v13 = vsel %vm2341_vm5, %v9726_v34, -inf }
 0x86f   : > { %v2706_v3 = vpop.f32.mrf.mxu1 }
 0x870   : > { %v9732_v10 = vmul.f32 0.25, %v2706_v3  ;;  %v2751_v21 = vsel %vm2341_vm5, %v9730_v24, -inf }
 0x871   : > { %2743 = vmax.xlane.f32.xlu0 %v2742_v13  ;;  %v8090_v32 = vpop.f32.mrf.mxu1 }
 0x872   : > { %v2745_v16 = vsel %vm2341_vm5, %v9732_v10, -inf  ;;  %v9738_v9 = vmul.f32 0.25, %v8090_v32 }
 0x873   : > { %2746 = vmax.xlane.f32.xlu1 %v2745_v16  ;;  %v2719_v17 = vpop.f32.mrf.mxu1 }
 0x874   : > { %v9744_v22 = vmul.f32 0.25, %v2719_v17  ;;  %v2760_v49 = vsel %vm2341_vm5, %v9738_v9, -inf }
 0x875   : > { %2752 = vmax.xlane.f32.xlu0 %v2751_v21  ;;  %v8091_v6 = vpop.f32.mrf.mxu1 }
 0x876   : > { %v9742_v4 = vmul.f32 0.25, %v8091_v6  ;;  %v2754_v29 = vsel %vm2341_vm5, %v9744_v22, -inf }
 0x877   : > { %v2722_v28 = vpop.f32.mrf.mxu1 }
 0x878   : > { %v9746_v40 = vmul.f32 0.25, %v2722_v28  ;;  %v2763_v27 = vsel %vm2341_vm5, %v9742_v4, -inf }
 0x879   : > { %2761 = vmax.xlane.f32.xlu0 %v2760_v49  ;;  %2764 = vmax.xlane.f32.xlu1 %v2763_v27 }
 0x87a   : > { %v2757_v30 = vsel %vm2341_vm5, %v9746_v40, -inf }
 0x87d   : > { %2755 = vmax.xlane.f32.xlu0 %v2754_v29  ;;  %2758 = vmax.xlane.f32.xlu1 %v2757_v30 }
 0x889   : > { %v8118_v31 = vpop.f32.mrf.mxu1 }
 0x88a   : > { %v9756_v33 = vmul.f32 0.25, %v8118_v31 }
 0x88b   : > { %v2993_v15 = vpop.f32.mrf.mxu1 }
 0x88c   : > { %v9758_v0 = vmul.f32 0.25, %v2993_v15  ;;  %v3038_v44 = vsel %vm2341_vm5, %v9756_v33, -inf }
 0x88d   : > { %3039 = vmax.xlane.f32.xlu0 %v3038_v44  ;;  %v8119_v45 = vpop.f32.mrf.mxu1 }
 0x88e   : > { %v9762_v18 = vmul.f32 0.25, %v8119_v45  ;;  %v3032_v42 = vsel %vm2341_vm5, %v9758_v0, -inf }
 0x88f   : > { %v2996_v38 = vpop.f32.mrf.mxu1 }
 0x890   : > { %v9764_v41 = vmul.f32 0.25, %v2996_v38  ;;  %v3041_v43 = vsel %vm2341_vm5, %v9762_v18, -inf }
 0x891   : > { %3033 = vmax.xlane.f32.xlu0 %v3032_v42  ;;  %3042 = vmax.xlane.f32.xlu1 %v3041_v43  ;;  %v8122_v46 = vpop.f32.mrf.mxu1 }
 0x892   : > { %v9770_v11 = vmul.f32 0.25, %v8122_v46  ;;  %v3035_v48 = vsel %vm2341_vm5, %v9764_v41, -inf }
 0x893   : > { %v3009_v47 = vpop.f32.mrf.mxu1 }
 0x894   : > { %v9772_v5 = vmul.f32 0.25, %v3009_v47  ;;  %v3050_v51 = vsel %vm2341_vm5, %v9770_v11, -inf }
 0x895   : > { %3036 = vmax.xlane.f32.xlu1 %v3035_v48  ;;  %3051 = vmax.xlane.f32.xlu0 %v3050_v51  ;;  %v8123_v52 = vpop.f32.mrf.mxu1 }
 0x896   : > { %v9778_v53 = vmul.f32 0.25, %v8123_v52  ;;  %v3044_v25 = vsel %vm2341_vm5, %v9772_v5, -inf }
 0x897   : > { %v3012_v26 = vpop.f32.mrf.mxu1 }
 0x898   : > { %v9780_v54 = vmul.f32 0.25, %v3012_v26  ;;  %v3053_v55 = vsel %vm2341_vm5, %v9778_v53, -inf }
 0x899   : > { %3045 = vmax.xlane.f32.xlu0 %v3044_v25  ;;  %3054 = vmax.xlane.f32.xlu1 %v3053_v55 }
 0x89a   : > { %v3047_v56 = vsel %vm2341_vm5, %v9780_v54, -inf }
 0x89d   : > { %3048 = vmax.xlane.f32.xlu1 %v3047_v56 }
 0x8ae   : > { %3132 = vrot.lane.b32.xlu1 %v9672_v35, %s11216_s26 }
 0x8af   : > { %3134 = vrot.lane.b32.xlu0 %v9668_v14, %s11216_s26 }
 0x8f6   : > { %v2750_v57 = vpop.xlane.xlu0 %2749 }
 0x8f7   : > { %v2768_v58 = vsub.f32 %v9724_v61, %v2750_v57 }
 0x8f9   : > { %v2778_v59 = vmul.f32 1.442695, %v2768_v58 }
 0x8fa   : > { %v2744_v60 = vpop.xlane.xlu0 %2743 }
 0x8fb   : > { %8682 = vpow2.f32 %v2778_v59  ;;  %v2766_v8 = vsub.f32 %v9726_v34, %v2744_v60 }
 0x8fc   : > { %v2747_v62 = vpop.xlane.xlu1 %2746 }
 0x8fd   : > { %v2774_v63 = vmul.f32 1.442695, %v2766_v8  ;;  %v2767_v2 = vsub.f32 %v9732_v10, %v2747_v62 }
 0x8fe   : > { %v2753_v3 = vpop.xlane.xlu0 %2752 }
 0x8ff   : > { %8684 = vpow2.f32 %v2774_v63  ;;  %v2769_v13 = vsub.f32 %v9730_v24, %v2753_v3  ;;  %v2776_v32 = vmul.f32 1.442695, %v2767_v2 }
 0x901   : > { %v2780_v16 = vmul.f32 1.442695, %v2769_v13 }
 0x902   : > { %v2765_v17 = vpop.xlane.xlu1 %2764  ;;  %v2762_v21 = vpop.xlane.xlu0 %2761 }
 0x903   : > { %8686 = vpow2.f32 %v2780_v16  ;;  %v2773_v61 = vsub.f32 %v9742_v4, %v2765_v17  ;;  %v2772_v6 = vsub.f32 %v9738_v9, %v2762_v21 }
 0x904   : > { %8688 = vpow2.f32 %v2776_v32 }
 0x905   : > { %v2788_v28 = vmul.f32 1.442695, %v2773_v61  ;;  %v2786_v34 = vmul.f32 1.442695, %v2772_v6 }
 0x906   : > { %v2759_v49 = vpop.xlane.xlu1 %2758  ;;  %v2756_v27 = vpop.xlane.xlu0 %2755 }
 0x907   : > { %v2771_v10 = vsub.f32 %v9746_v40, %v2759_v49  ;;  %v2770_v29 = vsub.f32 %v9744_v22, %v2756_v27  ;;  %8690 = vpow2.f32 %v2786_v34 }
 0x908   : > { %v9800_v30 = vpop.eup %8682  ;;  %8692 = vpow2.f32 %v2788_v28 }
 0x909   : > { %v2784_v24 = vmul.f32 1.442695, %v2771_v10  ;;  %v2782_v31 = vmul.f32 1.442695, %v2770_v29  ;;  %v2796_v4 = vsel %vm2341_vm5, %v9800_v30, 0.0 }
 0x90a   : > { %2797 = vadd.xlane.f32.xlu0 %v2796_v4 }
 0x90b   : > { %8694 = vpow2.f32 %v2782_v31 }
 0x90c   : > { %v9804_v9 = vpop.eup %8684  ;;  %8696 = vpow2.f32 %v2784_v24 }
 0x90d   : > { %v2790_v15 = vsel %vm2341_vm5, %v9804_v9, 0.0 }
 0x90e   : > { %2791 = vadd.xlane.f32.xlu0 %v2790_v15 }
 0x910   : > { %v9808_v40 = vpop.eup %8686 }
 0x911   : > { %v2799_v22 = vsel %vm2341_vm5, %v9808_v40, 0.0  ;;  %v9812_v44 = vpop.eup %8688 }
 0x912   : > { %2800 = vadd.xlane.f32.xlu1 %v2799_v22  ;;  %v2793_v38 = vsel %vm2341_vm5, %v9812_v44, 0.0 }
 0x914   : > { %v9814_v45 = vpop.eup %8690 }
 0x915   : > { %v9818_v42 = vpop.eup %8692  ;;  %v2808_v43 = vsel %vm2341_vm5, %v9814_v45, 0.0 }
 0x916   : > { %2794 = vadd.xlane.f32.xlu1 %v2793_v38  ;;  %v3040_v46 = vpop.xlane.xlu0 %3039  ;;  %2809 = vadd.xlane.f32.xlu0 %v2808_v43  ;;  %v2811_v52 = vsel %vm2341_vm5, %v9818_v42, 0.0 }
 0x917   : > { %v3058_v47 = vsub.f32 %v9756_v33, %v3040_v46 }
 0x918   : > { %v9823_v48 = vpop.eup %8694 }
 0x919   : > { %v3068_v51 = vmul.f32 1.442695, %v3058_v47  ;;  %v9827_v26 = vpop.eup %8696  ;;  %v2802_v55 = vsel %vm2341_vm5, %v9823_v48, 0.0 }
 0x91a   : > { %v3043_v25 = vpop.xlane.xlu1 %3042  ;;  %2812 = vadd.xlane.f32.xlu1 %v2811_v52  ;;  %v3034_v56 = vpop.xlane.xlu0 %3033  ;;  %2803 = vadd.xlane.f32.xlu0 %v2802_v55  ;;  %v2805_v60 = vsel %vm2341_vm5, %v9827_v26, 0.0 }
 0x91b   : > { %8698 = vpow2.f32 %v3068_v51  ;;  %v3059_v57 = vsub.f32 %v9762_v18, %v3043_v25  ;;  %v3056_v33 = vsub.f32 %v9758_v0, %v3034_v56 }
 0x91d   : > { %v3070_v58 = vmul.f32 1.442695, %v3059_v57  ;;  %v3064_v59 = vmul.f32 1.442695, %v3056_v33 }
 0x91e   : > { %v3037_v8 = vpop.xlane.xlu1 %3036  ;;  %2806 = vadd.xlane.f32.xlu1 %v2805_v60  ;;  %v3052_v62 = vpop.xlane.xlu0 %3051 }
 0x91f   : > { %8700 = vpow2.f32 %v3070_v58  ;;  %v3057_v63 = vsub.f32 %v9764_v41, %v3037_v8  ;;  %v3062_v3 = vsub.f32 %v9770_v11, %v3052_v62 }
 0x920   : > { %8702 = vpow2.f32 %v3064_v59 }
 0x921   : > { %v3066_v2 = vmul.f32 1.442695, %v3057_v63  ;;  %v3076_v16 = vmul.f32 1.442695, %v3062_v3 }
 0x922   : > { %v3055_v13 = vpop.xlane.xlu1 %3054  ;;  %v3046_v18 = vpop.xlane.xlu0 %3045 }
 0x923   : > { %8704 = vpow2.f32 %v3066_v2  ;;  %v3060_v0 = vsub.f32 %v9772_v5, %v3046_v18  ;;  %v3063_v17 = vsub.f32 %v9778_v53, %v3055_v13 }
 0x925   : > { %v3072_v32 = vmul.f32 1.442695, %v3060_v0  ;;  %v3078_v5 = vmul.f32 1.442695, %v3063_v17 }
 0x926   : > { %v3049_v21 = vpop.xlane.xlu1 %3048  ;;  %v9839_v61 = vpop.permute.xlu0 %3134 }
 0x927   : > { %v3061_v6 = vsub.f32 %v9780_v54, %v3049_v21  ;;  %8124 = vmatprep.subr.bf16.mxu0 %v9839_v61  ;;  %8706 = vpow2.f32 %v3072_v32 }
 0x928   : > { %v9843_v41 = vpop.eup %8698  ;;  %8708 = vpow2.f32 %v3076_v16 }
 0x929   : > { %v3074_v11 = vmul.f32 1.442695, %v3061_v6  ;;  %v3086_v28 = vsel %vm2341_vm5, %v9843_v41, 0.0 }
 0x92a   : > { %3087 = vadd.xlane.f32.xlu0 %v3086_v28  ;;  %v3133_v47 = vpop.permute.xlu1 %3132 }
 0x92b   : > { %8710 = vpow2.f32 %v3074_v11 }
 0x92c   : > { %v9847_v34 = vpop.eup %8700  ;;  %8712 = vpow2.f32 %v3078_v5 }
 0x92d   : > { %v9849_v53 = vpop.eup %8702  ;;  %v3089_v54 = vsel %vm2341_vm5, %v9847_v34, 0.0 }
 0x92e   : > { %3090 = vadd.xlane.f32.xlu1 %v3089_v54  ;;  %v3080_v49 = vsel %vm2341_vm5, %v9849_v53, 0.0 }
 0x92f   : > { %3081 = vadd.xlane.f32.xlu0 %v3080_v49 }
 0x930   : > { %v9855_v27 = vpop.eup %8704 }
 0x931   : > { %v3083_v10 = vsel %vm2341_vm5, %v9855_v27, 0.0 }
 0x932   : > { %3084 = vadd.xlane.f32.xlu1 %v3083_v10 }
 0x934   : > { %v9859_v29 = vpop.eup %8706 }
 0x935   : > { %v3092_v24 = vsel %vm2341_vm5, %v9859_v29, 0.0  ;;  %v9863_v31 = vpop.eup %8708 }
 0x936   : > { %3093 = vadd.xlane.f32.xlu1 %v3092_v24  ;;  %v3098_v22 = vsel %vm2341_vm5, %v9863_v31, 0.0 }
 0x938   : > { %v9865_v4 = vpop.eup %8710 }
 0x939   : > { %v3095_v15 = vsel %vm2341_vm5, %v9865_v4, 0.0  ;;  %v9871_v38 = vpop.eup %8712 }
 0x93a   : > { %3096 = vadd.xlane.f32.xlu0 %v3095_v15  ;;  %3099 = vadd.xlane.f32.xlu1 %v3098_v22  ;;  %v3101_v43 = vsel %vm2341_vm5, %v9871_v38, 0.0  ;;  %v8622_v15 = vld [vmem:[%s9367_s8 + $0x8] sm:$0xff]  }
 0x93e   : > { %3102 = vadd.xlane.f32.xlu1 %v3101_v43 }
 0x94f   : > { %3128 = vrot.lane.b32.xlu1 %v9685_v39, %s11216_s26 }
 0x950   : > { %3130 = vrot.lane.b32.xlu0 %v9679_v37, %s11216_s26  ;;  %s9149_s26 = smov 16  }
 0x953   : > { %3399 = vrot.lane.b32.xlu1 %v9659_v19, %s9147_s24 }
 0x954   : > { %3401 = vrot.lane.b32.xlu0 %v9666_v36, %s9147_s24 }
 0x957   : > { %3395 = vrot.lane.b32.xlu1 %v9655_v1, %s9147_s24 }
 0x958   : > { %3397 = vrot.lane.b32.xlu0 %v9662_v23, %s9147_s24  ;;  %s9150_s24 = smov 80  }
 0x95b   : > { %3389 = vrot.lane.b32.xlu1 %v9662_v23, %s9148_s1 }
 0x95c   : > { %3387 = vrot.lane.b32.xlu0 %v9655_v1, %s9148_s1 }
 0x95f   : > { %3393 = vrot.lane.b32.xlu1 %v9666_v36, %s9148_s1 }
 0x960   : > { %3391 = vrot.lane.b32.xlu0 %v9659_v19, %s9148_s1 }
 0x963   : > { %3788 = vrot.lane.b32.xlu1 %v9659_v19, %s9149_s26 }
 0x964   : > { %3790 = vrot.lane.b32.xlu0 %v9666_v36, %s9149_s26 }
 0x967   : > { %3784 = vrot.lane.b32.xlu1 %v9655_v1, %s9149_s26 }
 0x968   : > { %3786 = vrot.lane.b32.xlu0 %v9662_v23, %s9149_s26 }
 0x96b   : > { %3778 = vrot.lane.b32.xlu1 %v9662_v23, %s9150_s24 }
 0x96c   : > { %3776 = vrot.lane.b32.xlu0 %v9655_v1, %s9150_s24 }
 0x96f   : > { %3782 = vrot.lane.b32.xlu1 %v9666_v36, %s9150_s24 }
 0x970   : > { %3780 = vrot.lane.b32.xlu0 %v9659_v19, %s9150_s24 }
 0x993   : > { %v2798_v46 = vpop.xlane.xlu0 %2797 }
 0x997   : > { %v2792_v51 = vpop.xlane.xlu0 %2791 }
 0x99b   : > { %v2801_v52 = vpop.xlane.xlu1 %2800 }
 0x99c   : > { %8714 = vrcp.f32 %v2801_v52 }
 0x99d   : > { %8716 = vrcp.f32 %v2792_v51 }
 0x99e   : > { %8718 = vrcp.f32 %v2798_v46 }
 0x99f   : > { %v2795_v25 = vpop.xlane.xlu1 %2794  ;;  %v2810_v55 = vpop.xlane.xlu0 %2809 }
 0x9a0   : > { %8720 = vrcp.f32 %v2795_v25 }
 0x9a3   : > { %v2813_v23 = vpop.xlane.xlu1 %2812  ;;  %v2804_v56 = vpop.xlane.xlu0 %2803 }
 0x9a4   : > { %8722 = vrcp.f32 %v2813_v23 }
 0x9a5   : > { %8724 = vrcp.f32 %v2804_v56 }
 0x9a6   : > { %8726 = vrcp.f32 %v2810_v55 }
 0x9a7   : > { %v2807_v1 = vpop.xlane.xlu1 %2806 }
 0x9a8   : > { %8728 = vrcp.f32 %v2807_v1 }
 0x9a9   : > { %v8715_v36 = vpop.eup %8714 }
 0x9aa   : > { %v8717_v57 = vpop.eup %8716  ;;  %v2825_v58 = vmul.f32 %v8715_v36, %v9808_v40  ;;  %v8623_v36 = vld [vmem:[%s9367_s8] sm:$0xff]  }
 0x9ab   : > { %v8719_v19 = vpop.eup %8718  ;;  %v2822_v59 = vmul.f32 %v8717_v57, %v9804_v9  ;;  %8150 = vmatprep.subr.bf16.mxu1 %v8623_v36 }
 0x9ac   : > { %v2824_v8 = vmul.f32 %v8719_v19, %v9800_v30  ;;  %8151 = vmatpush3.bf16.msra.mxu1 %v8623_v36 }
 0x9ad   : > { %v8721_v33 = vpop.eup %8720 }
 0x9ae   : > { %v2823_v60 = vmul.f32 %v8721_v33, %v9812_v44  ;;  %v2831_v63 = vpack.c.bf16 %v2825_v58, %v2824_v8 }
 0x9b0   : > { %v2830_v62 = vpack.c.bf16 %v2823_v60, %v2822_v59 }
 0x9b1   : > { %v8723_v2 = vpop.eup %8722 }
 0x9b2   : > { %8100 = vmatprep.mubr.msk.bf16.mxu0 %vm2341_vm5, %v2830_v62  ;;  %v8725_v3 = vpop.eup %8724  ;;  %v2829_v9 = vmul.f32 %v8723_v2, %v9818_v42 }
 0x9b3   : > { %8101 = vmatmul.mubr.msk.bf16.vlgmr.msra.gmra.mxu0 %vm2341_vm5, %v2831_v63  ;;  %v3088_v13 = vpop.xlane.xlu0 %3087  ;;  %v8727_v18 = vpop.eup %8726  ;;  %v2826_v40 = vmul.f32 %v8725_v3, %v9823_v48 }
 0x9b4   : > { %8125 = vmatpush3.bf16.msra.mxu0 %v9839_v61  ;;  %v2828_v32 = vmul.f32 %v8727_v18, %v9814_v45 }
 0x9b5   : > { %v8729_v0 = vpop.eup %8728  ;;  %8126 = vmatprep.subr.bf16.mxu0 %v3133_v47 }
 0x9b6   : > { %v2827_v30 = vmul.f32 %v8729_v0, %v9827_v26  ;;  %v2833_v21 = vpack.c.bf16 %v2829_v9, %v2828_v32 }
 0x9b7   : > { %v3091_v44 = vpop.xlane.xlu1 %3090 }
 0x9b8   : > { %8127 = vmatpush3.bf16.msra.mxu0 %v3133_v47  ;;  %v3082_v16 = vpop.xlane.xlu0 %3081  ;;  %v2832_v17 = vpack.c.bf16 %v2827_v30, %v2826_v40 }
 0x9b9   : > { %8730 = vrcp.f32 %v3082_v16 }
 0x9ba   : > { %8104 = vmatprep.mubr.msk.bf16.mxu0 %vm2341_vm5, %v2832_v17  ;;  %8732 = vrcp.f32 %v3091_v44 }
 0x9bb   : > { %v3085_v61 = vpop.xlane.xlu1 %3084  ;;  %8105 = vmatmul.mubr.msk.bf16.gmra.mxu0 %vm2341_vm5, %v2833_v21 }
 0x9bc   : > { %8734 = vrcp.f32 %v3085_v61 }
 0x9bd   : > { %8736 = vrcp.f32 %v3088_v13 }
 0x9bf   : > { %v3094_v42 = vpop.xlane.xlu1 %3093 }
 0x9c0   : > { %8738 = vrcp.f32 %v3094_v42 }
 0x9c3   : > { %v3097_v48 = vpop.xlane.xlu0 %3096  ;;  %v3100_v26 = vpop.xlane.xlu1 %3099 }
 0x9c4   : > { %8740 = vrcp.f32 %v3097_v48 }
 0x9c5   : > { %8742 = vrcp.f32 %v3100_v26 }
 0x9c6   : > { %v8731_v45 = vpop.eup %8730 }
 0x9c7   : > { %v3131_v6 = vpop.permute.xlu0 %3130  ;;  %v8733_v11 = vpop.eup %8732  ;;  %v3112_v49 = vmul.f32 %v8731_v45, %v9849_v53 }
 0x9c8   : > { %v3103_v28 = vpop.xlane.xlu1 %3102  ;;  %8128 = vmatprep.subr.bf16.mxu0 %v3131_v6  ;;  %v3115_v24 = vmul.f32 %v8733_v11, %v9847_v34 }
 0x9c9   : > { %v8735_v5 = vpop.eup %8734  ;;  %8744 = vrcp.f32 %v3103_v28  ;;  %8129 = vmatpush3.bf16.msra.mxu0 %v3131_v6 }
 0x9ca   : > { %v8737_v54 = vpop.eup %8736  ;;  %v3113_v10 = vmul.f32 %v8735_v5, %v9855_v27 }
 0x9cb   : > { %v3114_v46 = vmul.f32 %v8737_v54, %v9843_v41  ;;  %v3402_v53 = vpop.permute.xlu0 %3401 }
 0x9cc   : > { %v3129_v22 = vpop.permute.xlu1 %3128  ;;  %v3120_v43 = vpack.c.bf16 %v3113_v10, %v3112_v49  ;;  %v3425_v40 = vsel %vm2644_vm6, %v3402_v53, 0 }
 0x9cd   : > { %8130 = vmatprep.subr.bf16.mxu0 %v3129_v22  ;;  %v8739_v47 = vpop.eup %8738  ;;  %v3121_v51 = vpack.c.bf16 %v3115_v24, %v3114_v46 }
 0x9ce   : > { %8131 = vmatpush3.bf16.msra.mxu0 %v3129_v22  ;;  %8132 = vmatprep.mubr.msk.bf16.mxu0 %vm2341_vm5, %v3120_v43  ;;  %v3116_v34 = vmul.f32 %v8739_v47, %v9859_v29 }
 0x9cf   : > { %8140 = vmatprep.subr.bf16.mxu0 %v8622_v15  ;;  %v3398_v32 = vpop.permute.xlu0 %3397 }
 0x9d0   : > { %v3400_v30 = vpop.permute.xlu1 %3399  ;;  %v3419_v45 = vsel %vm2644_vm6, %v3398_v32, 0 }
 0x9d1   : > { %v8741_v52 = vpop.eup %8740  ;;  %8133 = vmatmul.mubr.msk.bf16.vlgmr.msra.gmra.mxu0 %vm2341_vm5, %v3121_v51  ;;  %v3422_v42 = vsel %vm2644_vm6, %v3400_v30, 0 }
 0x9d2   : > { %8141 = vmatpush3.bf16.msra.mxu0 %v8622_v15  ;;  %v3117_v27 = vmul.f32 %v8741_v52, %v9865_v4  ;;  %v8743_v41 = vpop.eup %8742 }
 0x9d3   : > { %8456 = vmatprep.subr.msk.bf16.mxu0 %vm2644_vm6, %v3402_v53  ;;  %v3118_v23 = vmul.f32 %v8743_v41, %v9863_v31  ;;  %v3388_v48 = vpop.permute.xlu0 %3387 }
 0x9d4   : > { %v3122_v25 = vpack.c.bf16 %v3117_v27, %v3116_v34  ;;  %v3396_v26 = vpop.permute.xlu1 %3395 }
 0x9d5   : > { %v3416_v28 = vsel %vm2644_vm6, %v3396_v26, 0 }
 0x9d6   : > { %v8745_v55 = vpop.eup %8744  ;;  %8136 = vmatprep.mubr.msk.bf16.mxu0 %vm2341_vm5, %v3122_v25 }
 0x9d7   : > { %v3119_v56 = vmul.f32 %v8745_v55, %v9871_v38  ;;  %v3392_v6 = vpop.permute.xlu0 %3391 }
 0x9d8   : > { %v3390_v11 = vpop.permute.xlu1 %3389 }
 0x9d9   : > { %v3123_v1 = vpack.c.bf16 %v3119_v56, %v3118_v23 }
 0x9db   : > { %8137 = vmatmul.mubr.msk.bf16.gmra.mxu0 %vm2341_vm5, %v3123_v1  ;;  %v3791_v5 = vpop.permute.xlu0 %3790 }
 0x9dc   : > { %v3394_v54 = vpop.permute.xlu1 %3393  ;;  %v3814_v49 = vsel %vm2644_vm6, %v3791_v5, 0 }
 0x9df   : > { %v3787_v24 = vpop.permute.xlu0 %3786 }
 0x9e0   : > { %v3789_v10 = vpop.permute.xlu1 %3788  ;;  %v3808_v43 = vsel %vm2644_vm6, %v3787_v24, 0 }
 0x9e1   : > { %v3811_v22 = vsel %vm2644_vm6, %v3789_v10, 0 }
 0x9e3   : > { %v3777_v15 = vpop.permute.xlu0 %3776 }
 0x9e4   : > { %v3785_v46 = vpop.permute.xlu1 %3784 }
 0x9e5   : > { %v3805_v47 = vsel %vm2644_vm6, %v3785_v46, 0 }
 0x9e7   : > { %v3781_v52 = vpop.permute.xlu0 %3780 }
 0x9e8   : > { %v3779_v51 = vpop.permute.xlu1 %3778 }
 0x9ec   : > { %v3783_v53 = vpop.permute.xlu1 %3782 }
 0xa73   : > { %v8102_v29 = vpop.f32.mrf.mxu0 }
 0xa75   : > { %v2884_v57 = vpop.f32.mrf.mxu0 }
 0xa77   : > { %v8103_v4 = vpop.f32.mrf.mxu0 }
 0xa78   : > { %v2916_v58 = vpack.c.bf16 %v8103_v4, %v8102_v29 }
 0xa79   : > { %v2887_v19 = vpop.f32.mrf.mxu0 }
 0xa7a   : > { %v2915_v33 = vpack.c.bf16 %v2887_v19, %v2884_v57 }
 0xa7b   : > { %v8106_v59 = vpop.f32.mrf.mxu0 }
 0xa7c   : > { %8152 = vmatprep.mubr.msk.bf16.mxu1 %vm2644_vm6, %v2915_v33 }
 0xa7d   : > { %v2900_v60 = vpop.f32.mrf.mxu0  ;;  %8153 = vmatmul.mubr.msk.bf16.vlgmr.msra.gmra.mxu1 %vm2644_vm6, %v2916_v58 }
 0xa7f   : > { %v8107_v31 = vpop.f32.mrf.mxu0 }
 0xa80   : > { %v2918_v62 = vpack.c.bf16 %v8107_v31, %v8106_v59 }
 0xa81   : > { %v2903_v38 = vpop.f32.mrf.mxu0 }
 0xa82   : > { %v2917_v8 = vpack.c.bf16 %v2903_v38, %v2900_v60 }
 0xa84   : > { %8156 = vmatprep.mubr.msk.bf16.mxu1 %vm2644_vm6, %v2917_v8 }
 0xa85   : > { %8157 = vmatmul.mubr.msk.bf16.gmra.mxu1 %vm2644_vm6, %v2918_v62 }
 0xa91   : > { %v8134_v63 = vpop.f32.mrf.mxu0 }
 0xa93   : > { %v3186_v2 = vpop.f32.mrf.mxu0 }
 0xa95   : > { %v8135_v3 = vpop.f32.mrf.mxu0 }
 0xa96   : > { %v3218_v0 = vpack.c.bf16 %v8135_v3, %v8134_v63 }
 0xa97   : > { %v3189_v13 = vpop.f32.mrf.mxu0 }
 0xa98   : > { %v3217_v18 = vpack.c.bf16 %v3189_v13, %v3186_v2 }
 0xa9a   : > { %8142 = vmatprep.mubr.msk.bf16.mxu0 %vm2644_vm6, %v3217_v18 }
 0xa9b   : > { %v8138_v9 = vpop.f32.mrf.mxu0  ;;  %8143 = vmatmul.mubr.msk.bf16.vlgmr.msra.gmra.mxu0 %vm2644_vm6, %v3218_v0 }
 0xa9c   : > { %8161 = vmatpush3.bf16.xpose.msra.mxu0 %v3425_v40 }
 0xa9d   : > { %8457 = vmatprep.subr.msk.bf16.mxu0 %vm2644_vm6, %v3400_v30  ;;  %v3202_v44 = vpop.f32.mrf.mxu0 }
 0xa9f   : > { %v8139_v16 = vpop.f32.mrf.mxu0 }
 0xaa0   : > { %v3220_v61 = vpack.c.bf16 %v8139_v16, %v8138_v9 }
 0xaa1   : > { %v3205_v17 = vpop.f32.mrf.mxu0 }
 0xaa2   : > { %v3219_v21 = vpack.c.bf16 %v3205_v17, %v3202_v44 }
 0xaa4   : > { %8163 = vmatpush3.bf16.xpose.msra.mxu0 %v3422_v42  ;;  %8146 = vmatprep.mubr.msk.bf16.mxu0 %vm2644_vm6, %v3219_v21 }
 0xaa5   : > { %8458 = vmatprep.subr.msk.bf16.mxu0 %vm2644_vm6, %v3398_v32  ;;  %8147 = vmatmul.mubr.msk.bf16.gmra.mxu0 %vm2644_vm6, %v3220_v61 }
 0xaa6   : > { %8168 = vmatprep.mubr.msk.bf16.mxu0 %vm2644_vm6, %v3388_v48 }
 0xaac   : > { %8165 = vmatpush3.bf16.xpose.msra.mxu0 %v3419_v45 }
 0xaad   : > { %8459 = vmatprep.subr.msk.bf16.mxu0 %vm2644_vm6, %v3396_v26 }
 0xab4   : > { %8167 = vmatpush3.bf16.xpose.msra.mxu0 %v3416_v28 }
 0xab5   : > { %8460 = vmatprep.subr.msk.bf16.mxu0 %vm2644_vm6, %v3791_v5 }
 0xabb   : > { %8169 = vmatmul.mubr.msk.bf16.vlgmr.msra.gmra.mxu0 %vm2644_vm6, %v3390_v11 }
 0xabc   : > { %8172 = vmatprep.mubr.msk.bf16.mxu0 %vm2644_vm6, %v3392_v6  ;;  %8203 = vmatpush3.bf16.xpose.msra.mxu0 %v3814_v49 }
 0xabd   : > { %8461 = vmatprep.subr.msk.bf16.mxu0 %vm2644_vm6, %v3789_v10 }
 0xac3   : > { %8173 = vmatmul.mubr.msk.bf16.gmra.mxu0 %vm2644_vm6, %v3394_v54 }
 0xac4   : > { %8205 = vmatpush3.bf16.xpose.msra.mxu0 %v3811_v22  ;;  %8210 = vmatprep.mubr.msk.bf16.mxu0 %vm2644_vm6, %v3777_v15 }
 0xac5   : > { %8462 = vmatprep.subr.msk.bf16.mxu0 %vm2644_vm6, %v3787_v24 }
 0xacc   : > { %8207 = vmatpush3.bf16.xpose.msra.mxu0 %v3808_v43 }
 0xacd   : > { %8463 = vmatprep.subr.msk.bf16.mxu0 %vm2644_vm6, %v3785_v46 }
 0xad4   : > { %8209 = vmatpush3.bf16.xpose.msra.mxu0 %v3805_v47 }
 0xadb   : > { %8211 = vmatmul.mubr.msk.bf16.vlgmr.msra.gmra.mxu0 %vm2644_vm6, %v3779_v51 }
 0xadc   : > { %8214 = vmatprep.mubr.msk.bf16.mxu0 %vm2644_vm6, %v3781_v52 }
 0xae3   : > { %8215 = vmatmul.mubr.msk.bf16.gmra.mxu0 %vm2644_vm6, %v3783_v53 }
 0xb3d   : > { %v8154_v34 = vpop.f32.mrf.mxu1 }
 0xb3f   : > { %v3356_v27 = vpop.f32.mrf.mxu1 }
 0xb41   : > { %v8155_v41 = vpop.f32.mrf.mxu1 }
 0xb43   : > { %v3359_v23 = vpop.f32.mrf.mxu1 }
 0xb45   : > { %v8158_v57 = vpop.f32.mrf.mxu1 }
 0xb47   : > { %v3372_v33 = vpop.f32.mrf.mxu1 }
 0xb49   : > { %v8159_v38 = vpop.f32.mrf.mxu1 }
 0xb5b   : > { %v8144_v25 = vpop.f32.mrf.mxu0 }
 0xb5c   : > { %v9962_v55 = vadd.f32 %v8154_v34, %v8144_v25 }
 0xb5d   : > { %v3273_v56 = vpop.f32.mrf.mxu0 }
 0xb5e   : > { %v9964_v1 = vadd.f32 %v3356_v27, %v3273_v56 }
 0xb5f   : > { %v8145_v36 = vpop.f32.mrf.mxu0 }
 0xb60   : > { %v9966_v29 = vadd.f32 %v8155_v41, %v8145_v36 }
 0xb61   : > { %v3276_v4 = vpop.f32.mrf.mxu0 }
 0xb62   : > { %v9968_v19 = vadd.f32 %v3359_v23, %v3276_v4 }
 0xb65   : > { %v8148_v58 = vpop.f32.mrf.mxu0 }
 0xb66   : > { %v9970_v59 = vadd.f32 %v8158_v57, %v8148_v58 }
 0xb67   : > { %v3289_v60 = vpop.f32.mrf.mxu0 }
 0xb68   : > { %v9972_v31 = vadd.f32 %v3372_v33, %v3289_v60 }
 0xb69   : > { %v8149_v8 = vpop.f32.mrf.mxu0 }
 0xb6a   : > { %v9974_v62 = vadd.f32 %v8159_v38, %v8149_v8 }
 0xb6b   : > { %v9976_v63 = vpop.f32.mrf.mxu0 }
 0xb7b   : > { %v8170_v2 = vpop.f32.mrf.mxu0 }
 0xb7c   : > { %v3494_v0 = vmul.f32 0.25, %v8170_v2 }
 0xb7d   : > { %v3461_v3 = vpop.f32.mrf.mxu0 }
 0xb7e   : > { %v3492_v13 = vmul.f32 0.25, %v3461_v3  ;;  %v3506_v16 = vsel %vm2341_vm5, %v3494_v0, -inf }
 0xb7f   : > { %v8171_v18 = vpop.f32.mrf.mxu0 }
 0xb80   : > { %v3500_v9 = vsel %vm2341_vm5, %v3492_v13, -inf  ;;  %v3495_v32 = vmul.f32 0.25, %v8171_v18 }
 0xb81   : > { %3501 = vmax.xlane.f32.xlu0 %v3500_v9  ;;  %v3464_v40 = vpop.f32.mrf.mxu0 }
 0xb82   : > { %v3493_v30 = vmul.f32 0.25, %v3464_v40  ;;  %v3509_v48 = vsel %vm2341_vm5, %v3495_v32, -inf }
 0xb83   : > { %v8174_v44 = vpop.f32.mrf.mxu0 }
 0xb84   : > { %v3503_v17 = vsel %vm2341_vm5, %v3493_v30, -inf  ;;  %v3498_v6 = vmul.f32 0.25, %v8174_v44 }
 0xb85   : > { %3507 = vmax.xlane.f32.xlu0 %v3506_v16  ;;  %3504 = vmax.xlane.f32.xlu1 %v3503_v17  ;;  %v3477_v21 = vpop.f32.mrf.mxu0 }
 0xb86   : > { %v3496_v42 = vmul.f32 0.25, %v3477_v21  ;;  %v3518_v54 = vsel %vm2341_vm5, %v3498_v6, -inf }
 0xb87   : > { %v8175_v61 = vpop.f32.mrf.mxu0 }
 0xb88   : > { %v3499_v11 = vmul.f32 0.25, %v8175_v61  ;;  %v3512_v28 = vsel %vm2341_vm5, %v3496_v42, -inf }
 0xb89   : > { %3510 = vmax.xlane.f32.xlu0 %v3509_v48  ;;  %v3480_v26 = vpop.f32.mrf.mxu0 }
 0xb8a   : > { %v3497_v45 = vmul.f32 0.25, %v3480_v26  ;;  %v3521_v49 = vsel %vm2341_vm5, %v3499_v11, -inf }
 0xb8c   : > { %v3515_v5 = vsel %vm2341_vm5, %v3497_v45, -inf }
 0xb8d   : > { %3513 = vmax.xlane.f32.xlu0 %v3512_v28  ;;  %3516 = vmax.xlane.f32.xlu1 %v3515_v5 }
 0xb91   : > { %3519 = vmax.xlane.f32.xlu0 %v3518_v54  ;;  %3522 = vmax.xlane.f32.xlu1 %v3521_v49 }
 0xb9b   : > { %v8212_v21 = vpop.f32.mrf.mxu0 }
 0xb9d   : > { %v3850_v61 = vpop.f32.mrf.mxu0 }
 0xb9e   : > { %v10022_v28 = vmul.f32 0.25, %v3850_v61 }
 0xb9f   : > { %v8213_v48 = vpop.f32.mrf.mxu0 }
 0xba0   : > { %v3889_v54 = vsel %vm2341_vm5, %v10022_v28, -inf }
 0xba1   : > { %v3853_v5 = vpop.f32.mrf.mxu0 }
 0xba3   : > { %v8216_v49 = vpop.f32.mrf.mxu0 }
 0xc0a   : > { %v3502_v10 = vpop.xlane.xlu0 %3501 }
 0xc0b   : > { %v3524_v24 = vsub.f32 %v3492_v13, %v3502_v10  ;;  %v10030_v10 = vmul.f32 0.25, %v8213_v48 }
 0xc0d   : > { %v3532_v51 = vmul.f32 1.442695, %v3524_v24 }
 0xc0e   : > { %v3505_v15 = vpop.xlane.xlu1 %3504  ;;  %v3508_v22 = vpop.xlane.xlu0 %3507 }
 0xc0f   : > { %v3526_v43 = vsub.f32 %v3494_v0, %v3508_v22  ;;  %v3525_v46 = vsub.f32 %v3493_v30, %v3505_v15  ;;  %v3866_v15 = vpop.f32.mrf.mxu0 }
 0xc10   : > { %v10034_v22 = vmul.f32 0.25, %v3866_v15 }
 0xc11   : > { %v3536_v47 = vmul.f32 1.442695, %v3526_v43  ;;  %v3534_v34 = vmul.f32 1.442695, %v3525_v46  ;;  %v3898_v43 = vsel %vm2341_vm5, %v10030_v10, -inf  ;;  %v10038_v46 = vmul.f32 0.25, %v8216_v49 }
 0xc12   : > { %v3511_v52 = vpop.xlane.xlu0 %3510 }
 0xc13   : > { %v3527_v53 = vsub.f32 %v3495_v32, %v3511_v52  ;;  %8746 = vpow2.f32 %v3536_v47  ;;  %v3901_v47 = vsel %vm2341_vm5, %v10034_v22, -inf  ;;  %v8217_v52 = vpop.f32.mrf.mxu0 }
 0xc14   : > { %8748 = vpow2.f32 %v3532_v51  ;;  %v3907_v51 = vsel %vm2341_vm5, %v10038_v46, -inf }
 0xc15   : > { %v3538_v27 = vmul.f32 1.442695, %v3527_v53  ;;  %v10046_v53 = vmul.f32 0.25, %v3853_v5 }
 0xc16   : > { %v3514_v41 = vpop.xlane.xlu0 %3513  ;;  %v3517_v40 = vpop.xlane.xlu1 %3516 }
 0xc17   : > { %8750 = vpow2.f32 %v3538_v27  ;;  %v3528_v25 = vsub.f32 %v3496_v42, %v3514_v41  ;;  %v3529_v32 = vsub.f32 %v3497_v45, %v3517_v40  ;;  %v3892_v41 = vsel %vm2341_vm5, %v10046_v53, -inf }
 0xc18   : > { %8752 = vpow2.f32 %v3534_v34  ;;  %v3869_v34 = vpop.f32.mrf.mxu0 }
 0xc19   : > { %v3540_v57 = vmul.f32 1.442695, %v3528_v25  ;;  %v3542_v17 = vmul.f32 1.442695, %v3529_v32  ;;  %v10048_v27 = vmul.f32 0.25, %v3869_v34  ;;  %v10052_v25 = vmul.f32 0.25, %v8217_v52 }
 0xc1a   : > { %v3520_v23 = vpop.xlane.xlu0 %3519  ;;  %v3523_v30 = vpop.xlane.xlu1 %3522 }
 0xc1b   : > { %v3530_v56 = vsub.f32 %v3498_v6, %v3520_v23  ;;  %v3531_v44 = vsub.f32 %v3499_v11, %v3523_v30  ;;  %v10026_v11 = vmul.f32 0.25, %v8212_v21  ;;  %v3904_v23 = vsel %vm2341_vm5, %v10048_v27, -inf }
 0xc1d   : > { %v3544_v36 = vmul.f32 1.442695, %v3530_v56  ;;  %v3546_v16 = vmul.f32 1.442695, %v3531_v44  ;;  %v3895_v24 = vsel %vm2341_vm5, %v10026_v11, -inf  ;;  %v3910_v56 = vsel %vm2341_vm5, %v10052_v25, -inf }
 0xc1f   : > { %8754 = vpow2.f32 %v3544_v36 }
 0xc20   : > { %v9986_v4 = vpop.eup %8746  ;;  %8756 = vpow2.f32 %v3540_v57 }
 0xc21   : > { %v3554_v33 = vsel %vm2341_vm5, %v9986_v4, 0.0  ;;  %v9990_v58 = vpop.eup %8748  ;;  %8758 = vpow2.f32 %v3546_v16 }
 0xc22   : > { %3555 = vadd.xlane.f32.xlu0 %v3554_v33  ;;  %v3548_v2 = vsel %vm2341_vm5, %v9990_v58, 0.0  ;;  %8760 = vpow2.f32 %v3542_v17 }
 0xc24   : > { %v9992_v60 = vpop.eup %8750 }
 0xc25   : > { %v3557_v38 = vsel %vm2341_vm5, %v9992_v60, 0.0  ;;  %v9996_v8 = vpop.eup %8752 }
 0xc26   : > { %3558 = vadd.xlane.f32.xlu1 %v3557_v38  ;;  %3549 = vadd.xlane.f32.xlu0 %v3548_v2  ;;  %v3551_v3 = vsel %vm2341_vm5, %v9996_v8, 0.0 }
 0xc2a   : > { %3552 = vadd.xlane.f32.xlu1 %v3551_v3 }
 0xc2c   : > { %v10002_v13 = vpop.eup %8754 }
 0xc2d   : > { %v3566_v18 = vsel %vm2341_vm5, %v10002_v13, 0.0  ;;  %v10006_v0 = vpop.eup %8756 }
 0xc2e   : > { %3567 = vadd.xlane.f32.xlu0 %v3566_v18  ;;  %v3560_v9 = vsel %vm2341_vm5, %v10006_v0, 0.0  ;;  %v10016_v42 = vpop.eup %8758 }
 0xc2f   : > { %v3569_v26 = vsel %vm2341_vm5, %v10016_v42, 0.0  ;;  %v10020_v6 = vpop.eup %8760 }
 0xc30   : > { %v3563_v45 = vsel %vm2341_vm5, %v10020_v6, 0.0 }
 0xc32   : > { %3561 = vadd.xlane.f32.xlu0 %v3560_v9 }
 0xc3b   : > { %3596 = vrot.lane.b32.xlu1 %v9672_v35, %s9148_s1 }
 0xc3f   : > { %3594 = vrot.lane.b32.xlu1 %v9679_v37, %s9148_s1 }
 0xc48   : > { %3598 = vrot.lane.b32.xlu0 %v9668_v14, %s9148_s1 }
 0xc63   : > { %3570 = vadd.xlane.f32.xlu1 %v3569_v26 }
 0xc67   : > { %3564 = vadd.xlane.f32.xlu1 %v3563_v45  ;;  %3890 = vmax.xlane.f32.xlu0 %v3889_v54 }
 0xc6b   : > { %3896 = vmax.xlane.f32.xlu0 %v3895_v24 }
 0xc6f   : > { %3899 = vmax.xlane.f32.xlu0 %v3898_v43 }
 0xc73   : > { %3902 = vmax.xlane.f32.xlu0 %v3901_v47 }
 0xc77   : > { %3908 = vmax.xlane.f32.xlu0 %v3907_v51 }
 0xc78   : > { %3592 = vrot.lane.b32.xlu1 %v9685_v39, %s9148_s1 }
 0xc9c   : > { %3893 = vmax.xlane.f32.xlu1 %v3892_v41 }
 0xca0   : > { %3905 = vmax.xlane.f32.xlu1 %v3904_v23 }
 0xca4   : > { %3911 = vmax.xlane.f32.xlu1 %v3910_v56 }
 0xcab   : > { %v3556_v36 = vpop.xlane.xlu0 %3555 }
 0xcaf   : > { %v3559_v57 = vpop.xlane.xlu1 %3558  ;;  %v3550_v33 = vpop.xlane.xlu0 %3549 }
 0xcb0   : > { %8762 = vrcp.f32 %v3550_v33 }
 0xcb3   : > { %v3553_v38 = vpop.xlane.xlu1 %3552 }
 0xcb4   : > { %8764 = vrcp.f32 %v3553_v38 }
 0xcb5   : > { %8766 = vrcp.f32 %v3559_v57 }
 0xcb6   : > { %8768 = vrcp.f32 %v3556_v36 }
 0xcb7   : > { %v3568_v2 = vpop.xlane.xlu0 %3567  ;;  %v3597_v9 = vpop.permute.xlu1 %3596 }
 0xcbb   : > { %v3562_v3 = vpop.xlane.xlu0 %3561  ;;  %v3595_v17 = vpop.permute.xlu1 %3594 }
 0xcbd   : > { %v8763_v18 = vpop.eup %8762 }
 0xcbe   : > { %v3580_v44 = vmul.f32 %v8763_v18, %v9990_v58 }
 0xcbf   : > { %v3599_v40 = vpop.permute.xlu0 %3598 }
 0xcc0   : > { %8176 = vmatprep.subr.bf16.mxu1 %v3599_v40 }
 0xcc1   : > { %v8765_v30 = vpop.eup %8764  ;;  %8177 = vmatpush3.bf16.msra.mxu1 %v3599_v40 }
 0xcc2   : > { %v3581_v32 = vmul.f32 %v8765_v30, %v9996_v8  ;;  %8178 = vmatprep.subr.bf16.mxu1 %v3597_v9  ;;  %v8767_v61 = vpop.eup %8766 }
 0xcc3   : > { %v8769_v26 = vpop.eup %8768  ;;  %v3583_v8 = vmul.f32 %v8767_v61, %v9992_v60 }
 0xcc4   : > { %v3588_v16 = vpack.c.bf16 %v3581_v32, %v3580_v44  ;;  %v3582_v54 = vmul.f32 %v8769_v26, %v9986_v4 }
 0xcc5   : > { %8179 = vmatpush3.bf16.msra.mxu1 %v3597_v9 }
 0xcc6   : > { %8184 = vmatprep.mubr.msk.bf16.mxu1 %vm2341_vm5, %v3588_v16  ;;  %8180 = vmatprep.subr.bf16.mxu1 %v3595_v17  ;;  %v3589_v15 = vpack.c.bf16 %v3583_v8, %v3582_v54  ;;  %v8624_v16 = vld [vmem:[%s9367_s8 + $0x10] sm:$0xff]  }
 0xcc9   : > { %8181 = vmatpush3.bf16.msra.mxu1 %v3595_v17 }
 0xcec   : > { %v3571_v21 = vpop.xlane.xlu1 %3570 }
 0xced   : > { %8770 = vrcp.f32 %v3571_v21 }
 0xcee   : > { %8772 = vrcp.f32 %v3562_v3 }
 0xcef   : > { %8774 = vrcp.f32 %v3568_v2 }
 0xcf0   : > { %v3565_v48 = vpop.xlane.xlu1 %3564  ;;  %v3891_v58 = vpop.xlane.xlu0 %3890 }
 0xcf1   : > { %8776 = vrcp.f32 %v3565_v48  ;;  %v3913_v5 = vsub.f32 %v10022_v28, %v3891_v58 }
 0xcf3   : > { %v3921_v43 = vmul.f32 1.442695, %v3913_v5 }
 0xcf4   : > { %v3593_v45 = vpop.permute.xlu1 %3592  ;;  %v3897_v49 = vpop.xlane.xlu0 %3896 }
 0xcf5   : > { %8182 = vmatprep.subr.bf16.mxu1 %v3593_v45  ;;  %v3915_v24 = vsub.f32 %v10026_v11, %v3897_v49 }
 0xcf6   : > { %8183 = vmatpush3.bf16.msra.mxu1 %v3593_v45 }
 0xcf7   : > { %v3925_v47 = vmul.f32 1.442695, %v3915_v24  ;;  %8192 = vmatprep.subr.bf16.mxu1 %v8624_v16 }
 0xcf8   : > { %v3900_v51 = vpop.xlane.xlu0 %3899 }
 0xcf9   : > { %8185 = vmatmul.mubr.msk.bf16.vlgmr.msra.gmra.mxu1 %vm2341_vm5, %v3589_v15  ;;  %8778 = vpow2.f32 %v3925_v47  ;;  %v3916_v52 = vsub.f32 %v10030_v10, %v3900_v51  ;;  %v10116_v47 = vpop.f32.mrf.mxu1 }
 0xcfa   : > { %v8771_v60 = vpop.eup %8770  ;;  %8780 = vpow2.f32 %v3921_v43  ;;  %8193 = vmatpush3.bf16.msra.mxu1 %v8624_v16 }
 0xcfb   : > { %v8773_v34 = vpop.eup %8772  ;;  %v3927_v28 = vmul.f32 1.442695, %v3916_v52  ;;  %v3587_v11 = vmul.f32 %v8771_v60, %v10016_v42 }
 0xcfc   : > { %v8775_v41 = vpop.eup %8774  ;;  %v3903_v4 = vpop.xlane.xlu0 %3902  ;;  %v3584_v56 = vmul.f32 %v8773_v34, %v10006_v0 }
 0xcfd   : > { %8782 = vpow2.f32 %v3927_v28  ;;  %v3917_v57 = vsub.f32 %v10034_v22, %v3903_v4  ;;  %v3586_v33 = vmul.f32 %v8775_v41, %v10002_v13 }
 0xcfe   : > { %v8777_v23 = vpop.eup %8776 }
 0xcff   : > { %v3585_v36 = vmul.f32 %v8777_v23, %v10020_v6  ;;  %v3591_v3 = vpack.c.bf16 %v3587_v11, %v3586_v33  ;;  %v3929_v18 = vmul.f32 1.442695, %v3917_v57 }
 0xd00   : > { %v3909_v38 = vpop.xlane.xlu0 %3908 }
 0xd01   : > { %v3590_v10 = vpack.c.bf16 %v3585_v36, %v3584_v56  ;;  %v3919_v2 = vsub.f32 %v10038_v46, %v3909_v38 }
 0xd03   : > { %8188 = vmatprep.mubr.msk.bf16.mxu1 %vm2341_vm5, %v3590_v10  ;;  %v3933_v9 = vmul.f32 1.442695, %v3919_v2 }
 0xd04   : > { %8189 = vmatmul.mubr.msk.bf16.gmra.mxu1 %vm2341_vm5, %v3591_v3 }
 0xd05   : > { %8784 = vpow2.f32 %v3933_v9 }
 0xd06   : > { %v10075_v42 = vpop.eup %8778  ;;  %8786 = vpow2.f32 %v3929_v18 }
 0xd07   : > { %v3943_v0 = vsel %vm2341_vm5, %v10075_v42, 0.0  ;;  %v10079_v13 = vpop.eup %8780 }
 0xd08   : > { %3944 = vadd.xlane.f32.xlu0 %v3943_v0  ;;  %v3937_v22 = vsel %vm2341_vm5, %v10079_v13, 0.0 }
 0xd0a   : > { %v10081_v6 = vpop.eup %8782 }
 0xd0b   : > { %v3946_v46 = vsel %vm2341_vm5, %v10081_v6, 0.0 }
 0xd0c   : > { %3938 = vadd.xlane.f32.xlu0 %v3937_v22  ;;  %3947 = vadd.xlane.f32.xlu1 %v3946_v46 }
 0xd12   : > { %v10087_v40 = vpop.eup %8784 }
 0xd13   : > { %v3955_v30 = vsel %vm2341_vm5, %v10087_v40, 0.0  ;;  %v10091_v44 = vpop.eup %8786 }
 0xd14   : > { %3956 = vadd.xlane.f32.xlu0 %v3955_v30  ;;  %v3949_v32 = vsel %vm2341_vm5, %v10091_v44, 0.0 }
 0xd18   : > { %3950 = vadd.xlane.f32.xlu0 %v3949_v32 }
 0xd25   : > { %v3894_v17 = vpop.xlane.xlu1 %3893 }
 0xd26   : > { %v3914_v21 = vsub.f32 %v10046_v53, %v3894_v17 }
 0xd28   : > { %v3923_v61 = vmul.f32 1.442695, %v3914_v21 }
 0xd29   : > { %v3906_v26 = vpop.xlane.xlu1 %3905 }
 0xd2a   : > { %8788 = vpow2.f32 %v3923_v61  ;;  %v3918_v5 = vsub.f32 %v10048_v27, %v3906_v26 }
 0xd2c   : > { %v3931_v54 = vmul.f32 1.442695, %v3918_v5 }
 0xd2d   : > { %v3912_v8 = vpop.xlane.xlu1 %3911 }
 0xd2e   : > { %3987 = vrot.lane.b32.xlu0 %v9668_v14, %s9150_s24  ;;  %v3920_v53 = vsub.f32 %v10052_v25, %v3912_v8 }
 0xd30   : > { %v3935_v45 = vmul.f32 1.442695, %v3920_v53 }
 0xd32   : > { %8790 = vpow2.f32 %v3935_v45 }
 0xd33   : > { %8792 = vpow2.f32 %v3931_v54  ;;  %v8625_v54 = vld [vmem:[%s9367_s8 + $0x18] sm:$0xff]   ;;  %s9151_s8 = smov (!%p7694_p8), 64  }
 0xd37   : > { %v8789_v48 = vpop.eup %8788 }
 0xd38   : > { %v3940_v58 = vsel %vm2341_vm5, %v8789_v48, 0.0 }
 0xd39   : > { %3941 = vadd.xlane.f32.xlu1 %v3940_v58 }
 0xd3f   : > { %v10106_v14 = vpop.eup %8790 }
 0xd40   : > { %v3958_v49 = vsel %vm2341_vm5, %v10106_v14, 0.0  ;;  %v10110_v24 = vpop.eup %8792 }
 0xd4a   : > { %3985 = vrot.lane.b32.xlu1 %v9672_v35, %s9150_s24  ;;  %v3952_v35 = vsel %vm2341_vm5, %v10110_v24, 0.0 }
 0xd4e   : > { %3983 = vrot.lane.b32.xlu1 %v9679_v37, %s9150_s24 }
 0xd72   : > { %3959 = vadd.xlane.f32.xlu1 %v3958_v49 }
 0xd76   : > { %3953 = vadd.xlane.f32.xlu1 %v3952_v35 }
 0xd87   : > { %3981 = vrot.lane.b32.xlu1 %v9685_v39, %s9150_s24 }
 0xd91   : > { %v3945_v37 = vpop.xlane.xlu0 %3944 }
 0xd95   : > { %v3939_v27 = vpop.xlane.xlu0 %3938  ;;  %v3948_v34 = vpop.xlane.xlu1 %3947 }
 0xd96   : > { %8794 = vrcp.f32 %v3939_v27 }
 0xd9d   : > { %v3957_v25 = vpop.xlane.xlu0 %3956 }
 0xda1   : > { %v3951_v15 = vpop.xlane.xlu0 %3950 }
 0xda3   : > { %v8795_v2 = vpop.eup %8794 }
 0xda4   : > { %v3969_v18 = vmul.f32 %v8795_v2, %v10079_v13 }
 0xda5   : > { %v3988_v43 = vpop.permute.xlu0 %3987 }
 0xda6   : > { %8218 = vmatprep.subr.bf16.mxu1 %v3988_v43 }
 0xdb9   : > { %v8186_v51 = vpop.f32.mrf.mxu1 }
 0xdbb   : > { %v3650_v52 = vpop.f32.mrf.mxu1 }
 0xdbd   : > { %v8187_v60 = vpop.f32.mrf.mxu1 }
 0xdbe   : > { %v3682_v4 = vpack.c.bf16 %v8187_v60, %v8186_v51  ;;  %v3376_v60 = vadd.f32 %v10116_v47, %v9976_v63 }
 0xdbf   : > { %v3653_v28 = vpop.f32.mrf.mxu1 }
 0xdc0   : > { %v3681_v41 = vpack.c.bf16 %v3653_v28, %v3650_v52 }
 0xdc2   : > { %8194 = vmatprep.mubr.msk.bf16.mxu1 %vm2644_vm6, %v3681_v41  ;;  %v3942_v23 = vpop.xlane.xlu1 %3941 }
 0xdc3   : > { %8796 = vrcp.f32 %v3942_v23  ;;  %8195 = vmatmul.mubr.msk.bf16.vlgmr.msra.gmra.mxu1 %vm2644_vm6, %v3682_v4 }
 0xdc4   : > { %8219 = vmatpush3.bf16.msra.mxu1 %v3988_v43  ;;  %v8190_v39 = vpop.f32.mrf.mxu1  ;;  %8798 = vrcp.f32 %v3948_v34 }
 0xdc5   : > { %8800 = vrcp.f32 %v3945_v37 }
 0xdc6   : > { %v3666_v11 = vpop.f32.mrf.mxu1  ;;  %v3986_v56 = vpop.permute.xlu1 %3985 }
 0xdc7   : > { %8220 = vmatprep.subr.bf16.mxu1 %v3986_v56 }
 0xdc8   : > { %v8191_v36 = vpop.f32.mrf.mxu1  ;;  %8221 = vmatpush3.bf16.msra.mxu1 %v3986_v56 }
 0xdc9   : > { %v3684_v10 = vpack.c.bf16 %v8191_v36, %v8190_v39  ;;  %v4175_v36 = vsub.s32 6, %v9627_v12 }
 0xdca   : > { %v3669_v57 = vpop.f32.mrf.mxu1  ;;  %v3984_v33 = vpop.permute.xlu1 %3983 }
 0xdcb   : > { %v3683_v38 = vpack.c.bf16 %v3669_v57, %v3666_v11  ;;  %8222 = vmatprep.subr.bf16.mxu1 %v3984_v33 }
 0xdcc   : > { %8223 = vmatpush3.bf16.msra.mxu1 %v3984_v33 }
 0xdcd   : > { %8198 = vmatprep.mubr.msk.bf16.mxu1 %vm2644_vm6, %v3683_v38 }
 0xdce   : > { %8199 = vmatmul.mubr.msk.bf16.gmra.mxu1 %vm2644_vm6, %v3684_v10  ;;  %v9002_v10 = vld [vmem:[#allocation2 + $0x10] sm:$0xff] }
 0xdd0   : > { %v8797_v3 = vpop.eup %8796 }
 0xdd1   : > { %v3970_v9 = vmul.f32 %v8797_v3, %v8789_v48  ;;  %v8799_v46 = vpop.eup %8798  ;;  %v10149_v3 = vld [vmem:[%s9388_s28] sm:$0xff] }
 0xdd2   : > { %v8801_v32 = vpop.eup %8800  ;;  %v3972_v16 = vmul.f32 %v8799_v46, %v10081_v6 }
 0xdd3   : > { %v3977_v0 = vpack.c.bf16 %v3970_v9, %v3969_v18  ;;  %v3971_v21 = vmul.f32 %v8801_v32, %v10075_v42  ;;  %v4176_v18 = vrot.slane %v10149_v3, %v4175_v36  ;;  %v9004_v9 = vld [vmem:[#allocation2] sm:$0xff] }
 0xdd5   : > { %8226 = vmatprep.mubr.msk.bf16.mxu1 %vm2341_vm5, %v3977_v0  ;;  %v3978_v13 = vpack.c.bf16 %v3972_v16, %v3971_v21 }
 0xdfb   : > { %v3960_v22 = vpop.xlane.xlu1 %3959 }
 0xdfc   : > { %8802 = vrcp.f32 %v3960_v22 }
 0xdfd   : > { %8804 = vrcp.f32 %v3951_v15 }
 0xdfe   : > { %8806 = vrcp.f32 %v3957_v25 }
 0xdff   : > { %v3954_v30 = vpop.xlane.xlu1 %3953 }
 0xe00   : > { %8808 = vrcp.f32 %v3954_v30 }
 0xe03   : > { %v3982_v17 = vpop.permute.xlu1 %3981 }
 0xe04   : > { %8224 = vmatprep.subr.bf16.mxu1 %v3982_v17 }
 0xe05   : > { %8225 = vmatpush3.bf16.msra.mxu1 %v3982_v17  ;;  %v9005_v17 = vld [vmem:[#allocation2 + $0x18] sm:$0xff] }
 0xe06   : > { %8234 = vmatprep.subr.bf16.mxu1 %v8625_v54 }
 0xe08   : > { %8227 = vmatmul.mubr.msk.bf16.vlgmr.msra.gmra.mxu1 %vm2341_vm5, %v3978_v13  ;;  %v9006_v13 = vld [vmem:[#allocation2 + $0x8] sm:$0xff] }
 0xe09   : > { %v8803_v61 = vpop.eup %8802  ;;  %8235 = vmatpush3.bf16.msra.mxu1 %v8625_v54 }
 0xe0a   : > { %v8805_v48 = vpop.eup %8804  ;;  %v3976_v8 = vmul.f32 %v8803_v61, %v10106_v14 }
 0xe0b   : > { %v8807_v58 = vpop.eup %8806  ;;  %v3973_v53 = vmul.f32 %v8805_v48, %v10091_v44 }
 0xe0c   : > { %v3975_v6 = vmul.f32 %v8807_v58, %v10087_v40 }
 0xe0d   : > { %v8809_v26 = vpop.eup %8808 }
 0xe0e   : > { %v3974_v5 = vmul.f32 %v8809_v26, %v10110_v24  ;;  %v3980_v42 = vpack.c.bf16 %v3976_v8, %v3975_v6 }
 0xe10   : > { %v3979_v45 = vpack.c.bf16 %v3974_v5, %v3973_v53 }
 0xe12   : > { %8230 = vmatprep.mubr.msk.bf16.mxu1 %vm2341_vm5, %v3979_v45 }
 0xe13   : > { %8231 = vmatmul.mubr.msk.bf16.gmra.mxu1 %vm2341_vm5, %v3980_v42 }
 0xe83   : > { %v8196_v49 = vpop.f32.mrf.mxu1 }
 0xe84   : > { %v3770_v35 = vadd.f32 %v8196_v49, %v9962_v55  ;;  %v9007_v49 = vld [vmem:[#allocation2 + $0x20] sm:$0xff] }
 0xe85   : > { %v3737_v37 = vpop.f32.mrf.mxu1 }
 0xe86   : > { %v3768_v14 = vadd.f32 %v3737_v37, %v9964_v1 }
 0xe87   : > { %v8197_v44 = vpop.f32.mrf.mxu1 }
 0xe88   : > { %v3771_v24 = vadd.f32 %v8197_v44, %v9966_v29 }
 0xe89   : > { %v3740_v27 = vpop.f32.mrf.mxu1 }
 0xe8a   : > { %v3769_v40 = vadd.f32 %v3740_v27, %v9968_v19 }
 0xe8e   : > { %v8200_v25 = vpop.f32.mrf.mxu1 }
 0xe8f   : > { %v3774_v15 = vadd.f32 %v8200_v25, %v9970_v59 }
 0xe90   : > { %v3753_v43 = vpop.f32.mrf.mxu1 }
 0xe91   : > { %v3772_v51 = vadd.f32 %v3753_v43, %v9972_v31 }
 0xe92   : > { %v8201_v52 = vpop.f32.mrf.mxu1 }
 0xe93   : > { %v3775_v55 = vadd.f32 %v8201_v52, %v9974_v62 }
 0xe94   : > { %v3756_v34 = vpop.f32.mrf.mxu1 }
 0xe95   : > { %v3773_v1 = vadd.f32 %v3756_v34, %v3376_v60 }
 0xec8   : > { %v8228_v28 = vpop.f32.mrf.mxu1 }
 0xeca   : > { %v4039_v41 = vpop.f32.mrf.mxu1 }
 0xecc   : > { %v8229_v29 = vpop.f32.mrf.mxu1 }
 0xecd   : > { %v4071_v19 = vpack.c.bf16 %v8229_v29, %v8228_v28 }
 0xece   : > { %v4042_v4 = vpop.f32.mrf.mxu1 }
 0xecf   : > { %v4070_v23 = vpack.c.bf16 %v4042_v4, %v4039_v41  ;;  %v8626_v4 = vld [vmem:[%s9373_s5 + $0x18] sm:$0xff]  }
 0xed0   : > { %8260 = vmatprep.subr.bf16.mxu1 %v8626_v4 }
 0xed1   : > { %8236 = vmatprep.mubr.msk.bf16.mxu1 %vm2644_vm6, %v4070_v23 }
 0xed2   : > { %8237 = vmatmul.mubr.msk.bf16.vlgmr.msra.gmra.mxu1 %vm2644_vm6, %v4071_v19 }
 0xed3   : > { %v8232_v59 = vpop.f32.mrf.mxu1  ;;  %8261 = vmatpush3.bf16.msra.mxu1 %v8626_v4  ;;  %v8631_v4 = vld [vmem:[%s9370_s17 + $0x10] sm:$0xff]  }
 0xed5   : > { %v4055_v31 = vpop.f32.mrf.mxu1 }
 0xed7   : > { %v8233_v39 = vpop.f32.mrf.mxu1 }
 0xed8   : > { %v4073_v47 = vpack.c.bf16 %v8233_v39, %v8232_v59 }
 0xed9   : > { %v4058_v11 = vpop.f32.mrf.mxu1 }
 0xeda   : > { %v4072_v63 = vpack.c.bf16 %v4058_v11, %v4055_v31 }
 0xedc   : > { %8240 = vmatprep.mubr.msk.bf16.mxu1 %vm2644_vm6, %v4072_v63 }
 0xedd   : > { %8241 = vmatmul.mubr.msk.bf16.gmra.mxu1 %vm2644_vm6, %v4073_v47 }
 0xf92   : > { %v8238_v62 = vpop.f32.mrf.mxu1 }
 0xf93   : > { %v4159_v56 = vadd.f32 %v8238_v62, %v3770_v35 }
 0xf94   : > { %v4126_v57 = vpop.f32.mrf.mxu1 }
 0xf95   : > { %v4157_v33 = vadd.f32 %v4126_v57, %v3768_v14  ;;  %v4167_v2 = vadd.f32 %v9002_v10, %v4159_v56  ;;  %v9008_v14 = vld [vmem:[#allocation2 + $0x30] sm:$0xff] }
 0xf96   : > { %v8239_v38 = vpop.f32.mrf.mxu1 }
 0xf97   : > { %v4165_v0 = vadd.f32 %v9004_v9, %v4157_v33  ;;  %v4160_v22 = vadd.f32 %v8239_v38, %v3771_v24  ;;  %v10154_v16 = vadd.f32 %v4176_v18, %v4167_v2 }
 0xf98   : > { %v4129_v46 = vpop.f32.mrf.mxu1 }
 0xf99   : > { %v10152_v30 = vadd.f32 %v4176_v18, %v4165_v0  ;;  %v4158_v32 = vadd.f32 %v4129_v46, %v3769_v40  ;;  %v4168_v21 = vadd.f32 %v9005_v17, %v4160_v22  ;;  %v4191_v6 = vsel %vm2341_vm5, %v10154_v16, 0.0 }
 0xf9b   : > { %v4166_v61 = vadd.f32 %v9006_v13, %v4158_v32  ;;  %v4185_v48 = vsel %vm2341_vm5, %v10152_v30, 0.0  ;;  %v10160_v8 = vadd.f32 %v4176_v18, %v4168_v21 }
 0xf9c   : > { %4186 = vadd.xlane.f32.xlu0 %v4185_v48 }
 0xf9d   : > { %v10158_v58 = vadd.f32 %v4176_v18, %v4166_v61  ;;  %v8242_v26 = vpop.f32.mrf.mxu1  ;;  %v4194_v27 = vsel %vm2341_vm5, %v10160_v8, 0.0 }
 0xf9e   : > { %v4163_v53 = vadd.f32 %v8242_v26, %v3774_v15  ;;  %v9009_v15 = vld [vmem:[#allocation2 + $0x38] sm:$0xff] }
 0xf9f   : > { %v4142_v5 = vpop.f32.mrf.mxu1  ;;  %v4188_v45 = vsel %vm2341_vm5, %v10158_v58, 0.0 }
 0xfa0   : > { %v4161_v42 = vadd.f32 %v4142_v5, %v3772_v51  ;;  %4192 = vadd.xlane.f32.xlu0 %v4191_v6  ;;  %4189 = vadd.xlane.f32.xlu1 %v4188_v45  ;;  %v4171_v44 = vadd.f32 %v9008_v14, %v4163_v53  ;;  %v9010_v51 = vld [vmem:[#allocation2 + $0x28] sm:$0xff]  ;;  %v8627_v5 = vld [vmem:[%s9373_s5 + $0x10] sm:$0xff]  }
 0xfa1   : > { %v8243_v54 = vpop.f32.mrf.mxu1  ;;  %8262 = vmatprep.subr.bf16.mxu1 %v8627_v5 }
 0xfa2   : > { %v4169_v35 = vadd.f32 %v9007_v49, %v4161_v42  ;;  %v4164_v37 = vadd.f32 %v8243_v54, %v3775_v55  ;;  %v10172_v34 = vadd.f32 %v4176_v18, %v4171_v44  ;;  %8263 = vmatpush3.bf16.msra.mxu1 %v8627_v5  ;;  %v8628_v44 = vld [vmem:[%s9373_s5 + $0x8] sm:$0xff]  }
 0xfa3   : > { %v4145_v24 = vpop.f32.mrf.mxu1  ;;  %8264 = vmatprep.subr.bf16.mxu1 %v8628_v44 }
 0xfa4   : > { %v10168_v40 = vadd.f32 %v4176_v18, %v4169_v35  ;;  %v4162_v25 = vadd.f32 %v4145_v24, %v3773_v1  ;;  %4195 = vadd.xlane.f32.xlu0 %v4194_v27  ;;  %v4172_v43 = vadd.f32 %v9009_v15, %v4164_v37  ;;  %v4203_v1 = vsel %vm2341_vm5, %v10172_v34, 0.0  ;;  %v8629_v15 = vld [vmem:[%s9373_s5] sm:$0xff]   ;;  %s11269_s5 = smov 112  }
 0xfa6   : > { %v4170_v52 = vadd.f32 %v9010_v51, %v4162_v25  ;;  %v4197_v60 = vsel %vm2341_vm5, %v10168_v40, 0.0  ;;  %v10176_v28 = vadd.f32 %v4176_v18, %v4172_v43  ;;  %8265 = vmatpush3.bf16.msra.mxu1 %v8628_v44  ;;  %v4430_v43 = vld [vmem:[#allocation4] sm:$0xff]  ;;  %v4431_v51 = vld [vmem:[#allocation4 + $0x8] sm:$0xff] }
 0xfa7   : > { %8266 = vmatprep.subr.bf16.mxu1 %v8629_v15 }
 0xfa8   : > { %v10174_v55 = vadd.f32 %v4176_v18, %v4170_v52  ;;  %4198 = vadd.xlane.f32.xlu0 %v4197_v60  ;;  %v4206_v29 = vsel %vm2341_vm5, %v10176_v28, 0.0  ;;  %v4446_v52 = vpack.c.bf16 %v4431_v51, %v4430_v43  ;;  %v4432_v60 = vld [vmem:[#allocation4 + $0x10] sm:$0xff] }
 0xfaa   : > { %v4200_v41 = vsel %vm2341_vm5, %v10174_v55, 0.0  ;;  %8267 = vmatpush3.bf16.msra.mxu1 %v8629_v15  ;;  %8268 = vmatprep.mubr.msk.bf16.mxu1 %vm2341_vm5, %v4446_v52 }
 0xfab   : > { %4201 = vadd.xlane.f32.xlu1 %v4200_v41  ;;  %v4433_v41 = vld [vmem:[#allocation4 + $0x18] sm:$0xff] }
 0xfac   : > { %4204 = vadd.xlane.f32.xlu0 %v4203_v1  ;;  %v4447_v1 = vpack.c.bf16 %v4433_v41, %v4432_v60 }
 0xfae   : > { %8269 = vmatmul.mubr.msk.bf16.vlgmr.msra.gmra.mxu1 %vm2341_vm5, %v4447_v1 }
 0xfaf   : > { %4207 = vadd.xlane.f32.xlu1 %v4206_v29  ;;  %v8630_v29 = vld [vmem:[%s9370_s17 + $0x18] sm:$0xff]  }
 0xfb0   : > { %8244 = vmatprep.subr.bf16.mxu0 %v8630_v29 }
 0xfb1   : > { %8245 = vmatpush3.bf16.msra.mxu0 %v8630_v29 }
 0xfb2   : > { %8246 = vmatprep.subr.bf16.mxu0 %v8631_v4 }
 0xfb5   : > { %8247 = vmatpush3.bf16.msra.mxu0 %v8631_v4 }
0x1025   : > { %v4187_v23 = vpop.xlane.xlu0 %4186 }
0x1026   : > { %v4209_v19 = vmul.f32 0.015625, %v4187_v23  ;;  %v8632_v23 = vld [vmem:[%s9370_s17 + $0x8] sm:$0xff]  }
0x1027   : > { %8248 = vmatprep.subr.bf16.mxu0 %v8632_v23 }
0x1028   : > { %v10186_v59 = vsub.f32 %v10152_v30, %v4209_v19  ;;  %v8633_v19 = vld [vmem:[%s9370_s17] sm:$0xff]   ;;  %8249 = vmatpush3.bf16.msra.mxu0 %v8632_v23  ;;  %s11272_s17 = sld [smem:[#allocation22_spill]] (!%p7694_p8) }
0x1029   : > { %v4193_v31 = vpop.xlane.xlu0 %4192  ;;  %v4190_v39 = vpop.xlane.xlu1 %4189  ;;  %8250 = vmatprep.subr.bf16.mxu0 %v8633_v19 }
0x102a   : > { %v4211_v11 = vmul.f32 0.015625, %v4193_v31  ;;  %v4210_v63 = vmul.f32 0.015625, %v4190_v39  ;;  %v4225_v47 = vmul.f32 %v10186_v59, %v10186_v59 }
0x102c   : > { %v10191_v62 = vsub.f32 %v10154_v16, %v4211_v11  ;;  %v10194_v56 = vsub.f32 %v10158_v58, %v4210_v63  ;;  %v4233_v36 = vsel %vm2341_vm5, %v4225_v47, 0.0  ;;  %8251 = vmatpush3.bf16.msra.mxu0 %v8633_v19 }
0x102d   : > { %v4196_v57 = vpop.xlane.xlu0 %4195  ;;  %4234 = vadd.xlane.f32.xlu0 %v4233_v36 }
0x102e   : > { %v4212_v33 = vmul.f32 0.015625, %v4196_v57  ;;  %v4227_v38 = vmul.f32 %v10191_v62, %v10191_v62  ;;  %v4226_v10 = vmul.f32 %v10194_v56, %v10194_v56 }
0x1030   : > { %v10202_v2 = vsub.f32 %v10160_v8, %v4212_v33  ;;  %v4239_v18 = vsel %vm2341_vm5, %v4227_v38, 0.0  ;;  %v4236_v9 = vsel %vm2341_vm5, %v4226_v10, 0.0 }
0x1031   : > { %4240 = vadd.xlane.f32.xlu0 %v4239_v18  ;;  %v4199_v0 = vpop.xlane.xlu0 %4198  ;;  %4237 = vadd.xlane.f32.xlu1 %v4236_v9 }
0x1032   : > { %v4213_v22 = vmul.f32 0.015625, %v4199_v0  ;;  %v4228_v46 = vmul.f32 %v10202_v2, %v10202_v2 }
0x1034   : > { %v10209_v32 = vsub.f32 %v10168_v40, %v4213_v22  ;;  %v4202_v17 = vpop.xlane.xlu1 %4201  ;;  %v4242_v21 = vsel %vm2341_vm5, %v4228_v46, 0.0  ;;  %v4291_v46 = vsub.s32 2, %v9627_v12 }
0x1035   : > { %v4214_v13 = vmul.f32 0.015625, %v4202_v17  ;;  %v4205_v61 = vpop.xlane.xlu0 %4204  ;;  %4243 = vadd.xlane.f32.xlu1 %v4242_v21 }
0x1036   : > { %v4215_v48 = vmul.f32 0.015625, %v4205_v61  ;;  %v4229_v26 = vmul.f32 %v10209_v32, %v10209_v32 }
0x1037   : > { %v10215_v53 = vsub.f32 %v10174_v55, %v4214_v13 }
0x1038   : > { %v10219_v6 = vsub.f32 %v10172_v34, %v4215_v48  ;;  %v4208_v45 = vpop.xlane.xlu1 %4207  ;;  %v4245_v42 = vsel %vm2341_vm5, %v4229_v26, 0.0 }
0x1039   : > { %v4216_v54 = vmul.f32 0.015625, %v4208_v45  ;;  %4246 = vadd.xlane.f32.xlu0 %v4245_v42  ;;  %v4230_v49 = vmul.f32 %v10215_v53, %v10215_v53  ;;  %v4292_v45 = vrot.slane %v10149_v3, %v4291_v46 }
0x103a   : > { %v4231_v35 = vmul.f32 %v10219_v6, %v10219_v6 }
0x103b   : > { %v10227_v37 = vsub.f32 %v10176_v28, %v4216_v54  ;;  %v4248_v14 = vsel %vm2341_vm5, %v4230_v49, 0.0 }
0x103c   : > { %4249 = vadd.xlane.f32.xlu1 %v4248_v14  ;;  %v4251_v24 = vsel %vm2341_vm5, %v4231_v35, 0.0  ;;  %v4303_v14 = vsub.s32 3, %v9627_v12 }
0x103d   : > { %4252 = vadd.xlane.f32.xlu0 %v4251_v24  ;;  %v4232_v27 = vmul.f32 %v10227_v37, %v10227_v37 }
0x103e   : > { %v4304_v51 = vrot.slane %v10149_v3, %v4303_v14 }
0x103f   : > { %v4254_v25 = vsel %vm2341_vm5, %v4232_v27, 0.0 }
0x1040   : > { %4255 = vadd.xlane.f32.xlu1 %v4254_v25 }
0x10b6   : > { %v4235_v31 = vpop.xlane.xlu0 %4234 }
0x10b7   : > { %v4257_v39 = vmul.f32 0.015625, %v4235_v31 }
0x10b9   : > { %v4265_v11 = vadd.f32 1e-06, %v4257_v39 }
0x10ba   : > { %v4241_v63 = vpop.xlane.xlu0 %4240  ;;  %v4238_v47 = vpop.xlane.xlu1 %4237 }
0x10bb   : > { %8810 = vrsqrt.f32 %v4265_v11  ;;  %v4259_v36 = vmul.f32 0.015625, %v4241_v63  ;;  %v4258_v57 = vmul.f32 0.015625, %v4238_v47 }
0x10bd   : > { %v4267_v33 = vadd.f32 1e-06, %v4259_v36  ;;  %v4266_v38 = vadd.f32 1e-06, %v4258_v57 }
0x10be   : > { %v4244_v10 = vpop.xlane.xlu1 %4243 }
0x10bf   : > { %8812 = vrsqrt.f32 %v4267_v33  ;;  %v4260_v18 = vmul.f32 0.015625, %v4244_v10 }
0x10c0   : > { %8814 = vrsqrt.f32 %v4266_v38 }
0x10c1   : > { %v4268_v9 = vadd.f32 1e-06, %v4260_v18 }
0x10c2   : > { %v4247_v0 = vpop.xlane.xlu0 %4246 }
0x10c3   : > { %8816 = vrsqrt.f32 %v4268_v9  ;;  %v4261_v22 = vmul.f32 0.015625, %v4247_v0 }
0x10c5   : > { %v4269_v17 = vadd.f32 1e-06, %v4261_v22  ;;  %v4250_v21 = vpop.xlane.xlu1 %4249 }
0x10c6   : > { %v4262_v13 = vmul.f32 0.015625, %v4250_v21  ;;  %v4253_v61 = vpop.xlane.xlu0 %4252 }
0x10c7   : > { %8818 = vrsqrt.f32 %v4269_v17  ;;  %v4263_v48 = vmul.f32 0.015625, %v4253_v61  ;;  %v2340_v17 = vld [vmem:[%s9388_s28 + $0x8] sm:$0x7] }
0x10c8   : > { %v8811_v26 = vpop.eup %8810  ;;  %v4270_v5 = vadd.f32 1e-06, %v4262_v13  ;;  %v10286_v21 = vrot.slane %v2340_v17, %v9630_v7 }
0x10c9   : > { %v4271_v42 = vadd.f32 1e-06, %v4263_v48  ;;  %v4256_v54 = vpop.xlane.xlu1 %4255  ;;  %v4281_v35 = vmul.f32 %v8811_v26, %v10186_v59 }
0x10ca   : > { %8820 = vrsqrt.f32 %v4270_v5  ;;  %v4264_v49 = vmul.f32 0.015625, %v4256_v54 }
0x10cb   : > { %8822 = vrsqrt.f32 %v4271_v42  ;;  %v4293_v43 = vmul.f32 %v4292_v45, %v4281_v35 }
0x10cc   : > { %v8813_v44 = vpop.eup %8812  ;;  %v4272_v24 = vadd.f32 1e-06, %v4264_v49 }
0x10cd   : > { %v8815_v27 = vpop.eup %8814  ;;  %v4283_v25 = vmul.f32 %v8813_v44, %v10191_v62  ;;  %v10252_v59 = vadd.f32 %v4304_v51, %v4293_v43 }
0x10ce   : > { %8824 = vrsqrt.f32 %v4272_v24  ;;  %v4282_v15 = vmul.f32 %v8815_v27, %v10194_v56  ;;  %v4327_v24 = vsub.s32 7, %v9627_v12 }
0x10cf   : > { %v4295_v41 = vmul.f32 %v4292_v45, %v4283_v25 }
0x10d0   : > { %v8817_v52 = vpop.eup %8816  ;;  %v4294_v60 = vmul.f32 %v4292_v45, %v4282_v15  ;;  %v4328_v15 = vrot.slane %v10149_v3, %v4327_v24 }
0x10d1   : > { %v4284_v1 = vmul.f32 %v8817_v52, %v10202_v2  ;;  %v10258_v19 = vadd.f32 %v4304_v51, %v4295_v41 }
0x10d2   : > { %v10254_v29 = vadd.f32 %v4304_v51, %v4294_v60 }
0x10d3   : > { %v4296_v4 = vmul.f32 %v4292_v45, %v4284_v1 }
0x10d4   : > { %v8819_v23 = vpop.eup %8818  ;;  %v4321_v62 = vpack.c.bf16 %v10254_v29, %v10252_v59 }
0x10d5   : > { %v10260_v56 = vadd.f32 %v4304_v51, %v4296_v4  ;;  %v4285_v31 = vmul.f32 %v8819_v23, %v10209_v32 }
0x10d6   : > { %8252 = vmatprep.mubr.msk.bf16.mxu0 %vm2341_vm5, %v4321_v62 }
0x10d7   : > { %v8821_v39 = vpop.eup %8820  ;;  %v4322_v2 = vpack.c.bf16 %v10260_v56, %v10258_v19  ;;  %v4297_v47 = vmul.f32 %v4292_v45, %v4285_v31 }
0x10d8   : > { %v8823_v11 = vpop.eup %8822  ;;  %v4286_v63 = vmul.f32 %v8821_v39, %v10215_v53 }
0x10d9   : > { %8253 = vmatmul.mubr.msk.bf16.vlgmr.msra.gmra.mxu0 %vm2341_vm5, %v4322_v2  ;;  %v4287_v36 = vmul.f32 %v8823_v11, %v10219_v6  ;;  %v10269_v38 = vadd.f32 %v4304_v51, %v4297_v47 }
0x10da   : > { %v4298_v57 = vmul.f32 %v4292_v45, %v4286_v63 }
0x10db   : > { %v8825_v33 = vpop.eup %8824  ;;  %v4299_v18 = vmul.f32 %v4292_v45, %v4287_v36 }
0x10dc   : > { %v10271_v32 = vadd.f32 %v4304_v51, %v4298_v57  ;;  %v4288_v10 = vmul.f32 %v8825_v33, %v10227_v37  ;;  %v8270_v37 = vpop.f32.mrf.mxu1 }
0x10dd   : > { %v10277_v53 = vadd.f32 %v4304_v51, %v4299_v18  ;;  %v4533_v61 = vadd.f32 %v8270_v37, %v10286_v21  ;;  %v4437_v37 = vld [vmem:[#allocation4 + $0x38] sm:$0xff] }
0x10de   : > { %v4323_v9 = vpack.c.bf16 %v10271_v32, %v10269_v38  ;;  %v4300_v0 = vmul.f32 %v4292_v45, %v4288_v10  ;;  %v4524_v13 = vpop.f32.mrf.mxu1 }
0x10df   : > { %v4525_v26 = vadd.f32 %v4524_v13, %v10286_v21 }
0x10e0   : > { %8256 = vmatprep.mubr.msk.bf16.mxu0 %vm2341_vm5, %v4323_v9  ;;  %v10279_v22 = vadd.f32 %v4304_v51, %v4300_v0  ;;  %v8271_v48 = vpop.f32.mrf.mxu1  ;;  %v4434_v9 = vld [vmem:[#allocation4 + $0x20] sm:$0xff]  ;;  %v4435_v0 = vld [vmem:[#allocation4 + $0x28] sm:$0xff] }
0x10e1   : > { %v4536_v5 = vadd.f32 %v8271_v48, %v10286_v21  ;;  %v4448_v17 = vpack.c.bf16 %v4435_v0, %v4434_v9 }
0x10e2   : > { %v4324_v6 = vpack.c.bf16 %v10279_v22, %v10277_v53  ;;  %v4527_v45 = vpop.f32.mrf.mxu1 }
0x10e3   : > { %v10291_v42 = vpack.c.bf16 %v4536_v5, %v4533_v61  ;;  %v4528_v54 = vadd.f32 %v4527_v45, %v10286_v21  ;;  %8272 = vmatprep.mubr.msk.bf16.mxu1 %vm2341_vm5, %v4448_v17 }
0x10e4   : > { %8257 = vmatmul.mubr.msk.bf16.gmra.mxu0 %vm2341_vm5, %v4324_v6  ;;  %v4436_v6 = vld [vmem:[#allocation4 + $0x30] sm:$0xff] }
0x10e5   : > { %4852 = vrot.lane.b32.xlu0 %v10291_v42, %s11269_s5  ;;  %8464 = vmatprep.subr.msk.bf16.mxu0 %vm2644_vm6, %v10291_v42  ;;  %v4585_v49 = vsel %vm2644_vm6, %v10291_v42, 0  ;;  %v10300_v35 = vpack.c.bf16 %v4528_v54, %v4525_v26  ;;  %v4449_v13 = vpack.c.bf16 %v4437_v37, %v4436_v6 }
0x10e6   : > { %8277 = vmatpush3.bf16.xpose.msra.mxu0 %v4585_v49 }
0x10e7   : > { %4850 = vrot.lane.b32.xlu1 %v10300_v35, %s11269_s5  ;;  %8465 = vmatprep.subr.msk.bf16.mxu0 %vm2644_vm6, %v10300_v35  ;;  %v4582_v14 = vsel %vm2644_vm6, %v10300_v35, 0 }
0x10e8   : > { %8273 = vmatmul.mubr.msk.bf16.gmra.mxu1 %vm2341_vm5, %v4449_v13 }
0x10ee   : > { %8279 = vmatpush3.bf16.xpose.msra.mxu0 %v4582_v14 }
0x1157   : > { %v4853_v44 = vpop.permute.xlu0 %4852 }
0x1158   : > { %8466 = vmatprep.subr.msk.bf16.mxu0 %vm2644_vm6, %v4853_v44  ;;  %v4870_v62 = vsel %vm2644_vm6, %v4853_v44, 0 }
0x1159   : > { %v4851_v3 = vpop.permute.xlu1 %4850 }
0x115a   : > { %v4867_v10 = vsel %vm2644_vm6, %v4851_v3, 0 }
0x1199   : > { %v8254_v27 = vpop.f32.mrf.mxu0 }
0x119a   : > { %v4408_v1 = vadd.f32 %v8254_v27, %v4328_v15 }
0x119b   : > { %v4399_v25 = vpop.f32.mrf.mxu0 }
0x119c   : > { %v4400_v60 = vadd.f32 %v4399_v25, %v4328_v15 }
0x119d   : > { %v8255_v43 = vpop.f32.mrf.mxu0 }
0x119e   : > { %v4411_v51 = vadd.f32 %v8255_v43, %v4328_v15 }
0x119f   : > { %v4402_v52 = vpop.f32.mrf.mxu0 }
0x11a0   : > { %v4403_v41 = vadd.f32 %v4402_v52, %v4328_v15  ;;  %v10313_v23 = vpack.c.bf16 %v4411_v51, %v4408_v1 }
0x11a2   : > { %v10311_v4 = vpack.c.bf16 %v4403_v41, %v4400_v60 }
0x11a4   : > { %4840 = vrot.lane.b32.xlu1 %v10311_v4, %s11269_s5  ;;  %v8258_v31 = vpop.f32.mrf.mxu0  ;;  %8280 = vmatprep.mubr.msk.bf16.mxu0 %vm2644_vm6, %v10311_v4 }
0x11a5   : > { %8281 = vmatmul.mubr.msk.bf16.vlgmr.msra.gmra.mxu0 %vm2644_vm6, %v10313_v23  ;;  %v4424_v11 = vadd.f32 %v8258_v31, %v4328_v15 }
0x11a6   : > { %v4415_v39 = vpop.f32.mrf.mxu0  ;;  %8301 = vmatpush3.bf16.xpose.msra.mxu0 %v4870_v62 }
0x11a7   : > { %8467 = vmatprep.subr.msk.bf16.mxu0 %vm2644_vm6, %v4851_v3  ;;  %v4416_v36 = vadd.f32 %v4415_v39, %v4328_v15 }
0x11a8   : > { %4842 = vrot.lane.b32.xlu1 %v10313_v23, %s11269_s5  ;;  %v8259_v2 = vpop.f32.mrf.mxu0 }
0x11a9   : > { %v4427_v63 = vadd.f32 %v8259_v2, %v4328_v15 }
0x11aa   : > { %v4418_v47 = vpop.f32.mrf.mxu0 }
0x11ab   : > { %v10325_v57 = vpack.c.bf16 %v4427_v63, %v4424_v11  ;;  %v4419_v33 = vadd.f32 %v4418_v47, %v4328_v15 }
0x11ad   : > { %v10328_v18 = vpack.c.bf16 %v4419_v33, %v4416_v36  ;;  %4846 = vrot.lane.b32.xlu1 %v10325_v57, %s11269_s5 }
0x11ae   : > { %8303 = vmatpush3.bf16.xpose.msra.mxu0 %v4867_v10 }
0x11af   : > { %4844 = vrot.lane.b32.xlu0 %v10328_v18, %s11269_s5  ;;  %8284 = vmatprep.mubr.msk.bf16.mxu0 %vm2644_vm6, %v10328_v18 }
0x11b0   : > { %8285 = vmatmul.mubr.msk.bf16.gmra.mxu0 %vm2644_vm6, %v10325_v57 }
0x1216   : > { %v4841_v61 = vpop.permute.xlu1 %4840 }
0x1217   : > { %8304 = vmatprep.mubr.msk.bf16.mxu0 %vm2644_vm6, %v4841_v61 }
0x121a   : > { %v4843_v48 = vpop.permute.xlu1 %4842 }
0x121b   : > { %8305 = vmatmul.mubr.msk.bf16.vlgmr.msra.gmra.mxu0 %vm2644_vm6, %v4843_v48 }
0x121f   : > { %v4847_v5 = vpop.permute.xlu1 %4846 }
0x1221   : > { %v4845_v26 = vpop.permute.xlu0 %4844 }
0x1222   : > { %8308 = vmatprep.mubr.msk.bf16.mxu0 %vm2644_vm6, %v4845_v26 }
0x1223   : > { %8309 = vmatmul.mubr.msk.bf16.gmra.mxu0 %vm2644_vm6, %v4847_v5 }
0x1265   : > { %v8282_v45 = vpop.f32.mrf.mxu0 }
0x1266   : > { %v10344_v54 = vmul.f32 0.25, %v8282_v45 }
0x1267   : > { %v4621_v49 = vpop.f32.mrf.mxu0 }
0x1268   : > { %v10346_v14 = vmul.f32 0.25, %v4621_v49  ;;  %v4667_v44 = vsel %vm4660_vm7, %v10344_v54, -inf }
0x1269   : > { %v8283_v24 = vpop.f32.mrf.mxu0  ;;  %4668 = vmax.xlane.f32.xlu0 %v4667_v44 }
0x126a   : > { %v10350_v25 = vmul.f32 0.25, %v8283_v24  ;;  %v4661_v43 = vsel %vm4660_vm7, %v10346_v14, -inf }
0x126b   : > { %v4624_v27 = vpop.f32.mrf.mxu0 }
0x126c   : > { %v10352_v15 = vmul.f32 0.25, %v4624_v27  ;;  %v4670_v60 = vsel %vm4660_vm7, %v10350_v25, -inf }
0x126d   : > { %4662 = vmax.xlane.f32.xlu0 %v4661_v43 }
0x126e   : > { %v4664_v51 = vsel %vm4660_vm7, %v10352_v15, -inf }
0x126f   : > { %4665 = vmax.xlane.f32.xlu1 %v4664_v51 }
0x1270   : > { %v8286_v52 = vpop.f32.mrf.mxu0 }
0x1271   : > { %v10360_v41 = vmul.f32 0.25, %v8286_v52  ;;  %4671 = vmax.xlane.f32.xlu0 %v4670_v60 }
0x1272   : > { %v4637_v1 = vpop.f32.mrf.mxu0 }
0x1273   : > { %v4679_v62 = vsel %vm4660_vm7, %v10360_v41, -inf  ;;  %v10364_v31 = vmul.f32 0.25, %v4637_v1 }
0x1274   : > { %v8287_v3 = vpop.f32.mrf.mxu0 }
0x1275   : > { %v10366_v39 = vmul.f32 0.25, %v8287_v3  ;;  %4680 = vmax.xlane.f32.xlu0 %v4679_v62  ;;  %v4673_v47 = vsel %vm4660_vm7, %v10364_v31, -inf }
0x1276   : > { %v4640_v2 = vpop.f32.mrf.mxu0 }
0x1277   : > { %v10368_v11 = vmul.f32 0.25, %v4640_v2  ;;  %v4682_v63 = vsel %vm4660_vm7, %v10366_v39, -inf }
0x1278   : > { %4683 = vmax.xlane.f32.xlu1 %v4682_v63 }
0x1279   : > { %4674 = vmax.xlane.f32.xlu0 %v4673_v47  ;;  %v4676_v36 = vsel %vm4660_vm7, %v10368_v11, -inf }
0x127c   : > { %4677 = vmax.xlane.f32.xlu1 %v4676_v36 }
0x12db   : > { %v8306_v33 = vpop.f32.mrf.mxu0 }
0x12dc   : > { %v10378_v6 = vmul.f32 0.25, %v8306_v33 }
0x12dd   : > { %v4906_v10 = vpop.f32.mrf.mxu0 }
0x12de   : > { %v10376_v9 = vmul.f32 0.25, %v4906_v10  ;;  %v4951_v26 = vsel %vm4660_vm7, %v10378_v6, -inf }
0x12df   : > { %v8307_v0 = vpop.f32.mrf.mxu0 }
0x12e0   : > { %v4945_v17 = vsel %vm4660_vm7, %v10376_v9, -inf  ;;  %v10384_v48 = vmul.f32 0.25, %v8307_v0 }
0x12e1   : > { %4946 = vmax.xlane.f32.xlu0 %v4945_v17  ;;  %v4909_v37 = vpop.f32.mrf.mxu0 }
0x12e2   : > { %v10382_v13 = vmul.f32 0.25, %v4909_v37  ;;  %v4954_v27 = vsel %vm4660_vm7, %v10384_v48, -inf }
0x12e3   : > { %v8310_v61 = vpop.f32.mrf.mxu0 }
0x12e4   : > { %v4948_v5 = vsel %vm4660_vm7, %v10382_v13, -inf  ;;  %v10392_v24 = vmul.f32 0.25, %v8310_v61 }
0x12e5   : > { %4952 = vmax.xlane.f32.xlu0 %v4951_v26  ;;  %4949 = vmax.xlane.f32.xlu1 %v4948_v5  ;;  %v4922_v45 = vpop.f32.mrf.mxu0 }
0x12e6   : > { %v10390_v49 = vmul.f32 0.25, %v4922_v45  ;;  %v4963_v1 = vsel %vm4660_vm7, %v10392_v24, -inf }
0x12e7   : > { %v8311_v44 = vpop.f32.mrf.mxu0 }
0x12e8   : > { %v4957_v43 = vsel %vm4660_vm7, %v10390_v49, -inf  ;;  %v10400_v60 = vmul.f32 0.25, %v8311_v44 }
0x12e9   : > { %4955 = vmax.xlane.f32.xlu1 %v4954_v27  ;;  %4958 = vmax.xlane.f32.xlu0 %v4957_v43  ;;  %v4925_v51 = vpop.f32.mrf.mxu0 }
0x12ea   : > { %v10398_v52 = vmul.f32 0.25, %v4925_v51  ;;  %v4966_v3 = vsel %vm4660_vm7, %v10400_v60, -inf }
0x12ec   : > { %v4960_v62 = vsel %vm4660_vm7, %v10398_v52, -inf }
0x12ed   : > { %4964 = vmax.xlane.f32.xlu0 %v4963_v1  ;;  %4961 = vmax.xlane.f32.xlu1 %v4960_v62 }
0x12f1   : > { %4967 = vmax.xlane.f32.xlu1 %v4966_v3 }
0x12f2   : > { %v4669_v2 = vpop.xlane.xlu0 %4668 }
0x12f3   : > { %v4687_v63 = vsub.f32 %v10344_v54, %v4669_v2 }
0x12f5   : > { %v4697_v47 = vmul.f32 1.442695, %v4687_v63 }
0x12f6   : > { %v4663_v36 = vpop.xlane.xlu0 %4662 }
0x12f7   : > { %8826 = vpow2.f32 %v4697_v47  ;;  %v4685_v33 = vsub.f32 %v10346_v14, %v4663_v36 }
0x12f8   : > { %v4666_v10 = vpop.xlane.xlu1 %4665 }
0x12f9   : > { %v4693_v0 = vmul.f32 1.442695, %v4685_v33  ;;  %v4686_v17 = vsub.f32 %v10352_v15, %v4666_v10 }
0x12fa   : > { %v4672_v37 = vpop.xlane.xlu0 %4671 }
0x12fb   : > { %8828 = vpow2.f32 %v4693_v0  ;;  %v4688_v61 = vsub.f32 %v10350_v25, %v4672_v37  ;;  %v4695_v26 = vmul.f32 1.442695, %v4686_v17 }
0x12fd   : > { %v4699_v5 = vmul.f32 1.442695, %v4688_v61 }
0x12fe   : > { %v4681_v45 = vpop.xlane.xlu0 %4680 }
0x12ff   : > { %8830 = vpow2.f32 %v4699_v5  ;;  %v4691_v44 = vsub.f32 %v10360_v41, %v4681_v45  ;;  %v8274_v45 = vpop.f32.mrf.mxu1 }
0x1300   : > { %8832 = vpow2.f32 %v4695_v26 }
0x1301   : > { %v4705_v54 = vmul.f32 1.442695, %v4691_v44  ;;  %v4684_v27 = vpop.xlane.xlu1 %4683  ;;  %v4540_v44 = vpop.f32.mrf.mxu1 }
0x1302   : > { %v4692_v43 = vsub.f32 %v10366_v39, %v4684_v27  ;;  %v4675_v14 = vpop.xlane.xlu0 %4674 }
0x1303   : > { %8834 = vpow2.f32 %v4705_v54  ;;  %v4689_v51 = vsub.f32 %v10364_v31, %v4675_v14  ;;  %v8275_v54 = vpop.f32.mrf.mxu1  ;;  %v4541_v14 = vadd.f32 %v4540_v44, %v10286_v21 }
0x1304   : > { %v10415_v15 = vpop.eup %8826  ;;  %v4707_v1 = vmul.f32 1.442695, %v4692_v43  ;;  %v4549_v43 = vadd.f32 %v8274_v45, %v10286_v21 }
0x1305   : > { %v4701_v62 = vmul.f32 1.442695, %v4689_v51  ;;  %v4678_v25 = vpop.xlane.xlu1 %4677  ;;  %v4715_v3 = vsel %vm4660_vm7, %v10415_v15, 0.0  ;;  %v4543_v27 = vpop.f32.mrf.mxu1  ;;  %v4552_v51 = vadd.f32 %v8275_v54, %v10286_v21 }
0x1306   : > { %8836 = vpow2.f32 %v4707_v1  ;;  %v4690_v41 = vsub.f32 %v10368_v11, %v4678_v25  ;;  %4716 = vadd.xlane.f32.xlu0 %v4715_v3  ;;  %v4544_v1 = vadd.f32 %v4543_v27, %v10286_v21 }
0x1307   : > { %8838 = vpow2.f32 %v4701_v62  ;;  %v10452_v62 = vpack.c.bf16 %v4552_v51, %v4549_v43 }
0x1308   : > { %v10420_v2 = vpop.eup %8828  ;;  %v4703_v39 = vmul.f32 1.442695, %v4690_v41  ;;  %v10454_v25 = vpack.c.bf16 %v4544_v1, %v4541_v14 }
0x1309   : > { %v4709_v63 = vsel %vm4660_vm7, %v10420_v2, 0.0  ;;  %8288 = vmatprep.subr.bf16.mxu1 %v10452_v62 }
0x130a   : > { %8840 = vpow2.f32 %v4703_v39  ;;  %4710 = vadd.xlane.f32.xlu0 %v4709_v63  ;;  %8289 = vmatpush3.bf16.msra.mxu1 %v10452_v62 }
0x130b   : > { %8290 = vmatprep.subr.bf16.mxu1 %v10454_v25 }
0x130c   : > { %v10424_v31 = vpop.eup %8830 }
0x130d   : > { %v4718_v47 = vsel %vm4660_vm7, %v10424_v31, 0.0  ;;  %v10428_v36 = vpop.eup %8832 }
0x130e   : > { %4719 = vadd.xlane.f32.xlu1 %v4718_v47  ;;  %v4712_v10 = vsel %vm4660_vm7, %v10428_v36, 0.0  ;;  %8291 = vmatpush3.bf16.msra.mxu1 %v10454_v25 }
0x1310   : > { %v10430_v33 = vpop.eup %8834 }
0x1311   : > { %v4727_v11 = vsel %vm4660_vm7, %v10430_v33, 0.0 }
0x1312   : > { %4728 = vadd.xlane.f32.xlu0 %v4727_v11  ;;  %4713 = vadd.xlane.f32.xlu1 %v4712_v10 }
0x1313   : > { %v10436_v0 = vpop.eup %8836 }
0x1314   : > { %v10438_v17 = vpop.eup %8838  ;;  %v4730_v37 = vsel %vm4660_vm7, %v10436_v0, 0.0 }
0x1315   : > { %v4721_v61 = vsel %vm4660_vm7, %v10438_v17, 0.0 }
0x1316   : > { %4722 = vadd.xlane.f32.xlu0 %v4721_v61  ;;  %4731 = vadd.xlane.f32.xlu1 %v4730_v37 }
0x1317   : > { %v10444_v26 = vpop.eup %8840 }
0x1318   : > { %v4724_v5 = vsel %vm4660_vm7, %v10444_v26, 0.0 }
0x131a   : > { %4725 = vadd.xlane.f32.xlu1 %v4724_v5 }
0x136a   : > { %v4947_v3 = vpop.xlane.xlu0 %4946 }
0x136b   : > { %v4969_v41 = vsub.f32 %v10376_v9, %v4947_v3 }
0x136d   : > { %v4977_v21 = vmul.f32 1.442695, %v4969_v41 }
0x136e   : > { %v4953_v39 = vpop.xlane.xlu0 %4952  ;;  %v4950_v63 = vpop.xlane.xlu1 %4949 }
0x136f   : > { %v4971_v47 = vsub.f32 %v10378_v6, %v4953_v39  ;;  %v4970_v10 = vsub.f32 %v10382_v13, %v4950_v63 }
0x1371   : > { %v4981_v11 = vmul.f32 1.442695, %v4971_v47  ;;  %v4979_v54 = vmul.f32 1.442695, %v4970_v10 }
0x1372   : > { %v4959_v37 = vpop.xlane.xlu0 %4958  ;;  %v4956_v61 = vpop.xlane.xlu1 %4955 }
0x1373   : > { %8842 = vpow2.f32 %v4981_v11  ;;  %v4972_v5 = vsub.f32 %v10384_v48, %v4956_v61  ;;  %v4973_v45 = vsub.f32 %v10390_v49, %v4959_v37 }
0x1374   : > { %8844 = vpow2.f32 %v4977_v21 }
0x1375   : > { %v4983_v44 = vmul.f32 1.442695, %v4972_v5  ;;  %v4985_v6 = vmul.f32 1.442695, %v4973_v45 }
0x1376   : > { %v4965_v27 = vpop.xlane.xlu0 %4964  ;;  %v4962_v9 = vpop.xlane.xlu1 %4961 }
0x1377   : > { %v4975_v43 = vsub.f32 %v10392_v24, %v4965_v27  ;;  %8846 = vpow2.f32 %v4983_v44  ;;  %v4974_v13 = vsub.f32 %v10398_v52, %v4962_v9 }
0x1378   : > { %8848 = vpow2.f32 %v4979_v54 }
0x1379   : > { %v4989_v14 = vmul.f32 1.442695, %v4975_v43  ;;  %v4987_v3 = vmul.f32 1.442695, %v4974_v13 }
0x137a   : > { %v4968_v51 = vpop.xlane.xlu1 %4967 }
0x137b   : > { %8850 = vpow2.f32 %v4989_v14  ;;  %v4976_v1 = vsub.f32 %v10400_v60, %v4968_v51 }
0x137c   : > { %8852 = vpow2.f32 %v4985_v6 }
0x137d   : > { %v4991_v48 = vmul.f32 1.442695, %v4976_v1 }
0x137f   : > { %8854 = vpow2.f32 %v4991_v48 }
0x1380   : > { %v10468_v49 = vpop.eup %8842  ;;  %8856 = vpow2.f32 %v4987_v3 }
0x1381   : > { %v4999_v41 = vsel %vm4660_vm7, %v10468_v49, 0.0  ;;  %v10472_v24 = vpop.eup %8844 }
0x1382   : > { %5000 = vadd.xlane.f32.xlu0 %v4999_v41  ;;  %v4993_v52 = vsel %vm4660_vm7, %v10472_v24, 0.0 }
0x1384   : > { %v10474_v39 = vpop.eup %8846 }
0x1385   : > { %v5002_v60 = vsel %vm4660_vm7, %v10474_v39, 0.0  ;;  %v10480_v63 = vpop.eup %8848 }
0x1386   : > { %4994 = vadd.xlane.f32.xlu0 %v4993_v52  ;;  %5003 = vadd.xlane.f32.xlu1 %v5002_v60  ;;  %v4996_v10 = vsel %vm4660_vm7, %v10480_v63, 0.0 }
0x1388   : > { %v10482_v47 = vpop.eup %8850 }
0x1389   : > { %v5011_v21 = vsel %vm4660_vm7, %v10482_v47, 0.0  ;;  %v10486_v11 = vpop.eup %8852 }
0x138a   : > { %5012 = vadd.xlane.f32.xlu0 %v5011_v21  ;;  %4997 = vadd.xlane.f32.xlu1 %v4996_v10  ;;  %v5005_v61 = vsel %vm4660_vm7, %v10486_v11, 0.0 }
0x138c   : > { %v10490_v37 = vpop.eup %8854 }
0x138d   : > { %v5014_v5 = vsel %vm4660_vm7, %v10490_v37, 0.0  ;;  %v10496_v45 = vpop.eup %8856 }
0x138e   : > { %5006 = vadd.xlane.f32.xlu0 %v5005_v61  ;;  %5015 = vadd.xlane.f32.xlu1 %v5014_v5  ;;  %v5008_v54 = vsel %vm4660_vm7, %v10496_v45, 0.0 }
0x138f   : > { %v4717_v44 = vpop.xlane.xlu0 %4716 }
0x1392   : > { %5009 = vadd.xlane.f32.xlu1 %v5008_v54 }
0x1393   : > { %v4711_v27 = vpop.xlane.xlu0 %4710 }
0x1397   : > { %v4720_v9 = vpop.xlane.xlu1 %4719 }
0x1398   : > { %8858 = vrcp.f32 %v4720_v9 }
0x1399   : > { %8860 = vrcp.f32 %v4711_v27 }
0x139a   : > { %8862 = vrcp.f32 %v4717_v44 }
0x139b   : > { %v4729_v43 = vpop.xlane.xlu0 %4728  ;;  %v4714_v6 = vpop.xlane.xlu1 %4713 }
0x139c   : > { %8864 = vrcp.f32 %v4714_v6 }
0x139f   : > { %v4723_v14 = vpop.xlane.xlu0 %4722  ;;  %v4732_v13 = vpop.xlane.xlu1 %4731 }
0x13a0   : > { %8866 = vrcp.f32 %v4723_v14 }
0x13a1   : > { %8868 = vrcp.f32 %v4732_v13 }
0x13a2   : > { %8870 = vrcp.f32 %v4729_v43 }
0x13a3   : > { %v4726_v51 = vpop.xlane.xlu1 %4725  ;;  %5039 = vrot.lane.b32.xlu1 %v10454_v25, %s11269_s5 }
0x13a4   : > { %8872 = vrcp.f32 %v4726_v51  ;;  %5041 = vrot.lane.b32.xlu0 %v10452_v62, %s11269_s5 }
0x13a5   : > { %v8859_v1 = vpop.eup %8858 }
0x13a6   : > { %v8861_v48 = vpop.eup %8860  ;;  %v4744_v52 = vmul.f32 %v8859_v1, %v10424_v31 }
0x13a7   : > { %5302 = vrot.lane.b32.xlu1 %v10291_v42, %s9148_s1  ;;  %v8863_v3 = vpop.eup %8862  ;;  %v4741_v60 = vmul.f32 %v8861_v48, %v10420_v2 }
0x13a8   : > { %5292 = vrot.lane.b32.xlu0 %v10311_v4, %s9148_s1  ;;  %v4743_v10 = vmul.f32 %v8863_v3, %v10415_v15 }
0x13a9   : > { %v8865_v41 = vpop.eup %8864 }
0x13aa   : > { %v4742_v21 = vmul.f32 %v8865_v41, %v10428_v36  ;;  %v4750_v44 = vpack.c.bf16 %v4744_v52, %v4743_v10  ;;  %v8634_v41 = vld [vmem:[%s9376_s11 + $0x8] sm:$0xff]   ;;  %v8635_v52 = vld [vmem:[%s9376_s11] sm:$0xff]  }
0x13ab   : > { %5300 = vrot.lane.b32.xlu1 %v10300_v35, %s9148_s1 }
0x13ac   : > { %5296 = vrot.lane.b32.xlu0 %v10328_v18, %s9148_s1  ;;  %v4749_v61 = vpack.c.bf16 %v4742_v21, %v4741_v60 }
0x13ad   : > { %v8867_v5 = vpop.eup %8866 }
0x13ae   : > { %v8869_v54 = vpop.eup %8868  ;;  %8292 = vmatprep.mubr.msk.bf16.mxu1 %vm4660_vm7, %v4749_v61  ;;  %v4745_v15 = vmul.f32 %v8867_v5, %v10438_v17 }
0x13af   : > { %v8871_v27 = vpop.eup %8870  ;;  %5294 = vrot.lane.b32.xlu1 %v10313_v23, %s9148_s1  ;;  %8293 = vmatmul.mubr.msk.bf16.vlgmr.msra.gmra.mxu1 %vm4660_vm7, %v4750_v44  ;;  %v4748_v36 = vmul.f32 %v8869_v54, %v10436_v0 }
0x13b0   : > { %v4747_v43 = vmul.f32 %v8871_v27, %v10430_v33 }
0x13b1   : > { %v8873_v2 = vpop.eup %8872 }
0x13b2   : > { %v4746_v31 = vmul.f32 %v8873_v2, %v10444_v26  ;;  %v4752_v6 = vpack.c.bf16 %v4748_v36, %v4747_v43 }
0x13b3   : > { %5298 = vrot.lane.b32.xlu1 %v10325_v57, %s9148_s1 }
0x13b4   : > { %v4751_v9 = vpack.c.bf16 %v4746_v31, %v4745_v15 }
0x13b6   : > { %8296 = vmatprep.mubr.msk.bf16.mxu1 %vm4660_vm7, %v4751_v9 }
0x13b7   : > { %8297 = vmatmul.mubr.msk.bf16.gmra.mxu1 %vm4660_vm7, %v4752_v6 }
0x140b   : > { %v5001_v14 = vpop.xlane.xlu0 %5000 }
0x140f   : > { %v4995_v13 = vpop.xlane.xlu0 %4994  ;;  %v5004_v51 = vpop.xlane.xlu1 %5003 }
0x1410   : > { %8874 = vrcp.f32 %v5004_v51 }
0x1411   : > { %8876 = vrcp.f32 %v4995_v13 }
0x1412   : > { %8878 = vrcp.f32 %v5001_v14 }
0x1413   : > { %v5013_v17 = vpop.xlane.xlu0 %5012  ;;  %v4998_v0 = vpop.xlane.xlu1 %4997 }
0x1414   : > { %8880 = vrcp.f32 %v4998_v0 }
0x1417   : > { %v5007_v26 = vpop.xlane.xlu0 %5006  ;;  %v5016_v1 = vpop.xlane.xlu1 %5015 }
0x1418   : > { %8882 = vrcp.f32 %v5016_v1 }
0x1419   : > { %8884 = vrcp.f32 %v5007_v26 }
0x141a   : > { %8886 = vrcp.f32 %v5013_v17 }
0x141b   : > { %v5042_v33 = vpop.permute.xlu0 %5041  ;;  %v5010_v48 = vpop.xlane.xlu1 %5009 }
0x141c   : > { %8312 = vmatprep.subr.bf16.mxu0 %v5042_v33  ;;  %8444 = vmatprep.subr.bf16.mxu1 %v5042_v33  ;;  %8888 = vrcp.f32 %v5010_v48 }
0x141d   : > { %8313 = vmatpush3.bf16.msra.mxu0 %v5042_v33  ;;  %8446 = vmatpush3.bf16.msra.mxu1 %v5042_v33  ;;  %v8875_v3 = vpop.eup %8874 }
0x141e   : > { %v8877_v60 = vpop.eup %8876  ;;  %v5028_v5 = vmul.f32 %v8875_v3, %v10474_v39 }
0x141f   : > { %v5040_v21 = vpop.permute.xlu1 %5039  ;;  %v8879_v10 = vpop.eup %8878  ;;  %v5025_v44 = vmul.f32 %v8877_v60, %v10472_v24 }
0x1420   : > { %8314 = vmatprep.subr.bf16.mxu0 %v5040_v21  ;;  %8445 = vmatprep.subr.bf16.mxu1 %v5040_v21  ;;  %v5027_v27 = vmul.f32 %v8879_v10, %v10468_v49 }
0x1421   : > { %v8881_v61 = vpop.eup %8880  ;;  %8315 = vmatpush3.bf16.msra.mxu0 %v5040_v21  ;;  %8447 = vmatpush3.bf16.msra.mxu1 %v5040_v21 }
0x1422   : > { %v5026_v54 = vmul.f32 %v8881_v61, %v10480_v63  ;;  %8324 = vmatprep.subr.bf16.mxu0 %v8634_v41  ;;  %8334 = vmatprep.subr.bf16.mxu1 %v8635_v52  ;;  %v5034_v15 = vpack.c.bf16 %v5028_v5, %v5027_v27 }
0x1423   : > { %v5303_v39 = vpop.permute.xlu1 %5302 }
0x1424   : > { %v5033_v2 = vpack.c.bf16 %v5026_v54, %v5025_v44  ;;  %v5320_v44 = vsel %vm2644_vm6, %v5303_v39, 0 }
0x1425   : > { %v8883_v31 = vpop.eup %8882 }
0x1426   : > { %8316 = vmatprep.mubr.msk.bf16.mxu0 %vm4660_vm7, %v5033_v2  ;;  %v8885_v36 = vpop.eup %8884  ;;  %v5032_v24 = vmul.f32 %v8883_v31, %v10490_v37 }
0x1427   : > { %8317 = vmatmul.mubr.msk.bf16.vlgmr.msra.gmra.mxu0 %vm4660_vm7, %v5034_v15  ;;  %v8887_v9 = vpop.eup %8886  ;;  %v5029_v63 = vmul.f32 %v8885_v36, %v10486_v11  ;;  %v5301_v27 = vpop.permute.xlu1 %5300 }
0x1428   : > { %8325 = vmatpush3.bf16.msra.mxu0 %v8634_v41  ;;  %v5031_v6 = vmul.f32 %v8887_v9, %v10482_v47  ;;  %v5293_v9 = vpop.permute.xlu0 %5292 }
0x1429   : > { %v8889_v43 = vpop.eup %8888  ;;  %8468 = vmatprep.subr.msk.bf16.mxu0 %vm2644_vm6, %v5303_v39 }
0x142a   : > { %v5030_v49 = vmul.f32 %v8889_v43, %v10496_v45  ;;  %v5036_v13 = vpack.c.bf16 %v5032_v24, %v5031_v6  ;;  %v5317_v43 = vsel %vm2644_vm6, %v5301_v27, 0 }
0x142b   : > { %v5295_v39 = vpop.permute.xlu1 %5294 }
0x142c   : > { %v5035_v14 = vpack.c.bf16 %v5030_v49, %v5029_v63  ;;  %v5297_v24 = vpop.permute.xlu0 %5296 }
0x142e   : > { %8320 = vmatprep.mubr.msk.bf16.mxu1 %vm4660_vm7, %v5035_v14 }
0x142f   : > { %8321 = vmatmul.mubr.msk.bf16.vlgmr.msra.gmra.mxu1 %vm4660_vm7, %v5036_v13  ;;  %v5299_v63 = vpop.permute.xlu1 %5298 }
0x1430   : > { %8335 = vmatpush3.bf16.msra.mxu1 %v8635_v52 }
0x146f   : > { %v8294_v51 = vpop.f32.mrf.mxu1 }
0x1471   : > { %v4801_v17 = vpop.f32.mrf.mxu1 }
0x1473   : > { %v8295_v0 = vpop.f32.mrf.mxu1 }
0x1474   : > { %v4833_v1 = vpack.c.bf16 %v8295_v0, %v8294_v51 }
0x1475   : > { %v4804_v26 = vpop.f32.mrf.mxu1 }
0x1476   : > { %v4832_v37 = vpack.c.bf16 %v4804_v26, %v4801_v17 }
0x1477   : > { %v8298_v33 = vpop.f32.mrf.mxu1 }
0x1478   : > { %8336 = vmatprep.mubr.msk.bf16.mxu1 %vm2644_vm6, %v4832_v37 }
0x1479   : > { %v4817_v11 = vpop.f32.mrf.mxu1  ;;  %8337 = vmatmul.mubr.msk.bf16.vlgmr.msra.gmra.mxu1 %vm2644_vm6, %v4833_v1 }
0x147b   : > { %v8299_v47 = vpop.f32.mrf.mxu1 }
0x147c   : > { %v4835_v3 = vpack.c.bf16 %v8299_v47, %v8298_v33 }
0x147d   : > { %v4820_v45 = vpop.f32.mrf.mxu1 }
0x147e   : > { %v4834_v48 = vpack.c.bf16 %v4820_v45, %v4817_v11 }
0x1480   : > { %8340 = vmatprep.mubr.msk.bf16.mxu1 %vm2644_vm6, %v4834_v48 }
0x1481   : > { %8341 = vmatmul.mubr.msk.bf16.gmra.mxu1 %vm2644_vm6, %v4835_v3 }
0x14e7   : > { %v8318_v41 = vpop.f32.mrf.mxu0 }
0x14e9   : > { %v5091_v52 = vpop.f32.mrf.mxu0 }
0x14eb   : > { %v8319_v60 = vpop.f32.mrf.mxu0 }
0x14ec   : > { %v5123_v61 = vpack.c.bf16 %v8319_v60, %v8318_v41 }
0x14ed   : > { %v5094_v21 = vpop.f32.mrf.mxu0 }
0x14ee   : > { %v5122_v10 = vpack.c.bf16 %v5094_v21, %v5091_v52 }
0x14ef   : > { %v8322_v5 = vpop.f32.mrf.mxu1 }
0x14f0   : > { %8326 = vmatprep.mubr.msk.bf16.mxu0 %vm2644_vm6, %v5122_v10 }
0x14f1   : > { %v5107_v54 = vpop.f32.mrf.mxu1  ;;  %8327 = vmatmul.mubr.msk.bf16.vlgmr.msra.gmra.mxu0 %vm2644_vm6, %v5123_v61 }
0x14f2   : > { %8345 = vmatpush3.bf16.xpose.msra.mxu0 %v5320_v44 }
0x14f3   : > { %8469 = vmatprep.subr.msk.bf16.mxu0 %vm2644_vm6, %v5301_v27  ;;  %v8323_v2 = vpop.f32.mrf.mxu1 }
0x14f4   : > { %v5125_v36 = vpack.c.bf16 %v8323_v2, %v8322_v5 }
0x14f5   : > { %v5110_v15 = vpop.f32.mrf.mxu1 }
0x14f6   : > { %v5124_v31 = vpack.c.bf16 %v5110_v15, %v5107_v54 }
0x14f8   : > { %8330 = vmatprep.mubr.msk.bf16.mxu0 %vm2644_vm6, %v5124_v31 }
0x14f9   : > { %8331 = vmatmul.mubr.msk.bf16.gmra.mxu0 %vm2644_vm6, %v5125_v36 }
0x14fa   : > { %8347 = vmatpush3.bf16.xpose.msra.mxu0 %v5317_v43  ;;  %8348 = vmatprep.mubr.msk.bf16.mxu0 %vm2644_vm6, %v5293_v9 }
0x1501   : > { %8349 = vmatmul.mubr.msk.bf16.vlgmr.msra.gmra.mxu0 %vm2644_vm6, %v5295_v39 }
0x1502   : > { %8352 = vmatprep.mubr.msk.bf16.mxu0 %vm2644_vm6, %v5297_v24 }
0x1509   : > { %8353 = vmatmul.mubr.msk.bf16.gmra.mxu0 %vm2644_vm6, %v5299_v63 }
0x15b1   : > { %v10558_v49 = vpop.f32.mrf.mxu0 }
0x15b3   : > { %v10560_v6 = vpop.f32.mrf.mxu0 }
0x15b5   : > { %v10562_v14 = vpop.f32.mrf.mxu0 }
0x15b7   : > { %v10564_v13 = vpop.f32.mrf.mxu0 }
0x15b9   : > { %v10566_v51 = vpop.f32.mrf.mxu0 }
0x15bb   : > { %v10568_v17 = vpop.f32.mrf.mxu0 }
0x15bd   : > { %v10570_v0 = vpop.f32.mrf.mxu0 }
0x15bf   : > { %v10572_v26 = vpop.f32.mrf.mxu0 }
0x15c1   : > { %v8350_v37 = vpop.f32.mrf.mxu0 }
0x15c2   : > { %v5389_v47 = vmul.f32 0.25, %v8350_v37 }
0x15c3   : > { %v5356_v1 = vpop.f32.mrf.mxu0 }
0x15c4   : > { %v5387_v33 = vmul.f32 0.25, %v5356_v1  ;;  %v5401_v60 = vsel %vm4660_vm7, %v5389_v47, -inf }
0x15c5   : > { %v8351_v11 = vpop.f32.mrf.mxu0 }
0x15c6   : > { %v5395_v45 = vsel %vm4660_vm7, %v5387_v33, -inf  ;;  %v5390_v52 = vmul.f32 0.25, %v8351_v11 }
0x15c7   : > { %5396 = vmax.xlane.f32.xlu0 %v5395_v45  ;;  %v5359_v48 = vpop.f32.mrf.mxu0 }
0x15c8   : > { %v5388_v3 = vmul.f32 0.25, %v5359_v48  ;;  %v5404_v44 = vsel %vm4660_vm7, %v5390_v52, -inf }
0x15c9   : > { %v8354_v41 = vpop.f32.mrf.mxu0 }
0x15ca   : > { %v5398_v21 = vsel %vm4660_vm7, %v5388_v3, -inf  ;;  %v5393_v2 = vmul.f32 0.25, %v8354_v41 }
0x15cb   : > { %5402 = vmax.xlane.f32.xlu0 %v5401_v60  ;;  %5399 = vmax.xlane.f32.xlu1 %v5398_v21  ;;  %v5372_v10 = vpop.f32.mrf.mxu0 }
0x15cc   : > { %v5391_v5 = vmul.f32 0.25, %v5372_v10  ;;  %v5413_v9 = vsel %vm4660_vm7, %v5393_v2, -inf }
0x15cd   : > { %v8355_v61 = vpop.f32.mrf.mxu0 }
0x15ce   : > { %v5394_v15 = vmul.f32 0.25, %v8355_v61  ;;  %v5407_v31 = vsel %vm4660_vm7, %v5391_v5, -inf }
0x15cf   : > { %5405 = vmax.xlane.f32.xlu0 %v5404_v44  ;;  %v5375_v54 = vpop.f32.mrf.mxu0 }
0x15d0   : > { %v10578_v27 = vmul.f32 0.25, %v5375_v54  ;;  %v5416_v43 = vsel %vm4660_vm7, %v5394_v15, -inf }
0x15d2   : > { %v5410_v36 = vsel %vm4660_vm7, %v10578_v27, -inf }
0x15d3   : > { %5408 = vmax.xlane.f32.xlu0 %v5407_v31  ;;  %5411 = vmax.xlane.f32.xlu1 %v5410_v36 }
0x15d7   : > { %5414 = vmax.xlane.f32.xlu0 %v5413_v9  ;;  %5417 = vmax.xlane.f32.xlu1 %v5416_v43 }
0x1650   : > { %v5397_v39 = vpop.xlane.xlu0 %5396 }
0x1651   : > { %v5419_v24 = vsub.f32 %v5387_v33, %v5397_v39 }
0x1653   : > { %v5427_v11 = vmul.f32 1.442695, %v5419_v24 }
0x1654   : > { %v5403_v63 = vpop.xlane.xlu0 %5402  ;;  %v5400_v37 = vpop.xlane.xlu1 %5399 }
0x1655   : > { %v5421_v1 = vsub.f32 %v5389_v47, %v5403_v63  ;;  %v5420_v48 = vsub.f32 %v5388_v3, %v5400_v37 }
0x1657   : > { %v5431_v45 = vmul.f32 1.442695, %v5421_v1  ;;  %v5429_v21 = vmul.f32 1.442695, %v5420_v48 }
0x1658   : > { %v5406_v41 = vpop.xlane.xlu0 %5405 }
0x1659   : > { %8890 = vpow2.f32 %v5431_v45  ;;  %v5422_v60 = vsub.f32 %v5390_v52, %v5406_v41 }
0x165a   : > { %8892 = vpow2.f32 %v5427_v11 }
0x165b   : > { %v5433_v10 = vmul.f32 1.442695, %v5422_v60 }
0x165c   : > { %v5409_v61 = vpop.xlane.xlu0 %5408  ;;  %v5412_v11 = vpop.xlane.xlu1 %5411 }
0x165d   : > { %8894 = vpow2.f32 %v5433_v10  ;;  %v5423_v44 = vsub.f32 %v5391_v5, %v5409_v61  ;;  %v5424_v41 = vsub.f32 %v10578_v27, %v5412_v11 }
0x165e   : > { %8896 = vpow2.f32 %v5429_v21 }
0x165f   : > { %v5435_v36 = vmul.f32 1.442695, %v5423_v44  ;;  %v5437_v21 = vmul.f32 1.442695, %v5424_v41 }
0x1660   : > { %v5415_v54 = vpop.xlane.xlu0 %5414  ;;  %v5418_v45 = vpop.xlane.xlu1 %5417 }
0x1661   : > { %v5425_v31 = vsub.f32 %v5393_v2, %v5415_v54  ;;  %v5426_v48 = vsub.f32 %v5394_v15, %v5418_v45 }
0x1663   : > { %v5439_v33 = vmul.f32 1.442695, %v5425_v31  ;;  %v5441_v60 = vmul.f32 1.442695, %v5426_v48 }
0x1665   : > { %8898 = vpow2.f32 %v5439_v33 }
0x1666   : > { %v10585_v9 = vpop.eup %8890  ;;  %8900 = vpow2.f32 %v5435_v36 }
0x1667   : > { %v5449_v47 = vsel %vm4660_vm7, %v10585_v9, 0.0  ;;  %v8893_v3 = vpop.eup %8892  ;;  %8902 = vpow2.f32 %v5441_v60 }
0x1668   : > { %5450 = vadd.xlane.f32.xlu0 %v5449_v47  ;;  %v5443_v43 = vsel %vm4660_vm7, %v8893_v3, 0.0  ;;  %8904 = vpow2.f32 %v5437_v21 }
0x166a   : > { %v8895_v52 = vpop.eup %8894 }
0x166b   : > { %v5452_v39 = vsel %vm4660_vm7, %v8895_v52, 0.0  ;;  %v8897_v24 = vpop.eup %8896 }
0x166c   : > { %5444 = vadd.xlane.f32.xlu0 %v5443_v43  ;;  %5453 = vadd.xlane.f32.xlu1 %v5452_v39  ;;  %v5446_v5 = vsel %vm4660_vm7, %v8897_v24, 0.0 }
0x1670   : > { %5447 = vadd.xlane.f32.xlu1 %v5446_v5 }
0x1672   : > { %v10592_v2 = vpop.eup %8898 }
0x1673   : > { %v5461_v63 = vsel %vm4660_vm7, %v10592_v2, 0.0  ;;  %v10596_v37 = vpop.eup %8900 }
0x1674   : > { %5462 = vadd.xlane.f32.xlu0 %v5461_v63  ;;  %v5455_v1 = vsel %vm4660_vm7, %v10596_v37, 0.0  ;;  %v8903_v10 = vpop.eup %8902 }
0x1675   : > { %v8905_v61 = vpop.eup %8904 }
0x1676   : > { %v5458_v44 = vsel %vm4660_vm7, %v8905_v61, 0.0 }
0x1678   : > { %5456 = vadd.xlane.f32.xlu0 %v5455_v1 }
0x1681   : > { %5487 = vrot.lane.b32.xlu1 %v10454_v25, %s9148_s1 }
0x1685   : > { %5675 = vrot.lane.b32.xlu1 %v10291_v42, %s9150_s24  ;;  %v5464_v42 = vsel %vm4660_vm7, %v8903_v10, 0.0 }
0x168e   : > { %5489 = vrot.lane.b32.xlu0 %v10452_v62, %s9148_s1 }
0x1692   : > { %5665 = vrot.lane.b32.xlu0 %v10311_v4, %s9150_s24 }
0x1696   : > { %5669 = vrot.lane.b32.xlu0 %v10328_v18, %s9150_s24 }
0x16a9   : > { %5465 = vadd.xlane.f32.xlu1 %v5464_v42 }
0x16ad   : > { %5459 = vadd.xlane.f32.xlu1 %v5458_v44 }
0x16be   : > { %5673 = vrot.lane.b32.xlu1 %v10300_v35, %s9150_s24 }
0x16c2   : > { %5667 = vrot.lane.b32.xlu1 %v10313_v23, %s9150_s24 }
0x16c6   : > { %5671 = vrot.lane.b32.xlu1 %v10325_v57, %s9150_s24 }
0x16f1   : > { %v5451_v4 = vpop.xlane.xlu0 %5450 }
0x16f5   : > { %v5445_v18 = vpop.xlane.xlu0 %5444  ;;  %v5454_v27 = vpop.xlane.xlu1 %5453 }
0x16f6   : > { %8906 = vrcp.f32 %v5445_v18 }
0x16f7   : > { %8908 = vrcp.f32 %v5454_v27 }
0x16f8   : > { %8910 = vrcp.f32 %v5451_v4 }
0x16f9   : > { %v5448_v15 = vpop.xlane.xlu1 %5447 }
0x16fa   : > { %8912 = vrcp.f32 %v5448_v15 }
0x16fd   : > { %v5463_v54 = vpop.xlane.xlu0 %5462  ;;  %v5488_v47 = vpop.permute.xlu1 %5487 }
0x1701   : > { %v5457_v31 = vpop.xlane.xlu0 %5456  ;;  %v5676_v11 = vpop.permute.xlu1 %5675 }
0x1702   : > { %v5693_v48 = vsel %vm2644_vm6, %v5676_v11, 0 }
0x1703   : > { %v8907_v36 = vpop.eup %8906 }
0x1704   : > { %v8909_v33 = vpop.eup %8908  ;;  %v5475_v57 = vmul.f32 %v8907_v36, %v8893_v3 }
0x1705   : > { %v5490_v35 = vpop.permute.xlu0 %5489  ;;  %v8911_v43 = vpop.eup %8910  ;;  %v5478_v39 = vmul.f32 %v8909_v33, %v8895_v52 }
0x1706   : > { %8356 = vmatprep.subr.bf16.mxu1 %v5490_v35  ;;  %v5477_v63 = vmul.f32 %v8911_v43, %v10585_v9 }
0x1707   : > { %v8913_v23 = vpop.eup %8912  ;;  %8357 = vmatpush3.bf16.msra.mxu1 %v5490_v35 }
0x1708   : > { %8358 = vmatprep.subr.bf16.mxu1 %v5488_v47  ;;  %v5476_v5 = vmul.f32 %v8913_v23, %v8897_v24  ;;  %v5484_v45 = vpack.c.bf16 %v5478_v39, %v5477_v63 }
0x170a   : > { %v5483_v1 = vpack.c.bf16 %v5476_v5, %v5475_v57 }
0x170b   : > { %8359 = vmatpush3.bf16.msra.mxu1 %v5488_v47 }
0x170c   : > { %8360 = vmatprep.mubr.msk.bf16.mxu1 %vm4660_vm7, %v5483_v1  ;;  %8470 = vmatprep.subr.msk.bf16.mxu1 %vm2644_vm6, %v5676_v11 }
0x170e   : > { %8361 = vmatmul.mubr.msk.bf16.vlgmr.msra.gmra.mxu1 %vm4660_vm7, %v5484_v45 }
0x170f   : > { %8379 = vmatpush3.bf16.xpose.msra.mxu1 %v5693_v48 }
0x1732   : > { %v5466_v41 = vpop.xlane.xlu1 %5465 }
0x1733   : > { %8914 = vrcp.f32 %v5466_v41 }
0x1734   : > { %8916 = vrcp.f32 %v5457_v31  ;;  %v5666_v31 = vpop.permute.xlu0 %5665 }
0x1735   : > { %8918 = vrcp.f32 %v5463_v54 }
0x1736   : > { %v5460_v3 = vpop.xlane.xlu1 %5459 }
0x1737   : > { %8920 = vrcp.f32 %v5460_v3 }
0x1738   : > { %v5670_v33 = vpop.permute.xlu0 %5669 }
0x173a   : > { %v5674_v9 = vpop.permute.xlu1 %5673 }
0x173b   : > { %v5690_v52 = vsel %vm2644_vm6, %v5674_v9, 0  ;;  %8471 = vmatprep.subr.msk.bf16.mxu1 %vm2644_vm6, %v5674_v9 }
0x173c   : > { %8381 = vmatpush3.bf16.xpose.msra.mxu1 %v5690_v52 }
0x173e   : > { %v5668_v36 = vpop.permute.xlu1 %5667 }
0x1740   : > { %v8915_v24 = vpop.eup %8914 }
0x1741   : > { %v8917_v60 = vpop.eup %8916  ;;  %v5482_v44 = vmul.f32 %v8915_v24, %v8903_v10  ;;  %v8636_v10 = vld [vmem:[%s9376_s11 + $0x10] sm:$0xff]  }
0x1742   : > { %v8919_v21 = vpop.eup %8918  ;;  %v5479_v4 = vmul.f32 %v8917_v60, %v10596_v37  ;;  %8368 = vmatprep.subr.bf16.mxu0 %v8636_v10  ;;  %v5672_v37 = vpop.permute.xlu1 %5671 }
0x1743   : > { %v5481_v27 = vmul.f32 %v8919_v21, %v10592_v2  ;;  %8369 = vmatpush3.bf16.msra.mxu0 %v8636_v10  ;;  %v8338_v2 = vpop.f32.mrf.mxu1 }
0x1744   : > { %v8921_v42 = vpop.eup %8920 }
0x1745   : > { %v5480_v18 = vmul.f32 %v8921_v42, %v8905_v61  ;;  %v5486_v54 = vpack.c.bf16 %v5482_v44, %v5481_v27  ;;  %v5261_v61 = vpop.f32.mrf.mxu1 }
0x1747   : > { %v5485_v15 = vpack.c.bf16 %v5480_v18, %v5479_v4  ;;  %v8339_v47 = vpop.f32.mrf.mxu1 }
0x1749   : > { %8364 = vmatprep.mubr.msk.bf16.mxu1 %vm4660_vm7, %v5485_v15  ;;  %v5264_v35 = vpop.f32.mrf.mxu1 }
0x174a   : > { %8365 = vmatmul.mubr.msk.bf16.gmra.mxu1 %vm4660_vm7, %v5486_v54 }
0x174b   : > { %8382 = vmatprep.mubr.msk.bf16.mxu1 %vm2644_vm6, %v5666_v31  ;;  %v10635_v43 = vpop.f32.mrf.mxu1 }
0x174d   : > { %v10637_v23 = vpop.f32.mrf.mxu1 }
0x174f   : > { %v10639_v39 = vpop.f32.mrf.mxu1 }
0x1751   : > { %v10641_v57 = vpop.f32.mrf.mxu1 }
0x1752   : > { %8383 = vmatmul.mubr.msk.bf16.vlgmr.msra.gmra.mxu1 %vm2644_vm6, %v5668_v36 }
0x1753   : > { %8386 = vmatprep.mubr.msk.bf16.mxu1 %vm2644_vm6, %v5670_v33 }
0x175a   : > { %8387 = vmatmul.mubr.msk.bf16.gmra.mxu1 %vm2644_vm6, %v5672_v37 }
0x17ce   : > { %v8362_v5 = vpop.f32.mrf.mxu1 }
0x17d0   : > { %v5539_v63 = vpop.f32.mrf.mxu1 }
0x17d2   : > { %v8363_v1 = vpop.f32.mrf.mxu1 }
0x17d3   : > { %v5571_v48 = vpack.c.bf16 %v8363_v1, %v8362_v5 }
0x17d4   : > { %v5542_v11 = vpop.f32.mrf.mxu1 }
0x17d5   : > { %v5570_v45 = vpack.c.bf16 %v5542_v11, %v5539_v63 }
0x17d7   : > { %8370 = vmatprep.mubr.msk.bf16.mxu0 %vm2644_vm6, %v5570_v45 }
0x17d8   : > { %8371 = vmatmul.mubr.msk.bf16.vlgmr.msra.gmra.mxu0 %vm2644_vm6, %v5571_v48 }
0x180a   : > { %v8366_v41 = vpop.f32.mrf.mxu1 }
0x180c   : > { %v5555_v3 = vpop.f32.mrf.mxu1 }
0x180e   : > { %v8367_v9 = vpop.f32.mrf.mxu1 }
0x180f   : > { %v5573_v60 = vpack.c.bf16 %v8367_v9, %v8366_v41 }
0x1810   : > { %v5558_v52 = vpop.f32.mrf.mxu1 }
0x1811   : > { %v5572_v24 = vpack.c.bf16 %v5558_v52, %v5555_v3 }
0x1812   : > { %v8384_v21 = vpop.f32.mrf.mxu1 }
0x1813   : > { %8374 = vmatprep.mubr.msk.bf16.mxu0 %vm2644_vm6, %v5572_v24  ;;  %v5762_v18 = vmul.f32 0.25, %v8384_v21 }
0x1814   : > { %8375 = vmatmul.mubr.msk.bf16.gmra.mxu0 %vm2644_vm6, %v5573_v60  ;;  %v5729_v42 = vpop.f32.mrf.mxu1  ;;  %v5270_v60 = vadd.f32 %v8338_v2, %v10558_v49 }
0x1815   : > { %v5760_v44 = vmul.f32 0.25, %v5729_v42  ;;  %v5774_v33 = vsel %vm4660_vm7, %v5762_v18, -inf  ;;  %v5262_v42 = vadd.f32 %v5261_v61, %v10560_v6 }
0x1816   : > { %v8385_v4 = vpop.f32.mrf.mxu1 }
0x1817   : > { %v5768_v27 = vsel %vm4660_vm7, %v5760_v44, -inf  ;;  %v5763_v36 = vmul.f32 0.25, %v8385_v4 }
0x1818   : > { %5769 = vmax.xlane.f32.xlu0 %v5768_v27  ;;  %v5732_v15 = vpop.f32.mrf.mxu1 }
0x1819   : > { %v5761_v54 = vmul.f32 0.25, %v5732_v15  ;;  %v5777_v1 = vsel %vm4660_vm7, %v5763_v36, -inf  ;;  %v5273_v15 = vadd.f32 %v8339_v47, %v10562_v14 }
0x181a   : > { %v8388_v31 = vpop.f32.mrf.mxu1 }
0x181b   : > { %v5771_v10 = vsel %vm4660_vm7, %v5761_v54, -inf  ;;  %v5766_v48 = vmul.f32 0.25, %v8388_v31 }
0x181c   : > { %5775 = vmax.xlane.f32.xlu0 %v5774_v33  ;;  %5772 = vmax.xlane.f32.xlu1 %v5771_v10  ;;  %v5745_v37 = vpop.f32.mrf.mxu1  ;;  %v5265_v10 = vadd.f32 %v5264_v35, %v10564_v13 }
0x181d   : > { %v5764_v63 = vmul.f32 0.25, %v5745_v37  ;;  %v5786_v52 = vsel %vm4660_vm7, %v5766_v48, -inf }
0x181e   : > { %v8389_v5 = vpop.f32.mrf.mxu1 }
0x181f   : > { %v5767_v41 = vmul.f32 0.25, %v8389_v5  ;;  %v5780_v3 = vsel %vm4660_vm7, %v5764_v63, -inf }
0x1820   : > { %5778 = vmax.xlane.f32.xlu0 %v5777_v1  ;;  %v5748_v11 = vpop.f32.mrf.mxu1 }
0x1821   : > { %v5765_v45 = vmul.f32 0.25, %v5748_v11  ;;  %v5789_v24 = vsel %vm4660_vm7, %v5767_v41, -inf }
0x1823   : > { %v5783_v9 = vsel %vm4660_vm7, %v5765_v45, -inf }
0x1824   : > { %5781 = vmax.xlane.f32.xlu0 %v5780_v3  ;;  %5784 = vmax.xlane.f32.xlu1 %v5783_v9 }
0x1828   : > { %5787 = vmax.xlane.f32.xlu0 %v5786_v52  ;;  %5790 = vmax.xlane.f32.xlu1 %v5789_v24 }
0x1898   : > { %v8372_v21 = vpop.f32.mrf.mxu0 }
0x1899   : > { %v10657_v4 = vadd.f32 %v8372_v21, %v5270_v60 }
0x189a   : > { %v5626_v27 = vpop.f32.mrf.mxu0 }
0x189b   : > { %v10660_v31 = vadd.f32 %v5626_v27, %v5262_v42 }
0x189c   : > { %v8373_v33 = vpop.f32.mrf.mxu0 }
0x189d   : > { %v10663_v37 = vadd.f32 %v8373_v33, %v5273_v15 }
0x189e   : > { %v5629_v5 = vpop.f32.mrf.mxu0 }
0x189f   : > { %v10665_v1 = vadd.f32 %v5629_v5, %v5265_v10 }
0x18a1   : > { %v5770_v11 = vpop.xlane.xlu0 %5769 }
0x18a2   : > { %v5792_v49 = vsub.f32 %v5760_v44, %v5770_v11 }
0x18a4   : > { %v5800_v61 = vmul.f32 1.442695, %v5792_v49 }
0x18a5   : > { %v5776_v2 = vpop.xlane.xlu0 %5775  ;;  %v5773_v3 = vpop.xlane.xlu1 %5772 }
0x18a6   : > { %v5794_v6 = vsub.f32 %v5762_v18, %v5776_v2  ;;  %v5793_v52 = vsub.f32 %v5761_v54, %v5773_v3 }
0x18a8   : > { %v5804_v9 = vmul.f32 1.442695, %v5794_v6  ;;  %v5802_v47 = vmul.f32 1.442695, %v5793_v52 }
0x18a9   : > { %v5779_v24 = vpop.xlane.xlu0 %5778 }
0x18aa   : > { %8922 = vpow2.f32 %v5804_v9  ;;  %v5795_v14 = vsub.f32 %v5763_v36, %v5779_v24 }
0x18ab   : > { %8924 = vpow2.f32 %v5800_v61 }
0x18ac   : > { %v5806_v60 = vmul.f32 1.442695, %v5795_v14 }
0x18ad   : > { %v5782_v13 = vpop.xlane.xlu0 %5781  ;;  %v5785_v35 = vpop.xlane.xlu1 %5784 }
0x18ae   : > { %8926 = vpow2.f32 %v5806_v60  ;;  %v5796_v21 = vsub.f32 %v5764_v63, %v5782_v13  ;;  %v5797_v42 = vsub.f32 %v5765_v45, %v5785_v35  ;;  %v5286_v60 = vadd.f32 %v10635_v43, %v10566_v51 }
0x18af   : > { %8928 = vpow2.f32 %v5802_v47  ;;  %v5278_v35 = vadd.f32 %v10637_v23, %v10568_v17 }
0x18b0   : > { %v5808_v18 = vmul.f32 1.442695, %v5796_v21  ;;  %v5810_v54 = vmul.f32 1.442695, %v5797_v42 }
0x18b1   : > { %v5788_v27 = vpop.xlane.xlu0 %5787  ;;  %v5791_v44 = vpop.xlane.xlu1 %5790 }
0x18b2   : > { %v5798_v15 = vsub.f32 %v5766_v48, %v5788_v27  ;;  %v5799_v33 = vsub.f32 %v5767_v41, %v5791_v44  ;;  %v5289_v27 = vadd.f32 %v10639_v39, %v10570_v0 }
0x18b4   : > { %v5812_v10 = vmul.f32 1.442695, %v5798_v15  ;;  %v5814_v5 = vmul.f32 1.442695, %v5799_v33 }
0x18b6   : > { %8930 = vpow2.f32 %v5812_v10 }
0x18b7   : > { %v10667_v11 = vpop.eup %8922  ;;  %8932 = vpow2.f32 %v5814_v5 }
0x18b8   : > { %8934 = vpow2.f32 %v5808_v18  ;;  %v5822_v36 = vsel %vm4660_vm7, %v10667_v11, 0.0  ;;  %v8925_v49 = vpop.eup %8924 }
0x18b9   : > { %8936 = vpow2.f32 %v5810_v54  ;;  %5823 = vadd.xlane.f32.xlu0 %v5822_v36  ;;  %v5816_v45 = vsel %vm4660_vm7, %v8925_v49, 0.0 }
0x18bb   : > { %v8927_v63 = vpop.eup %8926 }
0x18bc   : > { %v5825_v48 = vsel %vm4660_vm7, %v8927_v63, 0.0  ;;  %v8929_v41 = vpop.eup %8928 }
0x18bd   : > { %5817 = vadd.xlane.f32.xlu0 %v5816_v45  ;;  %5826 = vadd.xlane.f32.xlu1 %v5825_v48  ;;  %v5819_v2 = vsel %vm4660_vm7, %v8929_v41, 0.0 }
0x18c1   : > { %5820 = vadd.xlane.f32.xlu1 %v5819_v2 }
0x18c3   : > { %v8931_v3 = vpop.eup %8930 }
0x18c4   : > { %v8933_v6 = vpop.eup %8932  ;;  %v5834_v61 = vsel %vm4660_vm7, %v8931_v3, 0.0 }
0x18c5   : > { %v8935_v9 = vpop.eup %8934  ;;  %5835 = vadd.xlane.f32.xlu0 %v5834_v61  ;;  %v5837_v52 = vsel %vm4660_vm7, %v8933_v6, 0.0 }
0x18c6   : > { %v8937_v24 = vpop.eup %8936  ;;  %5838 = vadd.xlane.f32.xlu1 %v5837_v52  ;;  %v5828_v14 = vsel %vm4660_vm7, %v8935_v9, 0.0 }
0x18c7   : > { %v5831_v47 = vsel %vm4660_vm7, %v8937_v24, 0.0 }
0x18c9   : > { %5829 = vadd.xlane.f32.xlu0 %v5828_v14 }
0x18ca   : > { %5832 = vadd.xlane.f32.xlu1 %v5831_v47 }
0x18d4   : > { %v8376_v13 = vpop.f32.mrf.mxu0 }
0x18d5   : > { %v10682_v21 = vadd.f32 %v8376_v13, %v5286_v60 }
0x18d6   : > { %v5642_v42 = vpop.f32.mrf.mxu0 }
0x18d7   : > { %v10686_v44 = vadd.f32 %v5642_v42, %v5278_v35 }
0x18d8   : > { %v8377_v15 = vpop.f32.mrf.mxu0 }
0x18d9   : > { %v10688_v33 = vadd.f32 %v8377_v15, %v5289_v27 }
0x18db   : > { %5860 = vrot.lane.b32.xlu1 %v10454_v25, %s9150_s24 }
0x18df   : > { %5862 = vrot.lane.b32.xlu0 %v10452_v62, %s9150_s24 }
0x1942   : > { %v5824_v51 = vpop.xlane.xlu0 %5823 }
0x1946   : > { %v5818_v43 = vpop.xlane.xlu0 %5817  ;;  %v5827_v17 = vpop.xlane.xlu1 %5826 }
0x1947   : > { %8938 = vrcp.f32 %v5818_v43  ;;  %v5645_v43 = vpop.f32.mrf.mxu0 }
0x1948   : > { %8940 = vrcp.f32 %v5827_v17 }
0x1949   : > { %8942 = vrcp.f32 %v5824_v51 }
0x194a   : > { %v5821_v23 = vpop.xlane.xlu1 %5820 }
0x194b   : > { %8944 = vrcp.f32 %v5821_v23 }
0x194e   : > { %v5836_v0 = vpop.xlane.xlu0 %5835 }
0x194f   : > { %v5839_v39 = vpop.xlane.xlu1 %5838  ;;  %8946 = vrcp.f32 %v5836_v0 }
0x1950   : > { %8948 = vrcp.f32 %v5839_v39 }
0x1952   : > { %v5830_v18 = vpop.xlane.xlu0 %5829 }
0x1953   : > { %8950 = vrcp.f32 %v5830_v18  ;;  %v5833_v10 = vpop.xlane.xlu1 %5832 }
0x1954   : > { %8952 = vrcp.f32 %v5833_v10  ;;  %v8939_v25 = vpop.eup %8938 }
0x1955   : > { %v8941_v5 = vpop.eup %8940  ;;  %v5848_v2 = vmul.f32 %v8939_v25, %v8925_v49 }
0x1956   : > { %v5863_v54 = vpop.permute.xlu0 %5862  ;;  %v8943_v62 = vpop.eup %8942  ;;  %v5851_v48 = vmul.f32 %v8941_v5, %v8927_v63 }
0x1957   : > { %8390 = vmatprep.subr.bf16.mxu0 %v5863_v54  ;;  %v5861_v45 = vpop.permute.xlu1 %5860  ;;  %v5850_v52 = vmul.f32 %v8943_v62, %v10667_v11  ;;  %v8637_v11 = vld [vmem:[%s9376_s11 + $0x18] sm:$0xff]  }
0x1958   : > { %v8945_v36 = vpop.eup %8944  ;;  %8391 = vmatpush3.bf16.msra.mxu0 %v5863_v54  ;;  %8402 = vmatprep.subr.bf16.mxu1 %v8637_v11 }
0x1959   : > { %8392 = vmatprep.subr.bf16.mxu0 %v5861_v45  ;;  %v5849_v61 = vmul.f32 %v8945_v36, %v8929_v41  ;;  %v5857_v60 = vpack.c.bf16 %v5851_v48, %v5850_v52  ;;  %8403 = vmatpush3.bf16.msra.mxu1 %v8637_v11 }
0x195b   : > { %v5856_v14 = vpack.c.bf16 %v5849_v61, %v5848_v2  ;;  %v10708_v2 = vld [vmem:[%s9388_s28 + $0x8] sm:$0x7] }
0x195c   : > { %8393 = vmatpush3.bf16.msra.mxu0 %v5861_v45  ;;  %v8947_v47 = vpop.eup %8946  ;;  %v6049_v61 = vrot.slane %v10708_v2, %v9636_v20 }
0x195d   : > { %8394 = vmatprep.mubr.msk.bf16.mxu0 %vm4660_vm7, %v5856_v14  ;;  %v8949_v13 = vpop.eup %8948  ;;  %v5854_v15 = vmul.f32 %v8947_v47, %v8931_v3 }
0x195e   : > { %v5855_v63 = vmul.f32 %v8949_v13, %v8933_v6 }
0x195f   : > { %8395 = vmatmul.mubr.msk.bf16.vlgmr.msra.gmra.mxu0 %vm4660_vm7, %v5857_v60 }
0x1960   : > { %v8951_v35 = vpop.eup %8950  ;;  %v5859_v41 = vpack.c.bf16 %v5855_v63, %v5854_v15 }
0x1961   : > { %v8953_v42 = vpop.eup %8952  ;;  %v5852_v27 = vmul.f32 %v8951_v35, %v8935_v9 }
0x1962   : > { %v5853_v51 = vmul.f32 %v8953_v42, %v8937_v24 }
0x1964   : > { %v5858_v49 = vpack.c.bf16 %v5853_v51, %v5852_v27 }
0x1966   : > { %8398 = vmatprep.mubr.msk.bf16.mxu0 %vm4660_vm7, %v5858_v49 }
0x1967   : > { %8399 = vmatmul.mubr.msk.bf16.gmra.mxu0 %vm4660_vm7, %v5859_v41 }
0x1968   : > { %6302 = vmatprep.mubr.bf16.mxu0 %v9143_v50 }
0x1a1f   : > { %v8396_v17 = vpop.f32.mrf.mxu0 }
0x1a21   : > { %v5912_v23 = vpop.f32.mrf.mxu0 }
0x1a23   : > { %v8397_v0 = vpop.f32.mrf.mxu0 }
0x1a24   : > { %v5944_v3 = vpack.c.bf16 %v8397_v0, %v8396_v17 }
0x1a25   : > { %v5915_v39 = vpop.f32.mrf.mxu0 }
0x1a26   : > { %v5943_v9 = vpack.c.bf16 %v5915_v39, %v5912_v23 }
0x1a27   : > { %v8400_v6 = vpop.f32.mrf.mxu0 }
0x1a28   : > { %8404 = vmatprep.mubr.msk.bf16.mxu1 %vm2644_vm6, %v5943_v9 }
0x1a29   : > { %v5928_v24 = vpop.f32.mrf.mxu0  ;;  %8405 = vmatmul.mubr.msk.bf16.vlgmr.msra.gmra.mxu1 %vm2644_vm6, %v5944_v3 }
0x1a2b   : > { %v8401_v18 = vpop.f32.mrf.mxu0 }
0x1a2c   : > { %v5946_v5 = vpack.c.bf16 %v8401_v18, %v8400_v6 }
0x1a2d   : > { %v5931_v10 = vpop.f32.mrf.mxu0 }
0x1a2e   : > { %v5945_v25 = vpack.c.bf16 %v5931_v10, %v5928_v24 }
0x1a30   : > { %8408 = vmatprep.mubr.msk.bf16.mxu1 %vm2644_vm6, %v5945_v25 }
0x1a31   : > { %8409 = vmatmul.mubr.msk.bf16.gmra.mxu1 %vm2644_vm6, %v5946_v5 }
0x1ae9   : > { %v8406_v54 = vpop.f32.mrf.mxu1 }
0x1aea   : > { %v6032_v62 = vadd.f32 %v8406_v54, %v10657_v4 }
0x1aeb   : > { %v5999_v36 = vpop.f32.mrf.mxu1 }
0x1aec   : > { %v6030_v45 = vadd.f32 %v5999_v36, %v10660_v31  ;;  %v6040_v47 = vadd.f32 %v6032_v62, %v10258_v19  ;;  %v5281_v19 = vadd.f32 %v10641_v57, %v10572_v26 }
0x1aed   : > { %v8407_v48 = vpop.f32.mrf.mxu1 }
0x1aee   : > { %v6038_v52 = vadd.f32 %v6030_v45, %v10252_v59  ;;  %v6033_v14 = vadd.f32 %v8407_v48, %v10663_v37  ;;  %v6052_v63 = vadd.f32 %v6049_v61, %v6040_v47 }
0x1aef   : > { %v6002_v60 = vpop.f32.mrf.mxu1 }
0x1af0   : > { %v6050_v13 = vadd.f32 %v6049_v61, %v6038_v52  ;;  %v6041_v35 = vadd.f32 %v6033_v14, %v10260_v56  ;;  %v6031_v4 = vadd.f32 %v6002_v60, %v10665_v1  ;;  %v10739_v17 = vadd.f32 %v6052_v63, %v10154_v16 }
0x1af1   : > { %v8410_v42 = vpop.f32.mrf.mxu1 }
0x1af2   : > { %v6053_v31 = vadd.f32 %v6049_v61, %v6041_v35  ;;  %v6039_v27 = vadd.f32 %v6031_v4, %v10254_v29  ;;  %v10719_v15 = vadd.f32 %v6050_v13, %v10152_v30  ;;  %v6036_v59 = vadd.f32 %v8410_v42, %v10682_v21 }
0x1af3   : > { %v6015_v51 = vpop.f32.mrf.mxu1  ;;  %v5662_v30 = vadd.f32 %v5645_v43, %v5281_v19 }
0x1af4   : > { %v6051_v37 = vadd.f32 %v6049_v61, %v6039_v27  ;;  %v6034_v49 = vadd.f32 %v6015_v51, %v10686_v44  ;;  %v6066_v56 = vsel %vm2341_vm5, %v10719_v15, 0.0  ;;  %v10728_v29 = vadd.f32 %v6053_v31, %v10160_v8 }
0x1af5   : > { %6067 = vadd.xlane.f32.xlu1 %v6066_v56  ;;  %v8411_v1 = vpop.f32.mrf.mxu1  ;;  %v6044_v26 = vadd.f32 %v6036_v59, %v10277_v53  ;;  %v6072_v53 = vsel %vm2341_vm5, %v10739_v17, 0.0 }
0x1af6   : > { %v6042_v41 = vadd.f32 %v6034_v49, %v10269_v38  ;;  %v6037_v21 = vadd.f32 %v8411_v1, %v10688_v33  ;;  %v10733_v11 = vadd.f32 %v6051_v37, %v10158_v58  ;;  %v6075_v44 = vsel %vm2341_vm5, %v10728_v29, 0.0 }
0x1af7   : > { %v6018_v57 = vpop.f32.mrf.mxu1  ;;  %v6056_v33 = vadd.f32 %v6049_v61, %v6044_v26 }
0x1af8   : > { %v6054_v23 = vadd.f32 %v6049_v61, %v6042_v41  ;;  %v6045_v8 = vadd.f32 %v6037_v21, %v10279_v22  ;;  %v6035_v43 = vadd.f32 %v6018_v57, %v5662_v30  ;;  %v6069_v38 = vsel %vm2341_vm5, %v10733_v11, 0.0 }
0x1af9   : > { %6076 = vadd.xlane.f32.xlu1 %v6075_v44  ;;  %6070 = vadd.xlane.f32.xlu0 %v6069_v38  ;;  %v8640_v38 = vld [vmem:[%s9379_s23 + $0x34] ss:$8 sps:$4 sm:$0xff]  }
0x1afa   : > { %v6043_v58 = vadd.f32 %v6035_v43, %v10271_v32  ;;  %v6057_v0 = vadd.f32 %v6049_v61, %v6045_v8  ;;  %v10748_v16 = vadd.f32 %v6054_v23, %v10168_v40  ;;  %v10758_v32 = vadd.f32 %v6056_v33, %v10172_v34  ;;  %6278 = vmatprep.subr.bf16.mxu0 %v8640_v38  ;;  %v8641_v33 = vld [vmem:[%s9379_s23 + $0x20] ss:$8 sps:$4 sm:$0xff]  }
0x1afc   : > { %v6055_v39 = vadd.f32 %v6049_v61, %v6043_v58  ;;  %v6078_v9 = vsel %vm2341_vm5, %v10748_v16, 0.0  ;;  %v10761_v6 = vadd.f32 %v6057_v0, %v10176_v28  ;;  %v6084_v40 = vsel %vm2341_vm5, %v10758_v32, 0.0  ;;  %v8638_v58 = vld [vmem:[%s9379_s23 + $0x30] ss:$8 sps:$4 sm:$0xff]   ;;  %v8646_v0 = vld [vmem:[%s9379_s23 + $0x14] ss:$8 sps:$4 sm:$0xff]  }
0x1afd   : > { %6073 = vadd.xlane.f32.xlu0 %v6072_v53  ;;  %6279 = vmatpush1.bf16.msra.mxu0 %v8638_v58  ;;  %v8643_v53 = vld [vmem:[%s9379_s23 + $0x24] ss:$8 sps:$4 sm:$0xff]  }
0x1afe   : > { %v10751_v22 = vadd.f32 %v6055_v39, %v10174_v55  ;;  %v6087_v55 = vsel %vm2341_vm5, %v10761_v6, 0.0  ;;  %6280 = vmatprep.subr.bf16.mxu0 %v8643_v53  ;;  %v8644_v39 = vld [vmem:[%s9379_s23 + $0x10] ss:$8 sps:$4 sm:$0xff]  }
0x1b00   : > { %v6081_v3 = vsel %vm2341_vm5, %v10751_v22, 0.0 }
0x1b01   : > { %6079 = vadd.xlane.f32.xlu0 %v6078_v9  ;;  %6082 = vadd.xlane.f32.xlu1 %v6081_v3  ;;  %v8649_v9 = vld [vmem:[%s9379_s23 + $0x4] ss:$8 sps:$4 sm:$0xff]   ;;  %v8647_v3 = vld [vmem:[%s9379_s23] ss:$8 sps:$4 sm:$0xff]  }
0x1b02   : > { %6281 = vmatpush1.bf16.msra.mxu0 %v8641_v33 }
0x1b03   : > { %6282 = vmatprep.subr.bf16.mxu0 %v8646_v0 }
0x1b05   : > { %6085 = vadd.xlane.f32.xlu0 %v6084_v40  ;;  %6088 = vadd.xlane.f32.xlu1 %v6087_v55 }
0x1b06   : > { %6283 = vmatpush1.bf16.msra.mxu0 %v8644_v39 }
0x1b07   : > { %6284 = vmatprep.subr.bf16.mxu0 %v8649_v9 }
0x1b0a   : > { %6285 = vmatpush1.bf16.msra.mxu0 %v8647_v3 }
0x1b7e   : > { %v6068_v24 = vpop.xlane.xlu1 %6067 }
0x1b7f   : > { %v6090_v18 = vmul.f32 0.015625, %v6068_v24 }
0x1b81   : > { %v10768_v10 = vsub.f32 %v10719_v15, %v6090_v18 }
0x1b82   : > { %v6077_v34 = vpop.xlane.xlu1 %6076  ;;  %v6071_v25 = vpop.xlane.xlu0 %6070 }
0x1b83   : > { %v6093_v5 = vmul.f32 0.015625, %v6077_v34  ;;  %v6091_v28 = vmul.f32 0.015625, %v6071_v25  ;;  %v6106_v54 = vmul.f32 %v10768_v10, %v10768_v10 }
0x1b85   : > { %v10773_v62 = vsub.f32 %v10728_v29, %v6093_v5  ;;  %v10776_v36 = vsub.f32 %v10733_v11, %v6091_v28  ;;  %v6114_v45 = vsel %vm2341_vm5, %v6106_v54, 0.0 }
0x1b86   : > { %v6074_v48 = vpop.xlane.xlu0 %6073  ;;  %6115 = vadd.xlane.f32.xlu0 %v6114_v45 }
0x1b87   : > { %v6092_v61 = vmul.f32 0.015625, %v6074_v48  ;;  %v6107_v52 = vmul.f32 %v10776_v36, %v10776_v36  ;;  %v6109_v60 = vmul.f32 %v10773_v62, %v10773_v62 }
0x1b89   : > { %v10782_v14 = vsub.f32 %v10739_v17, %v6092_v61  ;;  %v6117_v47 = vsel %vm2341_vm5, %v6107_v52, 0.0  ;;  %v6123_v51 = vsel %vm2341_vm5, %v6109_v60, 0.0 }
0x1b8a   : > { %v6080_v13 = vpop.xlane.xlu0 %6079  ;;  %6118 = vadd.xlane.f32.xlu1 %v6117_v47  ;;  %v6083_v35 = vpop.xlane.xlu1 %6082 }
0x1b8b   : > { %v6094_v4 = vmul.f32 0.015625, %v6080_v13  ;;  %v6095_v42 = vmul.f32 0.015625, %v6083_v35  ;;  %v6108_v31 = vmul.f32 %v10782_v14, %v10782_v14  ;;  %v6172_v35 = vsub.s32 4, %v9627_v12 }
0x1b8d   : > { %v10790_v27 = vsub.f32 %v10748_v16, %v6094_v4  ;;  %v10793_v63 = vsub.f32 %v10751_v22, %v6095_v42  ;;  %v6120_v59 = vsel %vm2341_vm5, %v6108_v31, 0.0 }
0x1b8e   : > { %6121 = vadd.xlane.f32.xlu0 %v6120_v59  ;;  %v6086_v19 = vpop.xlane.xlu0 %6085  ;;  %6124 = vadd.xlane.f32.xlu1 %v6123_v51  ;;  %v6089_v37 = vpop.xlane.xlu1 %6088 }
0x1b8f   : > { %v6096_v49 = vmul.f32 0.015625, %v6086_v19  ;;  %v6097_v56 = vmul.f32 0.015625, %v6089_v37  ;;  %v6110_v1 = vmul.f32 %v10790_v27, %v10790_v27  ;;  %v6111_v30 = vmul.f32 %v10793_v63, %v10793_v63 }
0x1b91   : > { %v10802_v41 = vsub.f32 %v10758_v32, %v6096_v49  ;;  %v10805_v21 = vsub.f32 %v10761_v6, %v6097_v56  ;;  %v6126_v26 = vsel %vm2341_vm5, %v6110_v1, 0.0  ;;  %v6129_v57 = vsel %vm2341_vm5, %v6111_v30, 0.0  ;;  %v9012_v49 = vld [vmem:[%s9388_s28] sm:$0xff] }
0x1b92   : > { %6127 = vadd.xlane.f32.xlu0 %v6126_v26  ;;  %6130 = vadd.xlane.f32.xlu1 %v6129_v57  ;;  %v6173_v56 = vrot.slane %v9012_v49, %v6172_v35  ;;  %v6184_v1 = vsub.s32 5, %v9627_v12  ;;  %v8651_v35 = vld [vmem:[%s9385_s13 + $0x38] sm:$0xff]  }
0x1b93   : > { %v6112_v44 = vmul.f32 %v10802_v41, %v10802_v41  ;;  %v6113_v23 = vmul.f32 %v10805_v21, %v10805_v21 }
0x1b95   : > { %v6132_v8 = vsel %vm2341_vm5, %v6112_v44, 0.0  ;;  %v6135_v43 = vsel %vm2341_vm5, %v6113_v23, 0.0  ;;  %v6185_v23 = vrot.slane %v9012_v49, %v6184_v1  ;;  %v8660_v49 = vld [vmem:[%s9385_s13 + $0x50] sm:$0xff]   ;;  %v8662_v1 = vld [vmem:[%s9385_s13 + $0x48] sm:$0xff]  }
0x1b96   : > { %6133 = vadd.xlane.f32.xlu0 %v6132_v8  ;;  %6136 = vadd.xlane.f32.xlu1 %v6135_v43 }
0x1c0f   : > { %v6116_v40 = vpop.xlane.xlu0 %6115 }
0x1c10   : > { %v6138_v55 = vmul.f32 0.015625, %v6116_v40 }
0x1c12   : > { %v6146_v24 = vadd.f32 1e-06, %v6138_v55 }
0x1c13   : > { %v6119_v18 = vpop.xlane.xlu1 %6118 }
0x1c14   : > { %8954 = vrsqrt.f32 %v6146_v24  ;;  %v6139_v34 = vmul.f32 0.015625, %v6119_v18 }
0x1c16   : > { %v6147_v25 = vadd.f32 1e-06, %v6139_v34 }
0x1c17   : > { %v6122_v5 = vpop.xlane.xlu0 %6121  ;;  %v6125_v28 = vpop.xlane.xlu1 %6124 }
0x1c18   : > { %8956 = vrsqrt.f32 %v6147_v25  ;;  %v6140_v54 = vmul.f32 0.015625, %v6122_v5  ;;  %v6141_v45 = vmul.f32 0.015625, %v6125_v28 }
0x1c1a   : > { %v6148_v48 = vadd.f32 1e-06, %v6140_v54  ;;  %v6149_v61 = vadd.f32 1e-06, %v6141_v45 }
0x1c1b   : > { %v6128_v52 = vpop.xlane.xlu0 %6127  ;;  %v6131_v47 = vpop.xlane.xlu1 %6130 }
0x1c1c   : > { %8958 = vrsqrt.f32 %v6148_v48  ;;  %v6142_v60 = vmul.f32 0.015625, %v6128_v52  ;;  %v6143_v13 = vmul.f32 0.015625, %v6131_v47 }
0x1c1d   : > { %8960 = vrsqrt.f32 %v6149_v61 }
0x1c1e   : > { %v6150_v4 = vadd.f32 1e-06, %v6142_v60  ;;  %v6151_v42 = vadd.f32 1e-06, %v6143_v13 }
0x1c1f   : > { %v6134_v31 = vpop.xlane.xlu0 %6133  ;;  %v6137_v59 = vpop.xlane.xlu1 %6136 }
0x1c20   : > { %8962 = vrsqrt.f32 %v6150_v4  ;;  %v6144_v51 = vmul.f32 0.015625, %v6134_v31  ;;  %v6145_v19 = vmul.f32 0.015625, %v6137_v59  ;;  %v8652_v4 = vld [vmem:[%s9385_s13 + $0x70] sm:$0xff]   ;;  %v8655_v31 = vld [vmem:[%s9385_s13 + $0x28] sm:$0xff]   ;;  %v8656_v59 = vld [vmem:[%s9385_s13 + $0x60] sm:$0xff]  }
0x1c21   : > { %v8955_v37 = vpop.eup %8954  ;;  %8964 = vrsqrt.f32 %v6151_v42  ;;  %v8653_v42 = vld [vmem:[%s9385_s13 + $0x30] sm:$0xff]  }
0x1c22   : > { %v6162_v30 = vmul.f32 %v8955_v37, %v10768_v10  ;;  %v6152_v26 = vadd.f32 1e-06, %v6144_v51  ;;  %v6153_v57 = vadd.f32 1e-06, %v6145_v19  ;;  %v8657_v51 = vld [vmem:[%s9385_s13 + $0x20] sm:$0xff]   ;;  %v8658_v19 = vld [vmem:[%s9385_s13 + $0x58] sm:$0xff]  }
0x1c23   : > { %v8659_v37 = vld [vmem:[%s9385_s13 + $0x18] sm:$0xff]  }
0x1c24   : > { %v6174_v8 = vmul.f32 %v6173_v56, %v6162_v30  ;;  %8966 = vrsqrt.f32 %v6152_v26  ;;  %v8663_v30 = vld [vmem:[%s9385_s13 + $0x8] sm:$0xff]   ;;  %v8664_v26 = vld [vmem:[%s9385_s13 + $0x40] sm:$0xff]  }
0x1c25   : > { %v8957_v44 = vpop.eup %8956  ;;  %8968 = vrsqrt.f32 %v6153_v57  ;;  %v8665_v57 = vld [vmem:[%s9385_s13] sm:$0xff]  }
0x1c26   : > { %v6163_v43 = vmul.f32 %v8957_v44, %v10776_v36  ;;  %v6186_v33 = vadd.f32 %v6185_v23, %v6174_v8  ;;  %v6206_v44 = vld [vmem:[%s9382_s9] sm:$0x3]  ;;  %s11270_s9 = sld [smem:[#allocation21_spill]] (!%p7694_p8) }
0x1c27   : > { %v10862_v8 = vrot.slane %v6206_v44, %v9636_v20 }
0x1c28   : > { %v6175_v38 = vmul.f32 %v6173_v56, %v6163_v43 }
0x1c29   : > { %v8959_v58 = vpop.eup %8958 }
0x1c2a   : > { %v8961_v53 = vpop.eup %8960  ;;  %v6187_v0 = vadd.f32 %v6185_v23, %v6175_v38  ;;  %v6164_v39 = vmul.f32 %v8959_v58, %v10782_v14 }
0x1c2b   : > { %v6165_v9 = vmul.f32 %v8961_v53, %v10773_v62 }
0x1c2c   : > { %v6202_v3 = vpack.c.bf16 %v6187_v0, %v6186_v33  ;;  %v6176_v10 = vmul.f32 %v6173_v56, %v6164_v39 }
0x1c2d   : > { %v8963_v40 = vpop.eup %8962  ;;  %v6177_v55 = vmul.f32 %v6173_v56, %v6165_v9 }
0x1c2e   : > { %v8965_v24 = vpop.eup %8964  ;;  %7674 = vmatmul.mubr.msk.bf16.vlgmr.msra.gmra.mxu0 %vm2341_vm5, %v6202_v3  ;;  %v6166_v36 = vmul.f32 %v8963_v40, %v10790_v27  ;;  %v6188_v34 = vadd.f32 %v6185_v23, %v6176_v10 }
0x1c2f   : > { %6312 = vmatprep.mubr.bf16.mxu0 %v9143_v50  ;;  %v6167_v18 = vmul.f32 %v8965_v24, %v10793_v63  ;;  %v6189_v25 = vadd.f32 %v6185_v23, %v6177_v55 }
0x1c30   : > { %v6178_v14 = vmul.f32 %v6173_v56, %v6166_v36 }
0x1c31   : > { %v8967_v5 = vpop.eup %8966  ;;  %v6203_v28 = vpack.c.bf16 %v6189_v25, %v6188_v34  ;;  %v6179_v54 = vmul.f32 %v6173_v56, %v6167_v18 }
0x1c32   : > { %v8969_v62 = vpop.eup %8968  ;;  %v6168_v45 = vmul.f32 %v8967_v5, %v10802_v41  ;;  %v6190_v27 = vadd.f32 %v6185_v23, %v6178_v14 }
0x1c33   : > { %v6169_v48 = vmul.f32 %v8969_v62, %v10805_v21  ;;  %v6191_v63 = vadd.f32 %v6185_v23, %v6179_v54  ;;  %v8650_v21 = vld [vmem:[%s9385_s13 + $0x78] sm:$0xff]  }
0x1c34   : > { %v6180_v52 = vmul.f32 %v6173_v56, %v6168_v45  ;;  %7982 = vmatprep.subr.bf16.mxu1 %v8650_v21 }
0x1c35   : > { %v6204_v61 = vpack.c.bf16 %v6191_v63, %v6190_v27  ;;  %v6181_v47 = vmul.f32 %v6173_v56, %v6169_v48  ;;  %7983 = vmatpush3.bf16.msra.mxu1 %v8651_v35  ;;  %v8661_v56 = vld [vmem:[%s9385_s13 + $0x10] sm:$0xff]  }
0x1c36   : > { %7675 = vmatmul.mubr.msk.bf16.gmra.mxu0 %vm2341_vm5, %v6203_v28  ;;  %v6192_v60 = vadd.f32 %v6185_v23, %v6180_v52  ;;  %7984 = vmatprep.subr.bf16.mxu1 %v8652_v4 }
0x1c37   : > { %6322 = vmatprep.mubr.bf16.mxu0 %v9143_v50  ;;  %v6193_v13 = vadd.f32 %v6185_v23, %v6181_v47  ;;  %v10859_v23 = vrot.slane %v6206_v44, %v9630_v7 }
0x1c39   : > { %v6205_v41 = vpack.c.bf16 %v6193_v13, %v6192_v60  ;;  %7985 = vmatpush3.bf16.msra.mxu1 %v8653_v42 }
0x1c3e   : > { %7676 = vmatmul.mubr.msk.bf16.gmra.mxu0 %vm2341_vm5, %v6204_v61 }
0x1c3f   : > { %6332 = vmatprep.mubr.bf16.mxu0 %v9143_v50  ;;  %v8654_v50 = vld [vmem:[%s9385_s13 + $0x68] sm:$0xff]   ;;  %s11271_s13 = sld [smem:[#allocation23_spill]] (!%p7694_p8) }
0x1c40   : > { %7986 = vmatprep.subr.bf16.mxu1 %v8654_v50 }
0x1c41   : > { %7987 = vmatpush3.bf16.msra.mxu1 %v8655_v31 }
0x1c42   : > { %7988 = vmatprep.subr.bf16.mxu1 %v8656_v59 }
0x1c45   : > { %7989 = vmatpush3.bf16.msra.mxu1 %v8657_v51 }
0x1c46   : > { %7677 = vmatmul.mubr.msk.bf16.gmra.mxu0 %vm2341_vm5, %v6205_v41  ;;  %7990 = vmatprep.subr.bf16.mxu1 %v8658_v19 }
0x1c49   : > { %7991 = vmatpush3.bf16.msra.mxu1 %v8659_v37 }
0x1c4a   : > { %7992 = vmatprep.subr.bf16.mxu1 %v8660_v49 }
0x1c4d   : > { %7993 = vmatpush3.bf16.msra.mxu1 %v8661_v56 }
0x1c4e   : > { %7994 = vmatprep.subr.bf16.mxu1 %v8662_v1 }
0x1c51   : > { %7995 = vmatpush3.bf16.msra.mxu1 %v8663_v30 }
0x1c52   : > { %7996 = vmatprep.subr.bf16.mxu1 %v8664_v26 }
0x1c55   : > { %7997 = vmatpush3.bf16.msra.mxu1 %v8665_v57 }
0x1cee   : > { %v6304_v43 = vpop.f32.mrf.mxu0 }
0x1cef   : > { %v10865_v38 = vadd.f32 %v6304_v43, %v10859_v23 }
0x1cf0   : > { %v6306_v58 = vpop.f32.mrf.mxu0 }
0x1cf1   : > { %v6343_v53 = vmul.f32 %v10865_v38, %v10865_v38  ;;  %v10870_v33 = vadd.f32 %v6306_v58, %v10862_v8 }
0x1cf2   : > { %v6308_v0 = vpop.f32.mrf.mxu0 }
0x1cf3   : > { %v6359_v39 = vmul.f32 %v6343_v53, %v10865_v38  ;;  %v6344_v7 = vmul.f32 %v10870_v33, %v10870_v33  ;;  %v10876_v20 = vadd.f32 %v6308_v0, %v10859_v23 }
0x1cf4   : > { %v6310_v9 = vpop.f32.mrf.mxu0 }
0x1cf5   : > { %v6375_v3 = vmul.f32 0.044715, %v6359_v39  ;;  %v6360_v10 = vmul.f32 %v6344_v7, %v10870_v33  ;;  %v6345_v40 = vmul.f32 %v10876_v20, %v10876_v20  ;;  %v10882_v55 = vadd.f32 %v6310_v9, %v10862_v8 }
0x1cf6   : > { %v6314_v24 = vpop.f32.mrf.mxu0 }
0x1cf7   : > { %v6391_v36 = vadd.f32 %v6375_v3, %v10865_v38  ;;  %v6376_v18 = vmul.f32 0.044715, %v6360_v10  ;;  %v6361_v34 = vmul.f32 %v6345_v40, %v10876_v20  ;;  %v6346_v25 = vmul.f32 %v10882_v55, %v10882_v55 }
0x1cf8   : > { %v10889_v5 = vadd.f32 %v6314_v24, %v10859_v23  ;;  %v6316_v28 = vpop.f32.mrf.mxu0 }
0x1cf9   : > { %v6407_v14 = vmul.f32 0.7978846, %v6391_v36  ;;  %v6392_v54 = vadd.f32 %v6376_v18, %v10870_v33  ;;  %v6377_v62 = vmul.f32 0.044715, %v6361_v34  ;;  %v6362_v45 = vmul.f32 %v6346_v25, %v10882_v55 }
0x1cfa   : > { %v6347_v48 = vmul.f32 %v10889_v5, %v10889_v5  ;;  %v10896_v27 = vadd.f32 %v6316_v28, %v10862_v8  ;;  %v6318_v63 = vpop.f32.mrf.mxu0 }
0x1cfb   : > { %8970 = vtanh.f32 %v6407_v14  ;;  %v6408_v61 = vmul.f32 0.7978846, %v6392_v54  ;;  %v6393_v52 = vadd.f32 %v6377_v62, %v10876_v20  ;;  %v6378_v47 = vmul.f32 0.044715, %v6362_v45 }
0x1cfc   : > { %v6363_v60 = vmul.f32 %v6347_v48, %v10889_v5  ;;  %v6348_v13 = vmul.f32 %v10896_v27, %v10896_v27  ;;  %v10903_v41 = vadd.f32 %v6318_v63, %v10859_v23  ;;  %v6320_v21 = vpop.f32.mrf.mxu0 }
0x1cfd   : > { %v6409_v35 = vmul.f32 0.7978846, %v6393_v52  ;;  %v6394_v4 = vadd.f32 %v6378_v47, %v10882_v55  ;;  %v10907_v42 = vadd.f32 %v6320_v21, %v10862_v8  ;;  %8972 = vtanh.f32 %v6408_v61 }
0x1cfe   : > { %v6379_v50 = vmul.f32 0.044715, %v6363_v60  ;;  %v6364_v31 = vmul.f32 %v6348_v13, %v10896_v27  ;;  %v6349_v59 = vmul.f32 %v10903_v41, %v10903_v41  ;;  %v6324_v51 = vpop.f32.mrf.mxu0 }
0x1cff   : > { %8974 = vtanh.f32 %v6409_v35  ;;  %v6410_v19 = vmul.f32 0.7978846, %v6394_v4  ;;  %v6350_v37 = vmul.f32 %v10907_v42, %v10907_v42  ;;  %v10915_v49 = vadd.f32 %v6324_v51, %v10859_v23 }
0x1d00   : > { %v6395_v56 = vadd.f32 %v6379_v50, %v10889_v5  ;;  %v6380_v1 = vmul.f32 0.044715, %v6364_v31  ;;  %v6365_v30 = vmul.f32 %v6349_v59, %v10903_v41  ;;  %v6326_v26 = vpop.f32.mrf.mxu0 }
0x1d01   : > { %8976 = vtanh.f32 %v6410_v19  ;;  %v6366_v57 = vmul.f32 %v6350_v37, %v10907_v42  ;;  %v6351_v44 = vmul.f32 %v10915_v49, %v10915_v49  ;;  %v10923_v43 = vadd.f32 %v6326_v26, %v10862_v8 }
0x1d02   : > { %v6411_v58 = vmul.f32 0.7978846, %v6395_v56  ;;  %v6396_v53 = vadd.f32 %v6380_v1, %v10896_v27  ;;  %v6381_v0 = vmul.f32 0.044715, %v6365_v30  ;;  %v6328_v39 = vpop.f32.mrf.mxu0 }
0x1d03   : > { %v6382_v7 = vmul.f32 0.044715, %v6366_v57  ;;  %v6367_v9 = vmul.f32 %v6351_v44, %v10915_v49  ;;  %v6352_v3 = vmul.f32 %v10923_v43, %v10923_v43  ;;  %v10930_v10 = vadd.f32 %v6328_v39, %v10859_v23 }
0x1d04   : > { %8978 = vtanh.f32 %v6411_v58  ;;  %v6412_v40 = vmul.f32 0.7978846, %v6396_v53  ;;  %v6397_v24 = vadd.f32 %v6381_v0, %v10903_v41  ;;  %v6330_v36 = vpop.f32.mrf.mxu0 }
0x1d05   : > { %v6398_v18 = vadd.f32 %v6382_v7, %v10907_v42  ;;  %v6383_v34 = vmul.f32 0.044715, %v6367_v9  ;;  %v6368_v25 = vmul.f32 %v6352_v3, %v10923_v43  ;;  %v6353_v28 = vmul.f32 %v10930_v10, %v10930_v10 }
0x1d06   : > { %8980 = vtanh.f32 %v6412_v40  ;;  %v6413_v14 = vmul.f32 0.7978846, %v6397_v24  ;;  %v10938_v54 = vadd.f32 %v6330_v36, %v10862_v8  ;;  %v6334_v62 = vpop.f32.mrf.mxu0 }
0x1d07   : > { %v6414_v45 = vmul.f32 0.7978846, %v6398_v18  ;;  %v6399_v48 = vadd.f32 %v6383_v34, %v10915_v49  ;;  %v6384_v63 = vmul.f32 0.044715, %v6368_v25  ;;  %v6369_v61 = vmul.f32 %v6353_v28, %v10930_v10 }
0x1d08   : > { %v8971_v52 = vpop.eup %8970  ;;  %8982 = vtanh.f32 %v6413_v14  ;;  %v6354_v47 = vmul.f32 %v10938_v54, %v10938_v54  ;;  %v10945_v60 = vadd.f32 %v6334_v62, %v10859_v23  ;;  %v6336_v13 = vpop.f32.mrf.mxu0 }
0x1d09   : > { %v6439_v21 = vadd.f32 1.0, %v8971_v52  ;;  %8984 = vtanh.f32 %v6414_v45  ;;  %v6415_v35 = vmul.f32 0.7978846, %v6399_v48  ;;  %v6400_v4 = vadd.f32 %v6384_v63, %v10923_v43 }
0x1d0a   : > { %v6385_v50 = vmul.f32 0.044715, %v6369_v61  ;;  %v6370_v31 = vmul.f32 %v6354_v47, %v10938_v54  ;;  %v6355_v59 = vmul.f32 %v10945_v60, %v10945_v60  ;;  %v10952_v51 = vadd.f32 %v6336_v13, %v10862_v8  ;;  %v6338_v19 = vpop.f32.mrf.mxu0  ;;  %v8973_v37 = vpop.eup %8972 }
0x1d0b   : > { %8986 = vtanh.f32 %v6415_v35  ;;  %v6416_v56 = vmul.f32 0.7978846, %v6400_v4  ;;  %v10955_v1 = vadd.f32 %v6338_v19, %v10859_v23  ;;  %v6455_v0 = vmul.f32 0.5, %v6439_v21 }
0x1d0c   : > { %v8975_v30 = vpop.eup %8974  ;;  %v6401_v26 = vadd.f32 %v6385_v50, %v10930_v10  ;;  %v6386_v57 = vmul.f32 0.044715, %v6370_v31  ;;  %v6371_v44 = vmul.f32 %v6355_v59, %v10945_v60  ;;  %v6356_v58 = vmul.f32 %v10952_v51, %v10952_v51  ;;  %v6340_v53 = vpop.f32.mrf.mxu0 }
0x1d0d   : > { %v6441_v39 = vadd.f32 1.0, %v8975_v30  ;;  %8988 = vtanh.f32 %v6416_v56  ;;  %v6357_v7 = vmul.f32 %v10955_v1, %v10955_v1  ;;  %v10967_v34 = vadd.f32 %v6340_v53, %v10862_v8 }
0x1d0e   : > { %v8977_v9 = vpop.eup %8976  ;;  %v6417_v3 = vmul.f32 0.7978846, %v6401_v26  ;;  %v6402_v23 = vadd.f32 %v6386_v57, %v10938_v54  ;;  %v6387_v40 = vmul.f32 0.044715, %v6371_v44  ;;  %v6372_v24 = vmul.f32 %v6356_v58, %v10952_v51 }
0x1d0f   : > { %v6457_v36 = vmul.f32 0.5, %v6441_v39  ;;  %v6373_v18 = vmul.f32 %v6357_v7, %v10955_v1  ;;  %v6440_v25 = vadd.f32 1.0, %v8973_v37  ;;  %v6358_v63 = vmul.f32 %v10967_v34, %v10967_v34 }
0x1d10   : > { %8990 = vtanh.f32 %v6417_v3  ;;  %v6418_v28 = vmul.f32 0.7978846, %v6402_v23  ;;  %v6403_v14 = vadd.f32 %v6387_v40, %v10945_v60  ;;  %v6388_v62 = vmul.f32 0.044715, %v6372_v24 }
0x1d11   : > { %v8979_v45 = vpop.eup %8978  ;;  %v6389_v48 = vmul.f32 0.044715, %v6373_v18  ;;  %v6442_v61 = vadd.f32 1.0, %v8977_v9  ;;  %v6471_v8 = vmul.f32 %v6455_v0, %v10865_v38  ;;  %v6374_v35 = vmul.f32 %v6358_v63, %v10967_v34 }
0x1d12   : > { %8992 = vtanh.f32 %v6418_v28  ;;  %v6419_v52 = vmul.f32 0.7978846, %v6403_v14  ;;  %v6404_v47 = vadd.f32 %v6388_v62, %v10952_v51  ;;  %v6456_v4 = vmul.f32 0.5, %v6440_v25 }
0x1d13   : > { %v8981_v13 = vpop.eup %8980  ;;  %v6405_v21 = vadd.f32 %v6389_v48, %v10955_v1  ;;  %v6473_v50 = vmul.f32 %v6457_v36, %v10876_v20  ;;  %v6443_v31 = vadd.f32 1.0, %v8979_v45  ;;  %v6458_v19 = vmul.f32 0.5, %v6442_v61 }
0x1d14   : > { %v6420_v59 = vmul.f32 0.7978846, %v6404_v47  ;;  %8994 = vtanh.f32 %v6419_v52  ;;  %v6390_v30 = vmul.f32 0.044715, %v6374_v35  ;;  %v6444_v26 = vadd.f32 1.0, %v8981_v13 }
0x1d15   : > { %v8983_v37 = vpop.eup %8982  ;;  %v6421_v56 = vmul.f32 0.7978846, %v6405_v21  ;;  %v6472_v38 = vmul.f32 %v6456_v4, %v10870_v33  ;;  %v6474_v58 = vmul.f32 %v6458_v19, %v10882_v55  ;;  %v6519_v9 = vpack.c.bf16 %v6473_v50, %v6471_v8 }
0x1d16   : > { %v8985_v57 = vpop.eup %8984  ;;  %v6445_v44 = vadd.f32 1.0, %v8983_v37  ;;  %8996 = vtanh.f32 %v6420_v59  ;;  %v6406_v53 = vadd.f32 %v6390_v30, %v10967_v34  ;;  %v6460_v20 = vmul.f32 0.5, %v6444_v26 }
0x1d17   : > { %8998 = vtanh.f32 %v6421_v56  ;;  %v6446_v0 = vadd.f32 1.0, %v8985_v57  ;;  %v6520_v7 = vpack.c.bf16 %v6474_v58, %v6472_v38  ;;  %v6459_v36 = vmul.f32 0.5, %v6443_v31 }
0x1d18   : > { %v8987_v39 = vpop.eup %8986  ;;  %v6461_v3 = vmul.f32 0.5, %v6445_v44  ;;  %v6422_v23 = vmul.f32 0.7978846, %v6406_v53  ;;  %v6476_v33 = vmul.f32 %v6460_v20, %v10896_v27 }
0x1d19   : > { %v6462_v40 = vmul.f32 0.5, %v6446_v0  ;;  %6655 = vmatprep.mubr.bf16.mxu1 %v6520_v7  ;;  %v6475_v48 = vmul.f32 %v6459_v36, %v10889_v5  ;;  %v6447_v63 = vadd.f32 1.0, %v8987_v39 }
0x1d1a   : > { %v8989_v24 = vpop.eup %8988  ;;  %9000 = vtanh.f32 %v6422_v23  ;;  %6656 = vmatmul.mubr.bf16.vlgmr.msra.gmra.mxu1 %v6519_v9  ;;  %v6477_v28 = vmul.f32 %v6461_v3, %v10903_v41  ;;  %v6699_v9 = vrot.slane %v10708_v2, %v4291_v46 }
0x1d1b   : > { %v6478_v55 = vmul.f32 %v6462_v40, %v10907_v42  ;;  %v6448_v18 = vadd.f32 1.0, %v8989_v24  ;;  %v6463_v35 = vmul.f32 0.5, %v6447_v63 }
0x1d1c   : > { %v6521_v13 = vpack.c.bf16 %v6477_v28, %v6475_v48 }
0x1d1d   : > { %v8991_v25 = vpop.eup %8990  ;;  %v6522_v14 = vpack.c.bf16 %v6478_v55, %v6476_v33  ;;  %v6464_v52 = vmul.f32 0.5, %v6448_v18  ;;  %v6479_v19 = vmul.f32 %v6463_v35, %v10915_v49 }
0x1d1e   : > { %v6449_v62 = vadd.f32 1.0, %v8991_v25 }
0x1d1f   : > { %v8993_v45 = vpop.eup %8992  ;;  %6663 = vmatprep.mubr.bf16.mxu1 %v6522_v14  ;;  %v6480_v4 = vmul.f32 %v6464_v52, %v10923_v43 }
0x1d20   : > { %v6450_v61 = vadd.f32 1.0, %v8993_v45  ;;  %v6465_v47 = vmul.f32 0.5, %v6449_v62 }
0x1d21   : > { %v8995_v8 = vpop.eup %8994 }
0x1d22   : > { %v6466_v21 = vmul.f32 0.5, %v6450_v61  ;;  %6664 = vmatmul.mubr.bf16.gmra.mxu1 %v6521_v13  ;;  %v6481_v50 = vmul.f32 %v6465_v47, %v10930_v10  ;;  %v6451_v37 = vadd.f32 1.0, %v8995_v8 }
0x1d23   : > { %v8997_v27 = vpop.eup %8996 }
0x1d24   : > { %v8999_v42 = vpop.eup %8998  ;;  %v6482_v41 = vmul.f32 %v6466_v21, %v10938_v54  ;;  %v6452_v5 = vadd.f32 1.0, %v8997_v27  ;;  %v6523_v26 = vpack.c.bf16 %v6481_v50, %v6479_v19  ;;  %v6467_v38 = vmul.f32 0.5, %v6451_v37 }
0x1d25   : > { %v6453_v31 = vadd.f32 1.0, %v8999_v42 }
0x1d26   : > { %v6524_v59 = vpack.c.bf16 %v6482_v41, %v6480_v4  ;;  %v6468_v44 = vmul.f32 0.5, %v6452_v5  ;;  %v6483_v53 = vmul.f32 %v6467_v38, %v10945_v60 }
0x1d27   : > { %v9001_v56 = vpop.eup %9000  ;;  %v6469_v30 = vmul.f32 0.5, %v6453_v31 }
0x1d28   : > { %6671 = vmatprep.mubr.bf16.mxu1 %v6524_v59  ;;  %v6454_v57 = vadd.f32 1.0, %v9001_v56  ;;  %v6484_v54 = vmul.f32 %v6468_v44, %v10952_v51 }
0x1d29   : > { %v6485_v43 = vmul.f32 %v6469_v30, %v10955_v1 }
0x1d2a   : > { %6672 = vmatmul.mubr.bf16.gmra.mxu1 %v6523_v26  ;;  %v6470_v58 = vmul.f32 0.5, %v6454_v57 }
0x1d2b   : > { %v6525_v49 = vpack.c.bf16 %v6485_v43, %v6483_v53 }
0x1d2c   : > { %v6486_v10 = vmul.f32 %v6470_v58, %v10967_v34 }
0x1d2e   : > { %v6526_v0 = vpack.c.bf16 %v6486_v10, %v6484_v54 }
0x1d30   : > { %6679 = vmatprep.mubr.bf16.mxu1 %v6526_v0 }
0x1d32   : > { %6680 = vmatmul.mubr.bf16.gmra.mxu1 %v6525_v49 }
0x1dda   : > { %v7998_v20 = vpop.f32.mrf.mxu1 }
0x1ddc   : > { %v7999_v39 = vpop.f32.mrf.mxu1 }
0x1ddd   : > { %v8000_v7 = vadd.f32 %v7999_v39, %v7998_v20 }
0x1dde   : > { %v8001_v3 = vpop.f32.mrf.mxu1 }
0x1ddf   : > { %v6688_v1 = vadd.f32 %v8000_v7, %v10719_v15 }
0x1de0   : > { %v8002_v23 = vpop.f32.mrf.mxu1 }
0x1de1   : > { %v10996_v51 = vadd.f32 %v6699_v9, %v6688_v1  ;;  %v8003_v34 = vadd.f32 %v8002_v23, %v8001_v3 }
0x1de2   : > { %v8004_v40 = vpop.f32.mrf.mxu1 }
0x1de3   : > { %6708 = vst.msk [vmem:[#allocation2] sm:$0xff] %vm2341_vm5, %v10996_v51  ;;  %v6689_v60 = vadd.f32 %v8003_v34, %v10733_v11 }
0x1de4   : > { %v8005_v24 = vpop.f32.mrf.mxu1 }
0x1de5   : > { %v11001_v36 = vadd.f32 %v6699_v9, %v6689_v60  ;;  %v8006_v33 = vadd.f32 %v8005_v24, %v8004_v40 }
0x1de6   : > { %v8007_v12 = vpop.f32.mrf.mxu1 }
0x1de7   : > { %6709 = vst.msk [vmem:[#allocation2 + $0x8] sm:$0xff] %vm2341_vm5, %v11001_v36  ;;  %v6690_v46 = vadd.f32 %v8006_v33, %v10739_v17 }
0x1de8   : > { %v8008_v2 = vpop.f32.mrf.mxu1 }
0x1de9   : > { %v11006_v15 = vadd.f32 %v6699_v9, %v6690_v46  ;;  %v8009_v55 = vadd.f32 %v8008_v2, %v8007_v12 }
0x1dea   : > { %v8010_v18 = vpop.f32.mrf.mxu1 }
0x1deb   : > { %6710 = vst.msk [vmem:[#allocation2 + $0x10] sm:$0xff] %vm2341_vm5, %v11006_v15  ;;  %v6691_v11 = vadd.f32 %v8009_v55, %v10728_v29 }
0x1dec   : > { %v8011_v25 = vpop.f32.mrf.mxu1 }
0x1ded   : > { %v11011_v28 = vadd.f32 %v6699_v9, %v6691_v11  ;;  %v8012_v14 = vadd.f32 %v8011_v25, %v8010_v18 }
0x1dee   : > { %v8013_v62 = vpop.f32.mrf.mxu1 }
0x1def   : > { %6711 = vst.msk [vmem:[#allocation2 + $0x18] sm:$0xff] %vm2341_vm5, %v11011_v28  ;;  %v6692_v17 = vadd.f32 %v8012_v14, %v10748_v16 }
0x1df0   : > { %v8014_v45 = vpop.f32.mrf.mxu1 }
0x1df1   : > { %v11016_v48 = vadd.f32 %v6699_v9, %v6692_v17  ;;  %v8015_v63 = vadd.f32 %v8014_v45, %v8013_v62 }
0x1df2   : > { %v8016_v61 = vpop.f32.mrf.mxu1 }
0x1df3   : > { %6712 = vst.msk [vmem:[#allocation2 + $0x20] sm:$0xff] %vm2341_vm5, %v11016_v48  ;;  %v6693_v29 = vadd.f32 %v8015_v63, %v10751_v22 }
0x1df4   : > { %v8017_v52 = vpop.f32.mrf.mxu1 }
0x1df5   : > { %v11021_v47 = vadd.f32 %v6699_v9, %v6693_v29  ;;  %v8018_v13 = vadd.f32 %v8017_v52, %v8016_v61 }
0x1df6   : > { %v8019_v8 = vpop.f32.mrf.mxu1 }
0x1df7   : > { %6713 = vst.msk [vmem:[#allocation2 + $0x28] sm:$0xff] %vm2341_vm5, %v11021_v47  ;;  %v6694_v16 = vadd.f32 %v8018_v13, %v10758_v32 }
0x1df8   : > { %v8020_v21 = vpop.f32.mrf.mxu1 }
0x1df9   : > { %v11026_v27 = vadd.f32 %v6699_v9, %v6694_v16  ;;  %v8021_v35 = vadd.f32 %v8020_v21, %v8019_v8 }
0x1dfb   : > { %6714 = vst.msk [vmem:[#allocation2 + $0x30] sm:$0xff] %vm2341_vm5, %v11026_v27  ;;  %v6695_v42 = vadd.f32 %v8021_v35, %v10761_v6  ;;  %6719 = sbr.rel (%p7694_p8) target bundleno = 8259 (0x2043), region = 152 }
0x1dfd   : > { %v11031_v22 = vadd.f32 %v6699_v9, %v6695_v42 }
0x1dff   : > { %6715 = vst.msk [vmem:[#allocation2 + $0x38] sm:$0xff] %vm2341_vm5, %v11031_v22 }
0x1e00   : > { %v6904_v32 = vsel %vm2341_vm5, %v10996_v51, 0.0  ;;  %v6910_v4 = vsel %vm2341_vm5, %v11006_v15, 0.0  ;;  %v6907_v6 = vsel %vm2341_vm5, %v11001_v36, 0.0  ;;  %v6913_v41 = vsel %vm2341_vm5, %v11011_v28, 0.0  ;;  %v9013_v50 = vld [vmem:[%s11270_s9 + $0x18] sm:$0xff]   ;;  %v9014_v31 = vld [vmem:[%s11270_s9 + $0x10] sm:$0xff]  }
0x1e01   : > { %6905 = vadd.xlane.f32.xlu0 %v6904_v32  ;;  %6911 = vadd.xlane.f32.xlu1 %v6910_v4  ;;  %v6916_v5 = vsel %vm2341_vm5, %v11016_v48, 0.0  ;;  %v6919_v59 = vsel %vm2341_vm5, %v11021_v47, 0.0  ;;  %v6922_v19 = vsel %vm2341_vm5, %v11026_v27, 0.0  ;;  %v6925_v37 = vsel %vm2341_vm5, %v11031_v22, 0.0  ;;  %v9015_v56 = vld [vmem:[%s11270_s9 + $0x8] sm:$0xff]   ;;  %v6720_v30 = vld [vmem:[#allocation3] sm:$0xff] }
0x1e02   : > { %8412 = vmatprep.subr.bf16.mxu0 %v9013_v50  ;;  %v11055_v26 = vld [vmem:[#allocation3 + $0x8] sm:$0xff]  ;;  %v7695_v57 = vmul.f32 -1.442695, %v6720_v30  ;;  %v6722_v38 = vld [vmem:[#allocation3 + $0x10] sm:$0xff]  ;;  %v11058_v58 = vld [vmem:[#allocation3 + $0x18] sm:$0xff] }
0x1e03   : > { %8413 = vmatpush3.bf16.msra.mxu0 %v9013_v50  ;;  %v7696_v44 = vmul.f32 -1.442695, %v11055_v26  ;;  %v7697_v43 = vmul.f32 -1.442695, %v6722_v38  ;;  %v7698_v54 = vmul.f32 -1.442695, %v11058_v58 }
0x1e04   : > { %8414 = vmatprep.subr.bf16.mxu0 %v9014_v31  ;;  %v6724_v10 = vld [vmem:[#allocation3 + $0x20] sm:$0xff]  ;;  %v11061_v53 = vld [vmem:[#allocation3 + $0x28] sm:$0xff]  ;;  %9021 = vpow2.f32 %v7695_v57  ;;  %v11064_v20 = vld [vmem:[#allocation3 + $0x30] sm:$0xff] }
0x1e05   : > { %6908 = vadd.xlane.f32.xlu0 %v6907_v6  ;;  %6914 = vadd.xlane.f32.xlu1 %v6913_v41  ;;  %v7699_v0 = vmul.f32 -1.442695, %v6724_v10  ;;  %v7700_v49 = vmul.f32 -1.442695, %v11061_v53  ;;  %v11066_v39 = vld [vmem:[#allocation3 + $0x38] sm:$0xff]  ;;  %v9016_v7 = vld [vmem:[%s11270_s9] sm:$0xff]   ;;  %9023 = vpow2.f32 %v7696_v44 }
0x1e06   : > { %v7701_v9 = vmul.f32 -1.442695, %v11064_v20  ;;  %v7702_v3 = vmul.f32 -1.442695, %v11066_v39  ;;  %9025 = vpow2.f32 %v7697_v43 }
0x1e07   : > { %8415 = vmatpush3.bf16.msra.mxu0 %v9014_v31  ;;  %9027 = vpow2.f32 %v7698_v54 }
0x1e08   : > { %8416 = vmatprep.subr.bf16.mxu0 %v9015_v56  ;;  %9029 = vpow2.f32 %v7699_v0 }
0x1e09   : > { %6917 = vadd.xlane.f32.xlu0 %v6916_v5  ;;  %6920 = vadd.xlane.f32.xlu1 %v6919_v59  ;;  %9031 = vpow2.f32 %v7700_v49 }
0x1e0a   : > { %9033 = vpow2.f32 %v7701_v9 }
0x1e0b   : > { %8417 = vmatpush3.bf16.msra.mxu0 %v9015_v56  ;;  %9035 = vpow2.f32 %v7702_v3 }
0x1e0c   : > { %8418 = vmatprep.subr.bf16.mxu0 %v9016_v7 }
0x1e0d   : > { %6923 = vadd.xlane.f32.xlu0 %v6922_v19  ;;  %6926 = vadd.xlane.f32.xlu1 %v6925_v37 }
0x1e0f   : > { %8419 = vmatpush3.bf16.msra.mxu0 %v9016_v7 }
0x1e11   : > { %v9022_v1 = vpop.eup %9021 }
0x1e12   : > { %v9024_v23 = vpop.eup %9023  ;;  %v6752_v34 = vadd.f32 1.0, %v9022_v1 }
0x1e13   : > { %v9026_v40 = vpop.eup %9025  ;;  %v6753_v60 = vadd.f32 1.0, %v9024_v23 }
0x1e14   : > { %v9028_v24 = vpop.eup %9027  ;;  %9037 = vrcp.f32 %v6752_v34  ;;  %v6754_v33 = vadd.f32 1.0, %v9026_v40 }
0x1e15   : > { %v9030_v12 = vpop.eup %9029  ;;  %9039 = vrcp.f32 %v6753_v60  ;;  %v6755_v46 = vadd.f32 1.0, %v9028_v24 }
0x1e16   : > { %v9032_v2 = vpop.eup %9031  ;;  %9041 = vrcp.f32 %v6754_v33  ;;  %v6756_v55 = vadd.f32 1.0, %v9030_v12 }
0x1e17   : > { %v9034_v18 = vpop.eup %9033  ;;  %9043 = vrcp.f32 %v6755_v46  ;;  %v6757_v11 = vadd.f32 1.0, %v9032_v2 }
0x1e18   : > { %v9036_v25 = vpop.eup %9035  ;;  %9045 = vrcp.f32 %v6756_v55  ;;  %v6758_v14 = vadd.f32 1.0, %v9034_v18 }
0x1e19   : > { %9047 = vrcp.f32 %v6757_v11  ;;  %v6759_v62 = vadd.f32 1.0, %v9036_v25  ;;  %v9017_v11 = vld [vmem:[%s11271_s13 + $0x18] sm:$0xff]   ;;  %v9018_v25 = vld [vmem:[%s11271_s13 + $0x10] sm:$0xff]  }
0x1e1a   : > { %9049 = vrcp.f32 %v6758_v14  ;;  %8428 = vmatprep.subr.bf16.mxu1 %v9017_v11  ;;  %v7703_v14 = vld [vmem:[%s11272_s17] ss:$0 sm:$0xff] }
0x1e1b   : > { %9051 = vrcp.f32 %v6759_v62  ;;  %8429 = vmatpush3.bf16.msra.mxu1 %v9017_v11  ;;  %v9019_v62 = vld [vmem:[%s11271_s13 + $0x8] sm:$0xff]  }
0x1e1c   : > { %8430 = vmatprep.subr.bf16.mxu1 %v9018_v25 }
0x1e1f   : > { %8431 = vmatpush3.bf16.msra.mxu1 %v9018_v25 }
0x1e20   : > { %8432 = vmatprep.subr.bf16.mxu1 %v9019_v62 }
0x1e21   : > { %v9038_v17 = vpop.eup %9037 }
0x1e22   : > { %v9040_v45 = vpop.eup %9039  ;;  %v6776_v63 = vmul.f32 %v9038_v17, %v6720_v30 }
0x1e23   : > { %v9042_v61 = vpop.eup %9041  ;;  %v6777_v29 = vmul.f32 %v9040_v45, %v11055_v26  ;;  %8433 = vmatpush3.bf16.msra.mxu1 %v9019_v62 }
0x1e24   : > { %v9044_v52 = vpop.eup %9043  ;;  %v6778_v13 = vmul.f32 %v9042_v61, %v6722_v38  ;;  %v9020_v61 = vld [vmem:[%s11271_s13] sm:$0xff]  }
0x1e25   : > { %v9046_v8 = vpop.eup %9045  ;;  %v6792_v16 = vpack.c.bf16 %v6777_v29, %v6776_v63  ;;  %v6779_v21 = vmul.f32 %v9044_v52, %v11058_v58  ;;  %8434 = vmatprep.subr.bf16.mxu1 %v9020_v61 }
0x1e26   : > { %v9048_v35 = vpop.eup %9047  ;;  %v6780_v42 = vmul.f32 %v9046_v8, %v6724_v10 }
0x1e27   : > { %v9050_v32 = vpop.eup %9049  ;;  %8420 = vmatprep.mubr.msk.bf16.mxu0 %vm2341_vm5, %v6792_v16  ;;  %v6793_v4 = vpack.c.bf16 %v6779_v21, %v6778_v13  ;;  %v6781_v6 = vmul.f32 %v9048_v35, %v11061_v53  ;;  %8435 = vmatpush3.bf16.msra.mxu1 %v9020_v61 }
0x1e28   : > { %v9052_v41 = vpop.eup %9051  ;;  %v6782_v31 = vmul.f32 %v9050_v32, %v11064_v20 }
0x1e29   : > { %8421 = vmatmul.mubr.msk.bf16.vlgmr.msra.gmra.mxu0 %vm2341_vm5, %v6793_v4  ;;  %v6794_v50 = vpack.c.bf16 %v6781_v6, %v6780_v42  ;;  %v6783_v5 = vmul.f32 %v9052_v41, %v11066_v39 }
0x1e2b   : > { %8424 = vmatprep.mubr.msk.bf16.mxu0 %vm2341_vm5, %v6794_v50  ;;  %v6795_v59 = vpack.c.bf16 %v6783_v5, %v6782_v31 }
0x1e31   : > { %8425 = vmatmul.mubr.msk.bf16.gmra.mxu0 %vm2341_vm5, %v6795_v59 }
0x1e8a   : > { %v6906_v19 = vpop.xlane.xlu0 %6905  ;;  %v6912_v37 = vpop.xlane.xlu1 %6911 }
0x1e8b   : > { %v6928_v56 = vmul.f32 0.015625, %v6906_v19  ;;  %v6930_v30 = vmul.f32 0.015625, %v6912_v37 }
0x1e8d   : > { %v11081_v26 = vsub.f32 %v10996_v51, %v6928_v56  ;;  %v11084_v57 = vsub.f32 %v11006_v15, %v6930_v30 }
0x1e8e   : > { %v6909_v44 = vpop.xlane.xlu0 %6908  ;;  %v6915_v38 = vpop.xlane.xlu1 %6914 }
0x1e8f   : > { %v6929_v58 = vmul.f32 0.015625, %v6909_v44  ;;  %v6931_v43 = vmul.f32 0.015625, %v6915_v38  ;;  %v6944_v54 = vmul.f32 %v11081_v26, %v11081_v26  ;;  %v6946_v10 = vmul.f32 %v11084_v57, %v11084_v57 }
0x1e91   : > { %v11091_v53 = vsub.f32 %v11001_v36, %v6929_v58  ;;  %v11094_v0 = vsub.f32 %v11011_v28, %v6931_v43  ;;  %v6952_v51 = vsel %vm2341_vm5, %v6944_v54, 0.0  ;;  %v6958_v20 = vsel %vm2341_vm5, %v6946_v10, 0.0 }
0x1e92   : > { %6953 = vadd.xlane.f32.xlu0 %v6952_v51  ;;  %v6918_v15 = vpop.xlane.xlu0 %6917  ;;  %v6921_v49 = vpop.xlane.xlu1 %6920 }
0x1e93   : > { %v6932_v39 = vmul.f32 0.015625, %v6918_v15  ;;  %v6933_v7 = vmul.f32 0.015625, %v6921_v49  ;;  %v6945_v9 = vmul.f32 %v11091_v53, %v11091_v53  ;;  %v6947_v3 = vmul.f32 %v11094_v0, %v11094_v0 }
0x1e95   : > { %v11103_v36 = vsub.f32 %v11016_v48, %v6932_v39  ;;  %v11106_v28 = vsub.f32 %v11021_v47, %v6933_v7  ;;  %v6955_v1 = vsel %vm2341_vm5, %v6945_v9, 0.0  ;;  %v6961_v40 = vsel %vm2341_vm5, %v6947_v3, 0.0 }
0x1e96   : > { %6959 = vadd.xlane.f32.xlu0 %v6958_v20  ;;  %6956 = vadd.xlane.f32.xlu1 %v6955_v1  ;;  %v6924_v23 = vpop.xlane.xlu0 %6923  ;;  %v6927_v34 = vpop.xlane.xlu1 %6926 }
0x1e97   : > { %v6934_v60 = vmul.f32 0.015625, %v6924_v23  ;;  %v6935_v24 = vmul.f32 0.015625, %v6927_v34  ;;  %v6948_v33 = vmul.f32 %v11103_v36, %v11103_v36  ;;  %v6949_v48 = vmul.f32 %v11106_v28, %v11106_v28 }
0x1e99   : > { %v11115_v47 = vsub.f32 %v11026_v27, %v6934_v60  ;;  %v11118_v12 = vsub.f32 %v11031_v22, %v6935_v24  ;;  %v6964_v46 = vsel %vm2341_vm5, %v6948_v33, 0.0  ;;  %v6967_v2 = vsel %vm2341_vm5, %v6949_v48, 0.0 }
0x1e9a   : > { %6962 = vadd.xlane.f32.xlu1 %v6961_v40  ;;  %6965 = vadd.xlane.f32.xlu0 %v6964_v46 }
0x1e9b   : > { %v6950_v55 = vmul.f32 %v11115_v47, %v11115_v47  ;;  %v6951_v18 = vmul.f32 %v11118_v12, %v11118_v12 }
0x1e9d   : > { %v6970_v27 = vsel %vm2341_vm5, %v6950_v55, 0.0  ;;  %v6973_v22 = vsel %vm2341_vm5, %v6951_v18, 0.0 }
0x1e9e   : > { %6968 = vadd.xlane.f32.xlu1 %v6967_v2  ;;  %6971 = vadd.xlane.f32.xlu0 %v6970_v27 }
0x1ea2   : > { %6974 = vadd.xlane.f32.xlu1 %v6973_v22 }
0x1ee9   : > { %v8422_v17 = vpop.f32.mrf.mxu0 }
0x1eea   : > { %v11132_v45 = vadd.f32 %v8422_v17, %v7703_v14 }
0x1eeb   : > { %v6873_v63 = vpop.f32.mrf.mxu0 }
0x1eec   : > { %v7010_v29 = vadd.f32 1.0, %v11132_v45  ;;  %v11136_v52 = vadd.f32 %v7703_v14, %v6873_v63 }
0x1eed   : > { %v8423_v13 = vpop.f32.mrf.mxu0 }
0x1eee   : > { %v7008_v8 = vadd.f32 1.0, %v11136_v52  ;;  %7028 = vrot.lane.b32.xlu1 %v7010_v29, %s9151_s8  ;;  %v11141_v42 = vadd.f32 %v8423_v13, %v7703_v14 }
0x1eef   : > { %v6876_v16 = vpop.f32.mrf.mxu0 }
0x1ef0   : > { %v11139_v21 = vadd.f32 %v7703_v14, %v6876_v16  ;;  %7024 = vrot.lane.b32.xlu0 %v7008_v8, %s9151_s8  ;;  %v7011_v50 = vadd.f32 1.0, %v11141_v42 }
0x1ef1   : > { %v8426_v35 = vpop.f32.mrf.mxu0 }
0x1ef2   : > { %v7009_v32 = vadd.f32 1.0, %v11139_v21  ;;  %v11147_v31 = vadd.f32 %v8426_v35, %v7703_v14 }
0x1ef3   : > { %v6889_v4 = vpop.f32.mrf.mxu0 }
0x1ef4   : > { %v11144_v6 = vadd.f32 %v7703_v14, %v6889_v4  ;;  %7026 = vrot.lane.b32.xlu1 %v7009_v32, %s9151_s8  ;;  %v7014_v37 = vadd.f32 1.0, %v11147_v31 }
0x1ef5   : > { %v8427_v41 = vpop.f32.mrf.mxu0 }
0x1ef6   : > { %v7012_v5 = vadd.f32 1.0, %v11144_v6  ;;  %v11153_v56 = vadd.f32 %v8427_v41, %v7703_v14 }
0x1ef7   : > { %v6892_v59 = vpop.f32.mrf.mxu0 }
0x1ef8   : > { %v11150_v19 = vadd.f32 %v7703_v14, %v6892_v59  ;;  %7030 = vrot.lane.b32.xlu1 %v7011_v50, %s9151_s8  ;;  %7032 = vrot.lane.b32.xlu0 %v7012_v5, %s9151_s8  ;;  %v7015_v44 = vadd.f32 1.0, %v11153_v56 }
0x1efa   : > { %v7013_v30 = vadd.f32 1.0, %v11150_v19 }
0x1efc   : > { %7034 = vrot.lane.b32.xlu1 %v7013_v30, %s9151_s8  ;;  %7036 = vrot.lane.b32.xlu0 %v7014_v37, %s9151_s8 }
0x1f00   : > { %7038 = vrot.lane.b32.xlu1 %v7015_v44, %s9151_s8 }
0x1f1b   : > { %v6954_v38 = vpop.xlane.xlu0 %6953 }
0x1f1c   : > { %v6976_v10 = vmul.f32 0.015625, %v6954_v38 }
0x1f1e   : > { %v6984_v49 = vadd.f32 1e-06, %v6976_v10 }
0x1f1f   : > { %v6957_v58 = vpop.xlane.xlu1 %6956  ;;  %v6960_v43 = vpop.xlane.xlu0 %6959 }
0x1f20   : > { %v6977_v51 = vmul.f32 0.015625, %v6957_v58  ;;  %v6978_v20 = vmul.f32 0.015625, %v6960_v43  ;;  %9053 = vrsqrt.f32 %v6984_v49 }
0x1f22   : > { %v6985_v7 = vadd.f32 1e-06, %v6977_v51  ;;  %v6986_v3 = vadd.f32 1e-06, %v6978_v20 }
0x1f23   : > { %v6963_v54 = vpop.xlane.xlu1 %6962  ;;  %v6966_v15 = vpop.xlane.xlu0 %6965 }
0x1f24   : > { %v6979_v9 = vmul.f32 0.015625, %v6963_v54  ;;  %v6980_v1 = vmul.f32 0.015625, %v6966_v15  ;;  %9055 = vrsqrt.f32 %v6985_v7 }
0x1f25   : > { %9057 = vrsqrt.f32 %v6986_v3 }
0x1f26   : > { %v6987_v34 = vadd.f32 1e-06, %v6979_v9  ;;  %v6988_v24 = vadd.f32 1e-06, %v6980_v1 }
0x1f27   : > { %v6969_v39 = vpop.xlane.xlu1 %6968  ;;  %v6972_v23 = vpop.xlane.xlu0 %6971 }
0x1f28   : > { %v6981_v40 = vmul.f32 0.015625, %v6969_v39  ;;  %v6982_v33 = vmul.f32 0.015625, %v6972_v23  ;;  %9059 = vrsqrt.f32 %v6987_v34 }
0x1f29   : > { %9061 = vrsqrt.f32 %v6988_v24 }
0x1f2a   : > { %v6989_v48 = vadd.f32 1e-06, %v6981_v40  ;;  %v6990_v2 = vadd.f32 1e-06, %v6982_v33 }
0x1f2b   : > { %v6975_v60 = vpop.xlane.xlu1 %6974 }
0x1f2c   : > { %v6983_v46 = vmul.f32 0.015625, %v6975_v60  ;;  %9063 = vrsqrt.f32 %v6989_v48 }
0x1f2d   : > { %9065 = vrsqrt.f32 %v6990_v2  ;;  %v9054_v18 = vpop.eup %9053 }
0x1f2e   : > { %v6991_v55 = vadd.f32 1e-06, %v6983_v46  ;;  %v7000_v25 = vmul.f32 %v9054_v18, %v11081_v26 }
0x1f30   : > { %9067 = vrsqrt.f32 %v6991_v55 }
0x1f31   : > { %v9056_v27 = vpop.eup %9055 }
0x1f32   : > { %v9058_v14 = vpop.eup %9057  ;;  %v7001_v17 = vmul.f32 %v9056_v27, %v11091_v53 }
0x1f33   : > { %v7002_v29 = vmul.f32 %v9058_v14, %v11084_v57 }
0x1f35   : > { %v9060_v63 = vpop.eup %9059 }
0x1f36   : > { %v9062_v8 = vpop.eup %9061  ;;  %v7003_v35 = vmul.f32 %v9060_v63, %v11094_v0 }
0x1f37   : > { %v7004_v59 = vmul.f32 %v9062_v8, %v11103_v36 }
0x1f39   : > { %v9064_v41 = vpop.eup %9063 }
0x1f3a   : > { %v9066_v37 = vpop.eup %9065  ;;  %v7005_v0 = vmul.f32 %v9064_v41, %v11106_v28 }
0x1f3b   : > { %v7006_v43 = vmul.f32 %v9066_v37, %v11115_v47 }
0x1f60   : > { %v7029_v22 = vpop.permute.xlu1 %7028 }
0x1f61   : > { %v7050_v16 = vmul.f32 %v7029_v22, %v7002_v29 }
0x1f62   : > { %v7025_v11 = vpop.permute.xlu0 %7024 }
0x1f63   : > { %v7048_v62 = vmul.f32 %v7025_v11, %v7000_v25  ;;  %v7058_v30 = vadd.f32 %v7050_v16, %v11132_v45 }
0x1f65   : > { %v7056_v32 = vadd.f32 %v7048_v62, %v11136_v52  ;;  %v9068_v52 = vpop.eup %9067 }
0x1f66   : > { %v7027_v61 = vpop.permute.xlu1 %7026 }
0x1f67   : > { %v7049_v13 = vmul.f32 %v7027_v61, %v7001_v17 }
0x1f69   : > { %v7057_v4 = vadd.f32 %v7049_v13, %v11139_v21 }
0x1f6a   : > { %v7031_v50 = vpop.permute.xlu1 %7030  ;;  %v7033_v26 = vpop.permute.xlu0 %7032 }
0x1f6b   : > { %v7051_v5 = vmul.f32 %v7031_v50, %v7003_v35  ;;  %v7072_v53 = vpack.c.bf16 %v7057_v4, %v7056_v32  ;;  %v7052_v44 = vmul.f32 %v7033_v26, %v7004_v59 }
0x1f6d   : > { %v7059_v57 = vadd.f32 %v7051_v5, %v11141_v42  ;;  %8436 = vmatprep.mubr.msk.bf16.mxu1 %vm2341_vm5, %v7072_v53  ;;  %v7060_v36 = vadd.f32 %v7052_v44, %v11144_v6  ;;  %v7007_v42 = vmul.f32 %v9068_v52, %v11118_v12 }
0x1f6e   : > { %v7035_v38 = vpop.permute.xlu1 %7034  ;;  %v7037_v21 = vpop.permute.xlu0 %7036 }
0x1f6f   : > { %v7053_v58 = vmul.f32 %v7035_v38, %v7005_v0  ;;  %v7073_v54 = vpack.c.bf16 %v7059_v57, %v7058_v30  ;;  %v7054_v45 = vmul.f32 %v7037_v21, %v7006_v43 }
0x1f71   : > { %v7061_v10 = vadd.f32 %v7053_v58, %v11150_v19  ;;  %8437 = vmatmul.mubr.msk.bf16.vlgmr.msra.gmra.mxu1 %vm2341_vm5, %v7073_v54  ;;  %v7062_v49 = vadd.f32 %v7054_v45, %v11147_v31  ;;  %v7712_v19 = vld [vmem:[%s11273_s22] ss:$0 sm:$0xff] }
0x1f72   : > { %v7039_v28 = vpop.permute.xlu1 %7038 }
0x1f73   : > { %v7055_v51 = vmul.f32 %v7039_v28, %v7007_v42  ;;  %v7074_v15 = vpack.c.bf16 %v7061_v10, %v7060_v36 }
0x1f75   : > { %v7063_v47 = vadd.f32 %v7055_v51, %v11153_v56  ;;  %8440 = vmatprep.mubr.msk.bf16.mxu1 %vm2341_vm5, %v7074_v15 }
0x1f77   : > { %v7075_v6 = vpack.c.bf16 %v7063_v47, %v7062_v49 }
0x1f79   : > { %8441 = vmatmul.mubr.msk.bf16.gmra.mxu1 %vm2341_vm5, %v7075_v6 }
0x2031   : > { %v8438_v20 = vpop.f32.mrf.mxu1 }
0x2032   : > { %v7162_v39 = vadd.f32 %v8438_v20, %v7712_v19 }
0x2033   : > { %v7153_v12 = vpop.f32.mrf.mxu1 }
0x2034   : > { %7186 = vst [vmem:[%s9391_s14 + $0x10] sm:$0xff] %v7162_v39  ;;  %v7154_v7 = vadd.f32 %v7712_v19, %v7153_v12 }
0x2035   : > { %v8439_v9 = vpop.f32.mrf.mxu1 }
0x2036   : > { %7184 = vst [vmem:[%s9391_s14] sm:$0xff] %v7154_v7  ;;  %v7165_v31 = vadd.f32 %v8439_v9, %v7712_v19 }
0x2037   : > { %v7156_v56 = vpop.f32.mrf.mxu1 }
0x2038   : > { %7187 = vst [vmem:[%s9391_s14 + $0x18] sm:$0xff] %v7165_v31  ;;  %v7157_v3 = vadd.f32 %v7712_v19, %v7156_v56 }
0x2039   : > { %v8442_v1 = vpop.f32.mrf.mxu1 }
0x203a   : > { %7185 = vst [vmem:[%s9391_s14 + $0x8] sm:$0xff] %v7157_v3  ;;  %v7178_v23 = vadd.f32 %v8442_v1, %v7712_v19 }
0x203b   : > { %v7169_v34 = vpop.f32.mrf.mxu1 }
0x203c   : > { %7190 = vst [vmem:[%s9391_s14 + $0x30] sm:$0xff] %v7178_v23  ;;  %v7170_v40 = vadd.f32 %v7712_v19, %v7169_v34 }
0x203d   : > { %v8443_v60 = vpop.f32.mrf.mxu1 }
0x203e   : > { %7188 = vst [vmem:[%s9391_s14 + $0x20] sm:$0xff] %v7170_v40  ;;  %v7181_v24 = vadd.f32 %v8443_v60, %v7712_v19 }
0x203f   : > { %v7172_v33 = vpop.f32.mrf.mxu1 }
0x2040   : > { %7191 = vst [vmem:[%s9391_s14 + $0x38] sm:$0xff] %v7181_v24  ;;  %v7173_v48 = vadd.f32 %v7712_v19, %v7172_v33 }
0x2042   : > { %7189 = vst [vmem:[%s9391_s14 + $0x28] sm:$0xff] %v7173_v48 }
0x2043 PF: > { %s11274_s28 = sld [smem:[#allocation29_spill]] }
0x2044   : > { %s11275_s22 = sld [smem:[#allocation27_spill]] }
0x2045   : > { %s11276_s23 = sld [smem:[#allocation28_spill]] }
0x2046   : > { %s11277_s26 = sld [smem:[#allocation30_spill]] }
0x2049   : > { %s73_s1 = sadd.s32 1, %s11274_s28   ;;  %s11278_s28 = sld [smem:[#allocation31_spill]] }
0x204a   : > { %p70_p9 = scmp.ge.s32.totalorder %s73_s1, 6  }
0x204c   :  { %72 = sbr.rel (!%p70_p9) target bundleno = 55 (0x37), region = 249 }

</bundles_post_ra>
